<compile_context>
chip_gen: v7x
topology: tpu7x:2x2x1
jax: 0.10.0
libtpu: 0.0.40
codegen_flags: <defaults>
</compile_context>

<pallas_src>
import jax
import jax.numpy as jnp
from jax.experimental import pallas as pl
from jax.experimental.pallas import tpu as pltpu


# ---------------------------------------------------------------------------
# Fused kernel
# ---------------------------------------------------------------------------
def _fused_autoencoder_kernel(x_ref, *refs):
    # refs layout:
    #   refs[0:16]  -> (w, b) x 8 layers (encoder 0..3, then decoder 0..3)
    #   refs[16]    -> centroids, pre-transposed to (F, C)
    #   refs[17:20] -> outputs: enc, dec, q
    wb_refs = refs[:16]
    cent_ref = refs[16]
    enc_ref, dec_ref, q_ref = refs[17], refs[18], refs[19]

    def dense(h, w_ref, b_ref, relu):
        # bf16 weights + bf16 activations on the MXU, f32 accumulation.
        y = jnp.dot(h.astype(w_ref.dtype), w_ref[...],
                    preferred_element_type=jnp.float32)
        y = y + b_ref[...]                     # (1, out) broadcast over batch
        if relu:
            y = jnp.maximum(y, 0.0)
        return y

    h = x_ref[...].astype(jnp.float32)
    # Encoder: dim -> 512 -> 512 -> 2048 -> feature_dim (ReLU on first 3)
    for li in range(4):
        h = dense(h, wb_refs[2 * li], wb_refs[2 * li + 1], relu=(li < 3))
    enc = h
    # Decoder: feature_dim -> 2048 -> 512 -> 512 -> dim (ReLU on first 3)
    d = enc
    for li in range(4):
        d = dense(d, wb_refs[8 + 2 * li], wb_refs[8 + 2 * li + 1],
                  relu=(li < 3))

    enc_ref[...] = enc.astype(enc_ref.dtype)
    dec_ref[...] = d.astype(dec_ref.dtype)

    # Soft assignment q: dist[b,c] = ||e_b - c_c||^2 via the MXU-friendly
    # expansion ||e||^2 - 2 e.C + ||c||^2, clamped >= 0 (f32 cancellation).
    ct = cent_ref[...]                                                # (F, C)
    cross = jnp.dot(enc, ct, preferred_element_type=jnp.float32)      # (B, C)
    e_sq = jnp.sum(enc * enc, axis=1, keepdims=True)                  # (B, 1)
    ones = jnp.ones((1, ct.shape[0]), jnp.float32)
    c_sq = jnp.dot(ones, ct * ct, preferred_element_type=jnp.float32) # (1, C)
    dist = jnp.maximum(e_sq - 2.0 * cross + c_sq, 0.0)
    q = 1.0 / (1.0 + dist)
    q = q / jnp.sum(q, axis=1, keepdims=True)
    q_ref[...] = q.astype(q_ref.dtype)


# ---------------------------------------------------------------------------
# Wrapper
# ---------------------------------------------------------------------------
def _choose_tile_m(batch):
    if batch <= 256:
        return batch                      # one block == full array -> always legal
    for t in (256, 128, 64, 32, 16, 8):
        if batch % t == 0:
            return t
    return batch                          # fallback: single full-batch block


@jax.jit
def autoencoder_forward(params, x):
    batch, dim = x.shape
    wb = params["encoder"] + params["decoder"]
    centroids = params["centroids"]
    class_num, feature_dim = centroids.shape

    tile_m = _choose_tile_m(batch)
    n_tiles = batch // tile_m

    # Present centroids as (F, C) so the kernel's cross term is a plain matmul.
    cent_t = centroids.astype(jnp.float32).T                      # (F, C), tiny

    flat_inputs = [x]
    for w, b in wb:
        flat_inputs += [w, b]
    flat_inputs.append(cent_t)

    def batch_spec(cols):
        return pl.BlockSpec((tile_m, cols), lambda i: (i, 0))

    def const_spec(shape):
        return pl.BlockSpec(shape, lambda i: (0, 0))

    in_specs = [batch_spec(dim)]
    for w, b in wb:
        in_specs.append(const_spec(w.shape))     # full weight, VMEM-resident
        in_specs.append(const_spec(b.shape))     # (1, out) bias
    in_specs.append(const_spec(cent_t.shape))

    out_specs = (batch_spec(feature_dim), batch_spec(dim), batch_spec(class_num))
    out_shape = (
        jax.ShapeDtypeStruct((batch, feature_dim), jnp.float32),
        jax.ShapeDtypeStruct((batch, dim), jnp.float32),
        jax.ShapeDtypeStruct((batch, class_num), jnp.float32),
    )

    # Advisory cost hint so XLA schedules around the fused custom call.
    flops = 2 * batch * class_num * feature_dim
    for w, _ in wb:
        flops += 2 * batch * w.shape[0] * w.shape[1]
    bytes_accessed = sum(a.size * a.dtype.itemsize for a in flat_inputs)
    bytes_accessed += 4 * batch * (feature_dim + dim + class_num)
    cost = pl.CostEstimate(flops=flops, transcendentals=0,
                           bytes_accessed=bytes_accessed)

    return pl.pallas_call(
        _fused_autoencoder_kernel,
        grid=(n_tiles,),
        in_specs=in_specs,
        out_specs=out_specs,
        out_shape=out_shape,
        compiler_params=pltpu.CompilerParams(
            dimension_semantics=("parallel",),     # megacore-shard the batch
            vmem_limit_bytes=32 * 1024 * 1024,     # explicit; safe on v5e/v6e/v7x
        ),
        cost_estimate=cost,
    )(*flat_inputs)


# ---------------------------------------------------------------------------
# Parameters (deterministic synthetic init, PyTorch nn.Linear-style)
# ---------------------------------------------------------------------------
def _pad_hidden(d):
    # Lane-align only the hidden dims (500 -> 512, 2000 -> 2048).
    return {500: 512, 2000: 2048}.get(d, d)


def _init_linear_padded(key, in_dim, out_dim, weight_dtype):
    """Init a logical (in_dim, out_dim) Linear, zero-padded to lane-aligned
    dims. Zero padding is exactly equivalent to the unpadded layer."""
    in_pad, out_pad = _pad_hidden(in_dim), _pad_hidden(out_dim)
    kw, kb = jax.random.split(key)
    scale = 1.0 / jnp.sqrt(jnp.float32(in_dim))
    w = jax.random.uniform(kw, (in_dim, out_dim), jnp.float32, -scale, scale)
    b = jax.random.uniform(kb, (out_dim,), jnp.float32, -scale, scale)
    w = jnp.pad(w, ((0, in_pad - in_dim), (0, out_pad - out_dim)))
    b = jnp.pad(b, ((0, out_pad - out_dim),))
    return w.astype(weight_dtype), b.reshape(1, -1).astype(jnp.float32)


def init_autoencoder_params(key, class_num, feature_dim, dim,
                            weight_dtype=jnp.bfloat16):
    keys = jax.random.split(key, 9)
    enc_dims = [(dim, 500), (500, 500), (500, 2000), (2000, feature_dim)]
    dec_dims = [(feature_dim, 2000), (2000, 500), (500, 500), (500, dim)]
    encoder = [_init_linear_padded(keys[i], di, do, weight_dtype)
               for i, (di, do) in enumerate(enc_dims)]
    decoder = [_init_linear_padded(keys[4 + i], di, do, weight_dtype)
               for i, (di, do) in enumerate(dec_dims)]
    # xavier_normal_ for centroids
    std = jnp.sqrt(2.0 / jnp.float32(class_num + feature_dim))
    centroids = std * jax.random.normal(keys[8], (class_num, feature_dim),
                                        jnp.float32)
    return {"encoder": encoder, "decoder": decoder, "centroids": centroids}


# ---------------------------------------------------------------------------
# Pure-JAX reference (same bf16 params) for a tolerance check
# ---------------------------------------------------------------------------
def reference_forward(params, x):
    def dense(h, w, b, relu):
        y = jnp.dot(h.astype(w.dtype), w,
                    preferred_element_type=jnp.float32) + b
        return jnp.maximum(y, 0.0) if relu else y

    h = x.astype(jnp.float32)
    for i, (w, b) in enumerate(params["encoder"]):
        h = dense(h, w, b, i < 3)
    enc = h
    d = enc
    for i, (w, b) in enumerate(params["decoder"]):
        d = dense(d, w, b, i < 3)
    c = params["centroids"].astype(jnp.float32)
    dist = jnp.sum((enc[:, None, :] - c[None, :, :]) ** 2, axis=2)
    q = 1.0 / (1.0 + dist)
    q = q / jnp.sum(q, axis=1, keepdims=True)
    return enc, d, q


# ---------------------------------------------------------------------------
# Main
# ---------------------------------------------------------------------------
if __name__ == "__main__":
    class_num, feature_dim, dim = 4, 32, 64
    batch = 8

    key = jax.random.PRNGKey(0)
    kp, kx = jax.random.split(key)
    params = init_autoencoder_params(kp, class_num, feature_dim, dim)
    x = jax.random.normal(kx, (batch, dim), jnp.float32)

    enc, dec, q = autoencoder_forward(params, x)
    jax.block_until_ready((enc, dec, q))

    assert enc.shape == (batch, feature_dim)
    assert dec.shape == (batch, dim)
    assert q.shape == (batch, class_num)
    # q rows must sum to 1 (row-normalized soft assignment)
    assert jnp.allclose(jnp.sum(q, axis=1), 1.0, atol=1e-5)

    # Validate fused kernel against a plain-JAX reference built from the same
    # (bf16, zero-padded) parameters.
    enc_r, dec_r, q_r = reference_forward(params, x)
    assert jnp.allclose(enc, enc_r, rtol=1e-2, atol=1e-2)
    assert jnp.allclose(dec, dec_r, rtol=1e-2, atol=1e-2)
    assert jnp.allclose(q, q_r, rtol=1e-2, atol=1e-2)

    print("KERNEL_OK")
</pallas_src>

<mosaic_0001>
module attributes {stable_mosaic.version = 11 : i64} {
  func.func @_fused_autoencoder_kernel(%arg0: i32, %arg1: memref<8x64xf32, #tpu.memory_space<vmem>>, %arg2: memref<64x512xbf16, #tpu.memory_space<vmem>>, %arg3: memref<1x512xf32, #tpu.memory_space<vmem>>, %arg4: memref<512x512xbf16, #tpu.memory_space<vmem>>, %arg5: memref<1x512xf32, #tpu.memory_space<vmem>>, %arg6: memref<512x2048xbf16, #tpu.memory_space<vmem>>, %arg7: memref<1x2048xf32, #tpu.memory_space<vmem>>, %arg8: memref<2048x32xbf16, #tpu.memory_space<vmem>>, %arg9: memref<1x32xf32, #tpu.memory_space<vmem>>, %arg10: memref<32x2048xbf16, #tpu.memory_space<vmem>>, %arg11: memref<1x2048xf32, #tpu.memory_space<vmem>>, %arg12: memref<2048x512xbf16, #tpu.memory_space<vmem>>, %arg13: memref<1x512xf32, #tpu.memory_space<vmem>>, %arg14: memref<512x512xbf16, #tpu.memory_space<vmem>>, %arg15: memref<1x512xf32, #tpu.memory_space<vmem>>, %arg16: memref<512x64xbf16, #tpu.memory_space<vmem>>, %arg17: memref<1x64xf32, #tpu.memory_space<vmem>>, %arg18: memref<32x4xf32, #tpu.memory_space<vmem>>, %arg19: memref<8x32xf32, #tpu.memory_space<vmem>>, %arg20: memref<8x64xf32, #tpu.memory_space<vmem>>, %arg21: memref<8x4xf32, #tpu.memory_space<vmem>>) attributes {dimension_semantics = [#tpu.dimension_semantics<parallel>], iteration_bounds = array<i64: 1>, scalar_prefetch = 0 : i64, scratch_operands = 0 : i64, tpu.core_type = #tpu.core_type<tc>, window_params = [{transform_indices = @transform_0, window_bounds = array<i64: 8, 64>}, {pipeline_mode = #tpu.pipeline_mode<synchronous>, transform_indices = @transform_1, window_bounds = array<i64: 64, 512>}, {pipeline_mode = #tpu.pipeline_mode<synchronous>, transform_indices = @transform_2, window_bounds = array<i64: 1, 512>}, {pipeline_mode = #tpu.pipeline_mode<synchronous>, transform_indices = @transform_3, window_bounds = array<i64: 512, 512>}, {pipeline_mode = #tpu.pipeline_mode<synchronous>, transform_indices = @transform_4, window_bounds = array<i64: 1, 512>}, {pipeline_mode = #tpu.pipeline_mode<synchronous>, transform_indices = @transform_5, window_bounds = array<i64: 512, 2048>}, {pipeline_mode = #tpu.pipeline_mode<synchronous>, transform_indices = @transform_6, window_bounds = array<i64: 1, 2048>}, {pipeline_mode = #tpu.pipeline_mode<synchronous>, transform_indices = @transform_7, window_bounds = array<i64: 2048, 32>}, {pipeline_mode = #tpu.pipeline_mode<synchronous>, transform_indices = @transform_8, window_bounds = array<i64: 1, 32>}, {pipeline_mode = #tpu.pipeline_mode<synchronous>, transform_indices = @transform_9, window_bounds = array<i64: 32, 2048>}, {pipeline_mode = #tpu.pipeline_mode<synchronous>, transform_indices = @transform_10, window_bounds = array<i64: 1, 2048>}, {pipeline_mode = #tpu.pipeline_mode<synchronous>, transform_indices = @transform_11, window_bounds = array<i64: 2048, 512>}, {pipeline_mode = #tpu.pipeline_mode<synchronous>, transform_indices = @transform_12, window_bounds = array<i64: 1, 512>}, {pipeline_mode = #tpu.pipeline_mode<synchronous>, transform_indices = @transform_13, window_bounds = array<i64: 512, 512>}, {pipeline_mode = #tpu.pipeline_mode<synchronous>, transform_indices = @transform_14, window_bounds = array<i64: 1, 512>}, {pipeline_mode = #tpu.pipeline_mode<synchronous>, transform_indices = @transform_15, window_bounds = array<i64: 512, 64>}, {pipeline_mode = #tpu.pipeline_mode<synchronous>, transform_indices = @transform_16, window_bounds = array<i64: 1, 64>}, {pipeline_mode = #tpu.pipeline_mode<synchronous>, transform_indices = @transform_17, window_bounds = array<i64: 32, 4>}, {transform_indices = @transform_18, window_bounds = array<i64: 8, 32>}, {transform_indices = @transform_19, window_bounds = array<i64: 8, 64>}, {transform_indices = @transform_20, window_bounds = array<i64: 8, 4>}]} {
    %c0 = arith.constant 0 : index
    %c0_0 = arith.constant 0 : index
    %0 = vector.load %arg1[%c0, %c0_0] : memref<8x64xf32, #tpu.memory_space<vmem>>, vector<8x64xf32>
    %1 = arith.truncf %0 : vector<8x64xf32> to vector<8x64xbf16>
    %c0_1 = arith.constant 0 : index
    %c0_2 = arith.constant 0 : index
    %2 = vector.load %arg2[%c0_1, %c0_2] : memref<64x512xbf16, #tpu.memory_space<vmem>>, vector<64x512xbf16>
    %cst = arith.constant dense<0.000000e+00> : vector<8x512xf32>
    %3 = tpu.matmul %1, %2, %cst {dimension_numbers = #tpu.dot_dimension_numbers<[1], [0], [0], [1], [0, 0, 1, 1], [], []>} : vector<8x64xbf16>, vector<64x512xbf16>, vector<8x512xf32> -> vector<8x512xf32>
    %c0_3 = arith.constant 0 : index
    %c0_4 = arith.constant 0 : index
    %4 = vector.load %arg3[%c0_3, %c0_4] : memref<1x512xf32, #tpu.memory_space<vmem>>, vector<1x512xf32>
    %5 = vector.broadcast %4 : vector<1x512xf32> to vector<8x512xf32>
    %6 = arith.addf %3, %5 : vector<8x512xf32>
    %cst_5 = arith.constant 0.000000e+00 : f32
    %7 = vector.broadcast %cst_5 : f32 to vector<8x512xf32>
    %8 = arith.maximumf %6, %7 : vector<8x512xf32>
    %9 = arith.truncf %8 : vector<8x512xf32> to vector<8x512xbf16>
    %c0_6 = arith.constant 0 : index
    %c0_7 = arith.constant 0 : index
    %10 = vector.load %arg4[%c0_6, %c0_7] : memref<512x512xbf16, #tpu.memory_space<vmem>>, vector<512x512xbf16>
    %cst_8 = arith.constant dense<0.000000e+00> : vector<8x512xf32>
    %11 = tpu.matmul %9, %10, %cst_8 {dimension_numbers = #tpu.dot_dimension_numbers<[1], [0], [0], [1], [0, 0, 1, 1], [], []>} : vector<8x512xbf16>, vector<512x512xbf16>, vector<8x512xf32> -> vector<8x512xf32>
    %c0_9 = arith.constant 0 : index
    %c0_10 = arith.constant 0 : index
    %12 = vector.load %arg5[%c0_9, %c0_10] : memref<1x512xf32, #tpu.memory_space<vmem>>, vector<1x512xf32>
    %13 = vector.broadcast %12 : vector<1x512xf32> to vector<8x512xf32>
    %14 = arith.addf %11, %13 : vector<8x512xf32>
    %cst_11 = arith.constant 0.000000e+00 : f32
    %15 = vector.broadcast %cst_11 : f32 to vector<8x512xf32>
    %16 = arith.maximumf %14, %15 : vector<8x512xf32>
    %17 = arith.truncf %16 : vector<8x512xf32> to vector<8x512xbf16>
    %c0_12 = arith.constant 0 : index
    %c0_13 = arith.constant 0 : index
    %18 = vector.load %arg6[%c0_12, %c0_13] : memref<512x2048xbf16, #tpu.memory_space<vmem>>, vector<512x2048xbf16>
    %cst_14 = arith.constant dense<0.000000e+00> : vector<8x2048xf32>
    %19 = tpu.matmul %17, %18, %cst_14 {dimension_numbers = #tpu.dot_dimension_numbers<[1], [0], [0], [1], [0, 0, 1, 1], [], []>} : vector<8x512xbf16>, vector<512x2048xbf16>, vector<8x2048xf32> -> vector<8x2048xf32>
    %c0_15 = arith.constant 0 : index
    %c0_16 = arith.constant 0 : index
    %20 = vector.load %arg7[%c0_15, %c0_16] : memref<1x2048xf32, #tpu.memory_space<vmem>>, vector<1x2048xf32>
    %21 = vector.broadcast %20 : vector<1x2048xf32> to vector<8x2048xf32>
    %22 = arith.addf %19, %21 : vector<8x2048xf32>
    %cst_17 = arith.constant 0.000000e+00 : f32
    %23 = vector.broadcast %cst_17 : f32 to vector<8x2048xf32>
    %24 = arith.maximumf %22, %23 : vector<8x2048xf32>
    %25 = arith.truncf %24 : vector<8x2048xf32> to vector<8x2048xbf16>
    %c0_18 = arith.constant 0 : index
    %c0_19 = arith.constant 0 : index
    %26 = vector.load %arg8[%c0_18, %c0_19] : memref<2048x32xbf16, #tpu.memory_space<vmem>>, vector<2048x32xbf16>
    %cst_20 = arith.constant dense<0.000000e+00> : vector<8x32xf32>
    %27 = tpu.matmul %25, %26, %cst_20 {dimension_numbers = #tpu.dot_dimension_numbers<[1], [0], [0], [1], [0, 0, 1, 1], [], []>} : vector<8x2048xbf16>, vector<2048x32xbf16>, vector<8x32xf32> -> vector<8x32xf32>
    %c0_21 = arith.constant 0 : index
    %c0_22 = arith.constant 0 : index
    %28 = vector.load %arg9[%c0_21, %c0_22] : memref<1x32xf32, #tpu.memory_space<vmem>>, vector<1x32xf32>
    %29 = vector.broadcast %28 : vector<1x32xf32> to vector<8x32xf32>
    %30 = arith.addf %27, %29 : vector<8x32xf32>
    %31 = arith.truncf %30 : vector<8x32xf32> to vector<8x32xbf16>
    %c0_23 = arith.constant 0 : index
    %c0_24 = arith.constant 0 : index
    %32 = vector.load %arg10[%c0_23, %c0_24] : memref<32x2048xbf16, #tpu.memory_space<vmem>>, vector<32x2048xbf16>
    %cst_25 = arith.constant dense<0.000000e+00> : vector<8x2048xf32>
    %33 = tpu.matmul %31, %32, %cst_25 {dimension_numbers = #tpu.dot_dimension_numbers<[1], [0], [0], [1], [0, 0, 1, 1], [], []>} : vector<8x32xbf16>, vector<32x2048xbf16>, vector<8x2048xf32> -> vector<8x2048xf32>
    %c0_26 = arith.constant 0 : index
    %c0_27 = arith.constant 0 : index
    %34 = vector.load %arg11[%c0_26, %c0_27] : memref<1x2048xf32, #tpu.memory_space<vmem>>, vector<1x2048xf32>
    %35 = vector.broadcast %34 : vector<1x2048xf32> to vector<8x2048xf32>
    %36 = arith.addf %33, %35 : vector<8x2048xf32>
    %cst_28 = arith.constant 0.000000e+00 : f32
    %37 = vector.broadcast %cst_28 : f32 to vector<8x2048xf32>
    %38 = arith.maximumf %36, %37 : vector<8x2048xf32>
    %39 = arith.truncf %38 : vector<8x2048xf32> to vector<8x2048xbf16>
    %c0_29 = arith.constant 0 : index
    %c0_30 = arith.constant 0 : index
    %40 = vector.load %arg12[%c0_29, %c0_30] : memref<2048x512xbf16, #tpu.memory_space<vmem>>, vector<2048x512xbf16>
    %cst_31 = arith.constant dense<0.000000e+00> : vector<8x512xf32>
    %41 = tpu.matmul %39, %40, %cst_31 {dimension_numbers = #tpu.dot_dimension_numbers<[1], [0], [0], [1], [0, 0, 1, 1], [], []>} : vector<8x2048xbf16>, vector<2048x512xbf16>, vector<8x512xf32> -> vector<8x512xf32>
    %c0_32 = arith.constant 0 : index
    %c0_33 = arith.constant 0 : index
    %42 = vector.load %arg13[%c0_32, %c0_33] : memref<1x512xf32, #tpu.memory_space<vmem>>, vector<1x512xf32>
    %43 = vector.broadcast %42 : vector<1x512xf32> to vector<8x512xf32>
    %44 = arith.addf %41, %43 : vector<8x512xf32>
    %cst_34 = arith.constant 0.000000e+00 : f32
    %45 = vector.broadcast %cst_34 : f32 to vector<8x512xf32>
    %46 = arith.maximumf %44, %45 : vector<8x512xf32>
    %47 = arith.truncf %46 : vector<8x512xf32> to vector<8x512xbf16>
    %c0_35 = arith.constant 0 : index
    %c0_36 = arith.constant 0 : index
    %48 = vector.load %arg14[%c0_35, %c0_36] : memref<512x512xbf16, #tpu.memory_space<vmem>>, vector<512x512xbf16>
    %cst_37 = arith.constant dense<0.000000e+00> : vector<8x512xf32>
    %49 = tpu.matmul %47, %48, %cst_37 {dimension_numbers = #tpu.dot_dimension_numbers<[1], [0], [0], [1], [0, 0, 1, 1], [], []>} : vector<8x512xbf16>, vector<512x512xbf16>, vector<8x512xf32> -> vector<8x512xf32>
    %c0_38 = arith.constant 0 : index
    %c0_39 = arith.constant 0 : index
    %50 = vector.load %arg15[%c0_38, %c0_39] : memref<1x512xf32, #tpu.memory_space<vmem>>, vector<1x512xf32>
    %51 = vector.broadcast %50 : vector<1x512xf32> to vector<8x512xf32>
    %52 = arith.addf %49, %51 : vector<8x512xf32>
    %cst_40 = arith.constant 0.000000e+00 : f32
    %53 = vector.broadcast %cst_40 : f32 to vector<8x512xf32>
    %54 = arith.maximumf %52, %53 : vector<8x512xf32>
    %55 = arith.truncf %54 : vector<8x512xf32> to vector<8x512xbf16>
    %c0_41 = arith.constant 0 : index
    %c0_42 = arith.constant 0 : index
    %56 = vector.load %arg16[%c0_41, %c0_42] : memref<512x64xbf16, #tpu.memory_space<vmem>>, vector<512x64xbf16>
    %cst_43 = arith.constant dense<0.000000e+00> : vector<8x64xf32>
    %57 = tpu.matmul %55, %56, %cst_43 {dimension_numbers = #tpu.dot_dimension_numbers<[1], [0], [0], [1], [0, 0, 1, 1], [], []>} : vector<8x512xbf16>, vector<512x64xbf16>, vector<8x64xf32> -> vector<8x64xf32>
    %c0_44 = arith.constant 0 : index
    %c0_45 = arith.constant 0 : index
    %58 = vector.load %arg17[%c0_44, %c0_45] : memref<1x64xf32, #tpu.memory_space<vmem>>, vector<1x64xf32>
    %59 = vector.broadcast %58 : vector<1x64xf32> to vector<8x64xf32>
    %60 = arith.addf %57, %59 : vector<8x64xf32>
    %c0_46 = arith.constant 0 : index
    %c0_47 = arith.constant 0 : index
    %61 = vector.load %arg19[%c0_46, %c0_47] : memref<8x32xf32, #tpu.memory_space<vmem>>, vector<8x32xf32>
    tpu.vector_store %arg19[%c0_46, %c0_47], %30 {strides = array<i32>} : memref<8x32xf32, #tpu.memory_space<vmem>>, vector<8x32xf32>,
    %c0_48 = arith.constant 0 : index
    %c0_49 = arith.constant 0 : index
    %62 = vector.load %arg20[%c0_48, %c0_49] : memref<8x64xf32, #tpu.memory_space<vmem>>, vector<8x64xf32>
    tpu.vector_store %arg20[%c0_48, %c0_49], %60 {strides = array<i32>} : memref<8x64xf32, #tpu.memory_space<vmem>>, vector<8x64xf32>,
    %c0_50 = arith.constant 0 : index
    %c0_51 = arith.constant 0 : index
    %63 = vector.load %arg18[%c0_50, %c0_51] : memref<32x4xf32, #tpu.memory_space<vmem>>, vector<32x4xf32>
    %cst_52 = arith.constant dense<0.000000e+00> : vector<8x4xf32>
    %64 = tpu.matmul %30, %63, %cst_52 {dimension_numbers = #tpu.dot_dimension_numbers<[1], [0], [0], [1], [0, 0, 1, 1], [], []>} : vector<8x32xf32>, vector<32x4xf32>, vector<8x4xf32> -> vector<8x4xf32>
    %65 = arith.mulf %30, %30 : vector<8x32xf32>
    %cst_53 = arith.constant dense<0.000000e+00> : vector<8xf32>
    %66 = vector.multi_reduction <add>, %65, %cst_53 [1] : vector<8x32xf32> to vector<8xf32>
    %67 = vector.shape_cast %66 : vector<8xf32> to vector<8x1xf32>
    %cst_54 = arith.constant 1.000000e+00 : f32
    %68 = vector.broadcast %cst_54 : f32 to vector<1x32xf32>
    %69 = arith.mulf %63, %63 : vector<32x4xf32>
    %cst_55 = arith.constant dense<0.000000e+00> : vector<1x4xf32>
    %70 = tpu.matmul %68, %69, %cst_55 {dimension_numbers = #tpu.dot_dimension_numbers<[1], [0], [0], [1], [0, 0, 1, 1], [], []>} : vector<1x32xf32>, vector<32x4xf32>, vector<1x4xf32> -> vector<1x4xf32>
    %cst_56 = arith.constant 2.000000e+00 : f32
    %71 = vector.broadcast %cst_56 : f32 to vector<8x4xf32>
    %72 = arith.mulf %71, %64 : vector<8x4xf32>
    %73 = vector.broadcast %67 : vector<8x1xf32> to vector<8x4xf32>
    %74 = arith.subf %73, %72 : vector<8x4xf32>
    %75 = vector.broadcast %70 : vector<1x4xf32> to vector<8x4xf32>
    %76 = arith.addf %74, %75 : vector<8x4xf32>
    %cst_57 = arith.constant 0.000000e+00 : f32
    %77 = vector.broadcast %cst_57 : f32 to vector<8x4xf32>
    %78 = arith.maximumf %76, %77 : vector<8x4xf32>
    %cst_58 = arith.constant 1.000000e+00 : f32
    %79 = vector.broadcast %cst_58 : f32 to vector<8x4xf32>
    %80 = arith.addf %79, %78 : vector<8x4xf32>
    %cst_59 = arith.constant 1.000000e+00 : f32
    %81 = vector.broadcast %cst_59 : f32 to vector<8x4xf32>
    %82 = arith.divf %81, %80 : vector<8x4xf32>
    %cst_60 = arith.constant dense<0.000000e+00> : vector<8xf32>
    %83 = vector.multi_reduction <add>, %82, %cst_60 [1] : vector<8x4xf32> to vector<8xf32>
    %84 = vector.shape_cast %83 : vector<8xf32> to vector<8x1xf32>
    %85 = vector.broadcast %84 : vector<8x1xf32> to vector<8x4xf32>
    %86 = arith.divf %82, %85 : vector<8x4xf32>
    %c0_61 = arith.constant 0 : index
    %c0_62 = arith.constant 0 : index
    %87 = vector.load %arg21[%c0_61, %c0_62] : memref<8x4xf32, #tpu.memory_space<vmem>>, vector<8x4xf32>
    tpu.vector_store %arg21[%c0_61, %c0_62], %86 {strides = array<i32>} : memref<8x4xf32, #tpu.memory_space<vmem>>, vector<8x4xf32>,
    return
  }
  func.func @transform_0(%arg0: i32) -> (i32, i32) {
    %c0_i32 = arith.constant 0 : i32
    %c0_i32_0 = arith.constant 0 : i32
    return %arg0, %c0_i32 : i32, i32
  }
  func.func @transform_1(%arg0: i32) -> (i32, i32) {
    %c0_i32 = arith.constant 0 : i32
    %c0_i32_0 = arith.constant 0 : i32
    %c0_i32_1 = arith.constant 0 : i32
    return %c0_i32, %c0_i32_0 : i32, i32
  }
  func.func @transform_2(%arg0: i32) -> (i32, i32) {
    %c0_i32 = arith.constant 0 : i32
    %c0_i32_0 = arith.constant 0 : i32
    %c0_i32_1 = arith.constant 0 : i32
    return %c0_i32, %c0_i32_0 : i32, i32
  }
  func.func @transform_3(%arg0: i32) -> (i32, i32) {
    %c0_i32 = arith.constant 0 : i32
    %c0_i32_0 = arith.constant 0 : i32
    %c0_i32_1 = arith.constant 0 : i32
    return %c0_i32, %c0_i32_0 : i32, i32
  }
  func.func @transform_4(%arg0: i32) -> (i32, i32) {
    %c0_i32 = arith.constant 0 : i32
    %c0_i32_0 = arith.constant 0 : i32
    %c0_i32_1 = arith.constant 0 : i32
    return %c0_i32, %c0_i32_0 : i32, i32
  }
  func.func @transform_5(%arg0: i32) -> (i32, i32) {
    %c0_i32 = arith.constant 0 : i32
    %c0_i32_0 = arith.constant 0 : i32
    %c0_i32_1 = arith.constant 0 : i32
    return %c0_i32, %c0_i32_0 : i32, i32
  }
  func.func @transform_6(%arg0: i32) -> (i32, i32) {
    %c0_i32 = arith.constant 0 : i32
    %c0_i32_0 = arith.constant 0 : i32
    %c0_i32_1 = arith.constant 0 : i32
    return %c0_i32, %c0_i32_0 : i32, i32
  }
  func.func @transform_7(%arg0: i32) -> (i32, i32) {
    %c0_i32 = arith.constant 0 : i32
    %c0_i32_0 = arith.constant 0 : i32
    %c0_i32_1 = arith.constant 0 : i32
    return %c0_i32, %c0_i32_0 : i32, i32
  }
  func.func @transform_8(%arg0: i32) -> (i32, i32) {
    %c0_i32 = arith.constant 0 : i32
    %c0_i32_0 = arith.constant 0 : i32
    %c0_i32_1 = arith.constant 0 : i32
    return %c0_i32, %c0_i32_0 : i32, i32
  }
  func.func @transform_9(%arg0: i32) -> (i32, i32) {
    %c0_i32 = arith.constant 0 : i32
    %c0_i32_0 = arith.constant 0 : i32
    %c0_i32_1 = arith.constant 0 : i32
    return %c0_i32, %c0_i32_0 : i32, i32
  }
  func.func @transform_10(%arg0: i32) -> (i32, i32) {
    %c0_i32 = arith.constant 0 : i32
    %c0_i32_0 = arith.constant 0 : i32
    %c0_i32_1 = arith.constant 0 : i32
    return %c0_i32, %c0_i32_0 : i32, i32
  }
  func.func @transform_11(%arg0: i32) -> (i32, i32) {
    %c0_i32 = arith.constant 0 : i32
    %c0_i32_0 = arith.constant 0 : i32
    %c0_i32_1 = arith.constant 0 : i32
    return %c0_i32, %c0_i32_0 : i32, i32
  }
  func.func @transform_12(%arg0: i32) -> (i32, i32) {
    %c0_i32 = arith.constant 0 : i32
    %c0_i32_0 = arith.constant 0 : i32
    %c0_i32_1 = arith.constant 0 : i32
    return %c0_i32, %c0_i32_0 : i32, i32
  }
  func.func @transform_13(%arg0: i32) -> (i32, i32) {
    %c0_i32 = arith.constant 0 : i32
    %c0_i32_0 = arith.constant 0 : i32
    %c0_i32_1 = arith.constant 0 : i32
    return %c0_i32, %c0_i32_0 : i32, i32
  }
  func.func @transform_14(%arg0: i32) -> (i32, i32) {
    %c0_i32 = arith.constant 0 : i32
    %c0_i32_0 = arith.constant 0 : i32
    %c0_i32_1 = arith.constant 0 : i32
    return %c0_i32, %c0_i32_0 : i32, i32
  }
  func.func @transform_15(%arg0: i32) -> (i32, i32) {
    %c0_i32 = arith.constant 0 : i32
    %c0_i32_0 = arith.constant 0 : i32
    %c0_i32_1 = arith.constant 0 : i32
    return %c0_i32, %c0_i32_0 : i32, i32
  }
  func.func @transform_16(%arg0: i32) -> (i32, i32) {
    %c0_i32 = arith.constant 0 : i32
    %c0_i32_0 = arith.constant 0 : i32
    %c0_i32_1 = arith.constant 0 : i32
    return %c0_i32, %c0_i32_0 : i32, i32
  }
  func.func @transform_17(%arg0: i32) -> (i32, i32) {
    %c0_i32 = arith.constant 0 : i32
    %c0_i32_0 = arith.constant 0 : i32
    %c0_i32_1 = arith.constant 0 : i32
    return %c0_i32, %c0_i32_0 : i32, i32
  }
  func.func @transform_18(%arg0: i32) -> (i32, i32) {
    %c0_i32 = arith.constant 0 : i32
    %c0_i32_0 = arith.constant 0 : i32
    return %arg0, %c0_i32 : i32, i32
  }
  func.func @transform_19(%arg0: i32) -> (i32, i32) {
    %c0_i32 = arith.constant 0 : i32
    %c0_i32_0 = arith.constant 0 : i32
    return %arg0, %c0_i32 : i32, i32
  }
  func.func @transform_20(%arg0: i32) -> (i32, i32) {
    %c0_i32 = arith.constant 0 : i32
    %c0_i32_0 = arith.constant 0 : i32
    return %arg0, %c0_i32 : i32, i32
  }
}

</mosaic_0001>

<bundles_post_ra>
// kernel: autoencoder_forward.1
= control target key start
LH: loop header
LB: loop body
LE: loop exit
PB: predicated region body
PF: predicated region fallthrough
CT: control target
= control target key end

     0   :  { %s17329_s0 = inlined_call_operand.hbm [shape: f32[8,64], index: 0, kind: input, shape index: {}]   ;;  %s17330_s1 = inlined_call_operand.hbm [shape: bf16[64,512], index: 1, kind: input, shape index: {}]   ;;  %s17331_s2 = inlined_call_operand.hbm [shape: f32[1,512], index: 2, kind: input, shape index: {}]   ;;  %s17332_s3 = inlined_call_operand.hbm [shape: bf16[512,512], index: 3, kind: input, shape index: {}]   ;;  %s17333_s4 = inlined_call_operand.hbm [shape: f32[1,512], index: 4, kind: input, shape index: {}]   ;;  %s17334_s5 = inlined_call_operand.hbm [shape: bf16[512,2048], index: 5, kind: input, shape index: {}]   ;;  %s17335_s6 = inlined_call_operand.hbm [shape: f32[1,2048], index: 6, kind: input, shape index: {}]   ;;  %s17336_s7 = inlined_call_operand.vmem [shape: bf16[2048,32], index: 7, kind: input, shape index: {}]   ;;  %s17337_s8 = inlined_call_operand.hbm [shape: f32[1,32], index: 8, kind: input, shape index: {}]   ;;  %s17338_s9 = inlined_call_operand.hbm [shape: bf16[32,2048], index: 9, kind: input, shape index: {}]   ;;  %s17339_s10 = inlined_call_operand.hbm [shape: f32[1,2048], index: 10, kind: input, shape index: {}]   ;;  %s17340_s11 = inlined_call_operand.hbm [shape: bf16[2048,512], index: 11, kind: input, shape index: {}]   ;;  %s17341_s12 = inlined_call_operand.hbm [shape: f32[1,512], index: 12, kind: input, shape index: {}]   ;;  %s17342_s13 = inlined_call_operand.hbm [shape: bf16[512,512], index: 13, kind: input, shape index: {}]   ;;  %s17343_s14 = inlined_call_operand.hbm [shape: f32[1,512], index: 14, kind: input, shape index: {}]   ;;  %s17344_s15 = inlined_call_operand.vmem [shape: bf16[512,64], index: 15, kind: input, shape index: {}]   ;;  %s17345_s16 = inlined_call_operand.hbm [shape: f32[1,64], index: 16, kind: input, shape index: {}]   ;;  %s17346_s17 = inlined_call_operand.vmem [shape: f32[32,4], index: 17, kind: input, shape index: {}]   ;;  %s17347_s18 = inlined_call_operand.hbm [shape: f32[8,32], index: 18, kind: output, shape index: {0}]   ;;  %s17348_s19 = inlined_call_operand.hbm [shape: f32[8,64], index: 19, kind: output, shape index: {1}]   ;;  %s17349_s20 = inlined_call_operand.vmem [shape: f32[8,4], index: 20, kind: output, shape index: {2}]  }
   0x1   :  { %17357 = sst [smem:[#allocation39_spill]] %s17329_s0 }
   0x2   :  { %17358 = sst [smem:[#allocation40_spill]] %s17330_s1 }
   0x3   :  { %17359 = sst [smem:[#allocation41_spill]] %s17331_s2 }
   0x4   :  { %17360 = sst [smem:[#allocation42_spill]] %s17332_s3 }
   0x5   :  { %17361 = sst [smem:[#allocation43_spill]] %s17333_s4 }
   0x6   :  { %17362 = sst [smem:[#allocation44_spill]] %s17347_s18 }
   0x7   :  { %17363 = sst [smem:[#allocation45_spill]] %s17348_s19 }
   0x8   :  { %17364 = sst [smem:[#allocation46_spill]] %s17349_s20 }
   0x9   :  { %26 = vsyncpa [#allocation3], 0 }
   0xa   :  { %27 = vsyncpa [#allocation6], 0 }
   0xb   :  { %28 = vsyncpa [#allocation9], 0 }
   0xc   :  { %29 = vsyncpa [#allocation12], 0 }
   0xd   :  { %30 = vsyncpa [#allocation15], 0 }
   0xe   :  { %31 = vsyncpa [#allocation18], 0 }
   0xf   :  { %32 = vsyncpa [#allocation21], 0 }
  0x10   :  { %33 = vsyncpa [#allocation24], 0 }
  0x11   :  { %34 = vsyncpa [#allocation4], 0 }
  0x12   :  { %35 = vsyncpa [#allocation28], 0  ;;  %s16202_s1 = smov [#allocation5]   ;;  %s17365_s2 = sld [smem:[#allocation40_spill]] }
  0x13   :  { %s51_s22 = sshll.u32 %s16202_s1, 4  ;;  %s52_s22 = int_to_ptr.vmem [resolvable:$true] %s51_s22 }
  0x18   :  { %s15808_s25 = scalar_lea.hbm %s17365_s2, 2048 }
  0x19   :  { %p15809_p0 = scmp.ne.s32.totalorder %s17365_s2, %s15808_s25  ;;  %p15812_p1 = scmp.lt.u32.totalorder %s15808_s25, %s17365_s2 }
  0x1b   :  { %p15814_p2 = pnand %p15812_p1, %p15809_p0 }
  0x1d   :  { %15817 = shalt.err (!%p15814_p2)
}
  0x1e   :  { %s15818_s4 = scalar_lea.vmem %s52_s22, 2048  ;;  %p15823_p4 = scmp.lt.s32.totalorder %s52_s22, %s52_s22 }
  0x1f   :  { %p15819_p3 = scmp.ne.s32.totalorder %s52_s22, %s15818_s4  ;;  %p15824_p5 = scmp.lt.s32.totalorder %s15818_s4, %s15818_s4 }
  0x21   :  { %p15825_p6 = por %p15824_p5, %p15823_p4 }
  0x23   :  { %p15826_p7 = pnand %p15825_p6, %p15819_p3 }
  0x25   :  { %15829 = shalt.err (!%p15826_p7)
}
  0x26   :  { %s16203_s29 = smov 256   ;;  %s16204_s30 = smov 16  }
  0x27   :  { %57 = dma.hbm_to_vmem [thread:$0]  %s17365_s2, 2048, %s52_s22, [#allocation6], %s16203_s29, %s16203_s29, %s16204_s30  }
  0x28   :  { %s16205_s1 = smov [#allocation8]   ;;  %s16206_s24 = smov [#allocation11]  }
  0x29   :  { %s73_s23 = sshll.u32 %s16205_s1, 4  ;;  %s95_s25 = sshll.u32 %s16206_s24, 4  ;;  %s74_s23 = int_to_ptr.vmem [resolvable:$true] %s73_s23  ;;  %s96_s25 = int_to_ptr.vmem [resolvable:$true] %s95_s25 }
  0x2a   :  { %s17366_s27 = sld [smem:[#allocation42_spill]] }
  0x30   :  { %s15830_s28 = scalar_lea.hbm %s17366_s27, 16384 }
  0x31   :  { %p15831_p8 = scmp.ne.s32.totalorder %s17366_s27, %s15830_s28  ;;  %p15834_p9 = scmp.lt.u32.totalorder %s15830_s28, %s17366_s27 }
  0x33   :  { %p15836_p10 = pnand %p15834_p9, %p15831_p8 }
  0x35   :  { %15839 = shalt.err (!%p15836_p10)
}
  0x36   :  { %s15840_s22 = scalar_lea.vmem %s74_s23, 16384  ;;  %p15845_p12 = scmp.lt.s32.totalorder %s74_s23, %s74_s23 }
  0x37   :  { %p15841_p11 = scmp.ne.s32.totalorder %s74_s23, %s15840_s22  ;;  %p15846_p13 = scmp.lt.s32.totalorder %s15840_s22, %s15840_s22 }
  0x39   :  { %p15847_p0 = por %p15846_p13, %p15845_p12 }
  0x3b   :  { %p15848_p1 = pnand %p15847_p0, %p15841_p11 }
  0x3d   :  { %15851 = shalt.err (!%p15848_p1)
}
  0x3e   :  { %79 = dma.hbm_to_vmem [thread:$0]  %s17366_s27, 16384, %s74_s23, [#allocation9], %s16203_s29, %s16203_s29, %s16204_s30  }
  0x3f   :  { %s15852_s19 = scalar_lea.hbm %s17334_s5, 65536 }
  0x40   :  { %p15853_p2 = scmp.ne.s32.totalorder %s17334_s5, %s15852_s19  ;;  %p15856_p3 = scmp.lt.u32.totalorder %s15852_s19, %s17334_s5 }
  0x42   :  { %p15858_p4 = pnand %p15856_p3, %p15853_p2 }
  0x44   :  { %15861 = shalt.err (!%p15858_p4)
}
  0x45   :  { %s15862_s26 = scalar_lea.vmem %s96_s25, 65536  ;;  %p15867_p6 = scmp.lt.s32.totalorder %s96_s25, %s96_s25 }
  0x46   :  { %p15863_p5 = scmp.ne.s32.totalorder %s96_s25, %s15862_s26  ;;  %p15868_p7 = scmp.lt.s32.totalorder %s15862_s26, %s15862_s26 }
  0x48   :  { %p15869_p8 = por %p15868_p7, %p15867_p6 }
  0x4a   :  { %p15870_p9 = pnand %p15869_p8, %p15863_p5 }
  0x4c   :  { %15873 = shalt.err (!%p15870_p9)
}
  0x4d   :  { %s16207_s23 = smov 1024   ;;  %s16208_s27 = smov 64  }
  0x4e   :  { %101 = dma.hbm_to_vmem [thread:$0]  %s17334_s5, 65536, %s96_s25, [#allocation12], %s16207_s23, %s16207_s23, %s16208_s27  }
  0x4f   :  { %s16209_s22 = smov [#allocation14]   ;;  %s16210_s0 = smov [#allocation17]  }
  0x50   :  { %s120_s2 = sshll.u32 %s16209_s22, 4  ;;  %s142_s20 = sshll.u32 %s16210_s0, 4  ;;  %s121_s2 = int_to_ptr.vmem [resolvable:$true] %s120_s2  ;;  %s143_s20 = int_to_ptr.vmem [resolvable:$true] %s142_s20 }
  0x51   :  { %s15874_s21 = scalar_lea.hbm %s17337_s8, 16 }
  0x52   :  { %p15875_p10 = scmp.ne.s32.totalorder %s17337_s8, %s15874_s21  ;;  %p15878_p11 = scmp.lt.u32.totalorder %s15874_s21, %s17337_s8 }
  0x54   :  { %p15880_p12 = pnand %p15878_p11, %p15875_p10 }
  0x56   :  { %15883 = shalt.err (!%p15880_p12)
}
  0x57   :  { %s15884_s5 = scalar_lea.vmem %s121_s2, 16  ;;  %s15888_s25 = scalar_lea.vmem %s121_s2, 32 }
  0x58   :  { %p15885_p13 = scmp.ne.s32.totalorder %s121_s2, %s15884_s5  ;;  %p15889_p0 = scmp.lt.s32.totalorder %s121_s2, %s121_s2 }
  0x59   :  { %p15890_p1 = scmp.lt.s32.totalorder %s15888_s25, %s15884_s5 }
  0x5b   :  { %p15891_p2 = por %p15890_p1, %p15889_p0 }
  0x5d   :  { %p15892_p3 = pnand %p15891_p2, %p15885_p13 }
  0x5f   :  { %15895 = shalt.err (!%p15892_p3)
}
  0x60   :  { %123 = dma.hbm_to_vmem [thread:$0]  %s17337_s8, 16, %s121_s2, [#allocation15]  }
  0x61   :  { %s15896_s18 = scalar_lea.hbm %s17339_s10, 256 }
  0x62   :  { %p15897_p4 = scmp.ne.s32.totalorder %s17339_s10, %s15896_s18  ;;  %p15900_p5 = scmp.lt.u32.totalorder %s15896_s18, %s17339_s10 }
  0x64   :  { %p15902_p6 = pnand %p15900_p5, %p15897_p4 }
  0x66   :  { %15905 = shalt.err (!%p15902_p6)
}
  0x67   :  { %s15906_s3 = scalar_lea.vmem %s143_s20, 256  ;;  %p15911_p8 = scmp.lt.s32.totalorder %s143_s20, %s143_s20 }
  0x68   :  { %p15907_p7 = scmp.ne.s32.totalorder %s143_s20, %s15906_s3  ;;  %p15912_p9 = scmp.lt.s32.totalorder %s15906_s3, %s15906_s3 }
  0x6a   :  { %p15913_p10 = por %p15912_p9, %p15911_p8 }
  0x6c   :  { %p15914_p11 = pnand %p15913_p10, %p15907_p7 }
  0x6e   :  { %15917 = shalt.err (!%p15914_p11)
}
  0x6f   :  { %145 = dma.hbm_to_vmem [thread:$0]  %s17339_s10, 256, %s143_s20, [#allocation18]  }
  0x70   :  { %s16211_s26 = smov [#allocation20]   ;;  %s16212_s25 = smov [#allocation23]  }
  0x71   :  { %s164_s5 = sshll.u32 %s16211_s26, 4  ;;  %s186_s28 = sshll.u32 %s16212_s25, 4  ;;  %s165_s5 = int_to_ptr.vmem [resolvable:$true] %s164_s5  ;;  %s187_s28 = int_to_ptr.vmem [resolvable:$true] %s186_s28 }
  0x72   :  { %s15918_s0 = scalar_lea.hbm %s17341_s12, 64 }
  0x73   :  { %p15919_p12 = scmp.ne.s32.totalorder %s17341_s12, %s15918_s0  ;;  %p15922_p13 = scmp.lt.u32.totalorder %s15918_s0, %s17341_s12 }
  0x75   :  { %p15924_p0 = pnand %p15922_p13, %p15919_p12 }
  0x77   :  { %15927 = shalt.err (!%p15924_p0)
}
  0x78   :  { %s15928_s10 = scalar_lea.vmem %s165_s5, 64  ;;  %p15933_p2 = scmp.lt.s32.totalorder %s165_s5, %s165_s5 }
  0x79   :  { %p15929_p1 = scmp.ne.s32.totalorder %s165_s5, %s15928_s10  ;;  %p15934_p3 = scmp.lt.s32.totalorder %s15928_s10, %s15928_s10 }
  0x7b   :  { %p15935_p4 = por %p15934_p3, %p15933_p2 }
  0x7d   :  { %p15936_p5 = pnand %p15935_p4, %p15929_p1 }
  0x7f   :  { %15939 = shalt.err (!%p15936_p5)
}
  0x80   :  { %167 = dma.hbm_to_vmem [thread:$0]  %s17341_s12, 64, %s165_s5, [#allocation21]  }
  0x81   :  { %s15940_s2 = scalar_lea.hbm %s17343_s14, 64 }
  0x82   :  { %p15941_p6 = scmp.ne.s32.totalorder %s17343_s14, %s15940_s2  ;;  %p15944_p7 = scmp.lt.u32.totalorder %s15940_s2, %s17343_s14 }
  0x84   :  { %p15946_p8 = pnand %p15944_p7, %p15941_p6 }
  0x86   :  { %15949 = shalt.err (!%p15946_p8)
}
  0x87   :  { %s15950_s0 = scalar_lea.vmem %s187_s28, 64  ;;  %p15955_p10 = scmp.lt.s32.totalorder %s187_s28, %s187_s28 }
  0x88   :  { %p15951_p9 = scmp.ne.s32.totalorder %s187_s28, %s15950_s0  ;;  %p15956_p11 = scmp.lt.s32.totalorder %s15950_s0, %s15950_s0 }
  0x8a   :  { %p15957_p12 = por %p15956_p11, %p15955_p10 }
  0x8c   :  { %p15958_p13 = pnand %p15957_p12, %p15951_p9 }
  0x8e   :  { %15961 = shalt.err (!%p15958_p13)
}
  0x8f   :  { %189 = dma.hbm_to_vmem [thread:$0]  %s17343_s14, 64, %s187_s28, [#allocation24]  }
  0x90   :  { %s16213_s18 = smov [#allocation2]   ;;  %s16214_s21 = smov [#allocation7]  }
  0x91   :  { %s42_s19 = sshll.u32 %s16213_s18, 4  ;;  %s64_s1 = sshll.u32 %s16214_s21, 4  ;;  %s43_s19 = int_to_ptr.vmem [resolvable:$true] %s42_s19  ;;  %s65_s1 = int_to_ptr.vmem [resolvable:$true] %s64_s1 }
  0x92   :  { %s17367_s24 = sld [smem:[#allocation39_spill]] }
  0x98   :  { %s15962_s3 = scalar_lea.hbm %s17367_s24, 128 }
  0x99   :  { %p15963_p0 = scmp.ne.s32.totalorder %s17367_s24, %s15962_s3  ;;  %p15966_p1 = scmp.lt.u32.totalorder %s15962_s3, %s17367_s24 }
  0x9b   :  { %p15968_p2 = pnand %p15966_p1, %p15963_p0 }
  0x9d   :  { %15971 = shalt.err (!%p15968_p2)
}
  0x9e   :  { %s15972_s14 = scalar_lea.vmem %s43_s19, 128  ;;  %p15977_p4 = scmp.lt.s32.totalorder %s43_s19, %s43_s19 }
  0x9f   :  { %p15973_p3 = scmp.ne.s32.totalorder %s43_s19, %s15972_s14  ;;  %p15978_p5 = scmp.lt.s32.totalorder %s15972_s14, %s15972_s14 }
  0xa1   :  { %p15979_p6 = por %p15978_p5, %p15977_p4 }
  0xa3   :  { %p15980_p7 = pnand %p15979_p6, %p15973_p3 }
  0xa5   :  { %15983 = shalt.err (!%p15980_p7)
}
  0xa6   :  { %45 = dma.hbm_to_vmem [thread:$0]  %s17367_s24, 128, %s43_s19, [#allocation3]  }
  0xa7   :  { %s17368_s12 = sld [smem:[#allocation41_spill]] }
  0xad   :  { %s15984_s5 = scalar_lea.hbm %s17368_s12, 64 }
  0xae   :  { %p15985_p8 = scmp.ne.s32.totalorder %s17368_s12, %s15984_s5  ;;  %p15988_p9 = scmp.lt.u32.totalorder %s15984_s5, %s17368_s12 }
  0xb0   :  { %p15990_p10 = pnand %p15988_p9, %p15985_p8 }
  0xb2   :  { %15993 = shalt.err (!%p15990_p10)
}
  0xb3   :  { %s15994_s3 = scalar_lea.vmem %s65_s1, 64  ;;  %p15999_p12 = scmp.lt.s32.totalorder %s65_s1, %s65_s1 }
  0xb4   :  { %p15995_p11 = scmp.ne.s32.totalorder %s65_s1, %s15994_s3  ;;  %p16000_p13 = scmp.lt.s32.totalorder %s15994_s3, %s15994_s3 }
  0xb6   :  { %p16001_p0 = por %p16000_p13, %p15999_p12 }
  0xb8   :  { %p16002_p1 = pnand %p16001_p0, %p15995_p11 }
  0xba   :  { %16005 = shalt.err (!%p16002_p1)
}
  0xbb   :  { %67 = dma.hbm_to_vmem [thread:$0]  %s17368_s12, 64, %s65_s1, [#allocation6]  }
  0xbc   :  { %s16215_s8 = smov [#allocation10]   ;;  %s16216_s26 = smov [#allocation13]  }
  0xbd   :  { %s86_s2 = sshll.u32 %s16215_s8, 4  ;;  %s108_s25 = sshll.u32 %s16216_s26, 4  ;;  %s87_s2 = int_to_ptr.vmem [resolvable:$true] %s86_s2  ;;  %s109_s25 = int_to_ptr.vmem [resolvable:$true] %s108_s25 }
  0xbe   :  { %s17369_s4 = sld [smem:[#allocation43_spill]] }
  0xc4   :  { %s16006_s22 = scalar_lea.hbm %s17369_s4, 64 }
  0xc5   :  { %p16007_p2 = scmp.ne.s32.totalorder %s17369_s4, %s16006_s22  ;;  %p16010_p3 = scmp.lt.u32.totalorder %s16006_s22, %s17369_s4 }
  0xc7   :  { %p16012_p4 = pnand %p16010_p3, %p16007_p2 }
  0xc9   :  { %16015 = shalt.err (!%p16012_p4)
}
  0xca   :  { %s16016_s1 = scalar_lea.vmem %s87_s2, 64  ;;  %p16021_p6 = scmp.lt.s32.totalorder %s87_s2, %s87_s2 }
  0xcb   :  { %p16017_p5 = scmp.ne.s32.totalorder %s87_s2, %s16016_s1  ;;  %p16022_p7 = scmp.lt.s32.totalorder %s16016_s1, %s16016_s1 }
  0xcd   :  { %p16023_p8 = por %p16022_p7, %p16021_p6 }
  0xcf   :  { %p16024_p9 = pnand %p16023_p8, %p16017_p5 }
  0xd1   :  { %16027 = shalt.err (!%p16024_p9)
}
  0xd2   :  { %89 = dma.hbm_to_vmem [thread:$0]  %s17369_s4, 64, %s87_s2, [#allocation9]  }
  0xd3   :  { %s16028_s19 = scalar_lea.hbm %s17335_s6, 256 }
  0xd4   :  { %p16029_p10 = scmp.ne.s32.totalorder %s17335_s6, %s16028_s19  ;;  %p16032_p11 = scmp.lt.u32.totalorder %s16028_s19, %s17335_s6 }
  0xd6   :  { %p16034_p12 = pnand %p16032_p11, %p16029_p10 }
  0xd8   :  { %16037 = shalt.err (!%p16034_p12)
}
  0xd9   :  { %s16038_s28 = scalar_lea.vmem %s109_s25, 256  ;;  %p16043_p0 = scmp.lt.s32.totalorder %s109_s25, %s109_s25 }
  0xda   :  { %p16039_p13 = scmp.ne.s32.totalorder %s109_s25, %s16038_s28  ;;  %p16044_p1 = scmp.lt.s32.totalorder %s16038_s28, %s16038_s28 }
  0xdc   :  { %p16045_p2 = por %p16044_p1, %p16043_p0 }
  0xde   :  { %p16046_p3 = pnand %p16045_p2, %p16039_p13 }
  0xe0   :  { %16049 = shalt.err (!%p16046_p3)
}
  0xe1   :  { %111 = dma.hbm_to_vmem [thread:$0]  %s17335_s6, 256, %s109_s25, [#allocation12]  }
  0xe2   :  { %s16217_s22 = smov [#allocation16]   ;;  %s16218_s5 = smov [#allocation19]  }
  0xe3   :  { %s129_s0 = sshll.u32 %s16217_s22, 4  ;;  %s151_s18 = sshll.u32 %s16218_s5, 4  ;;  %s130_s0 = int_to_ptr.vmem [resolvable:$true] %s129_s0  ;;  %s152_s18 = int_to_ptr.vmem [resolvable:$true] %s151_s18 }
  0xe4   :  { %s16050_s12 = scalar_lea.hbm %s17338_s9, 4096 }
  0xe5   :  { %p16051_p4 = scmp.ne.s32.totalorder %s17338_s9, %s16050_s12  ;;  %p16054_p5 = scmp.lt.u32.totalorder %s16050_s12, %s17338_s9 }
  0xe7   :  { %p16056_p6 = pnand %p16054_p5, %p16051_p4 }
  0xe9   :  { %16059 = shalt.err (!%p16056_p6)
}
  0xea   :  { %s16060_s6 = scalar_lea.vmem %s130_s0, 4096  ;;  %p16065_p8 = scmp.lt.s32.totalorder %s130_s0, %s130_s0 }
  0xeb   :  { %p16061_p7 = scmp.ne.s32.totalorder %s130_s0, %s16060_s6  ;;  %p16066_p9 = scmp.lt.s32.totalorder %s16060_s6, %s16060_s6 }
  0xed   :  { %p16067_p10 = por %p16066_p9, %p16065_p8 }
  0xef   :  { %p16068_p11 = pnand %p16067_p10, %p16061_p7 }
  0xf1   :  { %16071 = shalt.err (!%p16068_p11)
}
  0xf2   :  { %135 = dma.hbm_to_vmem [thread:$0]  %s17338_s9, 4096, %s130_s0, [#allocation15], %s16207_s23, %s16207_s23, %s16208_s27  }
  0xf3   :  { %s16072_s14 = scalar_lea.hbm %s17340_s11, 65536 }
  0xf4   :  { %p16073_p12 = scmp.ne.s32.totalorder %s17340_s11, %s16072_s14  ;;  %p16076_p13 = scmp.lt.u32.totalorder %s16072_s14, %s17340_s11 }
  0xf6   :  { %p16078_p0 = pnand %p16076_p13, %p16073_p12 }
  0xf8   :  { %16081 = shalt.err (!%p16078_p0)
}
  0xf9   :  { %s16082_s5 = scalar_lea.vmem %s152_s18, 65536  ;;  %p16087_p2 = scmp.lt.s32.totalorder %s152_s18, %s152_s18 }
  0xfa   :  { %p16083_p1 = scmp.ne.s32.totalorder %s152_s18, %s16082_s5  ;;  %p16088_p3 = scmp.lt.s32.totalorder %s16082_s5, %s16082_s5 }
  0xfc   :  { %p16089_p4 = por %p16088_p3, %p16087_p2 }
  0xfe   :  { %p16090_p5 = pnand %p16089_p4, %p16083_p1 }
 0x100   :  { %16093 = shalt.err (!%p16090_p5)
}
 0x101   :  { %157 = dma.hbm_to_vmem [thread:$0]  %s17340_s11, 65536, %s152_s18, [#allocation18], %s16203_s29, %s16203_s29, %s16204_s30  }
 0x102   :  { %s16219_s27 = smov [#allocation22]   ;;  %s16220_s21 = smov [#allocation25]  }
 0x103   :  { %s173_s0 = sshll.u32 %s16219_s27, 4  ;;  %s198_s1 = sshll.u32 %s16220_s21, 4  ;;  %s174_s0 = int_to_ptr.vmem [resolvable:$true] %s173_s0  ;;  %s199_s1 = int_to_ptr.vmem [resolvable:$true] %s198_s1 }
 0x104   :  { %s16094_s20 = scalar_lea.hbm %s17342_s13, 16384 }
 0x105   :  { %p16095_p6 = scmp.ne.s32.totalorder %s17342_s13, %s16094_s20  ;;  %p16098_p7 = scmp.lt.u32.totalorder %s16094_s20, %s17342_s13 }
 0x107   :  { %p16100_p8 = pnand %p16098_p7, %p16095_p6 }
 0x109   :  { %16103 = shalt.err (!%p16100_p8)
}
 0x10a   :  { %s16104_s11 = scalar_lea.vmem %s174_s0, 16384  ;;  %p16109_p10 = scmp.lt.s32.totalorder %s174_s0, %s174_s0 }
 0x10b   :  { %p16105_p9 = scmp.ne.s32.totalorder %s174_s0, %s16104_s11  ;;  %p16110_p11 = scmp.lt.s32.totalorder %s16104_s11, %s16104_s11 }
 0x10d   :  { %p16111_p12 = por %p16110_p11, %p16109_p10 }
 0x10f   :  { %p16112_p13 = pnand %p16111_p12, %p16105_p9 }
 0x111   :  { %16115 = shalt.err (!%p16112_p13)
}
 0x112   :  { %179 = dma.hbm_to_vmem [thread:$0]  %s17342_s13, 16384, %s174_s0, [#allocation21], %s16203_s29, %s16203_s29, %s16204_s30  }
 0x113   :  { %s16116_s14 = scalar_lea.hbm %s17345_s16, 16 }
 0x114   :  { %p16117_p0 = scmp.ne.s32.totalorder %s17345_s16, %s16116_s14  ;;  %p16120_p1 = scmp.lt.u32.totalorder %s16116_s14, %s17345_s16 }
 0x116   :  { %p16122_p2 = pnand %p16120_p1, %p16117_p0 }
 0x118   :  { %16125 = shalt.err (!%p16122_p2)
}
 0x119   :  { %s16126_s5 = scalar_lea.vmem %s199_s1, 16  ;;  %s16130_s9 = scalar_lea.vmem %s199_s1, 32 }
 0x11a   :  { %p16127_p3 = scmp.ne.s32.totalorder %s199_s1, %s16126_s5  ;;  %p16131_p4 = scmp.lt.s32.totalorder %s199_s1, %s199_s1 }
 0x11b   :  { %p16132_p5 = scmp.lt.s32.totalorder %s16130_s9, %s16126_s5 }
 0x11d   :  { %p16133_p6 = por %p16132_p5, %p16131_p4 }
 0x11f   :  { %p16134_p7 = pnand %p16133_p6, %p16127_p3 }
 0x121   :  { %16137 = shalt.err (!%p16134_p7)
}
 0x122   :  { %201 = dma.hbm_to_vmem [thread:$0]  %s17345_s16, 16, %s199_s1, [#allocation24]  }
 0x123   :  { %16182 = dma.done.wait [#allocation3], 128  }
 0x124   :  { %16183 = vsyncadd [#allocation3], 4294967168 }
 0x125   :  { %16184 = dma.done.wait [#allocation6], 2112  }
 0x126   :  { %16185 = vsyncadd [#allocation6], 4294965184 }
 0x127   :  { %16186 = dma.done.wait [#allocation9], 16448  }
 0x128   :  { %16187 = vsyncadd [#allocation9], 4294950848 }
 0x129   :  { %16188 = dma.done.wait [#allocation12], 65792  }
 0x12a   :  { %16189 = vsyncadd [#allocation12], 4294901504 }
 0x12b   :  { %16190 = dma.done.wait [#allocation15], 4112  }
 0x12c   :  { %16191 = vsyncadd [#allocation15], 4294963184 }
 0x12d   :  { %16192 = dma.done.wait [#allocation18], 65792  }
 0x12e   :  { %16193 = vsyncadd [#allocation18], 4294901504 }
 0x12f   :  { %16194 = dma.done.wait [#allocation21], 16448  }
 0x130   :  { %16195 = vsyncadd [#allocation21], 4294950848 }
 0x131   :  { %16196 = dma.done.wait [#allocation24], 80  }
 0x132   :  { %16197 = vsyncadd [#allocation24], 4294967216  ;;  %v16221_v0 = vmov 0   ;;  %v14467_v1 = vld [vmem:[#allocation5 + $0x4] ss:$16 sps:$4 sm:$0xff]   ;;  %v250_v14 = vld [vmem:[#allocation2] sm:$0xff] }
 0x133   :  { %406 = vmatprep.mubr.bf16.mxu0 %v16221_v0  ;;  %447 = vmatprep.mubr.bf16.mxu1 %v16221_v0  ;;  %v14469_v2 = vld [vmem:[#allocation5] ss:$16 sps:$4 sm:$0xff]   ;;  %v14470_v3 = vld [vmem:[#allocation5 + $0x24] ss:$16 sps:$4 sm:$0xff]   ;;  %v14479_v7 = vld [vmem:[#allocation5 + $0xc] ss:$16 sps:$4 sm:$0xff]   ;;  %v251_v17 = vpack.c.bf16 %v250_v14, %v250_v14 }
 0x134   :  { %374 = vmatprep.subr.bf16.mxu0 %v14467_v1  ;;  %v14472_v4 = vld [vmem:[#allocation5 + $0x20] ss:$16 sps:$4 sm:$0xff]   ;;  %v14473_v5 = vld [vmem:[#allocation5 + $0x44] ss:$16 sps:$4 sm:$0xff]   ;;  %v14481_v8 = vld [vmem:[#allocation5 + $0x8] ss:$16 sps:$4 sm:$0xff]   ;;  %415 = vmatprep.subr.bf16.mxu1 %v14479_v7 }
 0x135   :  { %375 = vmatpush1.bf16.msra.mxu0 %v14469_v2  ;;  %v14475_v6 = vld [vmem:[#allocation5 + $0x40] ss:$16 sps:$4 sm:$0xff]   ;;  %v14482_v9 = vld [vmem:[#allocation5 + $0x2c] ss:$16 sps:$4 sm:$0xff]   ;;  %v14476_v10 = vld [vmem:[#allocation5 + $0x64] ss:$16 sps:$4 sm:$0xff]   ;;  %416 = vmatpush1.bf16.msra.mxu1 %v14481_v8 }
 0x136   :  { %376 = vmatprep.subr.bf16.mxu0 %v14470_v3  ;;  %v14484_v11 = vld [vmem:[#allocation5 + $0x28] ss:$16 sps:$4 sm:$0xff]   ;;  %v14478_v12 = vld [vmem:[#allocation5 + $0x60] ss:$16 sps:$4 sm:$0xff]   ;;  %417 = vmatprep.subr.bf16.mxu1 %v14482_v9  ;;  %v14485_v13 = vld [vmem:[#allocation5 + $0x4c] ss:$16 sps:$4 sm:$0xff]  }
 0x137   :  { %v14493_v15 = vld [vmem:[#allocation8 + $0x4] ss:$16 sps:$4 sm:$0xff]   ;;  %v14488_v18 = vld [vmem:[#allocation5 + $0x6c] ss:$16 sps:$4 sm:$0xff]   ;;  %vm370_vm0 = vcmask 523264   ;;  %vm6898_vm1 = vcmask 261120  }
 0x138   :  { %v14487_v16 = vld [vmem:[#allocation5 + $0x48] ss:$16 sps:$4 sm:$0xff]   ;;  %v14491_v19 = vld [vmem:[#allocation8] ss:$16 sps:$4 sm:$0xff]   ;;  %v14496_v22 = vld [vmem:[#allocation8 + $0xc] ss:$16 sps:$4 sm:$0xff]  }
 0x139   :  { %377 = vmatpush1.bf16.msra.mxu0 %v14472_v4  ;;  %418 = vmatpush1.bf16.msra.mxu1 %v14484_v11  ;;  %v14499_v20 = vld [vmem:[#allocation8 + $0x24] ss:$16 sps:$4 sm:$0xff]   ;;  %v14497_v23 = vld [vmem:[#allocation8 + $0x20] ss:$16 sps:$4 sm:$0xff]   ;;  %v14494_v25 = vld [vmem:[#allocation8 + $0x8] ss:$16 sps:$4 sm:$0xff]  }
 0x13a   :  { %378 = vmatprep.subr.bf16.mxu0 %v14473_v5  ;;  %419 = vmatprep.subr.bf16.mxu1 %v14485_v13  ;;  %v14490_v21 = vld [vmem:[#allocation5 + $0x68] ss:$16 sps:$4 sm:$0xff]   ;;  %v14502_v26 = vld [vmem:[#allocation8 + $0x2c] ss:$16 sps:$4 sm:$0xff]   ;;  %v14503_v27 = vld [vmem:[#allocation8 + $0x40] ss:$16 sps:$4 sm:$0xff]  }
 0x13b   :  { %v14505_v24 = vld [vmem:[#allocation8 + $0x44] ss:$16 sps:$4 sm:$0xff]   ;;  %v14500_v29 = vld [vmem:[#allocation8 + $0x28] ss:$16 sps:$4 sm:$0xff]   ;;  %v14508_v30 = vld [vmem:[#allocation8 + $0x4c] ss:$16 sps:$4 sm:$0xff]  }
 0x13c   :  { %v14511_v28 = vld [vmem:[#allocation8 + $0x64] ss:$16 sps:$4 sm:$0xff]   ;;  %v14509_v31 = vld [vmem:[#allocation8 + $0x60] ss:$16 sps:$4 sm:$0xff]   ;;  %v14506_v33 = vld [vmem:[#allocation8 + $0x48] ss:$16 sps:$4 sm:$0xff]  }
 0x13d   :  { %379 = vmatpush1.bf16.msra.mxu0 %v14475_v6  ;;  %420 = vmatpush1.bf16.msra.mxu1 %v14487_v16  ;;  %v14517_v32 = vld [vmem:[#allocation8 + $0x84] ss:$16 sps:$4 sm:$0xff]   ;;  %v14514_v34 = vld [vmem:[#allocation8 + $0x6c] ss:$16 sps:$4 sm:$0xff]   ;;  %v14515_v35 = vld [vmem:[#allocation8 + $0x80] ss:$16 sps:$4 sm:$0xff]  }
 0x13e   :  { %380 = vmatprep.subr.bf16.mxu0 %v14476_v10  ;;  %421 = vmatprep.subr.bf16.mxu1 %v14488_v18  ;;  %v14523_v36 = vld [vmem:[#allocation8 + $0xa4] ss:$16 sps:$4 sm:$0xff]   ;;  %v14512_v37 = vld [vmem:[#allocation8 + $0x68] ss:$16 sps:$4 sm:$0xff]   ;;  %v14520_v38 = vld [vmem:[#allocation8 + $0x8c] ss:$16 sps:$4 sm:$0xff]  }
 0x13f   :  { %v14521_v39 = vld [vmem:[#allocation8 + $0xa0] ss:$16 sps:$4 sm:$0xff]   ;;  %v14529_v40 = vld [vmem:[#allocation8 + $0xc4] ss:$16 sps:$4 sm:$0xff]   ;;  %v14518_v41 = vld [vmem:[#allocation8 + $0x88] ss:$16 sps:$4 sm:$0xff]  }
 0x140   :  { %v14526_v42 = vld [vmem:[#allocation8 + $0xac] ss:$16 sps:$4 sm:$0xff]   ;;  %v14527_v43 = vld [vmem:[#allocation8 + $0xc0] ss:$16 sps:$4 sm:$0xff]   ;;  %v14535_v44 = vld [vmem:[#allocation8 + $0xe4] ss:$16 sps:$4 sm:$0xff]  }
 0x141   :  { %381 = vmatpush1.bf16.msra.mxu0 %v14478_v12  ;;  %422 = vmatpush1.bf16.msra.mxu1 %v14490_v21  ;;  %v14524_v45 = vld [vmem:[#allocation8 + $0xa8] ss:$16 sps:$4 sm:$0xff]   ;;  %v14532_v46 = vld [vmem:[#allocation8 + $0xcc] ss:$16 sps:$4 sm:$0xff]   ;;  %v14533_v47 = vld [vmem:[#allocation8 + $0xe0] ss:$16 sps:$4 sm:$0xff]  }
 0x142   :  { %1254 = vmatprep.subr.bf16.mxu0 %v14493_v15  ;;  %1336 = vmatprep.subr.bf16.mxu1 %v14496_v22  ;;  %v14541_v48 = vld [vmem:[#allocation8 + $0x104] ss:$16 sps:$4 sm:$0xff]   ;;  %v14530_v49 = vld [vmem:[#allocation8 + $0xc8] ss:$16 sps:$4 sm:$0xff]   ;;  %v14538_v50 = vld [vmem:[#allocation8 + $0xec] ss:$16 sps:$4 sm:$0xff]   ;;  %v270_v22 = vlaneseq }
 0x143   :  { %v14536_v51 = vld [vmem:[#allocation8 + $0xe8] ss:$16 sps:$4 sm:$0xff]   ;;  %v14539_v52 = vld [vmem:[#allocation8 + $0x100] ss:$16 sps:$4 sm:$0xff]   ;;  %v14544_v53 = vld [vmem:[#allocation8 + $0x10c] ss:$16 sps:$4 sm:$0xff]  }
 0x144   :  { %12559 = vmatmul.mubr.msk.bf16.vlgmr.msra.gmra.mrb[0].mxu0 %vm370_vm0, %v251_v17  ;;  %12560 = vmatmul.mubr.msk.bf16.vlgmr.msra.gmra.mrb[0].mxu1 %vm370_vm0, %v251_v17  ;;  %v14547_v54 = vld [vmem:[#allocation8 + $0x124] ss:$16 sps:$4 sm:$0xff]   ;;  %v14545_v55 = vld [vmem:[#allocation8 + $0x120] ss:$16 sps:$4 sm:$0xff]   ;;  %v14542_v57 = vld [vmem:[#allocation8 + $0x108] ss:$16 sps:$4 sm:$0xff]  }
 0x145   :  { %1255 = vmatpush1.bf16.msra.mxu0 %v14491_v19  ;;  %1337 = vmatpush1.bf16.msra.mxu1 %v14494_v25  ;;  %v14553_v56 = vld [vmem:[#allocation8 + $0x144] ss:$16 sps:$4 sm:$0xff]   ;;  %v14550_v58 = vld [vmem:[#allocation8 + $0x12c] ss:$16 sps:$4 sm:$0xff]   ;;  %v14551_v59 = vld [vmem:[#allocation8 + $0x140] ss:$16 sps:$4 sm:$0xff]  }
 0x146   :  { %1256 = vmatprep.subr.bf16.mxu0 %v14499_v20  ;;  %1338 = vmatprep.subr.bf16.mxu1 %v14502_v26  ;;  %v14559_v60 = vld [vmem:[#allocation8 + $0x164] ss:$16 sps:$4 sm:$0xff]   ;;  %v14548_v61 = vld [vmem:[#allocation8 + $0x128] ss:$16 sps:$4 sm:$0xff]   ;;  %v14556_v62 = vld [vmem:[#allocation8 + $0x14c] ss:$16 sps:$4 sm:$0xff]  }
 0x147   :  { %v14557_v63 = vld [vmem:[#allocation8 + $0x160] ss:$16 sps:$4 sm:$0xff]   ;;  %v14565_v1 = vld [vmem:[#allocation8 + $0x184] ss:$16 sps:$4 sm:$0xff]   ;;  %v14554_v2 = vld [vmem:[#allocation8 + $0x148] ss:$16 sps:$4 sm:$0xff]  }
 0x148   :  { %v14562_v3 = vld [vmem:[#allocation8 + $0x16c] ss:$16 sps:$4 sm:$0xff]   ;;  %v14563_v4 = vld [vmem:[#allocation8 + $0x180] ss:$16 sps:$4 sm:$0xff]   ;;  %v14571_v5 = vld [vmem:[#allocation8 + $0x1a4] ss:$16 sps:$4 sm:$0xff]  }
 0x149   :  { %1257 = vmatpush1.bf16.msra.mxu0 %v14497_v23  ;;  %1339 = vmatpush1.bf16.msra.mxu1 %v14500_v29  ;;  %v14560_v6 = vld [vmem:[#allocation8 + $0x168] ss:$16 sps:$4 sm:$0xff]   ;;  %v14568_v7 = vld [vmem:[#allocation8 + $0x18c] ss:$16 sps:$4 sm:$0xff]   ;;  %v14569_v8 = vld [vmem:[#allocation8 + $0x1a0] ss:$16 sps:$4 sm:$0xff]  }
 0x14a   :  { %1258 = vmatprep.subr.bf16.mxu0 %v14505_v24  ;;  %1340 = vmatprep.subr.bf16.mxu1 %v14508_v30  ;;  %v14566_v9 = vld [vmem:[#allocation8 + $0x188] ss:$16 sps:$4 sm:$0xff]   ;;  %v14574_v10 = vld [vmem:[#allocation8 + $0x1ac] ss:$16 sps:$4 sm:$0xff]   ;;  %v14577_v12 = vld [vmem:[#allocation8 + $0x1c4] ss:$16 sps:$4 sm:$0xff]  }
 0x14b   :  { %v14572_v11 = vld [vmem:[#allocation8 + $0x1a8] ss:$16 sps:$4 sm:$0xff]   ;;  %v14580_v13 = vld [vmem:[#allocation8 + $0x1cc] ss:$16 sps:$4 sm:$0xff]   ;;  %v14575_v14 = vld [vmem:[#allocation8 + $0x1c0] ss:$16 sps:$4 sm:$0xff]  }
 0x14c   :  { %v14578_v15 = vld [vmem:[#allocation8 + $0x1c8] ss:$16 sps:$4 sm:$0xff]   ;;  %v14583_v16 = vld [vmem:[#allocation8 + $0x1e4] ss:$16 sps:$4 sm:$0xff]   ;;  %v14586_v17 = vld [vmem:[#allocation8 + $0x1ec] ss:$16 sps:$4 sm:$0xff]  }
 0x14d   :  { %1259 = vmatpush1.bf16.msra.mxu0 %v14503_v27  ;;  %1341 = vmatpush1.bf16.msra.mxu1 %v14506_v33  ;;  %v14581_v18 = vld [vmem:[#allocation8 + $0x1e0] ss:$16 sps:$4 sm:$0xff]   ;;  %v14584_v19 = vld [vmem:[#allocation8 + $0x1e8] ss:$16 sps:$4 sm:$0xff]   ;;  %v14589_v20 = vld [vmem:[#allocation8 + $0x204] ss:$16 sps:$4 sm:$0xff]  }
 0x14e   :  { %1260 = vmatprep.subr.bf16.mxu0 %v14511_v28  ;;  %1342 = vmatprep.subr.bf16.mxu1 %v14514_v34  ;;  %v14592_v21 = vld [vmem:[#allocation8 + $0x20c] ss:$16 sps:$4 sm:$0xff]   ;;  %v16535_v23 = vshrl.u32 %v270_v22, 7  ;;  %v14644_v22 = vld [vmem:[#allocation8 + $0x328] ss:$16 sps:$4 sm:$0xff]   ;;  %vm16223_vm2 = vmmov 0  }
 0x14f   :  { %v16540_v25 = vld [vmem:[#allocation7] sm:$0xf]  ;;  %vm12496_vm3 = vcmask 31744   ;;  %s16227_s8 = smov [#allocation27]  }
 0x150   :  { %v16538_v24 = vsub.s32 0, %v16535_v23  ;;  %v16543_v26 = vsub.s32 1, %v16535_v23  ;;  %v16550_v30 = vsub.s32 3, %v16535_v23  ;;  %s12519_s26 = sshll.u32 %s16227_s8, 4  ;;  %s12520_s26 = int_to_ptr.vmem [resolvable:$true] %s12519_s26 }
 0x151   :  { %1261 = vmatpush1.bf16.msra.mxu0 %v14509_v31  ;;  %1343 = vmatpush1.bf16.msra.mxu1 %v14512_v37 }
 0x152   :  { %1262 = vmatprep.subr.bf16.mxu0 %v14517_v32  ;;  %1344 = vmatprep.subr.bf16.mxu1 %v14520_v38  ;;  %v273_v27 = vrot.slane %v16540_v25, %v16538_v24  ;;  %v277_v28 = vrot.slane %v16540_v25, %v16543_v26  ;;  %v14587_v38 = vld [vmem:[#allocation8 + $0x200] ss:$16 sps:$4 sm:$0xff]  }
 0x155   :  { %1263 = vmatpush1.bf16.msra.mxu0 %v14515_v35  ;;  %1345 = vmatpush1.bf16.msra.mxu1 %v14518_v41  ;;  %v14595_v41 = vld [vmem:[#allocation8 + $0x224] ss:$16 sps:$4 sm:$0xff]  }
 0x156   :  { %1264 = vmatprep.subr.bf16.mxu0 %v14523_v36  ;;  %1346 = vmatprep.subr.bf16.mxu1 %v14526_v42  ;;  %v14598_v42 = vld [vmem:[#allocation8 + $0x22c] ss:$16 sps:$4 sm:$0xff]  }
 0x159   :  { %1265 = vmatpush1.bf16.msra.mxu0 %v14521_v39  ;;  %1347 = vmatpush1.bf16.msra.mxu1 %v14524_v45  ;;  %v14590_v39 = vld [vmem:[#allocation8 + $0x208] ss:$16 sps:$4 sm:$0xff]  }
 0x15a   :  { %1266 = vmatprep.subr.bf16.mxu0 %v14529_v40  ;;  %1348 = vmatprep.subr.bf16.mxu1 %v14532_v46  ;;  %v285_v40 = vrot.slane %v16540_v25, %v16550_v30 }
 0x15d   :  { %1267 = vmatpush1.bf16.msra.mxu0 %v14527_v43  ;;  %1349 = vmatpush1.bf16.msra.mxu1 %v14530_v49 }
 0x15e   :  { %1268 = vmatprep.subr.bf16.mxu0 %v14535_v44  ;;  %1350 = vmatprep.subr.bf16.mxu1 %v14538_v50 }
 0x161   :  { %1269 = vmatpush1.bf16.msra.mxu0 %v14533_v47  ;;  %1351 = vmatpush1.bf16.msra.mxu1 %v14536_v51  ;;  %v14593_v47 = vld [vmem:[#allocation8 + $0x220] ss:$16 sps:$4 sm:$0xff]   ;;  %v14601_v51 = vld [vmem:[#allocation8 + $0x244] ss:$16 sps:$4 sm:$0xff]  }
 0x162   :  { %1270 = vmatprep.subr.bf16.mxu0 %v14541_v48  ;;  %1352 = vmatprep.subr.bf16.mxu1 %v14544_v53  ;;  %v14596_v48 = vld [vmem:[#allocation8 + $0x228] ss:$16 sps:$4 sm:$0xff]  }
 0x165   :  { %1271 = vmatpush1.bf16.msra.mxu0 %v14539_v52  ;;  %1353 = vmatpush1.bf16.msra.mxu1 %v14542_v57  ;;  %v14604_v52 = vld [vmem:[#allocation8 + $0x24c] ss:$16 sps:$4 sm:$0xff]  }
 0x166   :  { %1272 = vmatprep.subr.bf16.mxu0 %v14547_v54  ;;  %1354 = vmatprep.subr.bf16.mxu1 %v14550_v58  ;;  %v14607_v58 = vld [vmem:[#allocation8 + $0x264] ss:$16 sps:$4 sm:$0xff]  }
 0x169   :  { %1273 = vmatpush1.bf16.msra.mxu0 %v14545_v55  ;;  %1355 = vmatpush1.bf16.msra.mxu1 %v14548_v61  ;;  %v14599_v55 = vld [vmem:[#allocation8 + $0x240] ss:$16 sps:$4 sm:$0xff]   ;;  %v14608_v61 = vld [vmem:[#allocation8 + $0x268] ss:$16 sps:$4 sm:$0xff]  }
 0x16a   :  { %1274 = vmatprep.subr.bf16.mxu0 %v14553_v56  ;;  %1356 = vmatprep.subr.bf16.mxu1 %v14556_v62  ;;  %v14602_v56 = vld [vmem:[#allocation8 + $0x248] ss:$16 sps:$4 sm:$0xff]   ;;  %v14613_v62 = vld [vmem:[#allocation8 + $0x284] ss:$16 sps:$4 sm:$0xff]  }
 0x16d   :  { %1275 = vmatpush1.bf16.msra.mxu0 %v14551_v59  ;;  %1357 = vmatpush1.bf16.msra.mxu1 %v14554_v2  ;;  %v14610_v59 = vld [vmem:[#allocation8 + $0x26c] ss:$16 sps:$4 sm:$0xff]   ;;  %v14614_v2 = vld [vmem:[#allocation8 + $0x288] ss:$16 sps:$4 sm:$0xff]  }
 0x16e   :  { %1276 = vmatprep.subr.bf16.mxu0 %v14559_v60  ;;  %1358 = vmatprep.subr.bf16.mxu1 %v14562_v3  ;;  %v14605_v60 = vld [vmem:[#allocation8 + $0x260] ss:$16 sps:$4 sm:$0xff]   ;;  %v14619_v3 = vld [vmem:[#allocation8 + $0x2a4] ss:$16 sps:$4 sm:$0xff]  }
 0x171   :  { %1277 = vmatpush1.bf16.msra.mxu0 %v14557_v63  ;;  %1359 = vmatpush1.bf16.msra.mxu1 %v14560_v6  ;;  %v14616_v63 = vld [vmem:[#allocation8 + $0x28c] ss:$16 sps:$4 sm:$0xff]   ;;  %v14620_v6 = vld [vmem:[#allocation8 + $0x2a8] ss:$16 sps:$4 sm:$0xff]  }
 0x172   :  { %1278 = vmatprep.subr.bf16.mxu0 %v14565_v1  ;;  %1360 = vmatprep.subr.bf16.mxu1 %v14568_v7  ;;  %v14611_v1 = vld [vmem:[#allocation8 + $0x280] ss:$16 sps:$4 sm:$0xff]   ;;  %v14625_v7 = vld [vmem:[#allocation8 + $0x2c4] ss:$16 sps:$4 sm:$0xff]  }
 0x175   :  { %1279 = vmatpush1.bf16.msra.mxu0 %v14563_v4  ;;  %1361 = vmatpush1.bf16.msra.mxu1 %v14566_v9  ;;  %v14622_v4 = vld [vmem:[#allocation8 + $0x2ac] ss:$16 sps:$4 sm:$0xff]   ;;  %v14623_v9 = vld [vmem:[#allocation8 + $0x2c0] ss:$16 sps:$4 sm:$0xff]  }
 0x176   :  { %1280 = vmatprep.subr.bf16.mxu0 %v14571_v5  ;;  %1362 = vmatprep.subr.bf16.mxu1 %v14574_v10  ;;  %v14617_v5 = vld [vmem:[#allocation8 + $0x2a0] ss:$16 sps:$4 sm:$0xff]   ;;  %v14626_v10 = vld [vmem:[#allocation8 + $0x2c8] ss:$16 sps:$4 sm:$0xff]  }
 0x179   :  { %1281 = vmatpush1.bf16.msra.mxu0 %v14569_v8  ;;  %1363 = vmatpush1.bf16.msra.mxu1 %v14572_v11  ;;  %v14628_v8 = vld [vmem:[#allocation8 + $0x2cc] ss:$16 sps:$4 sm:$0xff]   ;;  %v14631_v11 = vld [vmem:[#allocation8 + $0x2e4] ss:$16 sps:$4 sm:$0xff]  }
 0x17a   :  { %1282 = vmatprep.subr.bf16.mxu0 %v14577_v12  ;;  %1364 = vmatprep.subr.bf16.mxu1 %v14580_v13  ;;  %v14634_v12 = vld [vmem:[#allocation8 + $0x2ec] ss:$16 sps:$4 sm:$0xff]   ;;  %v14629_v13 = vld [vmem:[#allocation8 + $0x2e0] ss:$16 sps:$4 sm:$0xff]  }
 0x17d   :  { %1283 = vmatpush1.bf16.msra.mxu0 %v14575_v14  ;;  %1365 = vmatpush1.bf16.msra.mxu1 %v14578_v15  ;;  %v14632_v14 = vld [vmem:[#allocation8 + $0x2e8] ss:$16 sps:$4 sm:$0xff]   ;;  %v14637_v15 = vld [vmem:[#allocation8 + $0x304] ss:$16 sps:$4 sm:$0xff]  }
 0x17e   :  { %1284 = vmatprep.subr.bf16.mxu0 %v14583_v16  ;;  %1366 = vmatprep.subr.bf16.mxu1 %v14586_v17  ;;  %v14640_v16 = vld [vmem:[#allocation8 + $0x30c] ss:$16 sps:$4 sm:$0xff]   ;;  %v14635_v17 = vld [vmem:[#allocation8 + $0x300] ss:$16 sps:$4 sm:$0xff]  }
 0x181   :  { %1285 = vmatpush1.bf16.msra.mxu0 %v14581_v18  ;;  %1367 = vmatpush1.bf16.msra.mxu1 %v14584_v19  ;;  %v14638_v18 = vld [vmem:[#allocation8 + $0x308] ss:$16 sps:$4 sm:$0xff]   ;;  %v14643_v19 = vld [vmem:[#allocation8 + $0x324] ss:$16 sps:$4 sm:$0xff]  }
 0x182   :  { %1295 = vmatprep.subr.bf16.mxu0 %v14589_v20  ;;  %1377 = vmatprep.subr.bf16.mxu1 %v14592_v21  ;;  %v14646_v20 = vld [vmem:[#allocation8 + $0x32c] ss:$16 sps:$4 sm:$0xff]   ;;  %v14641_v21 = vld [vmem:[#allocation8 + $0x320] ss:$16 sps:$4 sm:$0xff]  }
 0x217   :  { %v408_v29 = vpop.f32.mrb[0].mxu0  ;;  %v16554_v44 = vpop.f32.mrb[0].mxu1 }
 0x218   :  { %v409_v31 = vadd.f32 %v408_v29, %v273_v27  ;;  %v410_v32 = vpop.f32.mrb[1].mxu0  ;;  %v451_v46 = vpop.f32.mrb[1].mxu1  ;;  %v14649_v27 = vld [vmem:[#allocation8 + $0x344] ss:$16 sps:$4 sm:$0xff]   ;;  %v14647_v29 = vld [vmem:[#allocation8 + $0x340] ss:$16 sps:$4 sm:$0xff]  }
 0x219   :  { %v411_v33 = vadd.f32 %v410_v32, %v277_v28  ;;  %v412_v34 = vpop.f32.mrb[2].mxu0  ;;  %v452_v49 = vadd.f32 %v451_v46, %v285_v40  ;;  %v453_v50 = vpop.f32.mrb[2].mxu1  ;;  %v14652_v28 = vld [vmem:[#allocation8 + $0x34c] ss:$16 sps:$4 sm:$0xff]   ;;  %v14655_v32 = vld [vmem:[#allocation8 + $0x364] ss:$16 sps:$4 sm:$0xff]  }
 0x21a   :  { %v456_v35 = vmax.f32 %v409_v31, 0.0  ;;  %v413_v36 = vpop.f32.mrb[3].mxu0  ;;  %v454_v53 = vpop.f32.mrb[3].mxu1  ;;  %v14650_v31 = vld [vmem:[#allocation8 + $0x348] ss:$16 sps:$4 sm:$0xff]  }
 0x21b   :  { %v457_v37 = vmax.f32 %v411_v33, 0.0  ;;  %v459_v54 = vmax.f32 %v452_v49, 0.0  ;;  %v14658_v33 = vld [vmem:[#allocation8 + $0x36c] ss:$16 sps:$4 sm:$0xff]   ;;  %v14653_v34 = vld [vmem:[#allocation8 + $0x360] ss:$16 sps:$4 sm:$0xff]  }
 0x21c   :  { %v460_v45 = vpack.c.bf16 %v456_v35, %v456_v35  ;;  %v14656_v35 = vld [vmem:[#allocation8 + $0x368] ss:$16 sps:$4 sm:$0xff]   ;;  %v14661_v36 = vld [vmem:[#allocation8 + $0x384] ss:$16 sps:$4 sm:$0xff]   ;;  %v14671_v49 = vld [vmem:[#allocation8 + $0x3c0] ss:$16 sps:$4 sm:$0xff]  }
 0x21d   :  { %v461_v43 = vpack.c.bf16 %v457_v37, %v457_v37  ;;  %v463_v57 = vpack.c.bf16 %v459_v54, %v459_v54  ;;  %v14664_v37 = vld [vmem:[#allocation8 + $0x38c] ss:$16 sps:$4 sm:$0xff]   ;;  %v14667_v40 = vld [vmem:[#allocation8 + $0x3a4] ss:$16 sps:$4 sm:$0xff]   ;;  %v14674_v50 = vld [vmem:[#allocation8 + $0x3c8] ss:$16 sps:$4 sm:$0xff]  }
 0x21e   :  { %v14673_v46 = vld [vmem:[#allocation8 + $0x3c4] ss:$16 sps:$4 sm:$0xff]  }
 0x21f   :  { %1286 = vmatprep.mubr.bf16.mxu0 %v461_v43  ;;  %1368 = vmatprep.mubr.bf16.mxu1 %v461_v43  ;;  %v14665_v43 = vld [vmem:[#allocation8 + $0x3a0] ss:$16 sps:$4 sm:$0xff]   ;;  %v1426_v53 = vld [vmem:[#allocation11] sm:$0xff] }
 0x220   :  { %1287 = vmatmul.mubr.bf16.vlgmr.msra.gmra.mrb[4].mxu0 %v460_v45  ;;  %1369 = vmatmul.mubr.bf16.vlgmr.msra.gmra.mrb[4].mxu1 %v460_v45  ;;  %v14668_v45 = vld [vmem:[#allocation8 + $0x3a8] ss:$16 sps:$4 sm:$0xff]  }
 0x221   :  { %1296 = vmatpush1.bf16.msra.mxu0 %v14587_v38  ;;  %1378 = vmatpush1.bf16.msra.mxu1 %v14590_v39  ;;  %v14659_v38 = vld [vmem:[#allocation8 + $0x380] ss:$16 sps:$4 sm:$0xff]   ;;  %v14662_v39 = vld [vmem:[#allocation8 + $0x388] ss:$16 sps:$4 sm:$0xff]  }
 0x222   :  { %1297 = vmatprep.subr.bf16.mxu0 %v14595_v41  ;;  %1379 = vmatprep.subr.bf16.mxu1 %v14598_v42  ;;  %v14670_v41 = vld [vmem:[#allocation8 + $0x3ac] ss:$16 sps:$4 sm:$0xff]   ;;  %v16557_v42 = vsub.s32 2, %v16535_v23  ;;  %v1434_v54 = vld [vmem:[#allocation11 + $0x40] sm:$0xff] }
 0x223   :  { %1327 = vmatprep.mubr.bf16.mxu0 %v463_v57  ;;  %1409 = vmatprep.mubr.bf16.mxu1 %v463_v57 }
 0x225   :  { %1298 = vmatpush1.bf16.msra.mxu0 %v14593_v47  ;;  %1380 = vmatpush1.bf16.msra.mxu1 %v14596_v48  ;;  %v14676_v47 = vld [vmem:[#allocation8 + $0x3cc] ss:$16 sps:$4 sm:$0xff]   ;;  %v281_v48 = vrot.slane %v16540_v25, %v16557_v42  ;;  %v1442_v25 = vld [vmem:[#allocation11 + $0x80] sm:$0xff] }
 0x226   :  { %1299 = vmatprep.subr.bf16.mxu0 %v14601_v51  ;;  %1381 = vmatprep.subr.bf16.mxu1 %v14604_v52  ;;  %v14679_v51 = vld [vmem:[#allocation8 + $0x3e4] ss:$16 sps:$4 sm:$0xff]   ;;  %v14682_v52 = vld [vmem:[#allocation8 + $0x3ec] ss:$16 sps:$4 sm:$0xff]  }
 0x227   :  { %v450_v57 = vadd.f32 %v16554_v44, %v281_v48  ;;  %v1458_v44 = vld [vmem:[#allocation11 + $0x100] sm:$0xff] }
 0x229   :  { %1300 = vmatpush1.bf16.msra.mxu0 %v14599_v55  ;;  %1382 = vmatpush1.bf16.msra.mxu1 %v14602_v56  ;;  %v1427_v55 = vld [vmem:[#allocation11 + $0x8] sm:$0xff] }
 0x22a   :  { %1301 = vmatprep.subr.bf16.mxu0 %v14607_v58  ;;  %1383 = vmatprep.subr.bf16.mxu1 %v14610_v59  ;;  %v1435_v56 = vld [vmem:[#allocation11 + $0x48] sm:$0xff]  ;;  %v14680_v59 = vld [vmem:[#allocation8 + $0x3e8] ss:$16 sps:$4 sm:$0xff]  }
 0x22b   :  { %v14677_v58 = vld [vmem:[#allocation8 + $0x3e0] ss:$16 sps:$4 sm:$0xff]  }
 0x22d   :  { %1302 = vmatpush1.bf16.msra.mxu0 %v14605_v60  ;;  %1384 = vmatpush1.bf16.msra.mxu1 %v14608_v61  ;;  %v1450_v60 = vld [vmem:[#allocation11 + $0xc0] sm:$0xff]  ;;  %v1443_v61 = vld [vmem:[#allocation11 + $0x88] sm:$0xff] }
 0x22e   :  { %1303 = vmatprep.subr.bf16.mxu0 %v14613_v62  ;;  %1385 = vmatprep.subr.bf16.mxu1 %v14616_v63  ;;  %v1451_v62 = vld [vmem:[#allocation11 + $0xc8] sm:$0xff]  ;;  %v458_v63 = vmax.f32 %v450_v57, 0.0 }
 0x231   :  { %1304 = vmatpush1.bf16.msra.mxu0 %v14611_v1  ;;  %1386 = vmatpush1.bf16.msra.mxu1 %v14614_v2  ;;  %v12690_v1 = vcombine.high %v1426_v53, %v1434_v54  ;;  %v12692_v2 = vcombine.high %v1427_v55, %v1435_v56 }
 0x232   :  { %1305 = vmatprep.subr.bf16.mxu0 %v14619_v3  ;;  %1387 = vmatprep.subr.bf16.mxu1 %v14622_v4  ;;  %v12689_v3 = vcombine.low %v1426_v53, %v1434_v54  ;;  %v12691_v4 = vcombine.low %v1427_v55, %v1435_v56  ;;  %v1546_v53 = vld [vmem:[#allocation11 + $0x3c0] sm:$0xff]  ;;  %v1539_v54 = vld [vmem:[#allocation11 + $0x388] sm:$0xff] }
 0x233   :  { %v1547_v55 = vld [vmem:[#allocation11 + $0x3c8] sm:$0xff] }
 0x235   :  { %1306 = vmatpush1.bf16.msra.mxu0 %v14617_v5  ;;  %1388 = vmatpush1.bf16.msra.mxu1 %v14620_v6  ;;  %v1466_v5 = vld [vmem:[#allocation11 + $0x140] sm:$0xff]  ;;  %v1459_v6 = vld [vmem:[#allocation11 + $0x108] sm:$0xff] }
 0x236   :  { %1307 = vmatprep.subr.bf16.mxu0 %v14625_v7  ;;  %1389 = vmatprep.subr.bf16.mxu1 %v14628_v8  ;;  %v1467_v7 = vld [vmem:[#allocation11 + $0x148] sm:$0xff]  ;;  %v462_v8 = vpack.c.bf16 %v458_v63, %v458_v63 }
 0x239   :  { %1308 = vmatpush1.bf16.msra.mxu0 %v14623_v9  ;;  %1390 = vmatpush1.bf16.msra.mxu1 %v14626_v10  ;;  %v12706_v9 = vcombine.high %v1442_v25, %v1450_v60  ;;  %v12708_v10 = vcombine.high %v1443_v61, %v1451_v62 }
 0x23a   :  { %1309 = vmatprep.subr.bf16.mxu0 %v14631_v11  ;;  %1391 = vmatprep.subr.bf16.mxu1 %v14634_v12  ;;  %v12705_v11 = vcombine.low %v1442_v25, %v1450_v60  ;;  %v12707_v12 = vcombine.low %v1443_v61, %v1451_v62  ;;  %v1554_v25 = vld [vmem:[#allocation11 + $0x400] sm:$0xff]  ;;  %v1555_v61 = vld [vmem:[#allocation11 + $0x408] sm:$0xff] }
 0x23b   :  { %v1562_v60 = vld [vmem:[#allocation11 + $0x440] sm:$0xff]  ;;  %v1563_v62 = vld [vmem:[#allocation11 + $0x448] sm:$0xff] }
 0x23d   :  { %1310 = vmatpush1.bf16.msra.mxu0 %v14629_v13  ;;  %1392 = vmatpush1.bf16.msra.mxu1 %v14632_v14  ;;  %v1474_v13 = vld [vmem:[#allocation11 + $0x180] sm:$0xff] }
 0x23e   :  { %1311 = vmatprep.subr.bf16.mxu0 %v14637_v15  ;;  %1393 = vmatprep.subr.bf16.mxu1 %v14640_v16  ;;  %v1482_v14 = vld [vmem:[#allocation11 + $0x1c0] sm:$0xff]  ;;  %v1475_v15 = vld [vmem:[#allocation11 + $0x188] sm:$0xff] }
 0x23f   :  { %v1483_v16 = vld [vmem:[#allocation11 + $0x1c8] sm:$0xff] }
 0x241   :  { %1312 = vmatpush1.bf16.msra.mxu0 %v14635_v17  ;;  %1394 = vmatpush1.bf16.msra.mxu1 %v14638_v18  ;;  %v12722_v17 = vcombine.high %v1458_v44, %v1466_v5  ;;  %v12724_v18 = vcombine.high %v1459_v6, %v1467_v7 }
 0x242   :  { %1313 = vmatprep.subr.bf16.mxu0 %v14643_v19  ;;  %1395 = vmatprep.subr.bf16.mxu1 %v14646_v20  ;;  %v12721_v19 = vcombine.low %v1458_v44, %v1466_v5  ;;  %v12723_v20 = vcombine.low %v1459_v6, %v1467_v7  ;;  %v1578_v44 = vld [vmem:[#allocation11 + $0x4c0] sm:$0xff]  ;;  %v1571_v5 = vld [vmem:[#allocation11 + $0x488] sm:$0xff]  ;;  %v12818_v7 = vcombine.high %v1554_v25, %v1562_v60 }
 0x243   :  { %v1579_v6 = vld [vmem:[#allocation11 + $0x4c8] sm:$0xff] }
 0x245   :  { %1314 = vmatpush1.bf16.msra.mxu0 %v14641_v21  ;;  %1396 = vmatpush1.bf16.msra.mxu1 %v14644_v22  ;;  %v1490_v21 = vld [vmem:[#allocation11 + $0x200] sm:$0xff] }
 0x246   :  { %1315 = vmatprep.subr.bf16.mxu0 %v14649_v27  ;;  %1397 = vmatprep.subr.bf16.mxu1 %v14652_v28  ;;  %v1498_v22 = vld [vmem:[#allocation11 + $0x240] sm:$0xff]  ;;  %v1491_v27 = vld [vmem:[#allocation11 + $0x208] sm:$0xff] }
 0x247   :  { %v1499_v28 = vld [vmem:[#allocation11 + $0x248] sm:$0xff] }
 0x249   :  { %1316 = vmatpush1.bf16.msra.mxu0 %v14647_v29  ;;  %1398 = vmatpush1.bf16.msra.mxu1 %v14650_v31  ;;  %v12738_v29 = vcombine.high %v1474_v13, %v1482_v14  ;;  %v12740_v31 = vcombine.high %v1475_v15, %v1483_v16 }
 0x24a   :  { %1317 = vmatprep.subr.bf16.mxu0 %v14655_v32  ;;  %1399 = vmatprep.subr.bf16.mxu1 %v14658_v33  ;;  %v12737_v32 = vcombine.low %v1474_v13, %v1482_v14  ;;  %v12739_v33 = vcombine.low %v1475_v15, %v1483_v16  ;;  %v1587_v13 = vld [vmem:[#allocation11 + $0x508] sm:$0xff]  ;;  %v12836_v16 = vcombine.high %v1571_v5, %v1579_v6 }
 0x24b   :  { %v1595_v14 = vld [vmem:[#allocation11 + $0x548] sm:$0xff] }
 0x24d   :  { %1318 = vmatpush1.bf16.msra.mxu0 %v14653_v34  ;;  %1400 = vmatpush1.bf16.msra.mxu1 %v14656_v35  ;;  %v1506_v34 = vld [vmem:[#allocation11 + $0x280] sm:$0xff] }
 0x24e   :  { %1319 = vmatprep.subr.bf16.mxu0 %v14661_v36  ;;  %1401 = vmatprep.subr.bf16.mxu1 %v14664_v37  ;;  %v1514_v35 = vld [vmem:[#allocation11 + $0x2c0] sm:$0xff]  ;;  %v1507_v36 = vld [vmem:[#allocation11 + $0x288] sm:$0xff] }
 0x24f   :  { %v1515_v37 = vld [vmem:[#allocation11 + $0x2c8] sm:$0xff]  ;;  %v12770_v48 = vcombine.high %v1506_v34, %v1514_v35 }
 0x251   :  { %1320 = vmatpush1.bf16.msra.mxu0 %v14659_v38  ;;  %1402 = vmatpush1.bf16.msra.mxu1 %v14662_v39  ;;  %v12754_v38 = vcombine.high %v1490_v21, %v1498_v22  ;;  %v12756_v39 = vcombine.high %v1491_v27, %v1499_v28 }
 0x252   :  { %1321 = vmatprep.subr.bf16.mxu0 %v14667_v40  ;;  %1403 = vmatprep.subr.bf16.mxu1 %v14670_v41  ;;  %v12753_v40 = vcombine.low %v1490_v21, %v1498_v22  ;;  %v12755_v41 = vcombine.low %v1491_v27, %v1499_v28  ;;  %v1603_v21 = vld [vmem:[#allocation11 + $0x588] sm:$0xff]  ;;  %v12852_v28 = vcombine.high %v1587_v13, %v1595_v14 }
 0x253   :  { %v1611_v22 = vld [vmem:[#allocation11 + $0x5c8] sm:$0xff] }
 0x255   :  { %1322 = vmatpush1.bf16.msra.mxu0 %v14665_v43  ;;  %1404 = vmatpush1.bf16.msra.mxu1 %v14668_v45  ;;  %v1522_v43 = vld [vmem:[#allocation11 + $0x300] sm:$0xff] }
 0x256   :  { %1323 = vmatprep.subr.bf16.mxu0 %v14673_v46  ;;  %1405 = vmatprep.subr.bf16.mxu1 %v14676_v47  ;;  %v1530_v45 = vld [vmem:[#allocation11 + $0x340] sm:$0xff]  ;;  %v1523_v46 = vld [vmem:[#allocation11 + $0x308] sm:$0xff] }
 0x257   :  { %v1531_v47 = vld [vmem:[#allocation11 + $0x348] sm:$0xff]  ;;  %v12786_v56 = vcombine.high %v1522_v43, %v1530_v45 }
 0x258   :  { %v12788_v57 = vcombine.high %v1523_v46, %v1531_v47 }
 0x259   :  { %1324 = vmatpush1.bf16.msra.mxu0 %v14671_v49  ;;  %1406 = vmatpush1.bf16.msra.mxu1 %v14674_v50  ;;  %v12772_v49 = vcombine.high %v1507_v36, %v1515_v37  ;;  %v12769_v50 = vcombine.low %v1506_v34, %v1514_v35  ;;  %v1619_v34 = vld [vmem:[#allocation11 + $0x608] sm:$0xff] }
 0x25a   :  { %1325 = vmatprep.subr.bf16.mxu0 %v14679_v51  ;;  %1407 = vmatprep.subr.bf16.mxu1 %v14682_v52  ;;  %v12771_v51 = vcombine.low %v1507_v36, %v1515_v37  ;;  %v1538_v52 = vld [vmem:[#allocation11 + $0x380] sm:$0xff]  ;;  %v1627_v35 = vld [vmem:[#allocation11 + $0x648] sm:$0xff]  ;;  %v12868_v37 = vcombine.high %v1603_v21, %v1611_v22 }
 0x25b   :  { %v12802_v63 = vcombine.high %v1538_v52, %v1546_v53 }
 0x25d   :  { %1326 = vmatpush1.bf16.msra.mxu0 %v14677_v58  ;;  %1408 = vmatpush1.bf16.msra.mxu1 %v14680_v59  ;;  %v12785_v58 = vcombine.low %v1522_v43, %v1530_v45  ;;  %v12787_v59 = vcombine.low %v1523_v46, %v1531_v47  ;;  %v1635_v43 = vld [vmem:[#allocation11 + $0x688] sm:$0xff]  ;;  %v12884_v47 = vcombine.high %v1619_v34, %v1627_v35 }
 0x25e   :  { %4582 = vmatprep.subr.bf16.mxu0 %v12690_v1  ;;  %4664 = vmatprep.subr.bf16.mxu1 %v12692_v2  ;;  %v12804_v1 = vcombine.high %v1539_v54, %v1547_v55  ;;  %v12801_v2 = vcombine.low %v1538_v52, %v1546_v53  ;;  %v1643_v45 = vld [vmem:[#allocation11 + $0x6c8] sm:$0xff] }
 0x25f   :  { %v12899_v53 = vcombine.low %v1635_v43, %v1643_v45 }
 0x260   :  { %1328 = vmatmul.mubr.bf16.vlgmr.msra.gmra.mrb[4].mxu0 %v462_v8  ;;  %1410 = vmatmul.mubr.bf16.vlgmr.msra.gmra.mrb[4].mxu1 %v462_v8  ;;  %v12820_v8 = vcombine.high %v1555_v61, %v1563_v62 }
 0x261   :  { %4583 = vmatpush1.bf16.msra.mxu0 %v12689_v3  ;;  %4665 = vmatpush1.bf16.msra.mxu1 %v12691_v4  ;;  %v12803_v3 = vcombine.low %v1539_v54, %v1547_v55  ;;  %v1570_v4 = vld [vmem:[#allocation11 + $0x480] sm:$0xff] }
 0x262   :  { %4584 = vmatprep.subr.bf16.mxu0 %v12706_v9  ;;  %4666 = vmatprep.subr.bf16.mxu1 %v12708_v10  ;;  %v12817_v9 = vcombine.low %v1554_v25, %v1562_v60  ;;  %v12819_v10 = vcombine.low %v1555_v61, %v1563_v62  ;;  %v12834_v15 = vcombine.high %v1570_v4, %v1578_v44  ;;  %v1650_v54 = vld [vmem:[#allocation11 + $0x700] sm:$0xff] }
 0x263   :  { %v1658_v55 = vld [vmem:[#allocation11 + $0x740] sm:$0xff] }
 0x264   :  { %v1666_v61 = vld [vmem:[#allocation11 + $0x780] sm:$0xff] }
 0x265   :  { %4585 = vmatpush1.bf16.msra.mxu0 %v12705_v11  ;;  %4667 = vmatpush1.bf16.msra.mxu1 %v12707_v12  ;;  %v1586_v11 = vld [vmem:[#allocation11 + $0x500] sm:$0xff] }
 0x266   :  { %4586 = vmatprep.subr.bf16.mxu0 %v12722_v17  ;;  %4668 = vmatprep.subr.bf16.mxu1 %v12724_v18  ;;  %v1594_v12 = vld [vmem:[#allocation11 + $0x540] sm:$0xff]  ;;  %v12833_v17 = vcombine.low %v1570_v4, %v1578_v44  ;;  %v12835_v18 = vcombine.low %v1571_v5, %v1579_v6 }
 0x267   :  { %v12850_v27 = vcombine.high %v1586_v11, %v1594_v12  ;;  %v1674_v62 = vld [vmem:[#allocation11 + $0x7c0] sm:$0xff] }
 0x268   :  { %v1682_v5 = vld [vmem:[#allocation11 + $0x800] sm:$0xff] }
 0x269   :  { %4587 = vmatpush1.bf16.msra.mxu0 %v12721_v19  ;;  %4669 = vmatpush1.bf16.msra.mxu1 %v12723_v20  ;;  %v1602_v19 = vld [vmem:[#allocation11 + $0x580] sm:$0xff] }
 0x26a   :  { %4588 = vmatprep.subr.bf16.mxu0 %v12738_v29  ;;  %4670 = vmatprep.subr.bf16.mxu1 %v12740_v31  ;;  %v1610_v20 = vld [vmem:[#allocation11 + $0x5c0] sm:$0xff]  ;;  %v12849_v29 = vcombine.low %v1586_v11, %v1594_v12  ;;  %v12851_v31 = vcombine.low %v1587_v13, %v1595_v14  ;;  %v16562_v13 = vld [vmem:[#allocation10] sm:$0xf] }
 0x26b   :  { %v12866_v36 = vcombine.high %v1602_v19, %v1610_v20  ;;  %v1690_v6 = vld [vmem:[#allocation11 + $0x840] sm:$0xff]  ;;  %v597_v14 = vrot.slane %v16562_v13, %v16538_v24 }
 0x26d   :  { %4589 = vmatpush1.bf16.msra.mxu0 %v12737_v32  ;;  %4671 = vmatpush1.bf16.msra.mxu1 %v12739_v33  ;;  %v1618_v32 = vld [vmem:[#allocation11 + $0x600] sm:$0xff] }
 0x26e   :  { %4590 = vmatprep.subr.bf16.mxu0 %v12754_v38  ;;  %4672 = vmatprep.subr.bf16.mxu1 %v12756_v39  ;;  %v1626_v33 = vld [vmem:[#allocation11 + $0x640] sm:$0xff]  ;;  %v12865_v38 = vcombine.low %v1602_v19, %v1610_v20  ;;  %v12867_v39 = vcombine.low %v1603_v21, %v1611_v22 }
 0x26f   :  { %v12882_v46 = vcombine.high %v1618_v32, %v1626_v33 }
 0x271   :  { %4591 = vmatpush1.bf16.msra.mxu0 %v12753_v40  ;;  %4673 = vmatpush1.bf16.msra.mxu1 %v12755_v41  ;;  %v1634_v40 = vld [vmem:[#allocation11 + $0x680] sm:$0xff] }
 0x272   :  { %4592 = vmatprep.subr.bf16.mxu0 %v12770_v48  ;;  %4674 = vmatprep.subr.bf16.mxu1 %v12772_v49  ;;  %v1642_v41 = vld [vmem:[#allocation11 + $0x6c0] sm:$0xff]  ;;  %v12881_v48 = vcombine.low %v1618_v32, %v1626_v33  ;;  %v12883_v49 = vcombine.low %v1619_v34, %v1627_v35 }
 0x273   :  { %v12897_v52 = vcombine.low %v1634_v40, %v1642_v41  ;;  %v1698_v35 = vld [vmem:[#allocation11 + $0x880] sm:$0xff] }
 0x275   :  { %4593 = vmatpush1.bf16.msra.mxu0 %v12769_v50  ;;  %4675 = vmatpush1.bf16.msra.mxu1 %v12771_v51  ;;  %v12898_v50 = vcombine.high %v1634_v40, %v1642_v41  ;;  %v12900_v51 = vcombine.high %v1635_v43, %v1643_v45  ;;  %v1714_v43 = vld [vmem:[#allocation11 + $0x900] sm:$0xff] }
 0x276   :  { %4594 = vmatprep.subr.bf16.mxu0 %v12786_v56  ;;  %4676 = vmatprep.subr.bf16.mxu1 %v12788_v57  ;;  %v1651_v56 = vld [vmem:[#allocation11 + $0x708] sm:$0xff]  ;;  %v12914_v57 = vcombine.high %v1650_v54, %v1658_v55 }
 0x279   :  { %4595 = vmatpush1.bf16.msra.mxu0 %v12785_v58  ;;  %4677 = vmatpush1.bf16.msra.mxu1 %v12787_v59  ;;  %v1659_v58 = vld [vmem:[#allocation11 + $0x748] sm:$0xff]  ;;  %v12913_v59 = vcombine.low %v1650_v54, %v1658_v55  ;;  %v1730_v55 = vld [vmem:[#allocation11 + $0x980] sm:$0xff] }
 0x27a   :  { %4596 = vmatprep.subr.bf16.mxu0 %v12802_v63  ;;  %4678 = vmatprep.subr.bf16.mxu1 %v12804_v1  ;;  %v12915_v25 = vcombine.low %v1651_v56, %v1659_v58  ;;  %v12916_v60 = vcombine.high %v1651_v56, %v1659_v58  ;;  %v1667_v63 = vld [vmem:[#allocation11 + $0x788] sm:$0xff]  ;;  %v12930_v1 = vcombine.high %v1666_v61, %v1674_v62  ;;  %v1738_v56 = vld [vmem:[#allocation11 + $0x9c0] sm:$0xff] }
 0x27b   :  { %v1739_v58 = vld [vmem:[#allocation11 + $0x9c8] sm:$0xff] }
 0x27d   :  { %4597 = vmatpush1.bf16.msra.mxu0 %v12801_v2  ;;  %4679 = vmatpush1.bf16.msra.mxu1 %v12803_v3  ;;  %v1675_v2 = vld [vmem:[#allocation11 + $0x7c8] sm:$0xff]  ;;  %v12929_v3 = vcombine.low %v1666_v61, %v1674_v62  ;;  %v1746_v62 = vld [vmem:[#allocation11 + $0xa00] sm:$0xff] }
 0x27e   :  { %4598 = vmatprep.subr.bf16.mxu0 %v12818_v7  ;;  %4680 = vmatprep.subr.bf16.mxu1 %v12820_v8  ;;  %v12931_v4 = vcombine.low %v1667_v63, %v1675_v2  ;;  %v12932_v44 = vcombine.high %v1667_v63, %v1675_v2  ;;  %v1683_v7 = vld [vmem:[#allocation11 + $0x808] sm:$0xff]  ;;  %v12946_v8 = vcombine.high %v1682_v5, %v1690_v6  ;;  %v1754_v63 = vld [vmem:[#allocation11 + $0xa40] sm:$0xff] }
 0x27f   :  { %v1755_v2 = vld [vmem:[#allocation11 + $0xa48] sm:$0xff] }
 0x281   :  { %4599 = vmatpush1.bf16.msra.mxu0 %v12817_v9  ;;  %4681 = vmatpush1.bf16.msra.mxu1 %v12819_v10  ;;  %v1691_v9 = vld [vmem:[#allocation11 + $0x848] sm:$0xff]  ;;  %v12945_v10 = vcombine.low %v1682_v5, %v1690_v6  ;;  %v1762_v6 = vld [vmem:[#allocation11 + $0xa80] sm:$0xff] }
 0x282   :  { %4600 = vmatprep.subr.bf16.mxu0 %v12834_v15  ;;  %4682 = vmatprep.subr.bf16.mxu1 %v12836_v16  ;;  %v12947_v11 = vcombine.low %v1683_v7, %v1691_v9  ;;  %v12948_v12 = vcombine.high %v1683_v7, %v1691_v9  ;;  %v601_v15 = vrot.slane %v16562_v13, %v16543_v26  ;;  %v1770_v7 = vld [vmem:[#allocation11 + $0xac0] sm:$0xff]  ;;  %v1771_v9 = vld [vmem:[#allocation11 + $0xac8] sm:$0xff] }
 0x283   :  { %v609_v16 = vrot.slane %v16562_v13, %v16550_v30 }
 0x285   :  { %4601 = vmatpush1.bf16.msra.mxu0 %v12833_v17  ;;  %4683 = vmatpush1.bf16.msra.mxu1 %v12835_v18 }
 0x286   :  { %4602 = vmatprep.subr.bf16.mxu0 %v12850_v27  ;;  %4684 = vmatprep.subr.bf16.mxu1 %v12852_v28 }
 0x289   :  { %4603 = vmatpush1.bf16.msra.mxu0 %v12849_v29  ;;  %4685 = vmatpush1.bf16.msra.mxu1 %v12851_v31 }
 0x28a   :  { %4604 = vmatprep.subr.bf16.mxu0 %v12866_v36  ;;  %4686 = vmatprep.subr.bf16.mxu1 %v12868_v37  ;;  %v1706_v37 = vld [vmem:[#allocation11 + $0x8c0] sm:$0xff] }
 0x28b   :  { %v12962_v45 = vcombine.high %v1698_v35, %v1706_v37 }
 0x28d   :  { %4605 = vmatpush1.bf16.msra.mxu0 %v12865_v38  ;;  %4687 = vmatpush1.bf16.msra.mxu1 %v12867_v39  ;;  %v1699_v38 = vld [vmem:[#allocation11 + $0x888] sm:$0xff] }
 0x28e   :  { %4606 = vmatprep.subr.bf16.mxu0 %v12882_v46  ;;  %4688 = vmatprep.subr.bf16.mxu1 %v12884_v47  ;;  %v1707_v39 = vld [vmem:[#allocation11 + $0x8c8] sm:$0xff]  ;;  %v1722_v47 = vld [vmem:[#allocation11 + $0x940] sm:$0xff] }
 0x28f   :  { %v12964_v46 = vcombine.high %v1699_v38, %v1707_v39 }
 0x291   :  { %4607 = vmatpush1.bf16.msra.mxu0 %v12881_v48  ;;  %4689 = vmatpush1.bf16.msra.mxu1 %v12883_v49  ;;  %v1715_v48 = vld [vmem:[#allocation11 + $0x908] sm:$0xff] }
 0x292   :  { %4608 = vmatprep.subr.bf16.mxu0 %v12898_v50  ;;  %4690 = vmatprep.subr.bf16.mxu1 %v12900_v51  ;;  %v1723_v49 = vld [vmem:[#allocation11 + $0x948] sm:$0xff]  ;;  %v12961_v51 = vcombine.low %v1698_v35, %v1706_v37  ;;  %v1810_v37 = vld [vmem:[#allocation11 + $0xc00] sm:$0xff] }
 0x293   :  { %v12980_v54 = vcombine.high %v1715_v48, %v1723_v49 }
 0x295   :  { %4609 = vmatpush1.bf16.msra.mxu0 %v12897_v52  ;;  %4691 = vmatpush1.bf16.msra.mxu1 %v12899_v53  ;;  %v12963_v52 = vcombine.low %v1699_v38, %v1707_v39  ;;  %v12978_v53 = vcombine.high %v1714_v43, %v1722_v47  ;;  %v1818_v38 = vld [vmem:[#allocation11 + $0xc40] sm:$0xff]  ;;  %v1811_v39 = vld [vmem:[#allocation11 + $0xc08] sm:$0xff] }
 0x296   :  { %4610 = vmatprep.subr.bf16.mxu0 %v12914_v57  ;;  %4692 = vmatprep.subr.bf16.mxu1 %v12916_v60  ;;  %v1731_v57 = vld [vmem:[#allocation11 + $0x988] sm:$0xff]  ;;  %v12994_v60 = vcombine.high %v1730_v55, %v1738_v56 }
 0x297   :  { %v12996_v61 = vcombine.high %v1731_v57, %v1739_v58 }
 0x299   :  { %4611 = vmatpush1.bf16.msra.mxu0 %v12913_v59  ;;  %4693 = vmatpush1.bf16.msra.mxu1 %v12915_v25  ;;  %v12977_v59 = vcombine.low %v1714_v43, %v1722_v47  ;;  %v12979_v25 = vcombine.low %v1715_v48, %v1723_v49  ;;  %v1819_v43 = vld [vmem:[#allocation11 + $0xc48] sm:$0xff]  ;;  %v13074_v47 = vcombine.high %v1810_v37, %v1818_v38  ;;  %v1826_v49 = vld [vmem:[#allocation11 + $0xc80] sm:$0xff] }
 0x29a   :  { %4612 = vmatprep.subr.bf16.mxu0 %v12930_v1  ;;  %4694 = vmatprep.subr.bf16.mxu1 %v12932_v44  ;;  %v1747_v1 = vld [vmem:[#allocation11 + $0xa08] sm:$0xff]  ;;  %v13010_v44 = vcombine.high %v1746_v62, %v1754_v63  ;;  %v13076_v48 = vcombine.high %v1811_v39, %v1819_v43 }
 0x29b   :  { %v13012_v5 = vcombine.high %v1747_v1, %v1755_v2 }
 0x29d   :  { %4613 = vmatpush1.bf16.msra.mxu0 %v12929_v3  ;;  %4695 = vmatpush1.bf16.msra.mxu1 %v12931_v4  ;;  %v12993_v3 = vcombine.low %v1730_v55, %v1738_v56  ;;  %v12995_v4 = vcombine.low %v1731_v57, %v1739_v58  ;;  %v13075_v55 = vcombine.low %v1811_v39, %v1819_v43  ;;  %v1842_v58 = vld [vmem:[#allocation11 + $0xd00] sm:$0xff] }
 0x29e   :  { %4623 = vmatprep.subr.bf16.mxu0 %v12946_v8  ;;  %4705 = vmatprep.subr.bf16.mxu1 %v12948_v12  ;;  %v1763_v8 = vld [vmem:[#allocation11 + $0xa88] sm:$0xff]  ;;  %v13026_v12 = vcombine.high %v1762_v6, %v1770_v7 }
 0x333   :  { %v1329_v17 = vpop.f32.mrb[4].mxu0  ;;  %v16570_v18 = vpop.f32.mrb[4].mxu1 }
 0x334   :  { %v14309_v19 = vadd.f32 %v1329_v17, %v597_v14  ;;  %v1331_v20 = vpop.f32.mrb[5].mxu0  ;;  %v1413_v21 = vpop.f32.mrb[5].mxu1  ;;  %v13028_v14 = vcombine.high %v1763_v8, %v1771_v9  ;;  %v1779_v17 = vld [vmem:[#allocation11 + $0xb08] sm:$0xff] }
 0x335   :  { %v14310_v22 = vadd.f32 %v1331_v20, %v601_v15  ;;  %v14312_v27 = vadd.f32 %v1413_v21, %v609_v16  ;;  %v1333_v28 = vpop.f32.mrb[6].mxu0  ;;  %v1415_v29 = vpop.f32.mrb[6].mxu1  ;;  %v1778_v15 = vld [vmem:[#allocation11 + $0xb00] sm:$0xff]  ;;  %v13025_v20 = vcombine.low %v1762_v6, %v1770_v7  ;;  %v13027_v21 = vcombine.low %v1763_v8, %v1771_v9 }
 0x336   :  { %v1418_v31 = vmax.f32 %v14309_v19, 0.0  ;;  %v1334_v32 = vpop.f32.mrb[7].mxu0  ;;  %v1416_v33 = vpop.f32.mrb[7].mxu1  ;;  %v1786_v16 = vld [vmem:[#allocation11 + $0xb40] sm:$0xff]  ;;  %v1787_v19 = vld [vmem:[#allocation11 + $0xb48] sm:$0xff] }
 0x337   :  { %v1419_v34 = vmax.f32 %v14310_v22, 0.0  ;;  %v1421_v36 = vmax.f32 %v14312_v27, 0.0  ;;  %v13042_v22 = vcombine.high %v1778_v15, %v1786_v16  ;;  %v13044_v27 = vcombine.high %v1779_v17, %v1787_v19  ;;  %v1794_v28 = vld [vmem:[#allocation11 + $0xb80] sm:$0xff]  ;;  %v1803_v32 = vld [vmem:[#allocation11 + $0xbc8] sm:$0xff] }
 0x338   :  { %v16574_v41 = vpack.c.bf16 %v1418_v31, %v1418_v31  ;;  %v1802_v29 = vld [vmem:[#allocation11 + $0xbc0] sm:$0xff]  ;;  %v1795_v31 = vld [vmem:[#allocation11 + $0xb88] sm:$0xff]  ;;  %v13041_v33 = vcombine.low %v1778_v15, %v1786_v16 }
 0x339   :  { %v16572_v40 = vpack.c.bf16 %v1419_v34, %v1419_v34  ;;  %v16578_v50 = vpack.c.bf16 %v1421_v36, %v1421_v36  ;;  %v13043_v34 = vcombine.low %v1779_v17, %v1787_v19  ;;  %v13058_v35 = vcombine.high %v1794_v28, %v1802_v29  ;;  %v1874_v9 = vld [vmem:[#allocation11 + $0xe00] sm:$0xff] }
 0x33a   :  { %v13060_v36 = vcombine.high %v1795_v31, %v1803_v32  ;;  %v1890_v19 = vld [vmem:[#allocation11 + $0xe80] sm:$0xff] }
 0x33b   :  { %4614 = vmatprep.mubr.bf16.mxu0 %v16572_v40  ;;  %4696 = vmatprep.mubr.bf16.mxu1 %v16572_v40 }
 0x33c   :  { %4615 = vmatmul.mubr.bf16.vlgmr.msra.gmra.mrb[8].mxu0 %v16574_v41  ;;  %4697 = vmatmul.mubr.bf16.vlgmr.msra.gmra.mrb[8].mxu1 %v16574_v41 }
 0x33d   :  { %4624 = vmatpush1.bf16.msra.mxu0 %v12945_v10  ;;  %4706 = vmatpush1.bf16.msra.mxu1 %v12947_v11  ;;  %v13009_v10 = vcombine.low %v1746_v62, %v1754_v63  ;;  %v13011_v11 = vcombine.low %v1747_v1, %v1755_v2  ;;  %v1858_v2 = vld [vmem:[#allocation11 + $0xd80] sm:$0xff] }
 0x33e   :  { %4655 = vmatprep.mubr.bf16.mxu0 %v16578_v50  ;;  %4737 = vmatprep.mubr.bf16.mxu1 %v16578_v50 }
 0x33f   :  { %4625 = vmatprep.subr.bf16.mxu0 %v12962_v45  ;;  %4707 = vmatprep.subr.bf16.mxu1 %v12964_v46  ;;  %v13057_v45 = vcombine.low %v1794_v28, %v1802_v29  ;;  %v13059_v46 = vcombine.low %v1795_v31, %v1803_v32  ;;  %v1906_v32 = vld [vmem:[#allocation11 + $0xf00] sm:$0xff] }
 0x341   :  { %4626 = vmatpush1.bf16.msra.mxu0 %v12961_v51  ;;  %4708 = vmatpush1.bf16.msra.mxu1 %v12963_v52  ;;  %v1834_v51 = vld [vmem:[#allocation11 + $0xcc0] sm:$0xff]  ;;  %v1827_v52 = vld [vmem:[#allocation11 + $0xc88] sm:$0xff] }
 0x342   :  { %4627 = vmatprep.subr.bf16.mxu0 %v12978_v53  ;;  %4709 = vmatprep.subr.bf16.mxu1 %v12980_v54  ;;  %v1835_v53 = vld [vmem:[#allocation11 + $0xcc8] sm:$0xff]  ;;  %v13073_v54 = vcombine.low %v1810_v37, %v1818_v38  ;;  %v13090_v56 = vcombine.high %v1826_v49, %v1834_v51  ;;  %v605_v38 = vrot.slane %v16562_v13, %v16557_v42  ;;  %v1436_v13 = vld [vmem:[#allocation11 + $0x50] sm:$0xff] }
 0x343   :  { %v13092_v57 = vcombine.high %v1827_v52, %v1835_v53  ;;  %v13091_v62 = vcombine.low %v1827_v52, %v1835_v53 }
 0x344   :  { %v14311_v52 = vadd.f32 %v16570_v18, %v605_v38  ;;  %v1445_v18 = vld [vmem:[#allocation11 + $0x98] sm:$0xff]  ;;  %v1516_v38 = vld [vmem:[#allocation11 + $0x2d0] sm:$0xff] }
 0x345   :  { %4628 = vmatpush1.bf16.msra.mxu0 %v12977_v59  ;;  %4710 = vmatpush1.bf16.msra.mxu1 %v12979_v25  ;;  %v1850_v59 = vld [vmem:[#allocation11 + $0xd40] sm:$0xff]  ;;  %v1843_v25 = vld [vmem:[#allocation11 + $0xd08] sm:$0xff] }
 0x346   :  { %4629 = vmatprep.subr.bf16.mxu0 %v12994_v60  ;;  %4711 = vmatprep.subr.bf16.mxu1 %v12996_v61  ;;  %v1851_v60 = vld [vmem:[#allocation11 + $0xd48] sm:$0xff]  ;;  %v13089_v61 = vcombine.low %v1826_v49, %v1834_v51  ;;  %v13106_v63 = vcombine.high %v1842_v58, %v1850_v59 }
 0x347   :  { %v13108_v1 = vcombine.high %v1843_v25, %v1851_v60  ;;  %v13107_v6 = vcombine.low %v1843_v25, %v1851_v60  ;;  %v1420_v25 = vmax.f32 %v14311_v52, 0.0  ;;  %v1525_v52 = vld [vmem:[#allocation11 + $0x318] sm:$0xff] }
 0x349   :  { %4630 = vmatpush1.bf16.msra.mxu0 %v12993_v3  ;;  %4712 = vmatpush1.bf16.msra.mxu1 %v12995_v4  ;;  %v1866_v3 = vld [vmem:[#allocation11 + $0xdc0] sm:$0xff]  ;;  %v1859_v4 = vld [vmem:[#allocation11 + $0xd88] sm:$0xff] }
 0x34a   :  { %4631 = vmatprep.subr.bf16.mxu0 %v13010_v44  ;;  %4713 = vmatprep.subr.bf16.mxu1 %v13012_v5  ;;  %v1867_v44 = vld [vmem:[#allocation11 + $0xdc8] sm:$0xff]  ;;  %v13105_v5 = vcombine.low %v1842_v58, %v1850_v59  ;;  %v13122_v7 = vcombine.high %v1858_v2, %v1866_v3 }
 0x34b   :  { %v13124_v8 = vcombine.high %v1859_v4, %v1867_v44  ;;  %v13123_v15 = vcombine.low %v1859_v4, %v1867_v44 }
 0x34d   :  { %4632 = vmatpush1.bf16.msra.mxu0 %v13009_v10  ;;  %4714 = vmatpush1.bf16.msra.mxu1 %v13011_v11  ;;  %v1882_v10 = vld [vmem:[#allocation11 + $0xe40] sm:$0xff]  ;;  %v1875_v11 = vld [vmem:[#allocation11 + $0xe08] sm:$0xff] }
 0x34e   :  { %4633 = vmatprep.subr.bf16.mxu0 %v13026_v12  ;;  %4715 = vmatprep.subr.bf16.mxu1 %v13028_v14  ;;  %v1883_v12 = vld [vmem:[#allocation11 + $0xe48] sm:$0xff]  ;;  %v13121_v14 = vcombine.low %v1858_v2, %v1866_v3  ;;  %v13138_v16 = vcombine.high %v1874_v9, %v1882_v10  ;;  %v16587_v3 = vpack.c.bf16 %v1420_v25, %v1420_v25  ;;  %v1549_v25 = vld [vmem:[#allocation11 + $0x3d8] sm:$0xff] }
 0x34f   :  { %v13140_v17 = vcombine.high %v1875_v11, %v1883_v12  ;;  %v13139_v28 = vcombine.low %v1875_v11, %v1883_v12 }
 0x351   :  { %4634 = vmatpush1.bf16.msra.mxu0 %v13025_v20  ;;  %4716 = vmatpush1.bf16.msra.mxu1 %v13027_v21  ;;  %v1898_v20 = vld [vmem:[#allocation11 + $0xec0] sm:$0xff]  ;;  %v1891_v21 = vld [vmem:[#allocation11 + $0xe88] sm:$0xff] }
 0x352   :  { %4635 = vmatprep.subr.bf16.mxu0 %v13042_v22  ;;  %4717 = vmatprep.subr.bf16.mxu1 %v13044_v27  ;;  %v1899_v22 = vld [vmem:[#allocation11 + $0xec8] sm:$0xff]  ;;  %v13137_v27 = vcombine.low %v1874_v9, %v1882_v10  ;;  %v13154_v29 = vcombine.high %v1890_v19, %v1898_v20  ;;  %v1469_v9 = vld [vmem:[#allocation11 + $0x158] sm:$0xff] }
 0x353   :  { %v13156_v31 = vcombine.high %v1891_v21, %v1899_v22  ;;  %v13155_v37 = vcombine.low %v1891_v21, %v1899_v22 }
 0x355   :  { %4636 = vmatpush1.bf16.msra.mxu0 %v13041_v33  ;;  %4718 = vmatpush1.bf16.msra.mxu1 %v13043_v34  ;;  %v1914_v33 = vld [vmem:[#allocation11 + $0xf40] sm:$0xff]  ;;  %v1907_v34 = vld [vmem:[#allocation11 + $0xf08] sm:$0xff] }
 0x356   :  { %4637 = vmatprep.subr.bf16.mxu0 %v13058_v35  ;;  %4719 = vmatprep.subr.bf16.mxu1 %v13060_v36  ;;  %v1915_v35 = vld [vmem:[#allocation11 + $0xf48] sm:$0xff]  ;;  %v13153_v36 = vcombine.low %v1890_v19, %v1898_v20  ;;  %v13170_v39 = vcombine.high %v1906_v32, %v1914_v33  ;;  %v13169_v49 = vcombine.low %v1906_v32, %v1914_v33  ;;  %v1485_v19 = vld [vmem:[#allocation11 + $0x1d8] sm:$0xff] }
 0x357   :  { %v13172_v43 = vcombine.high %v1907_v34, %v1915_v35  ;;  %v13171_v51 = vcombine.low %v1907_v34, %v1915_v35  ;;  %v1501_v32 = vld [vmem:[#allocation11 + $0x258] sm:$0xff] }
 0x359   :  { %4638 = vmatpush1.bf16.msra.mxu0 %v13057_v45  ;;  %4720 = vmatpush1.bf16.msra.mxu1 %v13059_v46  ;;  %v1922_v45 = vld [vmem:[#allocation11 + $0xf80] sm:$0xff] }
 0x35a   :  { %4639 = vmatprep.subr.bf16.mxu0 %v13074_v47  ;;  %4721 = vmatprep.subr.bf16.mxu1 %v13076_v48  ;;  %v1930_v46 = vld [vmem:[#allocation11 + $0xfc0] sm:$0xff]  ;;  %v1923_v47 = vld [vmem:[#allocation11 + $0xf88] sm:$0xff] }
 0x35b   :  { %v1931_v48 = vld [vmem:[#allocation11 + $0xfc8] sm:$0xff]  ;;  %v13186_v53 = vcombine.high %v1922_v45, %v1930_v46  ;;  %v13185_v58 = vcombine.low %v1922_v45, %v1930_v46 }
 0x35c   :  { %v13187_v59 = vcombine.low %v1923_v47, %v1931_v48 }
 0x35d   :  { %4640 = vmatpush1.bf16.msra.mxu0 %v13073_v54  ;;  %4722 = vmatpush1.bf16.msra.mxu1 %v13075_v55  ;;  %v13188_v54 = vcombine.high %v1923_v47, %v1931_v48  ;;  %v1428_v55 = vld [vmem:[#allocation11 + $0x10] sm:$0xff] }
 0x35e   :  { %4641 = vmatprep.subr.bf16.mxu0 %v13090_v56  ;;  %4723 = vmatprep.subr.bf16.mxu1 %v13092_v57  ;;  %v1429_v56 = vld [vmem:[#allocation11 + $0x18] sm:$0xff]  ;;  %v12694_v60 = vcombine.high %v1428_v55, %v1436_v13  ;;  %v12693_v2 = vcombine.low %v1428_v55, %v1436_v13 }
 0x35f   :  { %v1437_v57 = vld [vmem:[#allocation11 + $0x58] sm:$0xff] }
 0x360   :  { %v12695_v4 = vcombine.low %v1429_v56, %v1437_v57 }
 0x361   :  { %4642 = vmatpush1.bf16.msra.mxu0 %v13089_v61  ;;  %4724 = vmatpush1.bf16.msra.mxu1 %v13091_v62  ;;  %v12696_v61 = vcombine.high %v1429_v56, %v1437_v57  ;;  %v1444_v62 = vld [vmem:[#allocation11 + $0x90] sm:$0xff] }
 0x362   :  { %4643 = vmatprep.subr.bf16.mxu0 %v13106_v63  ;;  %4725 = vmatprep.subr.bf16.mxu1 %v13108_v1  ;;  %v1452_v63 = vld [vmem:[#allocation11 + $0xd0] sm:$0xff]  ;;  %v1453_v1 = vld [vmem:[#allocation11 + $0xd8] sm:$0xff] }
 0x363   :  { %v12710_v44 = vcombine.high %v1444_v62, %v1452_v63  ;;  %v12709_v10 = vcombine.low %v1444_v62, %v1452_v63  ;;  %v12711_v11 = vcombine.low %v1445_v18, %v1453_v1  ;;  %v1540_v57 = vld [vmem:[#allocation11 + $0x390] sm:$0xff] }
 0x365   :  { %4644 = vmatpush1.bf16.msra.mxu0 %v13105_v5  ;;  %4726 = vmatpush1.bf16.msra.mxu1 %v13107_v6  ;;  %v12712_v5 = vcombine.high %v1445_v18, %v1453_v1  ;;  %v1460_v6 = vld [vmem:[#allocation11 + $0x110] sm:$0xff] }
 0x366   :  { %4645 = vmatprep.subr.bf16.mxu0 %v13122_v7  ;;  %4727 = vmatprep.subr.bf16.mxu1 %v13124_v8  ;;  %v1468_v7 = vld [vmem:[#allocation11 + $0x150] sm:$0xff]  ;;  %v1461_v8 = vld [vmem:[#allocation11 + $0x118] sm:$0xff] }
 0x367   :  { %v12726_v12 = vcombine.high %v1460_v6, %v1468_v7  ;;  %v12725_v20 = vcombine.low %v1460_v6, %v1468_v7  ;;  %v12727_v21 = vcombine.low %v1461_v8, %v1469_v9  ;;  %v1556_v18 = vld [vmem:[#allocation11 + $0x410] sm:$0xff] }
 0x368   :  { %v1564_v1 = vld [vmem:[#allocation11 + $0x450] sm:$0xff] }
 0x369   :  { %4646 = vmatpush1.bf16.msra.mxu0 %v13121_v14  ;;  %4728 = vmatpush1.bf16.msra.mxu1 %v13123_v15  ;;  %v12728_v14 = vcombine.high %v1461_v8, %v1469_v9  ;;  %v1476_v15 = vld [vmem:[#allocation11 + $0x190] sm:$0xff]  ;;  %v12822_v6 = vcombine.high %v1556_v18, %v1564_v1 }
 0x36a   :  { %4647 = vmatprep.subr.bf16.mxu0 %v13138_v16  ;;  %4729 = vmatprep.subr.bf16.mxu1 %v13140_v17  ;;  %v1484_v16 = vld [vmem:[#allocation11 + $0x1d0] sm:$0xff]  ;;  %v1477_v17 = vld [vmem:[#allocation11 + $0x198] sm:$0xff] }
 0x36b   :  { %v12742_v22 = vcombine.high %v1476_v15, %v1484_v16  ;;  %v12741_v33 = vcombine.low %v1476_v15, %v1484_v16  ;;  %v12743_v34 = vcombine.low %v1477_v17, %v1485_v19  ;;  %v1572_v8 = vld [vmem:[#allocation11 + $0x490] sm:$0xff] }
 0x36c   :  { %v1580_v9 = vld [vmem:[#allocation11 + $0x4d0] sm:$0xff] }
 0x36d   :  { %4648 = vmatpush1.bf16.msra.mxu0 %v13137_v27  ;;  %4730 = vmatpush1.bf16.msra.mxu1 %v13139_v28  ;;  %v12744_v27 = vcombine.high %v1477_v17, %v1485_v19  ;;  %v1492_v28 = vld [vmem:[#allocation11 + $0x210] sm:$0xff]  ;;  %v12838_v15 = vcombine.high %v1572_v8, %v1580_v9 }
 0x36e   :  { %4649 = vmatprep.subr.bf16.mxu0 %v13154_v29  ;;  %4731 = vmatprep.subr.bf16.mxu1 %v13156_v31  ;;  %v1500_v29 = vld [vmem:[#allocation11 + $0x250] sm:$0xff]  ;;  %v1493_v31 = vld [vmem:[#allocation11 + $0x218] sm:$0xff] }
 0x36f   :  { %v12758_v35 = vcombine.high %v1492_v28, %v1500_v29  ;;  %v12757_v45 = vcombine.low %v1492_v28, %v1500_v29  ;;  %v12759_v46 = vcombine.low %v1493_v31, %v1501_v32  ;;  %v1588_v17 = vld [vmem:[#allocation11 + $0x510] sm:$0xff] }
 0x370   :  { %v1596_v19 = vld [vmem:[#allocation11 + $0x550] sm:$0xff] }
 0x371   :  { %4650 = vmatpush1.bf16.msra.mxu0 %v13153_v36  ;;  %4732 = vmatpush1.bf16.msra.mxu1 %v13155_v37  ;;  %v12760_v36 = vcombine.high %v1493_v31, %v1501_v32  ;;  %v1508_v37 = vld [vmem:[#allocation11 + $0x290] sm:$0xff]  ;;  %v12854_v28 = vcombine.high %v1588_v17, %v1596_v19 }
 0x372   :  { %4651 = vmatprep.subr.bf16.mxu0 %v13170_v39  ;;  %4733 = vmatprep.subr.bf16.mxu1 %v13172_v43  ;;  %v1509_v39 = vld [vmem:[#allocation11 + $0x298] sm:$0xff]  ;;  %v12774_v47 = vcombine.high %v1508_v37, %v1516_v38  ;;  %v1604_v31 = vld [vmem:[#allocation11 + $0x590] sm:$0xff] }
 0x373   :  { %v1517_v43 = vld [vmem:[#allocation11 + $0x2d8] sm:$0xff]  ;;  %v1612_v32 = vld [vmem:[#allocation11 + $0x5d0] sm:$0xff] }
 0x374   :  { %v12776_v48 = vcombine.high %v1509_v39, %v1517_v43  ;;  %v12775_v55 = vcombine.low %v1509_v39, %v1517_v43  ;;  %v1620_v39 = vld [vmem:[#allocation11 + $0x610] sm:$0xff] }
 0x375   :  { %4652 = vmatpush1.bf16.msra.mxu0 %v13169_v49  ;;  %4734 = vmatpush1.bf16.msra.mxu1 %v13171_v51  ;;  %v1524_v49 = vld [vmem:[#allocation11 + $0x310] sm:$0xff] }
 0x376   :  { %4653 = vmatprep.subr.bf16.mxu0 %v13186_v53  ;;  %4735 = vmatprep.subr.bf16.mxu1 %v13188_v54  ;;  %v1532_v51 = vld [vmem:[#allocation11 + $0x350] sm:$0xff]  ;;  %v1533_v53 = vld [vmem:[#allocation11 + $0x358] sm:$0xff]  ;;  %v12773_v54 = vcombine.low %v1508_v37, %v1516_v38  ;;  %v12870_v37 = vcombine.high %v1604_v31, %v1612_v32 }
 0x377   :  { %v12790_v13 = vcombine.high %v1524_v49, %v1532_v51  ;;  %v12792_v56 = vcombine.high %v1525_v52, %v1533_v53  ;;  %v1628_v43 = vld [vmem:[#allocation11 + $0x650] sm:$0xff] }
 0x379   :  { %4654 = vmatpush1.bf16.msra.mxu0 %v13185_v58  ;;  %4736 = vmatpush1.bf16.msra.mxu1 %v13187_v59  ;;  %v1548_v58 = vld [vmem:[#allocation11 + $0x3d0] sm:$0xff]  ;;  %v1541_v59 = vld [vmem:[#allocation11 + $0x398] sm:$0xff] }
 0x37a   :  { %4746 = vmatprep.subr.bf16.mxu0 %v12694_v60  ;;  %4828 = vmatprep.subr.bf16.mxu1 %v12696_v61  ;;  %v12789_v60 = vcombine.low %v1524_v49, %v1532_v51  ;;  %v12791_v61 = vcombine.low %v1525_v52, %v1533_v53  ;;  %v12806_v62 = vcombine.high %v1540_v57, %v1548_v58  ;;  %v1636_v52 = vld [vmem:[#allocation11 + $0x690] sm:$0xff] }
 0x37b   :  { %v12808_v63 = vcombine.high %v1541_v59, %v1549_v25  ;;  %v12886_v49 = vcombine.high %v1620_v39, %v1628_v43  ;;  %v1644_v53 = vld [vmem:[#allocation11 + $0x6d0] sm:$0xff] }
 0x37c   :  { %4656 = vmatmul.mubr.bf16.vlgmr.msra.gmra.mrb[8].mxu0 %v16587_v3  ;;  %4738 = vmatmul.mubr.bf16.vlgmr.msra.gmra.mrb[8].mxu1 %v16587_v3 }
 0x37d   :  { %4747 = vmatpush1.bf16.msra.mxu0 %v12693_v2  ;;  %4778 = vmatprep.mubr.bf16.mxu0 %v16572_v40  ;;  %v1557_v2 = vld [vmem:[#allocation11 + $0x418] sm:$0xff] }
 0x37e   :  { %4829 = vmatpush1.bf16.msra.mxu1 %v12695_v4  ;;  %4860 = vmatprep.mubr.bf16.mxu1 %v16572_v40  ;;  %v1565_v4 = vld [vmem:[#allocation11 + $0x458] sm:$0xff] }
 0x37f   :  { %4748 = vmatprep.subr.bf16.mxu0 %v12710_v44  ;;  %4830 = vmatprep.subr.bf16.mxu1 %v12712_v5  ;;  %v12805_v44 = vcombine.low %v1540_v57, %v1548_v58  ;;  %v12807_v5 = vcombine.low %v1541_v59, %v1549_v25  ;;  %v12824_v7 = vcombine.high %v1557_v2, %v1565_v4  ;;  %v1652_v59 = vld [vmem:[#allocation11 + $0x710] sm:$0xff] }
 0x380   :  { %v12902_v57 = vcombine.high %v1636_v52, %v1644_v53  ;;  %v1660_v25 = vld [vmem:[#allocation11 + $0x750] sm:$0xff] }
 0x381   :  { %4749 = vmatpush1.bf16.msra.mxu0 %v12709_v10  ;;  %v1573_v10 = vld [vmem:[#allocation11 + $0x498] sm:$0xff] }
 0x382   :  { %4831 = vmatpush1.bf16.msra.mxu1 %v12711_v11  ;;  %4750 = vmatprep.subr.bf16.mxu0 %v12726_v12  ;;  %v1581_v11 = vld [vmem:[#allocation11 + $0x4d8] sm:$0xff]  ;;  %v12821_v12 = vcombine.low %v1556_v18, %v1564_v1  ;;  %v12918_v18 = vcombine.high %v1652_v59, %v1660_v25 }
 0x383   :  { %4832 = vmatprep.subr.bf16.mxu1 %v12728_v14  ;;  %v12823_v14 = vcombine.low %v1557_v2, %v1565_v4  ;;  %v12840_v16 = vcombine.high %v1573_v10, %v1581_v11  ;;  %v1668_v2 = vld [vmem:[#allocation11 + $0x790] sm:$0xff] }
 0x384   :  { %v1676_v4 = vld [vmem:[#allocation11 + $0x7d0] sm:$0xff] }
 0x385   :  { %4751 = vmatpush1.bf16.msra.mxu0 %v12725_v20  ;;  %v1589_v20 = vld [vmem:[#allocation11 + $0x518] sm:$0xff] }
 0x386   :  { %4833 = vmatpush1.bf16.msra.mxu1 %v12727_v21  ;;  %4752 = vmatprep.subr.bf16.mxu0 %v12742_v22  ;;  %v1597_v21 = vld [vmem:[#allocation11 + $0x558] sm:$0xff]  ;;  %v12837_v22 = vcombine.low %v1572_v8, %v1580_v9  ;;  %v12934_v8 = vcombine.high %v1668_v2, %v1676_v4 }
 0x387   :  { %4834 = vmatprep.subr.bf16.mxu1 %v12744_v27  ;;  %v12839_v27 = vcombine.low %v1573_v10, %v1581_v11  ;;  %v12856_v29 = vcombine.high %v1589_v20, %v1597_v21  ;;  %v1684_v10 = vld [vmem:[#allocation11 + $0x810] sm:$0xff] }
 0x388   :  { %v1692_v11 = vld [vmem:[#allocation11 + $0x850] sm:$0xff] }
 0x389   :  { %4753 = vmatpush1.bf16.msra.mxu0 %v12741_v33  ;;  %v1605_v33 = vld [vmem:[#allocation11 + $0x598] sm:$0xff] }
 0x38a   :  { %4835 = vmatpush1.bf16.msra.mxu1 %v12743_v34  ;;  %4754 = vmatprep.subr.bf16.mxu0 %v12758_v35  ;;  %v1613_v34 = vld [vmem:[#allocation11 + $0x5d8] sm:$0xff]  ;;  %v12853_v35 = vcombine.low %v1588_v17, %v1596_v19  ;;  %v12950_v17 = vcombine.high %v1684_v10, %v1692_v11 }
 0x38b   :  { %4836 = vmatprep.subr.bf16.mxu1 %v12760_v36  ;;  %v12855_v36 = vcombine.low %v1589_v20, %v1597_v21  ;;  %v12872_v38 = vcombine.high %v1605_v33, %v1613_v34  ;;  %v1700_v20 = vld [vmem:[#allocation11 + $0x890] sm:$0xff] }
 0x38c   :  { %v1708_v21 = vld [vmem:[#allocation11 + $0x8d0] sm:$0xff] }
 0x38d   :  { %4755 = vmatpush1.bf16.msra.mxu0 %v12757_v45  ;;  %v1621_v45 = vld [vmem:[#allocation11 + $0x618] sm:$0xff] }
 0x38e   :  { %4837 = vmatpush1.bf16.msra.mxu1 %v12759_v46  ;;  %4756 = vmatprep.subr.bf16.mxu0 %v12774_v47  ;;  %v1629_v46 = vld [vmem:[#allocation11 + $0x658] sm:$0xff]  ;;  %v12869_v47 = vcombine.low %v1604_v31, %v1612_v32  ;;  %v12966_v31 = vcombine.high %v1700_v20, %v1708_v21  ;;  %v1716_v32 = vld [vmem:[#allocation11 + $0x910] sm:$0xff] }
 0x38f   :  { %4838 = vmatprep.subr.bf16.mxu1 %v12776_v48  ;;  %v12871_v48 = vcombine.low %v1605_v33, %v1613_v34  ;;  %v12888_v51 = vcombine.high %v1621_v45, %v1629_v46  ;;  %v1724_v33 = vld [vmem:[#allocation11 + $0x950] sm:$0xff] }
 0x391   :  { %4757 = vmatpush1.bf16.msra.mxu0 %v12773_v54  ;;  %v1637_v54 = vld [vmem:[#allocation11 + $0x698] sm:$0xff] }
 0x392   :  { %4839 = vmatpush1.bf16.msra.mxu1 %v12775_v55  ;;  %4758 = vmatprep.subr.bf16.mxu0 %v12790_v13  ;;  %v1645_v55 = vld [vmem:[#allocation11 + $0x6d8] sm:$0xff]  ;;  %v12885_v13 = vcombine.low %v1620_v39, %v1628_v43  ;;  %v12982_v39 = vcombine.high %v1716_v32, %v1724_v33 }
 0x393   :  { %4840 = vmatprep.subr.bf16.mxu1 %v12792_v56  ;;  %v12887_v56 = vcombine.low %v1621_v45, %v1629_v46  ;;  %v12904_v58 = vcombine.high %v1637_v54, %v1645_v55  ;;  %v1732_v45 = vld [vmem:[#allocation11 + $0x990] sm:$0xff] }
 0x394   :  { %v1740_v46 = vld [vmem:[#allocation11 + $0x9d0] sm:$0xff] }
 0x395   :  { %4759 = vmatpush1.bf16.msra.mxu0 %v12789_v60  ;;  %v1653_v60 = vld [vmem:[#allocation11 + $0x718] sm:$0xff] }
 0x396   :  { %4841 = vmatpush1.bf16.msra.mxu1 %v12791_v61  ;;  %4760 = vmatprep.subr.bf16.mxu0 %v12806_v62  ;;  %v1661_v61 = vld [vmem:[#allocation11 + $0x758] sm:$0xff]  ;;  %v12901_v62 = vcombine.low %v1636_v52, %v1644_v53  ;;  %v12998_v52 = vcombine.high %v1732_v45, %v1740_v46 }
 0x397   :  { %4842 = vmatprep.subr.bf16.mxu1 %v12808_v63  ;;  %v12903_v63 = vcombine.low %v1637_v54, %v1645_v55  ;;  %v12920_v1 = vcombine.high %v1653_v60, %v1661_v61  ;;  %v1748_v54 = vld [vmem:[#allocation11 + $0xa10] sm:$0xff] }
 0x398   :  { %v1756_v55 = vld [vmem:[#allocation11 + $0xa50] sm:$0xff] }
 0x399   :  { %4761 = vmatpush1.bf16.msra.mxu0 %v12805_v44  ;;  %v1669_v44 = vld [vmem:[#allocation11 + $0x798] sm:$0xff] }
 0x39a   :  { %4843 = vmatpush1.bf16.msra.mxu1 %v12807_v5  ;;  %4762 = vmatprep.subr.bf16.mxu0 %v12822_v6  ;;  %v1677_v5 = vld [vmem:[#allocation11 + $0x7d8] sm:$0xff]  ;;  %v12917_v6 = vcombine.low %v1652_v59, %v1660_v25  ;;  %v13014_v59 = vcombine.high %v1748_v54, %v1756_v55 }
 0x39b   :  { %4844 = vmatprep.subr.bf16.mxu1 %v12824_v7  ;;  %v12919_v7 = vcombine.low %v1653_v60, %v1661_v61  ;;  %v12936_v9 = vcombine.high %v1669_v44, %v1677_v5  ;;  %v1764_v60 = vld [vmem:[#allocation11 + $0xa90] sm:$0xff] }
 0x39c   :  { %v1772_v61 = vld [vmem:[#allocation11 + $0xad0] sm:$0xff] }
 0x39d   :  { %4763 = vmatpush1.bf16.msra.mxu0 %v12821_v12  ;;  %v1685_v12 = vld [vmem:[#allocation11 + $0x818] sm:$0xff] }
 0x39e   :  { %4845 = vmatpush1.bf16.msra.mxu1 %v12823_v14  ;;  %4764 = vmatprep.subr.bf16.mxu0 %v12838_v15  ;;  %v1693_v14 = vld [vmem:[#allocation11 + $0x858] sm:$0xff]  ;;  %v12933_v15 = vcombine.low %v1668_v2, %v1676_v4  ;;  %v13030_v2 = vcombine.high %v1764_v60, %v1772_v61 }
 0x39f   :  { %4846 = vmatprep.subr.bf16.mxu1 %v12840_v16  ;;  %v12935_v16 = vcombine.low %v1669_v44, %v1677_v5  ;;  %v12952_v19 = vcombine.high %v1685_v12, %v1693_v14  ;;  %v1780_v44 = vld [vmem:[#allocation11 + $0xb10] sm:$0xff] }
 0x3a0   :  { %v1788_v5 = vld [vmem:[#allocation11 + $0xb50] sm:$0xff] }
 0x3a1   :  { %4765 = vmatpush1.bf16.msra.mxu0 %v12837_v22  ;;  %v12949_v22 = vcombine.low %v1684_v10, %v1692_v11  ;;  %v13046_v10 = vcombine.high %v1780_v44, %v1788_v5 }
 0x3a2   :  { %4847 = vmatpush1.bf16.msra.mxu1 %v12839_v27  ;;  %4766 = vmatprep.subr.bf16.mxu0 %v12854_v28  ;;  %v1701_v27 = vld [vmem:[#allocation11 + $0x898] sm:$0xff] }
 0x3a3   :  { %4848 = vmatprep.subr.bf16.mxu1 %v12856_v29  ;;  %v1709_v28 = vld [vmem:[#allocation11 + $0x8d8] sm:$0xff]  ;;  %v12951_v29 = vcombine.low %v1685_v12, %v1693_v14  ;;  %v1796_v12 = vld [vmem:[#allocation11 + $0xb90] sm:$0xff] }
 0x3a4   :  { %v12968_v34 = vcombine.high %v1701_v27, %v1709_v28  ;;  %v1804_v14 = vld [vmem:[#allocation11 + $0xbd0] sm:$0xff] }
 0x3a5   :  { %4767 = vmatpush1.bf16.msra.mxu0 %v12853_v35  ;;  %v1717_v35 = vld [vmem:[#allocation11 + $0x918] sm:$0xff] }
 0x3a6   :  { %4849 = vmatpush1.bf16.msra.mxu1 %v12855_v36  ;;  %4768 = vmatprep.subr.bf16.mxu0 %v12870_v37  ;;  %v1725_v36 = vld [vmem:[#allocation11 + $0x958] sm:$0xff]  ;;  %v12965_v37 = vcombine.low %v1700_v20, %v1708_v21  ;;  %v13062_v20 = vcombine.high %v1796_v12, %v1804_v14 }
 0x3a7   :  { %4850 = vmatprep.subr.bf16.mxu1 %v12872_v38  ;;  %v12967_v38 = vcombine.low %v1701_v27, %v1709_v28  ;;  %v12984_v43 = vcombine.high %v1717_v35, %v1725_v36  ;;  %v1820_v27 = vld [vmem:[#allocation11 + $0xc50] sm:$0xff]  ;;  %v1813_v28 = vld [vmem:[#allocation11 + $0xc18] sm:$0xff] }
 0x3a9   :  { %4769 = vmatpush1.bf16.msra.mxu0 %v12869_v47  ;;  %v1733_v47 = vld [vmem:[#allocation11 + $0x998] sm:$0xff] }
 0x3aa   :  { %4851 = vmatpush1.bf16.msra.mxu1 %v12871_v48  ;;  %4770 = vmatprep.subr.bf16.mxu0 %v12886_v49  ;;  %v1741_v48 = vld [vmem:[#allocation11 + $0x9d8] sm:$0xff]  ;;  %v12981_v49 = vcombine.low %v1716_v32, %v1724_v33 }
 0x3ab   :  { %4852 = vmatprep.subr.bf16.mxu1 %v12888_v51  ;;  %v12983_v51 = vcombine.low %v1717_v35, %v1725_v36  ;;  %v13000_v53 = vcombine.high %v1733_v47, %v1741_v48  ;;  %v1828_v35 = vld [vmem:[#allocation11 + $0xc90] sm:$0xff] }
 0x3ac   :  { %v1836_v36 = vld [vmem:[#allocation11 + $0xcd0] sm:$0xff] }
 0x3ad   :  { %4771 = vmatpush1.bf16.msra.mxu0 %v12885_v13  ;;  %v1749_v13 = vld [vmem:[#allocation11 + $0xa18] sm:$0xff] }
 0x3ae   :  { %4853 = vmatpush1.bf16.msra.mxu1 %v12887_v56  ;;  %4772 = vmatprep.subr.bf16.mxu0 %v12902_v57  ;;  %v1757_v56 = vld [vmem:[#allocation11 + $0xa58] sm:$0xff]  ;;  %v12997_v57 = vcombine.low %v1732_v45, %v1740_v46  ;;  %v13094_v45 = vcombine.high %v1828_v35, %v1836_v36 }
 0x3af   :  { %4854 = vmatprep.subr.bf16.mxu1 %v12904_v58  ;;  %v12999_v58 = vcombine.low %v1733_v47, %v1741_v48  ;;  %v13016_v25 = vcombine.high %v1749_v13, %v1757_v56  ;;  %v1844_v47 = vld [vmem:[#allocation11 + $0xd10] sm:$0xff] }
 0x3b0   :  { %v1852_v48 = vld [vmem:[#allocation11 + $0xd50] sm:$0xff] }
 0x3b1   :  { %4773 = vmatpush1.bf16.msra.mxu0 %v12901_v62  ;;  %v1765_v62 = vld [vmem:[#allocation11 + $0xa98] sm:$0xff] }
 0x3b2   :  { %4855 = vmatpush1.bf16.msra.mxu1 %v12903_v63  ;;  %4774 = vmatprep.subr.bf16.mxu0 %v12918_v18  ;;  %v1773_v63 = vld [vmem:[#allocation11 + $0xad8] sm:$0xff]  ;;  %v13013_v18 = vcombine.low %v1748_v54, %v1756_v55  ;;  %v13110_v54 = vcombine.high %v1844_v47, %v1852_v48 }
 0x3b3   :  { %4856 = vmatprep.subr.bf16.mxu1 %v12920_v1  ;;  %v13015_v1 = vcombine.low %v1749_v13, %v1757_v56  ;;  %v13032_v4 = vcombine.high %v1765_v62, %v1773_v63  ;;  %v1860_v13 = vld [vmem:[#allocation11 + $0xd90] sm:$0xff] }
 0x3b4   :  { %v1868_v56 = vld [vmem:[#allocation11 + $0xdd0] sm:$0xff] }
 0x3b5   :  { %4775 = vmatpush1.bf16.msra.mxu0 %v12917_v6  ;;  %v1781_v6 = vld [vmem:[#allocation11 + $0xb18] sm:$0xff] }
 0x3b6   :  { %4857 = vmatpush1.bf16.msra.mxu1 %v12919_v7  ;;  %4776 = vmatprep.subr.bf16.mxu0 %v12934_v8  ;;  %v1789_v7 = vld [vmem:[#allocation11 + $0xb58] sm:$0xff]  ;;  %v13029_v8 = vcombine.low %v1764_v60, %v1772_v61  ;;  %v13126_v60 = vcombine.high %v1860_v13, %v1868_v56 }
 0x3b7   :  { %4858 = vmatprep.subr.bf16.mxu1 %v12936_v9  ;;  %v13031_v9 = vcombine.low %v1765_v62, %v1773_v63  ;;  %v13048_v11 = vcombine.high %v1781_v6, %v1789_v7  ;;  %v1876_v62 = vld [vmem:[#allocation11 + $0xe10] sm:$0xff] }
 0x3b8   :  { %v1884_v63 = vld [vmem:[#allocation11 + $0xe50] sm:$0xff] }
 0x3b9   :  { %4777 = vmatpush1.bf16.msra.mxu0 %v12933_v15  ;;  %v1797_v15 = vld [vmem:[#allocation11 + $0xb98] sm:$0xff] }
 0x3ba   :  { %4859 = vmatpush1.bf16.msra.mxu1 %v12935_v16  ;;  %4787 = vmatprep.subr.bf16.mxu0 %v12950_v17  ;;  %v1805_v16 = vld [vmem:[#allocation11 + $0xbd8] sm:$0xff]  ;;  %v13045_v17 = vcombine.low %v1780_v44, %v1788_v5  ;;  %v13142_v44 = vcombine.high %v1876_v62, %v1884_v63 }
 0x3bb   :  { %4869 = vmatprep.subr.bf16.mxu1 %v12952_v19  ;;  %v13047_v19 = vcombine.low %v1781_v6, %v1789_v7  ;;  %v13064_v21 = vcombine.high %v1797_v15, %v1805_v16  ;;  %v13063_v32 = vcombine.low %v1797_v15, %v1805_v16  ;;  %v1892_v6 = vld [vmem:[#allocation11 + $0xe90] sm:$0xff] }
 0x3bc   :  { %4779 = vmatmul.mubr.bf16.vlgmr.msra.gmra.mrb[12].mxu0 %v16574_v41  ;;  %v1900_v7 = vld [vmem:[#allocation11 + $0xed0] sm:$0xff] }
 0x3bd   :  { %4861 = vmatmul.mubr.bf16.vlgmr.msra.gmra.mrb[12].mxu1 %v16574_v41  ;;  %4788 = vmatpush1.bf16.msra.mxu0 %v12949_v22  ;;  %v1812_v22 = vld [vmem:[#allocation11 + $0xc10] sm:$0xff] }
 0x3be   :  { %4819 = vmatprep.mubr.bf16.mxu0 %v16578_v50  ;;  %4870 = vmatpush1.bf16.msra.mxu1 %v12951_v29  ;;  %v1821_v29 = vld [vmem:[#allocation11 + $0xc58] sm:$0xff]  ;;  %v13078_v33 = vcombine.high %v1812_v22, %v1820_v27  ;;  %v1908_v15 = vld [vmem:[#allocation11 + $0xf10] sm:$0xff] }
 0x3bf   :  { %4901 = vmatprep.mubr.bf16.mxu1 %v16578_v50  ;;  %4789 = vmatprep.subr.bf16.mxu0 %v12966_v31  ;;  %v13061_v31 = vcombine.low %v1796_v12, %v1804_v14  ;;  %v13158_v12 = vcombine.high %v1892_v6, %v1900_v7  ;;  %v1916_v16 = vld [vmem:[#allocation11 + $0xf50] sm:$0xff] }
 0x3c0   :  { %4871 = vmatprep.subr.bf16.mxu1 %v12968_v34  ;;  %v13080_v34 = vcombine.high %v1813_v28, %v1821_v29 }
 0x3c1   :  { %4790 = vmatpush1.bf16.msra.mxu0 %v12965_v37  ;;  %v1829_v37 = vld [vmem:[#allocation11 + $0xc98] sm:$0xff] }
 0x3c2   :  { %4872 = vmatpush1.bf16.msra.mxu1 %v12967_v38  ;;  %4791 = vmatprep.subr.bf16.mxu0 %v12982_v39  ;;  %v1837_v38 = vld [vmem:[#allocation11 + $0xcd8] sm:$0xff]  ;;  %v13077_v39 = vcombine.low %v1812_v22, %v1820_v27  ;;  %v13174_v22 = vcombine.high %v1908_v15, %v1916_v16 }
 0x3c3   :  { %4873 = vmatprep.subr.bf16.mxu1 %v12984_v43  ;;  %v13079_v43 = vcombine.low %v1813_v28, %v1821_v29  ;;  %v13096_v46 = vcombine.high %v1829_v37, %v1837_v38  ;;  %v1924_v28 = vld [vmem:[#allocation11 + $0xf90] sm:$0xff] }
 0x3c4   :  { %v1932_v29 = vld [vmem:[#allocation11 + $0xfd0] sm:$0xff] }
 0x3c5   :  { %4792 = vmatpush1.bf16.msra.mxu0 %v12981_v49  ;;  %v1845_v49 = vld [vmem:[#allocation11 + $0xd18] sm:$0xff] }
 0x3c6   :  { %4874 = vmatpush1.bf16.msra.mxu1 %v12983_v51  ;;  %4793 = vmatprep.subr.bf16.mxu0 %v12998_v52  ;;  %v1853_v51 = vld [vmem:[#allocation11 + $0xd58] sm:$0xff]  ;;  %v13093_v52 = vcombine.low %v1828_v35, %v1836_v36  ;;  %v13190_v35 = vcombine.high %v1924_v28, %v1932_v29 }
 0x3c7   :  { %4875 = vmatprep.subr.bf16.mxu1 %v13000_v53  ;;  %v13095_v53 = vcombine.low %v1829_v37, %v1837_v38  ;;  %v13112_v55 = vcombine.high %v1845_v49, %v1853_v51  ;;  %v1430_v37 = vld [vmem:[#allocation11 + $0x20] sm:$0xff] }
 0x3c8   :  { %v1438_v38 = vld [vmem:[#allocation11 + $0x60] sm:$0xff] }
 0x3c9   :  { %4794 = vmatpush1.bf16.msra.mxu0 %v12997_v57  ;;  %v1861_v57 = vld [vmem:[#allocation11 + $0xd98] sm:$0xff] }
 0x3ca   :  { %4876 = vmatpush1.bf16.msra.mxu1 %v12999_v58  ;;  %4795 = vmatprep.subr.bf16.mxu0 %v13014_v59  ;;  %v1869_v58 = vld [vmem:[#allocation11 + $0xdd8] sm:$0xff]  ;;  %v13109_v59 = vcombine.low %v1844_v47, %v1852_v48  ;;  %v12698_v47 = vcombine.high %v1430_v37, %v1438_v38 }
 0x3cb   :  { %4877 = vmatprep.subr.bf16.mxu1 %v13016_v25  ;;  %v13111_v25 = vcombine.low %v1845_v49, %v1853_v51  ;;  %v13128_v61 = vcombine.high %v1861_v57, %v1869_v58  ;;  %v1446_v49 = vld [vmem:[#allocation11 + $0xa0] sm:$0xff] }
 0x3cc   :  { %v1454_v51 = vld [vmem:[#allocation11 + $0xe0] sm:$0xff] }
 0x3cd   :  { %4796 = vmatpush1.bf16.msra.mxu0 %v13013_v18  ;;  %v1877_v18 = vld [vmem:[#allocation11 + $0xe18] sm:$0xff] }
 0x3ce   :  { %4878 = vmatpush1.bf16.msra.mxu1 %v13015_v1  ;;  %4797 = vmatprep.subr.bf16.mxu0 %v13030_v2  ;;  %v1885_v1 = vld [vmem:[#allocation11 + $0xe58] sm:$0xff]  ;;  %v13125_v2 = vcombine.low %v1860_v13, %v1868_v56  ;;  %v12714_v13 = vcombine.high %v1446_v49, %v1454_v51  ;;  %v1462_v56 = vld [vmem:[#allocation11 + $0x120] sm:$0xff] }
 0x3cf   :  { %4879 = vmatprep.subr.bf16.mxu1 %v13032_v4  ;;  %v13127_v4 = vcombine.low %v1861_v57, %v1869_v58  ;;  %v13144_v5 = vcombine.high %v1877_v18, %v1885_v1  ;;  %v1470_v57 = vld [vmem:[#allocation11 + $0x160] sm:$0xff] }
 0x3d1   :  { %4798 = vmatpush1.bf16.msra.mxu0 %v13029_v8  ;;  %v1893_v8 = vld [vmem:[#allocation11 + $0xe98] sm:$0xff] }
 0x3d2   :  { %4880 = vmatpush1.bf16.msra.mxu1 %v13031_v9  ;;  %4799 = vmatprep.subr.bf16.mxu0 %v13046_v10  ;;  %v1901_v9 = vld [vmem:[#allocation11 + $0xed8] sm:$0xff]  ;;  %v13141_v10 = vcombine.low %v1876_v62, %v1884_v63  ;;  %v12730_v62 = vcombine.high %v1462_v56, %v1470_v57 }
 0x3d3   :  { %4881 = vmatprep.subr.bf16.mxu1 %v13048_v11  ;;  %v13143_v11 = vcombine.low %v1877_v18, %v1885_v1  ;;  %v13160_v14 = vcombine.high %v1893_v8, %v1901_v9  ;;  %v1478_v18 = vld [vmem:[#allocation11 + $0x1a0] sm:$0xff] }
 0x3d4   :  { %v1486_v1 = vld [vmem:[#allocation11 + $0x1e0] sm:$0xff] }
 0x3d5   :  { %4800 = vmatpush1.bf16.msra.mxu0 %v13045_v17  ;;  %v1909_v17 = vld [vmem:[#allocation11 + $0xf18] sm:$0xff] }
 0x3d6   :  { %4882 = vmatpush1.bf16.msra.mxu1 %v13047_v19  ;;  %4801 = vmatprep.subr.bf16.mxu0 %v13062_v20  ;;  %v1917_v19 = vld [vmem:[#allocation11 + $0xf58] sm:$0xff]  ;;  %v13157_v20 = vcombine.low %v1892_v6, %v1900_v7  ;;  %v12746_v6 = vcombine.high %v1478_v18, %v1486_v1 }
 0x3d7   :  { %4883 = vmatprep.subr.bf16.mxu1 %v13064_v21  ;;  %v13159_v21 = vcombine.low %v1893_v8, %v1901_v9  ;;  %v13176_v27 = vcombine.high %v1909_v17, %v1917_v19  ;;  %v1494_v8 = vld [vmem:[#allocation11 + $0x220] sm:$0xff] }
 0x3d8   :  { %v1502_v9 = vld [vmem:[#allocation11 + $0x260] sm:$0xff] }
 0x3d9   :  { %4802 = vmatpush1.bf16.msra.mxu0 %v13061_v31  ;;  %v1925_v31 = vld [vmem:[#allocation11 + $0xf98] sm:$0xff] }
 0x3da   :  { %4884 = vmatpush1.bf16.msra.mxu1 %v13063_v32  ;;  %4803 = vmatprep.subr.bf16.mxu0 %v13078_v33  ;;  %v1933_v32 = vld [vmem:[#allocation11 + $0xfd8] sm:$0xff]  ;;  %v13173_v33 = vcombine.low %v1908_v15, %v1916_v16  ;;  %v12762_v15 = vcombine.high %v1494_v8, %v1502_v9 }
 0x3db   :  { %4885 = vmatprep.subr.bf16.mxu1 %v13080_v34  ;;  %v13175_v34 = vcombine.low %v1909_v17, %v1917_v19  ;;  %v13192_v36 = vcombine.high %v1925_v31, %v1933_v32  ;;  %v1510_v17 = vld [vmem:[#allocation11 + $0x2a0] sm:$0xff] }
 0x3dc   :  { %v1518_v19 = vld [vmem:[#allocation11 + $0x2e0] sm:$0xff] }
 0x3dd   :  { %4804 = vmatpush1.bf16.msra.mxu0 %v13077_v39  ;;  %v1431_v39 = vld [vmem:[#allocation11 + $0x28] sm:$0xff] }
 0x3de   :  { %4886 = vmatpush1.bf16.msra.mxu1 %v13079_v43  ;;  %4805 = vmatprep.subr.bf16.mxu0 %v13094_v45  ;;  %v1439_v43 = vld [vmem:[#allocation11 + $0x68] sm:$0xff]  ;;  %v13189_v45 = vcombine.low %v1924_v28, %v1932_v29  ;;  %v12778_v28 = vcombine.high %v1510_v17, %v1518_v19 }
 0x3df   :  { %4887 = vmatprep.subr.bf16.mxu1 %v13096_v46  ;;  %v13191_v46 = vcombine.low %v1925_v31, %v1933_v32  ;;  %v12700_v48 = vcombine.high %v1431_v39, %v1439_v43  ;;  %v1526_v31 = vld [vmem:[#allocation11 + $0x320] sm:$0xff] }
 0x3e0   :  { %v1534_v32 = vld [vmem:[#allocation11 + $0x360] sm:$0xff] }
 0x3e1   :  { %4806 = vmatpush1.bf16.msra.mxu0 %v13093_v52  ;;  %v12697_v52 = vcombine.low %v1430_v37, %v1438_v38  ;;  %v12794_v37 = vcombine.high %v1526_v31, %v1534_v32 }
 0x3e2   :  { %4888 = vmatpush1.bf16.msra.mxu1 %v13095_v53  ;;  %4807 = vmatprep.subr.bf16.mxu0 %v13110_v54  ;;  %v1447_v53 = vld [vmem:[#allocation11 + $0xa8] sm:$0xff] }
 0x3e3   :  { %4889 = vmatprep.subr.bf16.mxu1 %v13112_v55  ;;  %v1455_v54 = vld [vmem:[#allocation11 + $0xe8] sm:$0xff]  ;;  %v12699_v55 = vcombine.low %v1431_v39, %v1439_v43  ;;  %v1542_v39 = vld [vmem:[#allocation11 + $0x3a0] sm:$0xff] }
 0x3e4   :  { %v12716_v58 = vcombine.high %v1447_v53, %v1455_v54  ;;  %v1550_v43 = vld [vmem:[#allocation11 + $0x3e0] sm:$0xff] }
 0x3e5   :  { %4808 = vmatpush1.bf16.msra.mxu0 %v13109_v59  ;;  %v1463_v59 = vld [vmem:[#allocation11 + $0x128] sm:$0xff] }
 0x3e6   :  { %4890 = vmatpush1.bf16.msra.mxu1 %v13111_v25  ;;  %4809 = vmatprep.subr.bf16.mxu0 %v13126_v60  ;;  %v1471_v25 = vld [vmem:[#allocation11 + $0x168] sm:$0xff]  ;;  %v12713_v60 = vcombine.low %v1446_v49, %v1454_v51  ;;  %v12810_v49 = vcombine.high %v1542_v39, %v1550_v43 }
 0x3e7   :  { %4891 = vmatprep.subr.bf16.mxu1 %v13128_v61  ;;  %v12715_v61 = vcombine.low %v1447_v53, %v1455_v54  ;;  %v12732_v63 = vcombine.high %v1463_v59, %v1471_v25  ;;  %v1566_v53 = vld [vmem:[#allocation11 + $0x460] sm:$0xff]  ;;  %v1559_v54 = vld [vmem:[#allocation11 + $0x428] sm:$0xff] }
 0x3e9   :  { %4810 = vmatpush1.bf16.msra.mxu0 %v13125_v2  ;;  %v1479_v2 = vld [vmem:[#allocation11 + $0x1a8] sm:$0xff] }
 0x3ea   :  { %4892 = vmatpush1.bf16.msra.mxu1 %v13127_v4  ;;  %4811 = vmatprep.subr.bf16.mxu0 %v13142_v44  ;;  %v1487_v4 = vld [vmem:[#allocation11 + $0x1e8] sm:$0xff]  ;;  %v12729_v44 = vcombine.low %v1462_v56, %v1470_v57 }
 0x3eb   :  { %4893 = vmatprep.subr.bf16.mxu1 %v13144_v5  ;;  %v12731_v5 = vcombine.low %v1463_v59, %v1471_v25  ;;  %v12748_v7 = vcombine.high %v1479_v2, %v1487_v4  ;;  %v1574_v59 = vld [vmem:[#allocation11 + $0x4a0] sm:$0xff] }
 0x3ec   :  { %v1582_v25 = vld [vmem:[#allocation11 + $0x4e0] sm:$0xff] }
 0x3ed   :  { %4812 = vmatpush1.bf16.msra.mxu0 %v13141_v10  ;;  %v1495_v10 = vld [vmem:[#allocation11 + $0x228] sm:$0xff] }
 0x3ee   :  { %4894 = vmatpush1.bf16.msra.mxu1 %v13143_v11  ;;  %4813 = vmatprep.subr.bf16.mxu0 %v13158_v12  ;;  %v1503_v11 = vld [vmem:[#allocation11 + $0x268] sm:$0xff]  ;;  %v12745_v12 = vcombine.low %v1478_v18, %v1486_v1  ;;  %v12842_v18 = vcombine.high %v1574_v59, %v1582_v25 }
 0x3ef   :  { %4895 = vmatprep.subr.bf16.mxu1 %v13160_v14  ;;  %v12747_v14 = vcombine.low %v1479_v2, %v1487_v4  ;;  %v12764_v16 = vcombine.high %v1495_v10, %v1503_v11  ;;  %v1590_v2 = vld [vmem:[#allocation11 + $0x520] sm:$0xff] }
 0x3f0   :  { %v1598_v4 = vld [vmem:[#allocation11 + $0x560] sm:$0xff] }
 0x3f1   :  { %4814 = vmatpush1.bf16.msra.mxu0 %v13157_v20  ;;  %v1511_v20 = vld [vmem:[#allocation11 + $0x2a8] sm:$0xff] }
 0x3f2   :  { %4896 = vmatpush1.bf16.msra.mxu1 %v13159_v21  ;;  %4815 = vmatprep.subr.bf16.mxu0 %v13174_v22  ;;  %v1519_v21 = vld [vmem:[#allocation11 + $0x2e8] sm:$0xff]  ;;  %v12761_v22 = vcombine.low %v1494_v8, %v1502_v9  ;;  %v12858_v8 = vcombine.high %v1590_v2, %v1598_v4 }
 0x3f3   :  { %4897 = vmatprep.subr.bf16.mxu1 %v13176_v27  ;;  %v12763_v27 = vcombine.low %v1495_v10, %v1503_v11  ;;  %v12780_v29 = vcombine.high %v1511_v20, %v1519_v21  ;;  %v1606_v10 = vld [vmem:[#allocation11 + $0x5a0] sm:$0xff] }
 0x3f4   :  { %v1614_v11 = vld [vmem:[#allocation11 + $0x5e0] sm:$0xff] }
 0x3f5   :  { %4816 = vmatpush1.bf16.msra.mxu0 %v13173_v33  ;;  %v1527_v33 = vld [vmem:[#allocation11 + $0x328] sm:$0xff] }
 0x3f6   :  { %4898 = vmatpush1.bf16.msra.mxu1 %v13175_v34  ;;  %4817 = vmatprep.subr.bf16.mxu0 %v13190_v35  ;;  %v1535_v34 = vld [vmem:[#allocation11 + $0x368] sm:$0xff]  ;;  %v12777_v35 = vcombine.low %v1510_v17, %v1518_v19  ;;  %v12874_v17 = vcombine.high %v1606_v10, %v1614_v11 }
 0x3f7   :  { %4899 = vmatprep.subr.bf16.mxu1 %v13192_v36  ;;  %v12779_v36 = vcombine.low %v1511_v20, %v1519_v21  ;;  %v12796_v38 = vcombine.high %v1527_v33, %v1535_v34  ;;  %v1622_v20 = vld [vmem:[#allocation11 + $0x620] sm:$0xff] }
 0x3f8   :  { %v1630_v21 = vld [vmem:[#allocation11 + $0x660] sm:$0xff] }
 0x3f9   :  { %4818 = vmatpush1.bf16.msra.mxu0 %v13189_v45  ;;  %v1543_v45 = vld [vmem:[#allocation11 + $0x3a8] sm:$0xff] }
 0x3fa   :  { %4900 = vmatpush1.bf16.msra.mxu1 %v13191_v46  ;;  %4910 = vmatprep.subr.bf16.mxu0 %v12698_v47  ;;  %v1551_v46 = vld [vmem:[#allocation11 + $0x3e8] sm:$0xff]  ;;  %v12793_v47 = vcombine.low %v1526_v31, %v1534_v32  ;;  %v12890_v31 = vcombine.high %v1622_v20, %v1630_v21 }
 0x3fb   :  { %4992 = vmatprep.subr.bf16.mxu1 %v12700_v48  ;;  %v12795_v48 = vcombine.low %v1527_v33, %v1535_v34  ;;  %v12812_v51 = vcombine.high %v1543_v45, %v1551_v46  ;;  %v12811_v56 = vcombine.low %v1543_v45, %v1551_v46  ;;  %v1638_v33 = vld [vmem:[#allocation11 + $0x6a0] sm:$0xff] }
 0x3fc   :  { %4820 = vmatmul.mubr.bf16.vlgmr.msra.gmra.mrb[12].mxu0 %v16587_v3  ;;  %v1646_v34 = vld [vmem:[#allocation11 + $0x6e0] sm:$0xff] }
 0x3fd   :  { %4902 = vmatmul.mubr.bf16.vlgmr.msra.gmra.mrb[12].mxu1 %v16587_v3  ;;  %4911 = vmatpush1.bf16.msra.mxu0 %v12697_v52  ;;  %v1558_v52 = vld [vmem:[#allocation11 + $0x420] sm:$0xff] }
 0x3fe   :  { %4942 = vmatprep.mubr.bf16.mxu0 %v16572_v40  ;;  %4993 = vmatpush1.bf16.msra.mxu1 %v12699_v55  ;;  %v1567_v55 = vld [vmem:[#allocation11 + $0x468] sm:$0xff]  ;;  %v12826_v57 = vcombine.high %v1558_v52, %v1566_v53  ;;  %v1654_v45 = vld [vmem:[#allocation11 + $0x720] sm:$0xff] }
 0x3ff   :  { %5024 = vmatprep.mubr.bf16.mxu1 %v16572_v40  ;;  %4912 = vmatprep.subr.bf16.mxu0 %v12714_v13  ;;  %v12809_v13 = vcombine.low %v1542_v39, %v1550_v43  ;;  %v12906_v39 = vcombine.high %v1638_v33, %v1646_v34  ;;  %v1662_v46 = vld [vmem:[#allocation11 + $0x760] sm:$0xff] }
 0x400   :  { %4994 = vmatprep.subr.bf16.mxu1 %v12716_v58  ;;  %v12828_v58 = vcombine.high %v1559_v54, %v1567_v55 }
 0x401   :  { %4913 = vmatpush1.bf16.msra.mxu0 %v12713_v60  ;;  %v1575_v60 = vld [vmem:[#allocation11 + $0x4a8] sm:$0xff] }
 0x402   :  { %4995 = vmatpush1.bf16.msra.mxu1 %v12715_v61  ;;  %4914 = vmatprep.subr.bf16.mxu0 %v12730_v62  ;;  %v1583_v61 = vld [vmem:[#allocation11 + $0x4e8] sm:$0xff]  ;;  %v12825_v62 = vcombine.low %v1558_v52, %v1566_v53  ;;  %v12922_v52 = vcombine.high %v1654_v45, %v1662_v46 }
 0x403   :  { %4996 = vmatprep.subr.bf16.mxu1 %v12732_v63  ;;  %v12827_v63 = vcombine.low %v1559_v54, %v1567_v55  ;;  %v12844_v1 = vcombine.high %v1575_v60, %v1583_v61  ;;  %v1670_v54 = vld [vmem:[#allocation11 + $0x7a0] sm:$0xff] }
 0x404   :  { %v1678_v55 = vld [vmem:[#allocation11 + $0x7e0] sm:$0xff] }
 0x405   :  { %4915 = vmatpush1.bf16.msra.mxu0 %v12729_v44  ;;  %v1591_v44 = vld [vmem:[#allocation11 + $0x528] sm:$0xff] }
 0x406   :  { %4997 = vmatpush1.bf16.msra.mxu1 %v12731_v5  ;;  %4916 = vmatprep.subr.bf16.mxu0 %v12746_v6  ;;  %v1599_v5 = vld [vmem:[#allocation11 + $0x568] sm:$0xff]  ;;  %v12841_v6 = vcombine.low %v1574_v59, %v1582_v25  ;;  %v12938_v59 = vcombine.high %v1670_v54, %v1678_v55 }
 0x407   :  { %4998 = vmatprep.subr.bf16.mxu1 %v12748_v7  ;;  %v12843_v7 = vcombine.low %v1575_v60, %v1583_v61  ;;  %v12860_v9 = vcombine.high %v1591_v44, %v1599_v5  ;;  %v1686_v60 = vld [vmem:[#allocation11 + $0x820] sm:$0xff] }
 0x408   :  { %v1694_v61 = vld [vmem:[#allocation11 + $0x860] sm:$0xff] }
 0x409   :  { %4917 = vmatpush1.bf16.msra.mxu0 %v12745_v12  ;;  %v1607_v12 = vld [vmem:[#allocation11 + $0x5a8] sm:$0xff] }
 0x40a   :  { %4999 = vmatpush1.bf16.msra.mxu1 %v12747_v14  ;;  %4918 = vmatprep.subr.bf16.mxu0 %v12762_v15  ;;  %v1615_v14 = vld [vmem:[#allocation11 + $0x5e8] sm:$0xff]  ;;  %v12857_v15 = vcombine.low %v1590_v2, %v1598_v4  ;;  %v12954_v2 = vcombine.high %v1686_v60, %v1694_v61 }
 0x40b   :  { %5000 = vmatprep.subr.bf16.mxu1 %v12764_v16  ;;  %v12859_v16 = vcombine.low %v1591_v44, %v1599_v5  ;;  %v12876_v19 = vcombine.high %v1607_v12, %v1615_v14  ;;  %v1702_v44 = vld [vmem:[#allocation11 + $0x8a0] sm:$0xff] }
 0x40c   :  { %v1710_v5 = vld [vmem:[#allocation11 + $0x8e0] sm:$0xff] }
 0x40d   :  { %4919 = vmatpush1.bf16.msra.mxu0 %v12761_v22  ;;  %v1623_v22 = vld [vmem:[#allocation11 + $0x628] sm:$0xff] }
 0x40e   :  { %5001 = vmatpush1.bf16.msra.mxu1 %v12763_v27  ;;  %4920 = vmatprep.subr.bf16.mxu0 %v12778_v28  ;;  %v1631_v27 = vld [vmem:[#allocation11 + $0x668] sm:$0xff]  ;;  %v12873_v28 = vcombine.low %v1606_v10, %v1614_v11  ;;  %v12970_v10 = vcombine.high %v1702_v44, %v1710_v5  ;;  %v1718_v11 = vld [vmem:[#allocation11 + $0x920] sm:$0xff] }
 0x40f   :  { %5002 = vmatprep.subr.bf16.mxu1 %v12780_v29  ;;  %v12875_v29 = vcombine.low %v1607_v12, %v1615_v14  ;;  %v12892_v32 = vcombine.high %v1623_v22, %v1631_v27  ;;  %v1726_v12 = vld [vmem:[#allocation11 + $0x960] sm:$0xff] }
 0x411   :  { %4921 = vmatpush1.bf16.msra.mxu0 %v12777_v35  ;;  %v1639_v35 = vld [vmem:[#allocation11 + $0x6a8] sm:$0xff] }
 0x412   :  { %5003 = vmatpush1.bf16.msra.mxu1 %v12779_v36  ;;  %4922 = vmatprep.subr.bf16.mxu0 %v12794_v37  ;;  %v1647_v36 = vld [vmem:[#allocation11 + $0x6e8] sm:$0xff]  ;;  %v12889_v37 = vcombine.low %v1622_v20, %v1630_v21  ;;  %v12986_v20 = vcombine.high %v1718_v11, %v1726_v12 }
 0x413   :  { %5004 = vmatprep.subr.bf16.mxu1 %v12796_v38  ;;  %v12891_v38 = vcombine.low %v1623_v22, %v1631_v27  ;;  %v12908_v43 = vcombine.high %v1639_v35, %v1647_v36  ;;  %v1734_v22 = vld [vmem:[#allocation11 + $0x9a0] sm:$0xff] }
 0x414   :  { %v1742_v27 = vld [vmem:[#allocation11 + $0x9e0] sm:$0xff] }
 0x415   :  { %4923 = vmatpush1.bf16.msra.mxu0 %v12793_v47  ;;  %v1655_v47 = vld [vmem:[#allocation11 + $0x728] sm:$0xff] }
 0x416   :  { %5005 = vmatpush1.bf16.msra.mxu1 %v12795_v48  ;;  %4924 = vmatprep.subr.bf16.mxu0 %v12810_v49  ;;  %v1663_v48 = vld [vmem:[#allocation11 + $0x768] sm:$0xff]  ;;  %v12905_v49 = vcombine.low %v1638_v33, %v1646_v34  ;;  %v13002_v33 = vcombine.high %v1734_v22, %v1742_v27 }
 0x417   :  { %5006 = vmatprep.subr.bf16.mxu1 %v12812_v51  ;;  %v12907_v51 = vcombine.low %v1639_v35, %v1647_v36  ;;  %v12924_v53 = vcombine.high %v1655_v47, %v1663_v48  ;;  %v1750_v35 = vld [vmem:[#allocation11 + $0xa20] sm:$0xff] }
 0x418   :  { %v1758_v36 = vld [vmem:[#allocation11 + $0xa60] sm:$0xff] }
 0x419   :  { %4925 = vmatpush1.bf16.msra.mxu0 %v12809_v13  ;;  %v1671_v13 = vld [vmem:[#allocation11 + $0x7a8] sm:$0xff] }
 0x41a   :  { %5007 = vmatpush1.bf16.msra.mxu1 %v12811_v56  ;;  %4926 = vmatprep.subr.bf16.mxu0 %v12826_v57  ;;  %v1679_v56 = vld [vmem:[#allocation11 + $0x7e8] sm:$0xff]  ;;  %v12921_v57 = vcombine.low %v1654_v45, %v1662_v46  ;;  %v13018_v45 = vcombine.high %v1750_v35, %v1758_v36 }
 0x41b   :  { %5008 = vmatprep.subr.bf16.mxu1 %v12828_v58  ;;  %v12923_v58 = vcombine.low %v1655_v47, %v1663_v48  ;;  %v12940_v25 = vcombine.high %v1671_v13, %v1679_v56  ;;  %v1766_v47 = vld [vmem:[#allocation11 + $0xaa0] sm:$0xff] }
 0x41c   :  { %v1774_v48 = vld [vmem:[#allocation11 + $0xae0] sm:$0xff] }
 0x41d   :  { %4927 = vmatpush1.bf16.msra.mxu0 %v12825_v62  ;;  %v1687_v62 = vld [vmem:[#allocation11 + $0x828] sm:$0xff] }
 0x41e   :  { %5009 = vmatpush1.bf16.msra.mxu1 %v12827_v63  ;;  %4928 = vmatprep.subr.bf16.mxu0 %v12842_v18  ;;  %v1695_v63 = vld [vmem:[#allocation11 + $0x868] sm:$0xff]  ;;  %v12937_v18 = vcombine.low %v1670_v54, %v1678_v55  ;;  %v13034_v54 = vcombine.high %v1766_v47, %v1774_v48 }
 0x41f   :  { %5010 = vmatprep.subr.bf16.mxu1 %v12844_v1  ;;  %v12939_v1 = vcombine.low %v1671_v13, %v1679_v56  ;;  %v12956_v4 = vcombine.high %v1687_v62, %v1695_v63  ;;  %v1782_v13 = vld [vmem:[#allocation11 + $0xb20] sm:$0xff] }
 0x420   :  { %v1790_v56 = vld [vmem:[#allocation11 + $0xb60] sm:$0xff] }
 0x421   :  { %4929 = vmatpush1.bf16.msra.mxu0 %v12841_v6  ;;  %v12953_v6 = vcombine.low %v1686_v60, %v1694_v61  ;;  %v13050_v60 = vcombine.high %v1782_v13, %v1790_v56 }
 0x422   :  { %5011 = vmatpush1.bf16.msra.mxu1 %v12843_v7  ;;  %4930 = vmatprep.subr.bf16.mxu0 %v12858_v8  ;;  %v1703_v7 = vld [vmem:[#allocation11 + $0x8a8] sm:$0xff] }
 0x423   :  { %5012 = vmatprep.subr.bf16.mxu1 %v12860_v9  ;;  %v1711_v8 = vld [vmem:[#allocation11 + $0x8e8] sm:$0xff]  ;;  %v12955_v9 = vcombine.low %v1687_v62, %v1695_v63 }
 0x424   :  { %v12972_v14 = vcombine.high %v1703_v7, %v1711_v8 }
 0x425   :  { %4931 = vmatpush1.bf16.msra.mxu0 %v12857_v15  ;;  %v1719_v15 = vld [vmem:[#allocation11 + $0x928] sm:$0xff] }
 0x426   :  { %5013 = vmatpush1.bf16.msra.mxu1 %v12859_v16  ;;  %4932 = vmatprep.subr.bf16.mxu0 %v12874_v17  ;;  %v1727_v16 = vld [vmem:[#allocation11 + $0x968] sm:$0xff]  ;;  %v12969_v17 = vcombine.low %v1702_v44, %v1710_v5 }
 0x427   :  { %5014 = vmatprep.subr.bf16.mxu1 %v12876_v19  ;;  %v12971_v19 = vcombine.low %v1703_v7, %v1711_v8  ;;  %v12988_v21 = vcombine.high %v1719_v15, %v1727_v16  ;;  %v1799_v44 = vld [vmem:[#allocation11 + $0xba8] sm:$0xff]  ;;  %v13049_v8 = vcombine.low %v1782_v13, %v1790_v56 }
 0x428   :  { %v1807_v5 = vld [vmem:[#allocation11 + $0xbe8] sm:$0xff] }
 0x429   :  { %4933 = vmatpush1.bf16.msra.mxu0 %v12873_v28  ;;  %v1735_v28 = vld [vmem:[#allocation11 + $0x9a8] sm:$0xff] }
 0x42a   :  { %5015 = vmatpush1.bf16.msra.mxu1 %v12875_v29  ;;  %4934 = vmatprep.subr.bf16.mxu0 %v12890_v31  ;;  %v1743_v29 = vld [vmem:[#allocation11 + $0x9e8] sm:$0xff]  ;;  %v12985_v31 = vcombine.low %v1718_v11, %v1726_v12 }
 0x42b   :  { %5016 = vmatprep.subr.bf16.mxu1 %v12892_v32  ;;  %v12987_v32 = vcombine.low %v1719_v15, %v1727_v16  ;;  %v13004_v34 = vcombine.high %v1735_v28, %v1743_v29  ;;  %v1814_v15 = vld [vmem:[#allocation11 + $0xc20] sm:$0xff] }
 0x42c   :  { %v1822_v16 = vld [vmem:[#allocation11 + $0xc60] sm:$0xff] }
 0x42d   :  { %4935 = vmatpush1.bf16.msra.mxu0 %v12889_v37  ;;  %v1751_v37 = vld [vmem:[#allocation11 + $0xa28] sm:$0xff] }
 0x42e   :  { %5017 = vmatpush1.bf16.msra.mxu1 %v12891_v38  ;;  %4936 = vmatprep.subr.bf16.mxu0 %v12906_v39  ;;  %v1759_v38 = vld [vmem:[#allocation11 + $0xa68] sm:$0xff]  ;;  %v13001_v39 = vcombine.low %v1734_v22, %v1742_v27  ;;  %v13082_v22 = vcombine.high %v1814_v15, %v1822_v16 }
 0x42f   :  { %5018 = vmatprep.subr.bf16.mxu1 %v12908_v43  ;;  %v13003_v43 = vcombine.low %v1735_v28, %v1743_v29  ;;  %v13020_v46 = vcombine.high %v1751_v37, %v1759_v38  ;;  %v1830_v28 = vld [vmem:[#allocation11 + $0xca0] sm:$0xff] }
 0x430   :  { %v1838_v29 = vld [vmem:[#allocation11 + $0xce0] sm:$0xff] }
 0x431   :  { %4937 = vmatpush1.bf16.msra.mxu0 %v12905_v49  ;;  %v1767_v49 = vld [vmem:[#allocation11 + $0xaa8] sm:$0xff] }
 0x432   :  { %5019 = vmatpush1.bf16.msra.mxu1 %v12907_v51  ;;  %4938 = vmatprep.subr.bf16.mxu0 %v12922_v52  ;;  %v1775_v51 = vld [vmem:[#allocation11 + $0xae8] sm:$0xff]  ;;  %v13017_v52 = vcombine.low %v1750_v35, %v1758_v36  ;;  %v13098_v35 = vcombine.high %v1830_v28, %v1838_v29 }
 0x433   :  { %5020 = vmatprep.subr.bf16.mxu1 %v12924_v53  ;;  %v13019_v53 = vcombine.low %v1751_v37, %v1759_v38  ;;  %v13036_v55 = vcombine.high %v1767_v49, %v1775_v51  ;;  %v1846_v37 = vld [vmem:[#allocation11 + $0xd20] sm:$0xff] }
 0x434   :  { %v1854_v38 = vld [vmem:[#allocation11 + $0xd60] sm:$0xff] }
 0x435   :  { %4939 = vmatpush1.bf16.msra.mxu0 %v12921_v57  ;;  %v1783_v57 = vld [vmem:[#allocation11 + $0xb28] sm:$0xff] }
 0x436   :  { %5021 = vmatpush1.bf16.msra.mxu1 %v12923_v58  ;;  %4940 = vmatprep.subr.bf16.mxu0 %v12938_v59  ;;  %v1791_v58 = vld [vmem:[#allocation11 + $0xb68] sm:$0xff]  ;;  %v13033_v59 = vcombine.low %v1766_v47, %v1774_v48  ;;  %v13114_v47 = vcombine.high %v1846_v37, %v1854_v38 }
 0x437   :  { %5022 = vmatprep.subr.bf16.mxu1 %v12940_v25  ;;  %v13035_v25 = vcombine.low %v1767_v49, %v1775_v51  ;;  %v13052_v63 = vcombine.high %v1783_v57, %v1791_v58  ;;  %v13051_v11 = vcombine.low %v1783_v57, %v1791_v58  ;;  %v1862_v49 = vld [vmem:[#allocation11 + $0xda0] sm:$0xff] }
 0x438   :  { %v1870_v51 = vld [vmem:[#allocation11 + $0xde0] sm:$0xff] }
 0x439   :  { %4941 = vmatpush1.bf16.msra.mxu0 %v12937_v18  ;;  %v1798_v18 = vld [vmem:[#allocation11 + $0xba0] sm:$0xff]  ;;  %v13130_v13 = vcombine.high %v1862_v49, %v1870_v51 }
 0x43a   :  { %5023 = vmatpush1.bf16.msra.mxu1 %v12939_v1  ;;  %4951 = vmatprep.subr.bf16.mxu0 %v12954_v2  ;;  %v1806_v1 = vld [vmem:[#allocation11 + $0xbe0] sm:$0xff] }
 0x43b   :  { %5033 = vmatprep.subr.bf16.mxu1 %v12956_v4  ;;  %v13066_v12 = vcombine.high %v1798_v18, %v1806_v1  ;;  %v1878_v57 = vld [vmem:[#allocation11 + $0xe20] sm:$0xff] }
 0x43c   :  { %4943 = vmatmul.mubr.bf16.vlgmr.msra.gmra.mrb[16].mxu0 %v16574_v41  ;;  %v1886_v58 = vld [vmem:[#allocation11 + $0xe60] sm:$0xff] }
 0x43d   :  { %5025 = vmatmul.mubr.bf16.vlgmr.msra.gmra.mrb[16].mxu1 %v16574_v41  ;;  %4952 = vmatpush1.bf16.msra.mxu0 %v12953_v6 }
 0x43e   :  { %4983 = vmatprep.mubr.bf16.mxu0 %v16578_v50  ;;  %5034 = vmatpush1.bf16.msra.mxu1 %v12955_v9 }
 0x43f   :  { %5065 = vmatprep.mubr.bf16.mxu1 %v16578_v50  ;;  %4953 = vmatprep.subr.bf16.mxu0 %v12970_v10 }
 0x440   :  { %5035 = vmatprep.subr.bf16.mxu1 %v12972_v14  ;;  %v13068_v14 = vcombine.high %v1799_v44, %v1807_v5 }
 0x441   :  { %4954 = vmatpush1.bf16.msra.mxu0 %v12969_v17  ;;  %v1815_v17 = vld [vmem:[#allocation11 + $0xc28] sm:$0xff] }
 0x442   :  { %5036 = vmatpush1.bf16.msra.mxu1 %v12971_v19  ;;  %4955 = vmatprep.subr.bf16.mxu0 %v12986_v20  ;;  %v1823_v19 = vld [vmem:[#allocation11 + $0xc68] sm:$0xff]  ;;  %v13065_v20 = vcombine.low %v1798_v18, %v1806_v1  ;;  %v13146_v18 = vcombine.high %v1878_v57, %v1886_v58 }
 0x443   :  { %5037 = vmatprep.subr.bf16.mxu1 %v12988_v21  ;;  %v13067_v21 = vcombine.low %v1799_v44, %v1807_v5  ;;  %v13084_v27 = vcombine.high %v1815_v17, %v1823_v19  ;;  %v1894_v44 = vld [vmem:[#allocation11 + $0xea0] sm:$0xff] }
 0x444   :  { %v1902_v5 = vld [vmem:[#allocation11 + $0xee0] sm:$0xff] }
 0x445   :  { %4956 = vmatpush1.bf16.msra.mxu0 %v12985_v31  ;;  %v1831_v31 = vld [vmem:[#allocation11 + $0xca8] sm:$0xff] }
 0x446   :  { %5038 = vmatpush1.bf16.msra.mxu1 %v12987_v32  ;;  %4957 = vmatprep.subr.bf16.mxu0 %v13002_v33  ;;  %v1839_v32 = vld [vmem:[#allocation11 + $0xce8] sm:$0xff]  ;;  %v13081_v33 = vcombine.low %v1814_v15, %v1822_v16 }
 0x447   :  { %5039 = vmatprep.subr.bf16.mxu1 %v13004_v34  ;;  %v13083_v34 = vcombine.low %v1815_v17, %v1823_v19  ;;  %v13100_v36 = vcombine.high %v1831_v31, %v1839_v32  ;;  %v1911_v15 = vld [vmem:[#allocation11 + $0xf28] sm:$0xff]  ;;  %v13161_v17 = vcombine.low %v1894_v44, %v1902_v5 }
 0x448   :  { %v1919_v16 = vld [vmem:[#allocation11 + $0xf68] sm:$0xff] }
 0x449   :  { %4958 = vmatpush1.bf16.msra.mxu0 %v13001_v39  ;;  %v1847_v39 = vld [vmem:[#allocation11 + $0xd28] sm:$0xff] }
 0x44a   :  { %5040 = vmatpush1.bf16.msra.mxu1 %v13003_v43  ;;  %4959 = vmatprep.subr.bf16.mxu0 %v13018_v45  ;;  %v1855_v43 = vld [vmem:[#allocation11 + $0xd68] sm:$0xff]  ;;  %v13097_v45 = vcombine.low %v1830_v28, %v1838_v29 }
 0x44b   :  { %5041 = vmatprep.subr.bf16.mxu1 %v13020_v46  ;;  %v13099_v46 = vcombine.low %v1831_v31, %v1839_v32  ;;  %v13116_v48 = vcombine.high %v1847_v39, %v1855_v43  ;;  %v1927_v28 = vld [vmem:[#allocation11 + $0xfa8] sm:$0xff]  ;;  %v13179_v32 = vcombine.low %v1911_v15, %v1919_v16 }
 0x44c   :  { %v1935_v29 = vld [vmem:[#allocation11 + $0xfe8] sm:$0xff] }
 0x44d   :  { %4960 = vmatpush1.bf16.msra.mxu0 %v13017_v52  ;;  %v1863_v52 = vld [vmem:[#allocation11 + $0xda8] sm:$0xff] }
 0x44e   :  { %5042 = vmatpush1.bf16.msra.mxu1 %v13019_v53  ;;  %4961 = vmatprep.subr.bf16.mxu0 %v13034_v54  ;;  %v1871_v53 = vld [vmem:[#allocation11 + $0xde8] sm:$0xff]  ;;  %v13113_v54 = vcombine.low %v1846_v37, %v1854_v38  ;;  %v1433_v37 = vld [vmem:[#allocation11 + $0x38] sm:$0xff] }
 0x44f   :  { %v16605_v61 = vpop.f32.mrb[8].mxu0  ;;  %v16607_v62 = vpop.f32.mrb[8].mxu1  ;;  %5043 = vmatprep.subr.bf16.mxu1 %v13036_v55  ;;  %v13115_v55 = vcombine.low %v1847_v39, %v1855_v43  ;;  %v13132_v56 = vcombine.high %v1863_v52, %v1871_v53  ;;  %v1441_v38 = vld [vmem:[#allocation11 + $0x78] sm:$0xff]  ;;  %v13195_v43 = vcombine.low %v1927_v28, %v1935_v29 }
 0x450   :  { %v16609_v2 = vpop.f32.mrb[9].mxu0  ;;  %v16611_v4 = vpop.f32.mrb[9].mxu1 }
 0x451   :  { %v4661_v6 = vpop.f32.mrb[10].mxu0  ;;  %v4743_v7 = vpop.f32.mrb[10].mxu1  ;;  %4962 = vmatpush1.bf16.msra.mxu0 %v13033_v59  ;;  %v1879_v59 = vld [vmem:[#allocation11 + $0xe28] sm:$0xff] }
 0x452   :  { %5044 = vmatpush1.bf16.msra.mxu1 %v13035_v25  ;;  %v4662_v9 = vpop.f32.mrb[11].mxu0  ;;  %v4744_v10 = vpop.f32.mrb[11].mxu1  ;;  %4963 = vmatprep.subr.bf16.mxu0 %v13050_v60  ;;  %v1887_v25 = vld [vmem:[#allocation11 + $0xe68] sm:$0xff]  ;;  %v13129_v60 = vcombine.low %v1862_v49, %v1870_v51  ;;  %v1449_v51 = vld [vmem:[#allocation11 + $0xb8] sm:$0xff] }
 0x453   :  { %5045 = vmatprep.subr.bf16.mxu1 %v13052_v63  ;;  %v13131_v63 = vcombine.low %v1863_v52, %v1871_v53  ;;  %v13148_v1 = vcombine.high %v1879_v59, %v1887_v25  ;;  %v1895_v6 = vld [vmem:[#allocation11 + $0xea8] sm:$0xff]  ;;  %v13147_v9 = vcombine.low %v1879_v59, %v1887_v25  ;;  %v13162_v10 = vcombine.high %v1894_v44, %v1902_v5  ;;  %v1457_v52 = vld [vmem:[#allocation11 + $0xf8] sm:$0xff] }
 0x454   :  { %v1903_v7 = vld [vmem:[#allocation11 + $0xee8] sm:$0xff]  ;;  %v12703_v53 = vcombine.low %v1433_v37, %v1441_v38  ;;  %v12719_v25 = vcombine.low %v1449_v51, %v1457_v52  ;;  %v1481_v44 = vld [vmem:[#allocation11 + $0x1b8] sm:$0xff] }
 0x455   :  { %4964 = vmatpush1.bf16.msra.mxu0 %v13049_v8  ;;  %v13145_v8 = vcombine.low %v1878_v57, %v1886_v58  ;;  %v13163_v19 = vcombine.low %v1895_v6, %v1903_v7  ;;  %v1465_v57 = vld [vmem:[#allocation11 + $0x138] sm:$0xff] }
 0x456   :  { %5046 = vmatpush1.bf16.msra.mxu1 %v13051_v11  ;;  %4965 = vmatprep.subr.bf16.mxu0 %v13066_v12  ;;  %v13164_v11 = vcombine.high %v1895_v6, %v1903_v7  ;;  %v1910_v12 = vld [vmem:[#allocation11 + $0xf20] sm:$0xff]  ;;  %v1473_v58 = vld [vmem:[#allocation11 + $0x178] sm:$0xff] }
 0x457   :  { %5047 = vmatprep.subr.bf16.mxu1 %v13068_v14  ;;  %v1918_v14 = vld [vmem:[#allocation11 + $0xf60] sm:$0xff]  ;;  %v1489_v5 = vld [vmem:[#allocation11 + $0x1f8] sm:$0xff]  ;;  %v12735_v7 = vcombine.low %v1465_v57, %v1473_v58 }
 0x458   :  { %v13177_v31 = vcombine.low %v1910_v12, %v1918_v14 }
 0x459   :  { %4966 = vmatpush1.bf16.msra.mxu0 %v13065_v20  ;;  %v13178_v20 = vcombine.high %v1910_v12, %v1918_v14  ;;  %v1497_v12 = vld [vmem:[#allocation11 + $0x238] sm:$0xff] }
 0x45a   :  { %5048 = vmatpush1.bf16.msra.mxu1 %v13067_v21  ;;  %4967 = vmatprep.subr.bf16.mxu0 %v13082_v22  ;;  %v13180_v21 = vcombine.high %v1911_v15, %v1919_v16  ;;  %v1926_v22 = vld [vmem:[#allocation11 + $0xfa0] sm:$0xff]  ;;  %v1505_v14 = vld [vmem:[#allocation11 + $0x278] sm:$0xff]  ;;  %v12751_v15 = vcombine.low %v1481_v44, %v1489_v5 }
 0x45b   :  { %5049 = vmatprep.subr.bf16.mxu1 %v13084_v27  ;;  %v1934_v27 = vld [vmem:[#allocation11 + $0xfe0] sm:$0xff] }
 0x45c   :  { %v13193_v39 = vcombine.low %v1926_v22, %v1934_v27 }
 0x45d   :  { %4968 = vmatpush1.bf16.msra.mxu0 %v13081_v33  ;;  %v13194_v33 = vcombine.high %v1926_v22, %v1934_v27  ;;  %v1521_v22 = vld [vmem:[#allocation11 + $0x2f8] sm:$0xff] }
 0x45e   :  { %5050 = vmatpush1.bf16.msra.mxu1 %v13083_v34  ;;  %4969 = vmatprep.subr.bf16.mxu0 %v13098_v35  ;;  %v13196_v34 = vcombine.high %v1927_v28, %v1935_v29  ;;  %v1432_v35 = vld [vmem:[#allocation11 + $0x30] sm:$0xff]  ;;  %v12767_v28 = vcombine.low %v1497_v12, %v1505_v14 }
 0x45f   :  { %5051 = vmatprep.subr.bf16.mxu1 %v13100_v36  ;;  %v1440_v36 = vld [vmem:[#allocation11 + $0x70] sm:$0xff] }
 0x460   :  { %v12701_v49 = vcombine.low %v1432_v35, %v1440_v36 }
 0x461   :  { %4970 = vmatpush1.bf16.msra.mxu0 %v13097_v45  ;;  %v12702_v45 = vcombine.high %v1432_v35, %v1440_v36  ;;  %v1537_v35 = vld [vmem:[#allocation11 + $0x378] sm:$0xff] }
 0x462   :  { %5052 = vmatpush1.bf16.msra.mxu1 %v13099_v46  ;;  %4971 = vmatprep.subr.bf16.mxu0 %v13114_v47  ;;  %v12704_v46 = vcombine.high %v1433_v37, %v1441_v38  ;;  %v1448_v47 = vld [vmem:[#allocation11 + $0xb0] sm:$0xff] }
 0x463   :  { %5053 = vmatprep.subr.bf16.mxu1 %v13116_v48  ;;  %v1456_v48 = vld [vmem:[#allocation11 + $0xf0] sm:$0xff] }
 0x464   :  { %v12717_v59 = vcombine.low %v1448_v47, %v1456_v48 }
 0x465   :  { %4972 = vmatpush1.bf16.msra.mxu0 %v13113_v54  ;;  %v12718_v54 = vcombine.high %v1448_v47, %v1456_v48  ;;  %v1553_v47 = vld [vmem:[#allocation11 + $0x3f8] sm:$0xff] }
 0x466   :  { %5054 = vmatpush1.bf16.msra.mxu1 %v13115_v55  ;;  %4973 = vmatprep.subr.bf16.mxu0 %v13130_v13  ;;  %v1464_v55 = vld [vmem:[#allocation11 + $0x130] sm:$0xff] }
 0x467   :  { %5055 = vmatprep.subr.bf16.mxu1 %v13132_v56  ;;  %v1472_v13 = vld [vmem:[#allocation11 + $0x170] sm:$0xff]  ;;  %v12720_v56 = vcombine.high %v1449_v51, %v1457_v52 }
 0x468   :  { %v12733_v6 = vcombine.low %v1464_v55, %v1472_v13 }
 0x469   :  { %4974 = vmatpush1.bf16.msra.mxu0 %v13129_v60  ;;  %v12734_v60 = vcombine.high %v1464_v55, %v1472_v13  ;;  %v1561_v55 = vld [vmem:[#allocation11 + $0x438] sm:$0xff] }
 0x46a   :  { %5056 = vmatpush1.bf16.msra.mxu1 %v13131_v63  ;;  %4975 = vmatprep.subr.bf16.mxu0 %v13146_v18  ;;  %v12736_v63 = vcombine.high %v1465_v57, %v1473_v58  ;;  %v1480_v18 = vld [vmem:[#allocation11 + $0x1b0] sm:$0xff]  ;;  %v1569_v13 = vld [vmem:[#allocation11 + $0x478] sm:$0xff] }
 0x46b   :  { %5057 = vmatprep.subr.bf16.mxu1 %v13148_v1  ;;  %v1488_v1 = vld [vmem:[#allocation11 + $0x1f0] sm:$0xff] }
 0x46d   :  { %4976 = vmatpush1.bf16.msra.mxu0 %v13145_v8  ;;  %v12750_v8 = vcombine.high %v1480_v18, %v1488_v1 }
 0x46e   :  { %5058 = vmatpush1.bf16.msra.mxu1 %v13147_v9  ;;  %4977 = vmatprep.subr.bf16.mxu0 %v13162_v10  ;;  %v12752_v9 = vcombine.high %v1481_v44, %v1489_v5  ;;  %v1496_v10 = vld [vmem:[#allocation11 + $0x230] sm:$0xff]  ;;  %v12831_v44 = vcombine.low %v1561_v55, %v1569_v13 }
 0x46f   :  { %5059 = vmatprep.subr.bf16.mxu1 %v13164_v11  ;;  %v1504_v11 = vld [vmem:[#allocation11 + $0x270] sm:$0xff] }
 0x470   :  { %v12766_v16 = vcombine.high %v1496_v10, %v1504_v11  ;;  %v12765_v27 = vcombine.low %v1496_v10, %v1504_v11  ;;  %v1601_v10 = vld [vmem:[#allocation11 + $0x578] sm:$0xff] }
 0x471   :  { %4978 = vmatpush1.bf16.msra.mxu0 %v13161_v17  ;;  %v12768_v17 = vcombine.high %v1497_v12, %v1505_v14 }
 0x472   :  { %5060 = vmatpush1.bf16.msra.mxu1 %v13163_v19  ;;  %4979 = vmatprep.subr.bf16.mxu0 %v13178_v20  ;;  %v1512_v19 = vld [vmem:[#allocation11 + $0x2b0] sm:$0xff] }
 0x473   :  { %5061 = vmatprep.subr.bf16.mxu1 %v13180_v21  ;;  %v1520_v20 = vld [vmem:[#allocation11 + $0x2f0] sm:$0xff]  ;;  %v1513_v21 = vld [vmem:[#allocation11 + $0x2b8] sm:$0xff] }
 0x474   :  { %v12782_v29 = vcombine.high %v1512_v19, %v1520_v20  ;;  %v12781_v36 = vcombine.low %v1512_v19, %v1520_v20  ;;  %v12783_v37 = vcombine.low %v1513_v21, %v1521_v22  ;;  %v1617_v19 = vld [vmem:[#allocation11 + $0x5f8] sm:$0xff] }
 0x475   :  { %4980 = vmatpush1.bf16.msra.mxu0 %v13177_v31  ;;  %v12784_v31 = vcombine.high %v1513_v21, %v1521_v22 }
 0x476   :  { %5062 = vmatpush1.bf16.msra.mxu1 %v13179_v32  ;;  %4981 = vmatprep.subr.bf16.mxu0 %v13194_v33  ;;  %v1528_v32 = vld [vmem:[#allocation11 + $0x330] sm:$0xff] }
 0x477   :  { %5063 = vmatprep.subr.bf16.mxu1 %v13196_v34  ;;  %v1536_v33 = vld [vmem:[#allocation11 + $0x370] sm:$0xff]  ;;  %v1529_v34 = vld [vmem:[#allocation11 + $0x338] sm:$0xff] }
 0x478   :  { %v12798_v38 = vcombine.high %v1528_v32, %v1536_v33  ;;  %v12797_v48 = vcombine.low %v1528_v32, %v1536_v33  ;;  %v1633_v32 = vld [vmem:[#allocation11 + $0x678] sm:$0xff] }
 0x479   :  { %4982 = vmatpush1.bf16.msra.mxu0 %v13193_v39  ;;  %v12800_v39 = vcombine.high %v1529_v34, %v1537_v35 }
 0x47a   :  { %5064 = vmatpush1.bf16.msra.mxu1 %v13195_v43  ;;  %5074 = vmatprep.subr.bf16.mxu0 %v12702_v45  ;;  %v1544_v43 = vld [vmem:[#allocation11 + $0x3b0] sm:$0xff] }
 0x47b   :  { %5156 = vmatprep.subr.bf16.mxu1 %v12704_v46  ;;  %v1552_v45 = vld [vmem:[#allocation11 + $0x3f0] sm:$0xff]  ;;  %v1545_v46 = vld [vmem:[#allocation11 + $0x3b8] sm:$0xff] }
 0x47c   :  { %4984 = vmatmul.mubr.bf16.vlgmr.msra.gmra.mrb[16].mxu0 %v16587_v3  ;;  %v12814_v51 = vcombine.high %v1544_v43, %v1552_v45  ;;  %v12816_v52 = vcombine.high %v1545_v46, %v1553_v47  ;;  %v12815_v57 = vcombine.low %v1545_v46, %v1553_v47 }
 0x47d   :  { %5066 = vmatmul.mubr.bf16.vlgmr.msra.gmra.mrb[16].mxu1 %v16587_v3  ;;  %5075 = vmatpush1.bf16.msra.mxu0 %v12701_v49  ;;  %v12799_v49 = vcombine.low %v1529_v34, %v1537_v35 }
 0x47e   :  { %5106 = vmatprep.mubr.bf16.mxu0 %v16572_v40  ;;  %5157 = vmatpush1.bf16.msra.mxu1 %v12703_v53  ;;  %v1560_v53 = vld [vmem:[#allocation11 + $0x430] sm:$0xff] }
 0x47f   :  { %5188 = vmatprep.mubr.bf16.mxu1 %v16572_v40  ;;  %5076 = vmatprep.subr.bf16.mxu0 %v12718_v54  ;;  %v12749_v40 = vcombine.low %v1480_v18, %v1488_v1  ;;  %v1568_v54 = vld [vmem:[#allocation11 + $0x470] sm:$0xff]  ;;  %v1585_v18 = vld [vmem:[#allocation11 + $0x4f8] sm:$0xff] }
 0x480   :  { %5158 = vmatprep.subr.bf16.mxu1 %v12720_v56  ;;  %v12813_v56 = vcombine.low %v1544_v43, %v1552_v45  ;;  %v12830_v58 = vcombine.high %v1560_v53, %v1568_v54  ;;  %v12829_v1 = vcombine.low %v1560_v53, %v1568_v54  ;;  %v1649_v43 = vld [vmem:[#allocation11 + $0x6f8] sm:$0xff] }
 0x481   :  { %5077 = vmatpush1.bf16.msra.mxu0 %v12717_v59  ;;  %v12832_v59 = vcombine.high %v1561_v55, %v1569_v13  ;;  %v1665_v53 = vld [vmem:[#allocation11 + $0x778] sm:$0xff] }
 0x482   :  { %5159 = vmatpush1.bf16.msra.mxu1 %v12719_v25  ;;  %5078 = vmatprep.subr.bf16.mxu0 %v12734_v60  ;;  %v1576_v25 = vld [vmem:[#allocation11 + $0x4b0] sm:$0xff] }
 0x483   :  { %5160 = vmatprep.subr.bf16.mxu1 %v12736_v63  ;;  %v1584_v60 = vld [vmem:[#allocation11 + $0x4f0] sm:$0xff]  ;;  %v1577_v63 = vld [vmem:[#allocation11 + $0x4b8] sm:$0xff] }
 0x484   :  { %v12846_v5 = vcombine.high %v1576_v25, %v1584_v60  ;;  %v12845_v11 = vcombine.low %v1576_v25, %v1584_v60  ;;  %v12847_v12 = vcombine.low %v1577_v63, %v1585_v18  ;;  %v1681_v25 = vld [vmem:[#allocation11 + $0x7f8] sm:$0xff] }
 0x485   :  { %5079 = vmatpush1.bf16.msra.mxu0 %v12733_v6  ;;  %v12848_v6 = vcombine.high %v1577_v63, %v1585_v18 }
 0x486   :  { %5161 = vmatpush1.bf16.msra.mxu1 %v12735_v7  ;;  %5080 = vmatprep.subr.bf16.mxu0 %v12750_v8  ;;  %v1592_v7 = vld [vmem:[#allocation11 + $0x530] sm:$0xff] }
 0x487   :  { %5162 = vmatprep.subr.bf16.mxu1 %v12752_v9  ;;  %v1600_v8 = vld [vmem:[#allocation11 + $0x570] sm:$0xff]  ;;  %v1593_v9 = vld [vmem:[#allocation11 + $0x538] sm:$0xff] }
 0x488   :  { %v12862_v14 = vcombine.high %v1592_v7, %v1600_v8  ;;  %v12861_v20 = vcombine.low %v1592_v7, %v1600_v8  ;;  %v12863_v21 = vcombine.low %v1593_v9, %v1601_v10  ;;  %v1697_v7 = vld [vmem:[#allocation11 + $0x878] sm:$0xff] }
 0x489   :  { %5081 = vmatpush1.bf16.msra.mxu0 %v12749_v40  ;;  %v12864_v40 = vcombine.high %v1593_v9, %v1601_v10 }
 0x48a   :  { %5163 = vmatpush1.bf16.msra.mxu1 %v12751_v15  ;;  %5082 = vmatprep.subr.bf16.mxu0 %v12766_v16  ;;  %v1608_v15 = vld [vmem:[#allocation11 + $0x5b0] sm:$0xff] }
 0x48b   :  { %5164 = vmatprep.subr.bf16.mxu1 %v12768_v17  ;;  %v1616_v16 = vld [vmem:[#allocation11 + $0x5f0] sm:$0xff]  ;;  %v1609_v17 = vld [vmem:[#allocation11 + $0x5b8] sm:$0xff] }
 0x48c   :  { %v12878_v22 = vcombine.high %v1608_v15, %v1616_v16  ;;  %v12877_v33 = vcombine.low %v1608_v15, %v1616_v16  ;;  %v12879_v34 = vcombine.low %v1609_v17, %v1617_v19  ;;  %v1705_v15 = vld [vmem:[#allocation11 + $0x8b8] sm:$0xff] }
 0x48d   :  { %5083 = vmatpush1.bf16.msra.mxu0 %v12765_v27  ;;  %v12880_v27 = vcombine.high %v1609_v17, %v1617_v19  ;;  %v1713_v16 = vld [vmem:[#allocation11 + $0x8f8] sm:$0xff] }
 0x48e   :  { %5165 = vmatpush1.bf16.msra.mxu1 %v12767_v28  ;;  %5084 = vmatprep.subr.bf16.mxu0 %v12782_v29  ;;  %v1624_v28 = vld [vmem:[#allocation11 + $0x630] sm:$0xff] }
 0x48f   :  { %5166 = vmatprep.subr.bf16.mxu1 %v12784_v31  ;;  %v1632_v29 = vld [vmem:[#allocation11 + $0x670] sm:$0xff]  ;;  %v1625_v31 = vld [vmem:[#allocation11 + $0x638] sm:$0xff] }
 0x490   :  { %v12894_v35 = vcombine.high %v1624_v28, %v1632_v29  ;;  %v12893_v45 = vcombine.low %v1624_v28, %v1632_v29  ;;  %v12895_v46 = vcombine.low %v1625_v31, %v1633_v32  ;;  %v1729_v28 = vld [vmem:[#allocation11 + $0x978] sm:$0xff] }
 0x491   :  { %5085 = vmatpush1.bf16.msra.mxu0 %v12781_v36  ;;  %v12896_v36 = vcombine.high %v1625_v31, %v1633_v32  ;;  %v12975_v31 = vcombine.low %v1705_v15, %v1713_v16 }
 0x492   :  { %5167 = vmatpush1.bf16.msra.mxu1 %v12783_v37  ;;  %5086 = vmatprep.subr.bf16.mxu0 %v12798_v38  ;;  %v1640_v37 = vld [vmem:[#allocation11 + $0x6b0] sm:$0xff] }
 0x493   :  { %5168 = vmatprep.subr.bf16.mxu1 %v12800_v39  ;;  %v1648_v38 = vld [vmem:[#allocation11 + $0x6f0] sm:$0xff]  ;;  %v1641_v39 = vld [vmem:[#allocation11 + $0x6b8] sm:$0xff] }
 0x494   :  { %v12910_v47 = vcombine.high %v1640_v37, %v1648_v38  ;;  %v12909_v54 = vcombine.low %v1640_v37, %v1648_v38  ;;  %v12911_v55 = vcombine.low %v1641_v39, %v1649_v43  ;;  %v1745_v37 = vld [vmem:[#allocation11 + $0x9f8] sm:$0xff] }
 0x495   :  { %5087 = vmatpush1.bf16.msra.mxu0 %v12797_v48  ;;  %v12912_v48 = vcombine.high %v1641_v39, %v1649_v43 }
 0x496   :  { %5169 = vmatpush1.bf16.msra.mxu1 %v12799_v49  ;;  %5088 = vmatprep.subr.bf16.mxu0 %v12814_v51  ;;  %v1656_v49 = vld [vmem:[#allocation11 + $0x730] sm:$0xff] }
 0x497   :  { %5170 = vmatprep.subr.bf16.mxu1 %v12816_v52  ;;  %v1664_v51 = vld [vmem:[#allocation11 + $0x770] sm:$0xff]  ;;  %v1657_v52 = vld [vmem:[#allocation11 + $0x738] sm:$0xff] }
 0x498   :  { %v12926_v13 = vcombine.high %v1656_v49, %v1664_v51  ;;  %v12925_v60 = vcombine.low %v1656_v49, %v1664_v51  ;;  %v12927_v63 = vcombine.low %v1657_v52, %v1665_v53 }
 0x499   :  { %5089 = vmatpush1.bf16.msra.mxu0 %v12813_v56  ;;  %v12928_v56 = vcombine.high %v1657_v52, %v1665_v53  ;;  %v1768_v53 = vld [vmem:[#allocation11 + $0xab0] sm:$0xff] }
 0x49a   :  { %5171 = vmatpush1.bf16.msra.mxu1 %v12815_v57  ;;  %5090 = vmatprep.subr.bf16.mxu0 %v12830_v58  ;;  %v1672_v57 = vld [vmem:[#allocation11 + $0x7b0] sm:$0xff] }
 0x49b   :  { %5172 = vmatprep.subr.bf16.mxu1 %v12832_v59  ;;  %v1680_v58 = vld [vmem:[#allocation11 + $0x7f0] sm:$0xff]  ;;  %v1673_v59 = vld [vmem:[#allocation11 + $0x7b8] sm:$0xff] }
 0x49c   :  { %v12942_v18 = vcombine.high %v1672_v57, %v1680_v58  ;;  %v12941_v8 = vcombine.low %v1672_v57, %v1680_v58  ;;  %v12943_v9 = vcombine.low %v1673_v59, %v1681_v25 }
 0x49d   :  { %5091 = vmatpush1.bf16.msra.mxu0 %v12829_v1  ;;  %v12944_v1 = vcombine.high %v1673_v59, %v1681_v25  ;;  %v1784_v25 = vld [vmem:[#allocation11 + $0xb30] sm:$0xff] }
 0x49e   :  { %5173 = vmatpush1.bf16.msra.mxu1 %v12831_v44  ;;  %5092 = vmatprep.subr.bf16.mxu0 %v12846_v5  ;;  %v1688_v44 = vld [vmem:[#allocation11 + $0x830] sm:$0xff] }
 0x49f   :  { %5174 = vmatprep.subr.bf16.mxu1 %v12848_v6  ;;  %v1696_v5 = vld [vmem:[#allocation11 + $0x870] sm:$0xff]  ;;  %v1689_v6 = vld [vmem:[#allocation11 + $0x838] sm:$0xff] }
 0x4a0   :  { %v12958_v10 = vcombine.high %v1688_v44, %v1696_v5  ;;  %v12959_v17 = vcombine.low %v1689_v6, %v1697_v7 }
 0x4a1   :  { %5093 = vmatpush1.bf16.msra.mxu0 %v12845_v11  ;;  %v12960_v11 = vcombine.high %v1689_v6, %v1697_v7 }
 0x4a2   :  { %5175 = vmatpush1.bf16.msra.mxu1 %v12847_v12  ;;  %5094 = vmatprep.subr.bf16.mxu0 %v12862_v14  ;;  %v1704_v12 = vld [vmem:[#allocation11 + $0x8b0] sm:$0xff] }
 0x4a3   :  { %5176 = vmatprep.subr.bf16.mxu1 %v12864_v40  ;;  %v1712_v14 = vld [vmem:[#allocation11 + $0x8f0] sm:$0xff]  ;;  %v12957_v40 = vcombine.low %v1688_v44, %v1696_v5 }
 0x4a4   :  { %v12974_v19 = vcombine.high %v1704_v12, %v1712_v14  ;;  %v12973_v29 = vcombine.low %v1704_v12, %v1712_v14  ;;  %v1801_v12 = vld [vmem:[#allocation11 + $0xbb8] sm:$0xff] }
 0x4a5   :  { %5095 = vmatpush1.bf16.msra.mxu0 %v12861_v20  ;;  %v1720_v20 = vld [vmem:[#allocation11 + $0x930] sm:$0xff]  ;;  %v1809_v14 = vld [vmem:[#allocation11 + $0xbf8] sm:$0xff] }
 0x4a6   :  { %5177 = vmatpush1.bf16.msra.mxu1 %v12863_v21  ;;  %5096 = vmatprep.subr.bf16.mxu0 %v12878_v22  ;;  %v1728_v21 = vld [vmem:[#allocation11 + $0x970] sm:$0xff]  ;;  %v12976_v22 = vcombine.high %v1705_v15, %v1713_v16 }
 0x4a7   :  { %5178 = vmatprep.subr.bf16.mxu1 %v12880_v27  ;;  %v1721_v27 = vld [vmem:[#allocation11 + $0x938] sm:$0xff]  ;;  %v12990_v32 = vcombine.high %v1720_v20, %v1728_v21  ;;  %v12989_v38 = vcombine.low %v1720_v20, %v1728_v21 }
 0x4a9   :  { %5097 = vmatpush1.bf16.msra.mxu0 %v12877_v33  ;;  %v12992_v33 = vcombine.high %v1721_v27, %v1729_v28 }
 0x4aa   :  { %5179 = vmatpush1.bf16.msra.mxu1 %v12879_v34  ;;  %5098 = vmatprep.subr.bf16.mxu0 %v12894_v35  ;;  %v1736_v34 = vld [vmem:[#allocation11 + $0x9b0] sm:$0xff] }
 0x4ab   :  { %5180 = vmatprep.subr.bf16.mxu1 %v12896_v36  ;;  %v1744_v35 = vld [vmem:[#allocation11 + $0x9f0] sm:$0xff]  ;;  %v1737_v36 = vld [vmem:[#allocation11 + $0x9b8] sm:$0xff] }
 0x4ac   :  { %v13006_v39 = vcombine.high %v1736_v34, %v1744_v35  ;;  %v13008_v43 = vcombine.high %v1737_v36, %v1745_v37  ;;  %v13007_v49 = vcombine.low %v1737_v36, %v1745_v37  ;;  %v1832_v37 = vld [vmem:[#allocation11 + $0xcb0] sm:$0xff] }
 0x4ad   :  { %5099 = vmatpush1.bf16.msra.mxu0 %v12893_v45  ;;  %v1752_v45 = vld [vmem:[#allocation11 + $0xa30] sm:$0xff] }
 0x4ae   :  { %5181 = vmatpush1.bf16.msra.mxu1 %v12895_v46  ;;  %5100 = vmatprep.subr.bf16.mxu0 %v12910_v47  ;;  %v1760_v46 = vld [vmem:[#allocation11 + $0xa70] sm:$0xff]  ;;  %v1753_v47 = vld [vmem:[#allocation11 + $0xa38] sm:$0xff] }
 0x4af   :  { %5182 = vmatprep.subr.bf16.mxu1 %v12912_v48  ;;  %v1761_v48 = vld [vmem:[#allocation11 + $0xa78] sm:$0xff]  ;;  %v13022_v51 = vcombine.high %v1752_v45, %v1760_v46 }
 0x4b0   :  { %v13024_v52 = vcombine.high %v1753_v47, %v1761_v48  ;;  %v13023_v57 = vcombine.low %v1753_v47, %v1761_v48  ;;  %v1848_v48 = vld [vmem:[#allocation11 + $0xd30] sm:$0xff] }
 0x4b1   :  { %5101 = vmatpush1.bf16.msra.mxu0 %v12909_v54  ;;  %v1776_v54 = vld [vmem:[#allocation11 + $0xaf0] sm:$0xff] }
 0x4b2   :  { %5183 = vmatpush1.bf16.msra.mxu1 %v12911_v55  ;;  %5102 = vmatprep.subr.bf16.mxu0 %v12926_v13  ;;  %v1769_v55 = vld [vmem:[#allocation11 + $0xab8] sm:$0xff]  ;;  %v13038_v58 = vcombine.high %v1768_v53, %v1776_v54 }
 0x4b3   :  { %5184 = vmatprep.subr.bf16.mxu1 %v12928_v56  ;;  %v1777_v13 = vld [vmem:[#allocation11 + $0xaf8] sm:$0xff]  ;;  %v13021_v56 = vcombine.low %v1752_v45, %v1760_v46 }
 0x4b4   :  { %v13040_v59 = vcombine.high %v1769_v55, %v1777_v13  ;;  %v13039_v44 = vcombine.low %v1769_v55, %v1777_v13  ;;  %v1864_v13 = vld [vmem:[#allocation11 + $0xdb0] sm:$0xff] }
 0x4b5   :  { %5103 = vmatpush1.bf16.msra.mxu0 %v12925_v60  ;;  %v1792_v60 = vld [vmem:[#allocation11 + $0xb70] sm:$0xff] }
 0x4b6   :  { %5185 = vmatpush1.bf16.msra.mxu1 %v12927_v63  ;;  %5104 = vmatprep.subr.bf16.mxu0 %v12942_v18  ;;  %v1785_v63 = vld [vmem:[#allocation11 + $0xb38] sm:$0xff]  ;;  %v13054_v5 = vcombine.high %v1784_v25, %v1792_v60  ;;  %v13053_v16 = vcombine.low %v1784_v25, %v1792_v60 }
 0x4b7   :  { %5186 = vmatprep.subr.bf16.mxu1 %v12944_v1  ;;  %v1793_v18 = vld [vmem:[#allocation11 + $0xb78] sm:$0xff]  ;;  %v13037_v1 = vcombine.low %v1768_v53, %v1776_v54 }
 0x4b8   :  { %v13056_v7 = vcombine.high %v1785_v63, %v1793_v18  ;;  %v13055_v20 = vcombine.low %v1785_v63, %v1793_v18  ;;  %v1880_v18 = vld [vmem:[#allocation11 + $0xe30] sm:$0xff] }
 0x4b9   :  { %5105 = vmatpush1.bf16.msra.mxu0 %v12941_v8  ;;  %v1800_v8 = vld [vmem:[#allocation11 + $0xbb0] sm:$0xff] }
 0x4ba   :  { %5187 = vmatpush1.bf16.msra.mxu1 %v12943_v9  ;;  %5115 = vmatprep.subr.bf16.mxu0 %v12958_v10  ;;  %v1808_v9 = vld [vmem:[#allocation11 + $0xbf0] sm:$0xff] }
 0x4bb   :  { %5197 = vmatprep.subr.bf16.mxu1 %v12960_v11  ;;  %v13070_v21 = vcombine.high %v1800_v8, %v1808_v9 }
 0x4bc   :  { %5107 = vmatmul.mubr.bf16.vlgmr.msra.gmra.mrb[20].mxu0 %v16574_v41 }
 0x4bd   :  { %5189 = vmatmul.mubr.bf16.vlgmr.msra.gmra.mrb[20].mxu1 %v16574_v41  ;;  %5116 = vmatpush1.bf16.msra.mxu0 %v12957_v40  ;;  %v12991_v41 = vcombine.low %v1721_v27, %v1729_v28  ;;  %v13072_v27 = vcombine.high %v1801_v12, %v1809_v14  ;;  %v1816_v28 = vld [vmem:[#allocation11 + $0xc30] sm:$0xff] }
 0x4be   :  { %5147 = vmatprep.mubr.bf16.mxu0 %v16578_v50  ;;  %5198 = vmatpush1.bf16.msra.mxu1 %v12959_v17 }
 0x4bf   :  { %5229 = vmatprep.mubr.bf16.mxu1 %v16578_v50  ;;  %5117 = vmatprep.subr.bf16.mxu0 %v12974_v19  ;;  %v13005_v50 = vcombine.low %v1736_v34, %v1744_v35  ;;  %v13071_v34 = vcombine.low %v1801_v12, %v1809_v14  ;;  %v1896_v14 = vld [vmem:[#allocation11 + $0xeb0] sm:$0xff] }
 0x4c0   :  { %5199 = vmatprep.subr.bf16.mxu1 %v12976_v22 }
 0x4c1   :  { %5118 = vmatpush1.bf16.msra.mxu0 %v12973_v29  ;;  %v1824_v29 = vld [vmem:[#allocation11 + $0xc70] sm:$0xff] }
 0x4c2   :  { %5200 = vmatpush1.bf16.msra.mxu1 %v12975_v31  ;;  %5119 = vmatprep.subr.bf16.mxu0 %v12990_v32  ;;  %v1817_v31 = vld [vmem:[#allocation11 + $0xc38] sm:$0xff]  ;;  %v13086_v35 = vcombine.high %v1816_v28, %v1824_v29 }
 0x4c3   :  { %5201 = vmatprep.subr.bf16.mxu1 %v12992_v33  ;;  %v1825_v32 = vld [vmem:[#allocation11 + $0xc78] sm:$0xff]  ;;  %v13069_v33 = vcombine.low %v1800_v8, %v1808_v9 }
 0x4c4   :  { %v13088_v36 = vcombine.high %v1817_v31, %v1825_v32  ;;  %v13087_v45 = vcombine.low %v1817_v31, %v1825_v32  ;;  %v1921_v31 = vld [vmem:[#allocation11 + $0xf78] sm:$0xff]  ;;  %v16629_v32 = vld [vmem:[#allocation13] sm:$0xff] }
 0x4c5   :  { %5120 = vmatpush1.bf16.msra.mxu0 %v12989_v38  ;;  %v1840_v38 = vld [vmem:[#allocation11 + $0xcf0] sm:$0xff] }
 0x4c6   :  { %5202 = vmatpush1.bf16.msra.mxu1 %v12991_v41  ;;  %5121 = vmatprep.subr.bf16.mxu0 %v13006_v39  ;;  %v1833_v41 = vld [vmem:[#allocation11 + $0xcb8] sm:$0xff]  ;;  %v13102_v46 = vcombine.high %v1832_v37, %v1840_v38 }
 0x4c7   :  { %5203 = vmatprep.subr.bf16.mxu1 %v13008_v43  ;;  %v1841_v39 = vld [vmem:[#allocation11 + $0xcf8] sm:$0xff]  ;;  %v13085_v43 = vcombine.low %v1816_v28, %v1824_v29  ;;  %v1920_v28 = vld [vmem:[#allocation11 + $0xf70] sm:$0xff] }
 0x4c8   :  { %v13104_v47 = vcombine.high %v1833_v41, %v1841_v39  ;;  %v13103_v53 = vcombine.low %v1833_v41, %v1841_v39  ;;  %v1913_v29 = vld [vmem:[#allocation11 + $0xf38] sm:$0xff]  ;;  %v1949_v41 = vrot.slane %v16629_v32, %v16543_v26 }
 0x4c9   :  { %5122 = vmatpush1.bf16.msra.mxu0 %v13005_v50  ;;  %v1856_v50 = vld [vmem:[#allocation11 + $0xd70] sm:$0xff]  ;;  %v1929_v39 = vld [vmem:[#allocation11 + $0xfb8] sm:$0xff] }
 0x4ca   :  { %5204 = vmatpush1.bf16.msra.mxu1 %v13007_v49  ;;  %5123 = vmatprep.subr.bf16.mxu0 %v13022_v51  ;;  %v1849_v49 = vld [vmem:[#allocation11 + $0xd38] sm:$0xff]  ;;  %v13118_v54 = vcombine.high %v1848_v48, %v1856_v50 }
 0x4cb   :  { %5205 = vmatprep.subr.bf16.mxu1 %v13024_v52  ;;  %v1857_v51 = vld [vmem:[#allocation11 + $0xd78] sm:$0xff]  ;;  %v13101_v52 = vcombine.low %v1832_v37, %v1840_v38  ;;  %v1928_v37 = vld [vmem:[#allocation11 + $0xfb0] sm:$0xff] }
 0x4cc   :  { %v13120_v55 = vcombine.high %v1849_v49, %v1857_v51  ;;  %v13119_v25 = vcombine.low %v1849_v49, %v1857_v51  ;;  %v1936_v38 = vld [vmem:[#allocation11 + $0xff0] sm:$0xff]  ;;  %v14314_v49 = vadd.f32 %v16609_v2, %v1949_v41  ;;  %v14711_v41 = vld [vmem:[%s17336_s7 + $0x78] sm:$0xff]  }
 0x4cd   :  { %5124 = vmatpush1.bf16.msra.mxu0 %v13021_v56  ;;  %v1872_v56 = vld [vmem:[#allocation11 + $0xdf0] sm:$0xff] }
 0x4ce   :  { %5206 = vmatpush1.bf16.msra.mxu1 %v13023_v57  ;;  %5125 = vmatprep.subr.bf16.mxu0 %v13038_v58  ;;  %v1865_v57 = vld [vmem:[#allocation11 + $0xdb8] sm:$0xff]  ;;  %v13134_v60 = vcombine.high %v1864_v13, %v1872_v56  ;;  %v14685_v2 = vld [vmem:[%s17336_s7] sm:$0xff]  }
 0x4cf   :  { %v16621_v6 = vpop.f32.mrb[12].mxu0  ;;  %5207 = vmatprep.subr.bf16.mxu1 %v13040_v59  ;;  %v1873_v58 = vld [vmem:[#allocation11 + $0xdf8] sm:$0xff]  ;;  %v13117_v59 = vcombine.low %v1848_v48, %v1856_v50  ;;  %v13198_v48 = vcombine.high %v1928_v37, %v1936_v38 }
 0x4d0   :  { %v16623_v10 = vpop.f32.mrb[12].mxu1  ;;  %v16625_v11 = vpop.f32.mrb[13].mxu0  ;;  %v13136_v63 = vcombine.high %v1865_v57, %v1873_v58  ;;  %v13135_v8 = vcombine.low %v1865_v57, %v1873_v58  ;;  %v14687_v57 = vld [vmem:[%s17336_s7 + $0x48] sm:$0xff]  }
 0x4d1   :  { %v16627_v40 = vpop.f32.mrb[13].mxu1  ;;  %v4825_v15 = vpop.f32.mrb[14].mxu0  ;;  %5126 = vmatpush1.bf16.msra.mxu0 %v13037_v1  ;;  %v1888_v1 = vld [vmem:[#allocation11 + $0xe70] sm:$0xff] }
 0x4d2   :  { %v4907_v17 = vpop.f32.mrb[14].mxu1  ;;  %5208 = vmatpush1.bf16.msra.mxu1 %v13039_v44  ;;  %v4826_v19 = vpop.f32.mrb[15].mxu0  ;;  %5127 = vmatprep.subr.bf16.mxu0 %v13054_v5  ;;  %v1881_v44 = vld [vmem:[#allocation11 + $0xe38] sm:$0xff]  ;;  %v13150_v9 = vcombine.high %v1880_v18, %v1888_v1  ;;  %v1904_v15 = vld [vmem:[#allocation11 + $0xef0] sm:$0xff] }
 0x4d3   :  { %v4908_v22 = vpop.f32.mrb[15].mxu1  ;;  %5209 = vmatprep.subr.bf16.mxu1 %v13056_v7  ;;  %v1889_v5 = vld [vmem:[#allocation11 + $0xe78] sm:$0xff]  ;;  %v13133_v7 = vcombine.low %v1864_v13, %v1872_v56  ;;  %v13149_v19 = vcombine.low %v1880_v18, %v1888_v1  ;;  %v5239_v13 = vmax.f32 %v14314_v49, 0.0  ;;  %v14691_v18 = vld [vmem:[%s17336_s7 + $0x50] sm:$0xff]  }
 0x4d4   :  { %v13152_v12 = vcombine.high %v1881_v44, %v1889_v5  ;;  %v1905_v17 = vld [vmem:[#allocation11 + $0xef8] sm:$0xff]  ;;  %v14693_v1 = vld [vmem:[%s17336_s7 + $0x10] sm:$0xff]  }
 0x4d5   :  { %5128 = vmatpush1.bf16.msra.mxu0 %v13053_v16  ;;  %v1897_v16 = vld [vmem:[#allocation11 + $0xeb8] sm:$0xff]  ;;  %v5255_v58 = vpack.c.bf16 %v5239_v13, %v5239_v13 }
 0x4d6   :  { %5210 = vmatpush1.bf16.msra.mxu1 %v13055_v20  ;;  %5129 = vmatprep.subr.bf16.mxu0 %v13070_v21  ;;  %v13151_v20 = vcombine.low %v1881_v44, %v1889_v5  ;;  %v13166_v21 = vcombine.high %v1896_v14, %v1904_v15  ;;  %v13168_v22 = vcombine.high %v1897_v16, %v1905_v17  ;;  %v14694_v44 = vld [vmem:[%s17336_s7 + $0x90] sm:$0xff]   ;;  %v14695_v5 = vld [vmem:[%s17336_s7 + $0x58] sm:$0xff]  }
 0x4d7   :  { %5211 = vmatprep.subr.bf16.mxu1 %v13072_v27  ;;  %v1912_v27 = vld [vmem:[#allocation11 + $0xf30] sm:$0xff] }
 0x4d9   :  { %5130 = vmatpush1.bf16.msra.mxu0 %v13069_v33  ;;  %v13165_v33 = vcombine.low %v1896_v14, %v1904_v15  ;;  %v14700_v14 = vld [vmem:[%s17336_s7 + $0xe0] sm:$0xff]  }
 0x4da   :  { %5212 = vmatpush1.bf16.msra.mxu1 %v13071_v34  ;;  %5131 = vmatprep.subr.bf16.mxu0 %v13086_v35  ;;  %v13167_v34 = vcombine.low %v1897_v16, %v1905_v17  ;;  %v13182_v35 = vcombine.high %v1912_v27, %v1920_v28  ;;  %v14701_v15 = vld [vmem:[%s17336_s7 + $0x20] sm:$0xff]   ;;  %v14703_v17 = vld [vmem:[%s17336_s7 + $0x68] sm:$0xff]  }
 0x4db   :  { %5213 = vmatprep.subr.bf16.mxu1 %v13088_v36  ;;  %v13184_v36 = vcombine.high %v1913_v29, %v1921_v31  ;;  %v14702_v16 = vld [vmem:[%s17336_s7 + $0xa0] sm:$0xff]  }
 0x4dd   :  { %5132 = vmatpush1.bf16.msra.mxu0 %v13085_v43  ;;  %v1937_v43 = vld [vmem:[#allocation11 + $0xff8] sm:$0xff] }
 0x4de   :  { %5214 = vmatpush1.bf16.msra.mxu1 %v13087_v45  ;;  %5133 = vmatprep.subr.bf16.mxu0 %v13102_v46  ;;  %v1957_v45 = vrot.slane %v16629_v32, %v16550_v30  ;;  %v13181_v46 = vcombine.low %v1912_v27, %v1920_v28  ;;  %v13200_v50 = vcombine.high %v1929_v39, %v1937_v43  ;;  %v14706_v28 = vld [vmem:[%s17336_s7 + $0xa8] sm:$0xff]  }
 0x4df   :  { %5215 = vmatprep.subr.bf16.mxu1 %v13104_v47  ;;  %v13183_v47 = vcombine.low %v1913_v29, %v1921_v31  ;;  %v1945_v27 = vrot.slane %v16629_v32, %v16538_v24  ;;  %v14707_v29 = vld [vmem:[%s17336_s7 + $0x70] sm:$0xff]   ;;  %v1953_v31 = vrot.slane %v16629_v32, %v16557_v42 }
 0x4e0   :  { %v14316_v51 = vadd.f32 %v16611_v4, %v1957_v45  ;;  %v14686_v4 = vld [vmem:[%s17336_s7 + $0x80] sm:$0xff]  }
 0x4e1   :  { %5134 = vmatpush1.bf16.msra.mxu0 %v13101_v52  ;;  %v13197_v52 = vcombine.low %v1928_v37, %v1936_v38  ;;  %v14313_v37 = vadd.f32 %v16605_v61, %v1945_v27  ;;  %v14710_v38 = vld [vmem:[%s17336_s7 + $0xb0] sm:$0xff]  }
 0x4e2   :  { %5216 = vmatpush1.bf16.msra.mxu1 %v13103_v53  ;;  %5135 = vmatprep.subr.bf16.mxu0 %v13118_v54  ;;  %v13199_v53 = vcombine.low %v1929_v39, %v1937_v43  ;;  %v14683_v54 = vld [vmem:[%s17336_s7 + $0x40] sm:$0xff]   ;;  %v5241_v56 = vmax.f32 %v14316_v51, 0.0  ;;  %v14315_v39 = vadd.f32 %v16607_v62, %v1953_v31  ;;  %v14712_v43 = vld [vmem:[%s17336_s7 + $0xf8] sm:$0xff]   ;;  %v14740_v27 = vld [vmem:[%s17336_s7 + $0x1f0] sm:$0xff]  }
 0x4e3   :  { %5217 = vmatprep.subr.bf16.mxu1 %v13120_v55  ;;  %v14684_v55 = vld [vmem:[%s17336_s7 + $0xc0] sm:$0xff]   ;;  %v14714_v62 = vld [vmem:[%s17336_s7 + $0xb8] sm:$0xff]   ;;  %v14742_v31 = vld [vmem:[%s17336_s7 + $0x1b0] sm:$0xff]  }
 0x4e4   :  { %v14717_v51 = vld [vmem:[%s17336_s7 + $0x100] sm:$0xff]  }
 0x4e5   :  { %5136 = vmatpush1.bf16.msra.mxu0 %v13117_v59  ;;  %v14688_v59 = vld [vmem:[%s17336_s7 + $0xc8] sm:$0xff]  }
 0x4e6   :  { %5218 = vmatpush1.bf16.msra.mxu1 %v13119_v25  ;;  %5137 = vmatprep.subr.bf16.mxu0 %v13134_v60  ;;  %v5257_v25 = vpack.c.bf16 %v5241_v56, %v5241_v56  ;;  %v14689_v60 = vld [vmem:[%s17336_s7 + $0x8] sm:$0xff]  }
 0x4e7   :  { %5219 = vmatprep.subr.bf16.mxu1 %v13136_v63  ;;  %v14690_v63 = vld [vmem:[%s17336_s7 + $0x88] sm:$0xff]  }
 0x4e8   :  { %v14720_v56 = vld [vmem:[%s17336_s7 + $0x1c8] sm:$0xff]  }
 0x4e9   :  { %5138 = vmatpush1.bf16.msra.mxu0 %v13133_v7  ;;  %v14696_v7 = vld [vmem:[%s17336_s7 + $0xd8] sm:$0xff]  }
 0x4ea   :  { %5220 = vmatpush1.bf16.msra.mxu1 %v13135_v8  ;;  %5139 = vmatprep.subr.bf16.mxu0 %v13150_v9  ;;  %v14697_v8 = vld [vmem:[%s17336_s7 + $0x18] sm:$0xff]  }
 0x4eb   :  { %5221 = vmatprep.subr.bf16.mxu1 %v13152_v12  ;;  %v14698_v9 = vld [vmem:[%s17336_s7 + $0x98] sm:$0xff]   ;;  %v14699_v12 = vld [vmem:[%s17336_s7 + $0x60] sm:$0xff]  }
 0x4ed   :  { %5140 = vmatpush1.bf16.msra.mxu0 %v13149_v19  ;;  %v14704_v19 = vld [vmem:[%s17336_s7 + $0xe8] sm:$0xff]  }
 0x4ee   :  { %5222 = vmatpush1.bf16.msra.mxu1 %v13151_v20  ;;  %5141 = vmatprep.subr.bf16.mxu0 %v13166_v21  ;;  %v16706_v20 = vsub.s32 5, %v16535_v23  ;;  %v16709_v21 = vsub.s32 7, %v16535_v23 }
 0x4ef   :  { %5223 = vmatprep.subr.bf16.mxu1 %v13168_v22  ;;  %v14705_v22 = vld [vmem:[%s17336_s7 + $0x28] sm:$0xff]  }
 0x4f1   :  { %5142 = vmatpush1.bf16.msra.mxu0 %v13165_v33  ;;  %v14708_v33 = vld [vmem:[%s17336_s7 + $0xf0] sm:$0xff]  }
 0x4f2   :  { %5224 = vmatpush1.bf16.msra.mxu1 %v13167_v34  ;;  %5143 = vmatprep.subr.bf16.mxu0 %v13182_v35  ;;  %v1965_v34 = vrot.slane %v16629_v32, %v16706_v20  ;;  %v1973_v35 = vrot.slane %v16629_v32, %v16709_v21 }
 0x4f3   :  { %5225 = vmatprep.subr.bf16.mxu1 %v13184_v36  ;;  %v14709_v36 = vld [vmem:[%s17336_s7 + $0x30] sm:$0xff]  }
 0x4f4   :  { %v14318_v45 = vadd.f32 %v16625_v11, %v1965_v34  ;;  %v14320_v61 = vadd.f32 %v16627_v40, %v1973_v35  ;;  %v14716_v11 = vld [vmem:[%s17336_s7 + $0x1c0] sm:$0xff]   ;;  %v14744_v34 = vld [vmem:[%s17336_s7 + $0x1f8] sm:$0xff]  }
 0x4f5   :  { %5144 = vmatpush1.bf16.msra.mxu0 %v13181_v46  ;;  %v14713_v46 = vld [vmem:[%s17336_s7 + $0x38] sm:$0xff]  }
 0x4f6   :  { %5226 = vmatpush1.bf16.msra.mxu1 %v13183_v47  ;;  %5145 = vmatprep.subr.bf16.mxu0 %v13198_v48  ;;  %v5238_v47 = vmax.f32 %v14313_v37, 0.0  ;;  %v14715_v48 = vld [vmem:[%s17336_s7 + $0x140] sm:$0xff]   ;;  %v5243_v40 = vmax.f32 %v14318_v45, 0.0  ;;  %v5245_v49 = vmax.f32 %v14320_v61, 0.0  ;;  %v14751_v45 = vld [vmem:[%s17336_s7 + $0x248] sm:$0xff]  }
 0x4f7   :  { %5227 = vmatprep.subr.bf16.mxu1 %v13200_v50  ;;  %v5240_v50 = vmax.f32 %v14315_v39, 0.0 }
 0x4f8   :  { %v5259_v13 = vpack.c.bf16 %v5243_v40, %v5243_v40  ;;  %v14758_v40 = vld [vmem:[%s17336_s7 + $0x290] sm:$0xff]  }
 0x4f9   :  { %5146 = vmatpush1.bf16.msra.mxu0 %v13197_v52  ;;  %v5254_v52 = vpack.c.bf16 %v5238_v47, %v5238_v47  ;;  %v14753_v47 = vld [vmem:[%s17336_s7 + $0x208] sm:$0xff]  }
 0x4fa   :  { %5228 = vmatpush1.bf16.msra.mxu1 %v13199_v53  ;;  %14045 = vmatprep.subr.bf16.mxu0 %v14683_v54  ;;  %v14718_v53 = vld [vmem:[%s17336_s7 + $0x180] sm:$0xff]   ;;  %v5256_v54 = vpack.c.bf16 %v5240_v50, %v5240_v50  ;;  %v14756_v50 = vld [vmem:[%s17336_s7 + $0x2d0] sm:$0xff]  }
 0x4fb   :  { %14067 = vmatprep.subr.bf16.mxu1 %v14684_v55  ;;  %v14719_v55 = vld [vmem:[%s17336_s7 + $0x148] sm:$0xff]  }
 0x4fc   :  { %5148 = vmatmul.mubr.bf16.vlgmr.msra.gmra.mrb[20].mxu0 %v16587_v3 }
 0x4fd   :  { %5230 = vmatmul.mubr.bf16.vlgmr.msra.gmra.mrb[20].mxu1 %v16587_v3  ;;  %14046 = vmatpush3.bf16.msra.mxu0 %v14685_v2  ;;  %v14692_v3 = vld [vmem:[%s17336_s7 + $0xd0] sm:$0xff]   ;;  %v5261_v2 = vpack.c.bf16 %v5245_v49, %v5245_v49  ;;  %v14759_v49 = vld [vmem:[%s17336_s7 + $0x258] sm:$0xff]  }
 0x4fe   :  { %6333 = vmatprep.mubr.bf16.mxu0 %v5255_v58  ;;  %14068 = vmatpush3.bf16.msra.mxu1 %v14686_v4  ;;  %v14721_v4 = vld [vmem:[%s17336_s7 + $0x108] sm:$0xff]   ;;  %v14723_v58 = vld [vmem:[%s17336_s7 + $0x150] sm:$0xff]  }
 0x4ff   :  { %6373 = vmatprep.mubr.bf16.mxu1 %v5257_v25  ;;  %14047 = vmatprep.subr.bf16.mxu0 %v14687_v57  ;;  %v14722_v57 = vld [vmem:[%s17336_s7 + $0x188] sm:$0xff]   ;;  %v14725_v25 = vld [vmem:[%s17336_s7 + $0x110] sm:$0xff]  }
 0x500   :  { %14069 = vmatprep.subr.bf16.mxu1 %v14688_v59  ;;  %v14724_v59 = vld [vmem:[%s17336_s7 + $0x1d0] sm:$0xff]  }
 0x501   :  { %14048 = vmatpush3.bf16.msra.mxu0 %v14689_v60  ;;  %v14726_v60 = vld [vmem:[%s17336_s7 + $0x190] sm:$0xff]  }
 0x502   :  { %14070 = vmatpush3.bf16.msra.mxu1 %v14690_v63  ;;  %14049 = vmatprep.subr.bf16.mxu0 %v14691_v18  ;;  %v14727_v63 = vld [vmem:[%s17336_s7 + $0x158] sm:$0xff]  }
 0x503   :  { %14071 = vmatprep.subr.bf16.mxu1 %v14692_v3  ;;  %v14728_v18 = vld [vmem:[%s17336_s7 + $0x1d8] sm:$0xff]  }
 0x504   :  { %v14729_v3 = vld [vmem:[%s17336_s7 + $0x118] sm:$0xff]  }
 0x505   :  { %14050 = vmatpush3.bf16.msra.mxu0 %v14693_v1  ;;  %v14730_v1 = vld [vmem:[%s17336_s7 + $0x198] sm:$0xff]  }
 0x506   :  { %14072 = vmatpush3.bf16.msra.mxu1 %v14694_v44  ;;  %14051 = vmatprep.subr.bf16.mxu0 %v14695_v5  ;;  %v14731_v44 = vld [vmem:[%s17336_s7 + $0x160] sm:$0xff]  }
 0x507   :  { %14073 = vmatprep.subr.bf16.mxu1 %v14696_v7  ;;  %v14732_v5 = vld [vmem:[%s17336_s7 + $0x1e0] sm:$0xff]  }
 0x508   :  { %v14733_v7 = vld [vmem:[%s17336_s7 + $0x120] sm:$0xff]  }
 0x509   :  { %14052 = vmatpush3.bf16.msra.mxu0 %v14697_v8  ;;  %v16811_v8 = vsub.s32 4, %v16535_v23 }
 0x50a   :  { %14074 = vmatpush3.bf16.msra.mxu1 %v14698_v9  ;;  %14053 = vmatprep.subr.bf16.mxu0 %v14699_v12  ;;  %v14734_v9 = vld [vmem:[%s17336_s7 + $0x1a0] sm:$0xff]   ;;  %v14735_v12 = vld [vmem:[%s17336_s7 + $0x168] sm:$0xff]  }
 0x50b   :  { %14075 = vmatprep.subr.bf16.mxu1 %v14700_v14  ;;  %v16820_v14 = vsub.s32 6, %v16535_v23  ;;  %v14738_v23 = vld [vmem:[%s17336_s7 + $0x1a8] sm:$0xff]  }
 0x50d   :  { %14054 = vmatpush3.bf16.msra.mxu0 %v14701_v15  ;;  %v14736_v15 = vld [vmem:[%s17336_s7 + $0x1e8] sm:$0xff]  }
 0x50e   :  { %14076 = vmatpush3.bf16.msra.mxu1 %v14702_v16  ;;  %14055 = vmatprep.subr.bf16.mxu0 %v14703_v17  ;;  %v14737_v16 = vld [vmem:[%s17336_s7 + $0x128] sm:$0xff]   ;;  %v1961_v17 = vrot.slane %v16629_v32, %v16811_v8 }
 0x50f   :  { %14077 = vmatprep.subr.bf16.mxu1 %v14704_v19  ;;  %v14739_v19 = vld [vmem:[%s17336_s7 + $0x170] sm:$0xff]  }
 0x511   :  { %14056 = vmatpush3.bf16.msra.mxu0 %v14705_v22  ;;  %v1969_v22 = vrot.slane %v16629_v32, %v16820_v14  ;;  %v14743_v32 = vld [vmem:[%s17336_s7 + $0x178] sm:$0xff]  }
 0x512   :  { %14078 = vmatpush3.bf16.msra.mxu1 %v14706_v28  ;;  %14057 = vmatprep.subr.bf16.mxu0 %v14707_v29  ;;  %v14741_v28 = vld [vmem:[%s17336_s7 + $0x130] sm:$0xff]   ;;  %v14317_v29 = vadd.f32 %v16621_v6, %v1961_v17  ;;  %v14745_v6 = vld [vmem:[%s17336_s7 + $0x138] sm:$0xff]  }
 0x513   :  { %14079 = vmatprep.subr.bf16.mxu1 %v14708_v33  ;;  %v14319_v33 = vadd.f32 %v16623_v10, %v1969_v22  ;;  %v14747_v10 = vld [vmem:[%s17336_s7 + $0x240] sm:$0xff]  }
 0x514   :  { %v5242_v35 = vmax.f32 %v14317_v29, 0.0 }
 0x515   :  { %14058 = vmatpush3.bf16.msra.mxu0 %v14709_v36  ;;  %v14746_v36 = vld [vmem:[%s17336_s7 + $0x1b8] sm:$0xff]   ;;  %v5244_v37 = vmax.f32 %v14319_v33, 0.0 }
 0x516   :  { %14080 = vmatpush3.bf16.msra.mxu1 %v14710_v38  ;;  %14059 = vmatprep.subr.bf16.mxu0 %v14711_v41  ;;  %v14748_v38 = vld [vmem:[%s17336_s7 + $0x2c0] sm:$0xff]   ;;  %v5258_v39 = vpack.c.bf16 %v5242_v35, %v5242_v35  ;;  %v14776_v33 = vld [vmem:[%s17336_s7 + $0x2f8] sm:$0xff]  }
 0x517   :  { %14081 = vmatprep.subr.bf16.mxu1 %v14712_v43  ;;  %v14749_v41 = vld [vmem:[%s17336_s7 + $0x200] sm:$0xff]   ;;  %v5260_v61 = vpack.c.bf16 %v5244_v37, %v5244_v37  ;;  %v14777_v35 = vld [vmem:[%s17336_s7 + $0x238] sm:$0xff]  }
 0x518   :  { %v14750_v43 = vld [vmem:[%s17336_s7 + $0x280] sm:$0xff]   ;;  %v14778_v37 = vld [vmem:[%s17336_s7 + $0x2b8] sm:$0xff]  }
 0x519   :  { %14060 = vmatpush3.bf16.msra.mxu0 %v14713_v46  ;;  %v14752_v46 = vld [vmem:[%s17336_s7 + $0x2c8] sm:$0xff]  }
 0x51a   :  { %14082 = vmatpush3.bf16.msra.mxu1 %v14714_v62  ;;  %14089 = vmatprep.subr.bf16.mxu0 %v14715_v48  ;;  %v14754_v62 = vld [vmem:[%s17336_s7 + $0x288] sm:$0xff]   ;;  %v14755_v48 = vld [vmem:[%s17336_s7 + $0x250] sm:$0xff]  }
 0x51b   :  { %14111 = vmatprep.subr.bf16.mxu1 %v14716_v11  ;;  %v14757_v11 = vld [vmem:[%s17336_s7 + $0x210] sm:$0xff]  }
 0x51c   :  { %6334 = vmatmul.mubr.bf16.vlgmr.msra.gmra.mrb[24].mxu0 %v5254_v52  ;;  %v14761_v52 = vld [vmem:[%s17336_s7 + $0x218] sm:$0xff]  }
 0x51d   :  { %6374 = vmatmul.mubr.bf16.vlgmr.msra.gmra.mrb[24].mxu1 %v5256_v54  ;;  %14090 = vmatpush3.bf16.msra.mxu0 %v14717_v51  ;;  %v14760_v51 = vld [vmem:[%s17336_s7 + $0x2d8] sm:$0xff]   ;;  %v14763_v54 = vld [vmem:[%s17336_s7 + $0x260] sm:$0xff]  }
 0x51e   :  { %6413 = vmatprep.mubr.bf16.mxu0 %v5259_v13  ;;  %14112 = vmatpush3.bf16.msra.mxu1 %v14718_v53  ;;  %v14762_v53 = vld [vmem:[%s17336_s7 + $0x298] sm:$0xff]   ;;  %v14765_v13 = vld [vmem:[%s17336_s7 + $0x220] sm:$0xff]  }
 0x51f   :  { %6453 = vmatprep.mubr.bf16.mxu1 %v5261_v2  ;;  %14091 = vmatprep.subr.bf16.mxu0 %v14719_v55  ;;  %v14764_v55 = vld [vmem:[%s17336_s7 + $0x2e0] sm:$0xff]   ;;  %v16921_v2 = vld [vmem:[#allocation13 + $0x8] sm:$0xff] }
 0x520   :  { %14113 = vmatprep.subr.bf16.mxu1 %v14720_v56  ;;  %v14766_v56 = vld [vmem:[%s17336_s7 + $0x2a0] sm:$0xff]  }
 0x521   :  { %14092 = vmatpush3.bf16.msra.mxu0 %v14721_v4  ;;  %v14767_v4 = vld [vmem:[%s17336_s7 + $0x268] sm:$0xff]  }
 0x522   :  { %14114 = vmatpush3.bf16.msra.mxu1 %v14722_v57  ;;  %14093 = vmatprep.subr.bf16.mxu0 %v14723_v58  ;;  %v14768_v57 = vld [vmem:[%s17336_s7 + $0x2e8] sm:$0xff]   ;;  %v1981_v58 = vrot.slane %v16921_v2, %v16543_v26 }
 0x523   :  { %14115 = vmatprep.subr.bf16.mxu1 %v14724_v59  ;;  %v14769_v59 = vld [vmem:[%s17336_s7 + $0x228] sm:$0xff]  }
 0x525   :  { %14094 = vmatpush3.bf16.msra.mxu0 %v14725_v25  ;;  %v1977_v25 = vrot.slane %v16921_v2, %v16538_v24 }
 0x526   :  { %14116 = vmatpush3.bf16.msra.mxu1 %v14726_v60  ;;  %14095 = vmatprep.subr.bf16.mxu0 %v14727_v63  ;;  %v1989_v60 = vrot.slane %v16921_v2, %v16550_v30  ;;  %v14770_v63 = vld [vmem:[%s17336_s7 + $0x2a8] sm:$0xff]  }
 0x527   :  { %14117 = vmatprep.subr.bf16.mxu1 %v14728_v18  ;;  %v14771_v18 = vld [vmem:[%s17336_s7 + $0x270] sm:$0xff]  }
 0x529   :  { %14096 = vmatpush3.bf16.msra.mxu0 %v14729_v3 }
 0x52a   :  { %14118 = vmatpush3.bf16.msra.mxu1 %v14730_v1  ;;  %14097 = vmatprep.subr.bf16.mxu0 %v14731_v44  ;;  %v1985_v1 = vrot.slane %v16921_v2, %v16557_v42  ;;  %v14772_v44 = vld [vmem:[%s17336_s7 + $0x2f0] sm:$0xff]  }
 0x52b   :  { %14119 = vmatprep.subr.bf16.mxu1 %v14732_v5 }
 0x52d   :  { %14098 = vmatpush3.bf16.msra.mxu0 %v14733_v7 }
 0x52e   :  { %14120 = vmatpush3.bf16.msra.mxu1 %v14734_v9  ;;  %14099 = vmatprep.subr.bf16.mxu0 %v14735_v12 }
 0x52f   :  { %14121 = vmatprep.subr.bf16.mxu1 %v14736_v15 }
 0x531   :  { %14100 = vmatpush3.bf16.msra.mxu0 %v14737_v16  ;;  %v14773_v16 = vld [vmem:[%s17336_s7 + $0x230] sm:$0xff]  }
 0x532   :  { %14122 = vmatpush3.bf16.msra.mxu1 %v14738_v23  ;;  %14101 = vmatprep.subr.bf16.mxu0 %v14739_v19 }
 0x533   :  { %14123 = vmatprep.subr.bf16.mxu1 %v14740_v27  ;;  %v14774_v27 = vld [vmem:[%s17336_s7 + $0x2b0] sm:$0xff]  }
 0x535   :  { %14102 = vmatpush3.bf16.msra.mxu0 %v14741_v28  ;;  %v14775_v28 = vld [vmem:[%s17336_s7 + $0x278] sm:$0xff]  }
 0x536   :  { %14124 = vmatpush3.bf16.msra.mxu1 %v14742_v31  ;;  %14103 = vmatprep.subr.bf16.mxu0 %v14743_v32 }
 0x537   :  { %14125 = vmatprep.subr.bf16.mxu1 %v14744_v34 }
 0x539   :  { %14104 = vmatpush3.bf16.msra.mxu0 %v14745_v6 }
 0x53a   :  { %14126 = vmatpush3.bf16.msra.mxu1 %v14746_v36  ;;  %14133 = vmatprep.subr.bf16.mxu0 %v14747_v10 }
 0x53b   :  { %14155 = vmatprep.subr.bf16.mxu1 %v14748_v38  ;;  %v14779_v38 = vld [vmem:[%s17336_s7 + $0x340] sm:$0xff]  }
 0x53c   :  { %6414 = vmatmul.mubr.bf16.vlgmr.msra.gmra.mrb[28].mxu0 %v5258_v39  ;;  %v14780_v39 = vld [vmem:[%s17336_s7 + $0x3c0] sm:$0xff]  }
 0x53d   :  { %6454 = vmatmul.mubr.bf16.vlgmr.msra.gmra.mrb[28].mxu1 %v5260_v61  ;;  %14134 = vmatpush3.bf16.msra.mxu0 %v14749_v41  ;;  %v14782_v61 = vld [vmem:[%s17336_s7 + $0x380] sm:$0xff]  }
 0x53e   :  { %14156 = vmatpush3.bf16.msra.mxu1 %v14750_v43  ;;  %14135 = vmatprep.subr.bf16.mxu0 %v14751_v45  ;;  %v14781_v43 = vld [vmem:[%s17336_s7 + $0x300] sm:$0xff]  }
 0x53f   :  { %14157 = vmatprep.subr.bf16.mxu1 %v14752_v46  ;;  %v14783_v46 = vld [vmem:[%s17336_s7 + $0x348] sm:$0xff]  }
 0x541   :  { %14136 = vmatpush3.bf16.msra.mxu0 %v14753_v47 }
 0x542   :  { %14158 = vmatpush3.bf16.msra.mxu1 %v14754_v62  ;;  %14137 = vmatprep.subr.bf16.mxu0 %v14755_v48  ;;  %v14784_v62 = vld [vmem:[%s17336_s7 + $0x3c8] sm:$0xff]  }
 0x543   :  { %14159 = vmatprep.subr.bf16.mxu1 %v14756_v50  ;;  %v14785_v48 = vld [vmem:[%s17336_s7 + $0x308] sm:$0xff]  }
 0x544   :  { %v14786_v50 = vld [vmem:[%s17336_s7 + $0x388] sm:$0xff]  }
 0x545   :  { %14138 = vmatpush3.bf16.msra.mxu0 %v14757_v11  ;;  %v14787_v11 = vld [vmem:[%s17336_s7 + $0x350] sm:$0xff]  }
 0x546   :  { %14160 = vmatpush3.bf16.msra.mxu1 %v14758_v40  ;;  %14139 = vmatprep.subr.bf16.mxu0 %v14759_v49  ;;  %v14788_v40 = vld [vmem:[%s17336_s7 + $0x3d0] sm:$0xff]  }
 0x547   :  { %14161 = vmatprep.subr.bf16.mxu1 %v14760_v51  ;;  %v14789_v49 = vld [vmem:[%s17336_s7 + $0x310] sm:$0xff]  }
 0x548   :  { %v14790_v51 = vld [vmem:[%s17336_s7 + $0x390] sm:$0xff]  }
 0x549   :  { %14140 = vmatpush3.bf16.msra.mxu0 %v14761_v52  ;;  %v14791_v52 = vld [vmem:[%s17336_s7 + $0x358] sm:$0xff]  }
 0x54a   :  { %14162 = vmatpush3.bf16.msra.mxu1 %v14762_v53  ;;  %14141 = vmatprep.subr.bf16.mxu0 %v14763_v54  ;;  %v14792_v53 = vld [vmem:[%s17336_s7 + $0x3d8] sm:$0xff]  }
 0x54b   :  { %14163 = vmatprep.subr.bf16.mxu1 %v14764_v55  ;;  %v14793_v54 = vld [vmem:[%s17336_s7 + $0x318] sm:$0xff]  }
 0x54c   :  { %v14794_v55 = vld [vmem:[%s17336_s7 + $0x398] sm:$0xff]  }
 0x54d   :  { %14142 = vmatpush3.bf16.msra.mxu0 %v14765_v13  ;;  %v14795_v13 = vld [vmem:[%s17336_s7 + $0x360] sm:$0xff]  }
 0x54e   :  { %14164 = vmatpush3.bf16.msra.mxu1 %v14766_v56  ;;  %14143 = vmatprep.subr.bf16.mxu0 %v14767_v4  ;;  %v14796_v56 = vld [vmem:[%s17336_s7 + $0x3e0] sm:$0xff]  }
 0x54f   :  { %v4985_v3 = vpop.f32.mrb[16].mxu0  ;;  %14165 = vmatprep.subr.bf16.mxu1 %v14768_v57  ;;  %v14797_v4 = vld [vmem:[%s17336_s7 + $0x320] sm:$0xff]  }
 0x550   :  { %v5067_v5 = vpop.f32.mrb[16].mxu1  ;;  %v4987_v7 = vpop.f32.mrb[17].mxu0  ;;  %v14321_v17 = vadd.f32 %v4985_v3, %v1977_v25  ;;  %v14798_v57 = vld [vmem:[%s17336_s7 + $0x3a0] sm:$0xff]   ;;  %v14801_v25 = vld [vmem:[%s17336_s7 + $0x328] sm:$0xff]   ;;  %v14805_v3 = vld [vmem:[%s17336_s7 + $0x330] sm:$0xff]  }
 0x551   :  { %v14322_v9 = vadd.f32 %v4987_v7, %v1981_v58  ;;  %v5069_v12 = vpop.f32.mrb[17].mxu1  ;;  %v4989_v15 = vpop.f32.mrb[18].mxu0  ;;  %14144 = vmatpush3.bf16.msra.mxu0 %v14769_v59  ;;  %v14323_v29 = vadd.f32 %v5067_v5, %v1985_v1  ;;  %v14799_v58 = vld [vmem:[%s17336_s7 + $0x368] sm:$0xff]   ;;  %v14806_v1 = vld [vmem:[%s17336_s7 + $0x3b0] sm:$0xff]   ;;  %v14808_v5 = vld [vmem:[%s17336_s7 + $0x3f8] sm:$0xff]  }
 0x552   :  { %v14324_v23 = vadd.f32 %v5069_v12, %v1989_v60  ;;  %v5071_v19 = vpop.f32.mrb[18].mxu1  ;;  %14166 = vmatpush3.bf16.msra.mxu1 %v14770_v63  ;;  %v4990_v22 = vpop.f32.mrb[19].mxu0  ;;  %14145 = vmatprep.subr.bf16.mxu0 %v14771_v18  ;;  %v5246_v36 = vmax.f32 %v14321_v17, 0.0  ;;  %v14800_v59 = vld [vmem:[%s17336_s7 + $0x3e8] sm:$0xff]   ;;  %v14803_v63 = vld [vmem:[%s17336_s7 + $0x370] sm:$0xff]   ;;  %v14809_v7 = vld [vmem:[%s17336_s7 + $0x338] sm:$0xff]   ;;  %v1993_v12 = vrot.slane %v16921_v2, %v16811_v8  ;;  %v2001_v15 = vrot.slane %v16921_v2, %v16820_v14 }
 0x553   :  { %v5247_v31 = vmax.f32 %v14322_v9, 0.0  ;;  %v5072_v32 = vpop.f32.mrb[19].mxu1  ;;  %14167 = vmatprep.subr.bf16.mxu1 %v14772_v44  ;;  %v5248_v41 = vmax.f32 %v14323_v29, 0.0  ;;  %v14802_v60 = vld [vmem:[%s17336_s7 + $0x3a8] sm:$0xff]   ;;  %v14804_v18 = vld [vmem:[%s17336_s7 + $0x3f0] sm:$0xff]   ;;  %v14807_v44 = vld [vmem:[%s17336_s7 + $0x378] sm:$0xff]   ;;  %v2005_v17 = vrot.slane %v16921_v2, %v16709_v21 }
 0x554   :  { %v5249_v34 = vmax.f32 %v14324_v23, 0.0  ;;  %v5262_v45 = vpack.c.bf16 %v5246_v36, %v5246_v36  ;;  %v14810_v9 = vld [vmem:[%s17336_s7 + $0x3b8] sm:$0xff]  }
 0x555   :  { %v5263_v6 = vpack.c.bf16 %v5247_v31, %v5247_v31  ;;  %14146 = vmatpush3.bf16.msra.mxu0 %v14773_v16  ;;  %v5264_v47 = vpack.c.bf16 %v5248_v41, %v5248_v41  ;;  %v1997_v16 = vrot.slane %v16921_v2, %v16706_v20 }
 0x556   :  { %v5265_v10 = vpack.c.bf16 %v5249_v34, %v5249_v34  ;;  %14168 = vmatpush3.bf16.msra.mxu1 %v14774_v27  ;;  %14147 = vmatprep.subr.bf16.mxu0 %v14775_v28 }
 0x557   :  { %6493 = vmatprep.mubr.bf16.mxu0 %v5263_v6  ;;  %14169 = vmatprep.subr.bf16.mxu1 %v14776_v33 }
 0x558   :  { %6533 = vmatprep.mubr.bf16.mxu1 %v5265_v10 }
 0x559   :  { %14148 = vmatpush3.bf16.msra.mxu0 %v14777_v35 }
 0x55a   :  { %14170 = vmatpush3.bf16.msra.mxu1 %v14778_v37  ;;  %14177 = vmatprep.subr.bf16.mxu0 %v14779_v38 }
 0x55b   :  { %14199 = vmatprep.subr.bf16.mxu1 %v14780_v39 }
 0x55c   :  { %6494 = vmatmul.mubr.bf16.vlgmr.msra.gmra.mrb[32].mxu0 %v5262_v45 }
 0x55d   :  { %6534 = vmatmul.mubr.bf16.vlgmr.msra.gmra.mrb[32].mxu1 %v5264_v47  ;;  %14178 = vmatpush3.bf16.msra.mxu0 %v14781_v43 }
 0x55e   :  { %14200 = vmatpush3.bf16.msra.mxu1 %v14782_v61  ;;  %14179 = vmatprep.subr.bf16.mxu0 %v14783_v46  ;;  %v13201_v46 = vld [vmem:[#allocation14] ss:$0 sm:$0xff] }
 0x55f   :  { %14201 = vmatprep.subr.bf16.mxu1 %v14784_v62 }
 0x561   :  { %14180 = vmatpush3.bf16.msra.mxu0 %v14785_v48 }
 0x562   :  { %14202 = vmatpush3.bf16.msra.mxu1 %v14786_v50  ;;  %14181 = vmatprep.subr.bf16.mxu0 %v14787_v11 }
 0x563   :  { %14203 = vmatprep.subr.bf16.mxu1 %v14788_v40 }
 0x565   :  { %14182 = vmatpush3.bf16.msra.mxu0 %v14789_v49 }
 0x566   :  { %14204 = vmatpush3.bf16.msra.mxu1 %v14790_v51  ;;  %14183 = vmatprep.subr.bf16.mxu0 %v14791_v52 }
 0x567   :  { %14205 = vmatprep.subr.bf16.mxu1 %v14792_v53 }
 0x569   :  { %14184 = vmatpush3.bf16.msra.mxu0 %v14793_v54 }
 0x56a   :  { %14206 = vmatpush3.bf16.msra.mxu1 %v14794_v55  ;;  %14185 = vmatprep.subr.bf16.mxu0 %v14795_v13 }
 0x56b   :  { %14207 = vmatprep.subr.bf16.mxu1 %v14796_v56 }
 0x56d   :  { %14186 = vmatpush3.bf16.msra.mxu0 %v14797_v4 }
 0x56e   :  { %14208 = vmatpush3.bf16.msra.mxu1 %v14798_v57  ;;  %14187 = vmatprep.subr.bf16.mxu0 %v14799_v58 }
 0x56f   :  { %14209 = vmatprep.subr.bf16.mxu1 %v14800_v59 }
 0x571   :  { %14188 = vmatpush3.bf16.msra.mxu0 %v14801_v25 }
 0x572   :  { %14210 = vmatpush3.bf16.msra.mxu1 %v14802_v60  ;;  %14189 = vmatprep.subr.bf16.mxu0 %v14803_v63 }
 0x573   :  { %14211 = vmatprep.subr.bf16.mxu1 %v14804_v18 }
 0x575   :  { %14190 = vmatpush3.bf16.msra.mxu0 %v14805_v3  ;;  %v6622_v3 = vld [vmem:[#allocation16] sm:$0xff] }
 0x576   :  { %14212 = vmatpush3.bf16.msra.mxu1 %v14806_v1  ;;  %14191 = vmatprep.subr.bf16.mxu0 %v14807_v44  ;;  %v6630_v1 = vld [vmem:[#allocation16 + $0x40] sm:$0xff]  ;;  %v6623_v44 = vld [vmem:[#allocation16 + $0x8] sm:$0xff] }
 0x577   :  { %14213 = vmatprep.subr.bf16.mxu1 %v14808_v5  ;;  %v13331_v5 = vcombine.high %v6622_v3, %v6630_v1 }
 0x579   :  { %14192 = vmatpush3.bf16.msra.mxu0 %v14809_v7  ;;  %v6631_v7 = vld [vmem:[#allocation16 + $0x48] sm:$0xff] }
 0x57a   :  { %14214 = vmatpush3.bf16.msra.mxu1 %v14810_v9  ;;  %v13330_v9 = vcombine.low %v6622_v3, %v6630_v1  ;;  %6902 = vmatprep.subr.bf16.mxu0 %v13331_v5  ;;  %v6626_v1 = vld [vmem:[#allocation16 + $0x20] sm:$0xff] }
 0x5cf   :  { %v5149_v23 = vpop.f32.mrb[20].mxu0 }
 0x5d0   :  { %v14325_v19 = vadd.f32 %v5149_v23, %v1993_v12  ;;  %v5231_v22 = vpop.f32.mrb[20].mxu1  ;;  %v5151_v27 = vpop.f32.mrb[21].mxu0  ;;  %v13332_v12 = vcombine.low %v6623_v44, %v6631_v7 }
 0x5d1   :  { %v14327_v28 = vadd.f32 %v5231_v22, %v2001_v15  ;;  %v14326_v29 = vadd.f32 %v5151_v27, %v1997_v16  ;;  %v5233_v31 = vpop.f32.mrb[21].mxu1  ;;  %v5153_v32 = vpop.f32.mrb[22].mxu0  ;;  %v13333_v15 = vcombine.high %v6623_v44, %v6631_v7  ;;  %v6646_v22 = vld [vmem:[#allocation16 + $0xc0] sm:$0xff]  ;;  %v6639_v27 = vld [vmem:[#allocation16 + $0x88] sm:$0xff] }
 0x5d2   :  { %v5250_v33 = vmax.f32 %v14325_v19, 0.0  ;;  %v14328_v34 = vadd.f32 %v5233_v31, %v2005_v17  ;;  %v5235_v6 = vpop.f32.mrb[22].mxu1  ;;  %v5154_v35 = vpop.f32.mrb[23].mxu0  ;;  %v6638_v19 = vld [vmem:[#allocation16 + $0x80] sm:$0xff]  ;;  %v6627_v7 = vld [vmem:[#allocation16 + $0x28] sm:$0xff] }
 0x5d3   :  { %v5252_v36 = vmax.f32 %v14327_v28, 0.0  ;;  %v5251_v10 = vmax.f32 %v14326_v29, 0.0  ;;  %v5236_v37 = vpop.f32.mrb[23].mxu1  ;;  %6943 = vmatprep.subr.bf16.mxu1 %v13333_v15  ;;  %v13347_v32 = vcombine.high %v6638_v19, %v6646_v22  ;;  %v6634_v44 = vld [vmem:[#allocation16 + $0x60] sm:$0xff] }
 0x5d4   :  { %v5253_v38 = vmax.f32 %v14328_v34, 0.0  ;;  %v5266_v39 = vpack.c.bf16 %v5250_v33, %v5250_v33  ;;  %v6647_v33 = vld [vmem:[#allocation16 + $0xc8] sm:$0xff] }
 0x5d5   :  { %v5267_v41 = vpack.c.bf16 %v5251_v10, %v5251_v10  ;;  %v5268_v2 = vpack.c.bf16 %v5252_v36, %v5252_v36  ;;  %v13346_v36 = vcombine.low %v6638_v19, %v6646_v22  ;;  %v13348_v10 = vcombine.low %v6639_v27, %v6647_v33  ;;  %v6650_v19 = vld [vmem:[#allocation16 + $0xe0] sm:$0xff]  ;;  %v6643_v22 = vld [vmem:[#allocation16 + $0xa8] sm:$0xff] }
 0x5d6   :  { %v5269_v43 = vpack.c.bf16 %v5253_v38, %v5253_v38  ;;  %v13349_v37 = vcombine.high %v6639_v27, %v6647_v33  ;;  %v6651_v27 = vld [vmem:[#allocation16 + $0xe8] sm:$0xff]  ;;  %v6628_v33 = vld [vmem:[#allocation16 + $0x30] sm:$0xff] }
 0x5d7   :  { %6573 = vmatprep.mubr.bf16.mxu0 %v5267_v41 }
 0x5d8   :  { %6613 = vmatprep.mubr.bf16.mxu1 %v5269_v43  ;;  %6574 = vmatmul.mubr.bf16.vlgmr.msra.gmra.mrb[36].mxu0 %v5266_v39  ;;  %v6624_v39 = vld [vmem:[#allocation16 + $0x10] sm:$0xff] }
 0x5d9   :  { %6614 = vmatmul.mubr.bf16.vlgmr.msra.gmra.mrb[36].mxu1 %v5268_v2  ;;  %6934 = vmatprep.mubr.bf16.mxu0 %v16221_v0  ;;  %v6632_v43 = vld [vmem:[#allocation16 + $0x50] sm:$0xff]  ;;  %v6625_v2 = vld [vmem:[#allocation16 + $0x18] sm:$0xff] }
 0x5da   :  { %6975 = vmatprep.mubr.bf16.mxu1 %v16221_v0  ;;  %6903 = vmatpush1.bf16.msra.mxu0 %v13330_v9  ;;  %v6635_v9 = vld [vmem:[#allocation16 + $0x68] sm:$0xff] }
 0x5db   :  { %6944 = vmatpush1.bf16.msra.mxu1 %v13332_v12  ;;  %6904 = vmatprep.subr.bf16.mxu0 %v13347_v32  ;;  %v13357_v32 = vcombine.high %v6643_v22, %v6651_v27 }
 0x5dc   :  { %6945 = vmatprep.subr.bf16.mxu1 %v13349_v37 }
 0x5de   :  { %6905 = vmatpush1.bf16.msra.mxu0 %v13346_v36 }
 0x5df   :  { %6946 = vmatpush1.bf16.msra.mxu1 %v13348_v10  ;;  %v13356_v10 = vcombine.low %v6643_v22, %v6651_v27  ;;  %v14856_v22 = vld [vmem:[#allocation19 + $0xe8] ss:$16 sps:$4 sm:$0xff]   ;;  %v14861_v27 = vld [vmem:[#allocation19 + $0x104] ss:$16 sps:$4 sm:$0xff]  }
 0x5ef   :  { %v14061_v45 = vpop.f32.mrb[24].mxu0 }
 0x5f0   :  { %v14083_v61 = vpop.f32.mrb[24].mxu1  ;;  %v14062_v47 = vpop.f32.mrb[25].mxu0 }
 0x5f1   :  { %v14063_v62 = vadd.f32 %v14062_v47, %v14061_v45  ;;  %v14084_v48 = vpop.f32.mrb[25].mxu1  ;;  %v14064_v50 = vpop.f32.mrb[26].mxu0  ;;  %v6633_v47 = vld [vmem:[#allocation16 + $0x58] sm:$0xff] }
 0x5f2   :  { %v14085_v11 = vadd.f32 %v14084_v48, %v14083_v61  ;;  %v14086_v40 = vpop.f32.mrb[26].mxu1  ;;  %v14065_v49 = vpop.f32.mrb[27].mxu0  ;;  %v13334_v61 = vcombine.low %v6624_v39, %v6632_v43  ;;  %v13337_v48 = vcombine.high %v6625_v2, %v6633_v47 }
 0x5f3   :  { %v6336_v51 = vadd.f32 %v14063_v62, %v13201_v46  ;;  %v14087_v52 = vpop.f32.mrb[27].mxu1  ;;  %v13335_v46 = vcombine.high %v6624_v39, %v6632_v43  ;;  %v13336_v62 = vcombine.low %v6625_v2, %v6633_v47  ;;  %v6652_v39 = vld [vmem:[#allocation16 + $0xf0] sm:$0xff]  ;;  %v6645_v43 = vld [vmem:[#allocation16 + $0xb8] sm:$0xff] }
 0x5f4   :  { %7025 = vmatprep.subr.bf16.mxu1 %v13337_v48  ;;  %v6653_v2 = vld [vmem:[#allocation16 + $0xf8] sm:$0xff] }
 0x5f5   :  { %v6376_v53 = vadd.f32 %v14085_v11, %v6336_v51  ;;  %6984 = vmatprep.subr.bf16.mxu0 %v13335_v46  ;;  %v13361_v47 = vcombine.high %v6645_v43, %v6653_v2  ;;  %v13360_v48 = vcombine.low %v6645_v43, %v6653_v2  ;;  %v14880_v43 = vld [vmem:[#allocation19 + $0x168] ss:$16 sps:$4 sm:$0xff]   ;;  %v14885_v2 = vld [vmem:[#allocation19 + $0x184] ss:$16 sps:$4 sm:$0xff]  }
 0x60f   :  { %v14105_v54 = vpop.f32.mrb[28].mxu0 }
 0x610   :  { %v14127_v55 = vpop.f32.mrb[28].mxu1  ;;  %v14106_v13 = vpop.f32.mrb[29].mxu0 }
 0x611   :  { %v14107_v56 = vadd.f32 %v14106_v13, %v14105_v54  ;;  %v14128_v4 = vpop.f32.mrb[29].mxu1  ;;  %v14108_v57 = vpop.f32.mrb[30].mxu0 }
 0x612   :  { %v14129_v58 = vadd.f32 %v14128_v4, %v14127_v55  ;;  %v14130_v59 = vpop.f32.mrb[30].mxu1  ;;  %v14109_v25 = vpop.f32.mrb[31].mxu0  ;;  %v6640_v4 = vld [vmem:[#allocation16 + $0x90] sm:$0xff] }
 0x613   :  { %v6416_v60 = vadd.f32 %v14107_v56, %v6376_v53  ;;  %v14131_v63 = vpop.f32.mrb[31].mxu1  ;;  %v6648_v57 = vld [vmem:[#allocation16 + $0xd0] sm:$0xff]  ;;  %v6641_v59 = vld [vmem:[#allocation16 + $0x98] sm:$0xff] }
 0x614   :  { %v6649_v25 = vld [vmem:[#allocation16 + $0xd8] sm:$0xff]  ;;  %v13350_v12 = vcombine.low %v6640_v4, %v6648_v57 }
 0x615   :  { %v6456_v18 = vadd.f32 %v14129_v58, %v6416_v60  ;;  %v13353_v3 = vcombine.high %v6641_v59, %v6649_v25  ;;  %v13352_v15 = vcombine.low %v6641_v59, %v6649_v25  ;;  %v14829_v59 = vld [vmem:[#allocation19 + $0x60] ss:$16 sps:$4 sm:$0xff]   ;;  %v14832_v25 = vld [vmem:[#allocation19 + $0x68] ss:$16 sps:$4 sm:$0xff]  }
 0x62f   :  { %v14149_v16 = vpop.f32.mrb[32].mxu0 }
 0x630   :  { %v14171_v17 = vpop.f32.mrb[32].mxu1  ;;  %v14150_v23 = vpop.f32.mrb[33].mxu0 }
 0x631   :  { %v14151_v28 = vadd.f32 %v14150_v23, %v14149_v16  ;;  %v14172_v29 = vpop.f32.mrb[33].mxu1  ;;  %v14152_v31 = vpop.f32.mrb[34].mxu0  ;;  %v13339_v16 = vcombine.high %v6626_v1, %v6634_v44  ;;  %v6642_v23 = vld [vmem:[#allocation16 + $0xa0] sm:$0xff] }
 0x632   :  { %v14173_v34 = vadd.f32 %v14172_v29, %v14171_v17  ;;  %v14174_v6 = vpop.f32.mrb[34].mxu1  ;;  %v14153_v35 = vpop.f32.mrb[35].mxu0  ;;  %v13341_v17 = vcombine.high %v6627_v7, %v6635_v9  ;;  %v13340_v29 = vcombine.low %v6627_v7, %v6635_v9  ;;  %v13355_v31 = vcombine.high %v6642_v23, %v6650_v19  ;;  %v14844_v7 = vld [vmem:[#allocation19 + $0xa8] ss:$16 sps:$4 sm:$0xff]   ;;  %v14849_v9 = vld [vmem:[#allocation19 + $0xc4] ss:$16 sps:$4 sm:$0xff]  }
 0x633   :  { %v6496_v38 = vadd.f32 %v14151_v28, %v6456_v18  ;;  %v14175_v41 = vpop.f32.mrb[35].mxu1  ;;  %v13351_v18 = vcombine.high %v6640_v4, %v6648_v57  ;;  %v13338_v28 = vcombine.low %v6626_v1, %v6634_v44  ;;  %v6629_v6 = vld [vmem:[#allocation16 + $0x38] sm:$0xff]  ;;  %v13354_v36 = vcombine.low %v6642_v23, %v6650_v19  ;;  %v14831_v4 = vld [vmem:[#allocation19 + $0x64] ss:$16 sps:$4 sm:$0xff]   ;;  %v14853_v19 = vld [vmem:[#allocation19 + $0xe0] ss:$16 sps:$4 sm:$0xff]  }
 0x634   :  { %v6637_v35 = vld [vmem:[#allocation16 + $0x78] sm:$0xff]  ;;  %v6644_v41 = vld [vmem:[#allocation16 + $0xb0] sm:$0xff] }
 0x635   :  { %v6536_v45 = vadd.f32 %v14173_v34, %v6496_v38  ;;  %v6636_v34 = vld [vmem:[#allocation16 + $0x70] sm:$0xff]  ;;  %v13345_v38 = vcombine.high %v6629_v6, %v6637_v35  ;;  %v13359_v46 = vcombine.high %v6644_v41, %v6652_v39  ;;  %v14834_v57 = vld [vmem:[#allocation19 + $0x6c] ss:$16 sps:$4 sm:$0xff]  }
 0x636   :  { %v13343_v37 = vcombine.high %v6628_v33, %v6636_v34  ;;  %v14843_v1 = vld [vmem:[#allocation19 + $0xa4] ss:$16 sps:$4 sm:$0xff]   ;;  %v14846_v44 = vld [vmem:[#allocation19 + $0xac] ss:$16 sps:$4 sm:$0xff]  }
 0x637   :  { %v14858_v23 = vld [vmem:[#allocation19 + $0xec] ss:$16 sps:$4 sm:$0xff]  }
 0x6ab   :  { %v14193_v50 = vpop.f32.mrb[36].mxu0 }
 0x6ac   :  { %v14215_v11 = vpop.f32.mrb[36].mxu1  ;;  %v14194_v40 = vpop.f32.mrb[37].mxu0 }
 0x6ad   :  { %v14195_v49 = vadd.f32 %v14194_v40, %v14193_v50  ;;  %v14216_v51 = vpop.f32.mrb[37].mxu1  ;;  %v14196_v52 = vpop.f32.mrb[38].mxu0  ;;  %v14813_v50 = vld [vmem:[#allocation19 + $0x4] ss:$16 sps:$4 sm:$0xff]   ;;  %v14811_v40 = vld [vmem:[#allocation19] ss:$16 sps:$4 sm:$0xff]  }
 0x6ae   :  { %v14217_v53 = vadd.f32 %v14216_v51, %v14215_v11  ;;  %v14218_v54 = vpop.f32.mrb[38].mxu1  ;;  %v14197_v55 = vpop.f32.mrb[39].mxu0  ;;  %v14816_v11 = vld [vmem:[#allocation19 + $0xc] ss:$16 sps:$4 sm:$0xff]   ;;  %v14819_v51 = vld [vmem:[#allocation19 + $0x24] ss:$16 sps:$4 sm:$0xff]  }
 0x6af   :  { %v6576_v13 = vadd.f32 %v14195_v49, %v6536_v45  ;;  %v14219_v56 = vpop.f32.mrb[39].mxu1  ;;  %v13342_v45 = vcombine.low %v6628_v33, %v6636_v34  ;;  %v14814_v49 = vld [vmem:[#allocation19 + $0x8] ss:$16 sps:$4 sm:$0xff]   ;;  %v14822_v52 = vld [vmem:[#allocation19 + $0x2c] ss:$16 sps:$4 sm:$0xff]  }
 0x6b0   :  { %v14820_v54 = vld [vmem:[#allocation19 + $0x28] ss:$16 sps:$4 sm:$0xff]   ;;  %v14828_v55 = vld [vmem:[#allocation19 + $0x4c] ss:$16 sps:$4 sm:$0xff]   ;;  %v14865_v34 = vld [vmem:[#allocation19 + $0x120] ss:$16 sps:$4 sm:$0xff]  }
 0x6b1   :  { %v17073_v58 = vadd.f32 %v14217_v53, %v6576_v13  ;;  %v14817_v53 = vld [vmem:[#allocation19 + $0x20] ss:$16 sps:$4 sm:$0xff]   ;;  %v14826_v56 = vld [vmem:[#allocation19 + $0x48] ss:$16 sps:$4 sm:$0xff]   ;;  %v14870_v33 = vld [vmem:[#allocation19 + $0x12c] ss:$16 sps:$4 sm:$0xff]  }
 0x6b2   :  { %v14823_v13 = vld [vmem:[#allocation19 + $0x40] ss:$16 sps:$4 sm:$0xff]  }
 0x6b3   :  { %v17077_v60 = vpack.c.bf16 %v17073_v58, %v17073_v58  ;;  %12325 = vst.msk [vmem:[#allocation26] sm:$0xff] %vm6898_vm1, %v17073_v58  ;;  %v12404_v63 = vmul.f32 %v17073_v58, %v17073_v58 }
 0x6b5   :  { %13362 = vmatmul.mubr.msk.bf16.vlgmr.msra.gmra.mrb[40].mxu0 %vm6898_vm1, %v17077_v60  ;;  %13363 = vmatmul.mubr.msk.bf16.vlgmr.msra.gmra.mrb[40].mxu1 %vm6898_vm1, %v17077_v60  ;;  %v12405_v5 = vsel %vm6898_vm1, %v12404_v63, 0.0  ;;  %v14840_v63 = vld [vmem:[#allocation19 + $0x8c] ss:$16 sps:$4 sm:$0xff]  }
 0x6b6   :  { %12406 = vadd.xlane.f32.xlu0 %v12405_v5  ;;  %6985 = vmatpush1.bf16.msra.mxu0 %v13334_v61  ;;  %v13344_v61 = vcombine.low %v6629_v6, %v6637_v35  ;;  %v14841_v5 = vld [vmem:[#allocation19 + $0xa0] ss:$16 sps:$4 sm:$0xff]   ;;  %v14868_v6 = vld [vmem:[#allocation19 + $0x128] ss:$16 sps:$4 sm:$0xff]   ;;  %v14873_v35 = vld [vmem:[#allocation19 + $0x144] ss:$16 sps:$4 sm:$0xff]  }
 0x6b7   :  { %7026 = vmatpush1.bf16.msra.mxu1 %v13336_v62  ;;  %6986 = vmatprep.subr.bf16.mxu0 %v13351_v18  ;;  %v13358_v62 = vcombine.low %v6644_v41, %v6652_v39  ;;  %v14835_v18 = vld [vmem:[#allocation19 + $0x80] ss:$16 sps:$4 sm:$0xff]   ;;  %v14882_v41 = vld [vmem:[#allocation19 + $0x16c] ss:$16 sps:$4 sm:$0xff]  }
 0x6b8   :  { %7027 = vmatprep.subr.bf16.mxu1 %v13353_v3  ;;  %7016 = vmatprep.mubr.bf16.mxu0 %v16221_v0  ;;  %v14838_v3 = vld [vmem:[#allocation19 + $0x88] ss:$16 sps:$4 sm:$0xff]   ;;  %v14877_v39 = vld [vmem:[#allocation19 + $0x160] ss:$16 sps:$4 sm:$0xff]  }
 0x6b9   :  { %7057 = vmatprep.mubr.bf16.mxu1 %v16221_v0 }
 0x6ba   :  { %6987 = vmatpush1.bf16.msra.mxu0 %v13350_v12  ;;  %v14852_v12 = vld [vmem:[#allocation19 + $0xcc] ss:$16 sps:$4 sm:$0xff]  }
 0x6bb   :  { %7028 = vmatpush1.bf16.msra.mxu1 %v13352_v15  ;;  %7066 = vmatprep.subr.bf16.mxu0 %v13339_v16  ;;  %v14847_v15 = vld [vmem:[#allocation19 + $0xc0] ss:$16 sps:$4 sm:$0xff]   ;;  %v14850_v16 = vld [vmem:[#allocation19 + $0xc8] ss:$16 sps:$4 sm:$0xff]  }
 0x6bc   :  { %7107 = vmatprep.subr.bf16.mxu1 %v13341_v17  ;;  %v14855_v17 = vld [vmem:[#allocation19 + $0xe4] ss:$16 sps:$4 sm:$0xff]  }
 0x6bd   :  { %13364 = vmatmul.mubr.msk.bf16.vlgmr.msra.gmra.mrb[44].mxu0 %vm6898_vm1, %v17077_v60 }
 0x6be   :  { %13365 = vmatmul.mubr.msk.bf16.vlgmr.msra.gmra.mrb[44].mxu1 %vm6898_vm1, %v17077_v60  ;;  %7067 = vmatpush1.bf16.msra.mxu0 %v13338_v28  ;;  %v14864_v28 = vld [vmem:[#allocation19 + $0x10c] ss:$16 sps:$4 sm:$0xff]  }
 0x6bf   :  { %7108 = vmatpush1.bf16.msra.mxu1 %v13340_v29  ;;  %7068 = vmatprep.subr.bf16.mxu0 %v13355_v31  ;;  %v14859_v29 = vld [vmem:[#allocation19 + $0x100] ss:$16 sps:$4 sm:$0xff]   ;;  %v14862_v31 = vld [vmem:[#allocation19 + $0x108] ss:$16 sps:$4 sm:$0xff]  }
 0x6c0   :  { %7109 = vmatprep.subr.bf16.mxu1 %v13357_v32  ;;  %7098 = vmatprep.mubr.bf16.mxu0 %v16221_v0  ;;  %v14867_v32 = vld [vmem:[#allocation19 + $0x124] ss:$16 sps:$4 sm:$0xff]  }
 0x6c1   :  { %7139 = vmatprep.mubr.bf16.mxu1 %v16221_v0 }
 0x6c2   :  { %7069 = vmatpush1.bf16.msra.mxu0 %v13354_v36  ;;  %v14876_v36 = vld [vmem:[#allocation19 + $0x14c] ss:$16 sps:$4 sm:$0xff]  }
 0x6c3   :  { %7110 = vmatpush1.bf16.msra.mxu1 %v13356_v10  ;;  %7148 = vmatprep.subr.bf16.mxu0 %v13343_v37  ;;  %v14871_v10 = vld [vmem:[#allocation19 + $0x140] ss:$16 sps:$4 sm:$0xff]   ;;  %v14874_v37 = vld [vmem:[#allocation19 + $0x148] ss:$16 sps:$4 sm:$0xff]  }
 0x6c4   :  { %7189 = vmatprep.subr.bf16.mxu1 %v13345_v38  ;;  %v14879_v38 = vld [vmem:[#allocation19 + $0x164] ss:$16 sps:$4 sm:$0xff]  }
 0x6c5   :  { %13366 = vmatmul.mubr.msk.bf16.vlgmr.msra.gmra.mrb[48].mxu0 %vm6898_vm1, %v17077_v60 }
 0x6c6   :  { %13367 = vmatmul.mubr.msk.bf16.vlgmr.msra.gmra.mrb[48].mxu1 %vm6898_vm1, %v17077_v60  ;;  %7149 = vmatpush1.bf16.msra.mxu0 %v13342_v45  ;;  %v14888_v45 = vld [vmem:[#allocation19 + $0x18c] ss:$16 sps:$4 sm:$0xff]  }
 0x6c7   :  { %7190 = vmatpush1.bf16.msra.mxu1 %v13344_v61  ;;  %7150 = vmatprep.subr.bf16.mxu0 %v13359_v46  ;;  %v14883_v61 = vld [vmem:[#allocation19 + $0x180] ss:$16 sps:$4 sm:$0xff]   ;;  %v14886_v46 = vld [vmem:[#allocation19 + $0x188] ss:$16 sps:$4 sm:$0xff]  }
 0x6c8   :  { %7191 = vmatprep.subr.bf16.mxu1 %v13361_v47  ;;  %7180 = vmatprep.mubr.bf16.mxu0 %v16221_v0  ;;  %v14891_v47 = vld [vmem:[#allocation19 + $0x1a4] ss:$16 sps:$4 sm:$0xff]  }
 0x6c9   :  { %7221 = vmatprep.mubr.bf16.mxu1 %v16221_v0  ;;  %v14825_v0 = vld [vmem:[#allocation19 + $0x44] ss:$16 sps:$4 sm:$0xff]  }
 0x6ca   :  { %7151 = vmatpush1.bf16.msra.mxu0 %v13358_v62  ;;  %v14894_v62 = vld [vmem:[#allocation19 + $0x1ac] ss:$16 sps:$4 sm:$0xff]  }
 0x6cb   :  { %7192 = vmatpush1.bf16.msra.mxu1 %v13360_v48  ;;  %10356 = vmatprep.subr.bf16.mxu0 %v14813_v50  ;;  %v14889_v48 = vld [vmem:[#allocation19 + $0x1a0] ss:$16 sps:$4 sm:$0xff]   ;;  %v14892_v50 = vld [vmem:[#allocation19 + $0x1a8] ss:$16 sps:$4 sm:$0xff]  }
 0x6cc   :  { %10684 = vmatprep.subr.bf16.mxu1 %v14816_v11  ;;  %v14897_v11 = vld [vmem:[#allocation19 + $0x1c4] ss:$16 sps:$4 sm:$0xff]  }
 0x6cd   :  { %13368 = vmatmul.mubr.msk.bf16.vlgmr.msra.gmra.mrb[52].mxu0 %vm6898_vm1, %v17077_v60 }
 0x6ce   :  { %13369 = vmatmul.mubr.msk.bf16.vlgmr.msra.gmra.mrb[52].mxu1 %vm6898_vm1, %v17077_v60  ;;  %10357 = vmatpush1.bf16.msra.mxu0 %v14811_v40  ;;  %v14837_v60 = vld [vmem:[#allocation19 + $0x84] ss:$16 sps:$4 sm:$0xff]   ;;  %v14900_v40 = vld [vmem:[#allocation19 + $0x1cc] ss:$16 sps:$4 sm:$0xff]  }
 0x6cf   :  { %10685 = vmatpush1.bf16.msra.mxu1 %v14814_v49  ;;  %10358 = vmatprep.subr.bf16.mxu0 %v14819_v51  ;;  %v14895_v49 = vld [vmem:[#allocation19 + $0x1c0] ss:$16 sps:$4 sm:$0xff]   ;;  %v14898_v51 = vld [vmem:[#allocation19 + $0x1c8] ss:$16 sps:$4 sm:$0xff]  }
 0x6d0   :  { %10686 = vmatprep.subr.bf16.mxu1 %v14822_v52  ;;  %v14903_v52 = vld [vmem:[#allocation19 + $0x1e4] ss:$16 sps:$4 sm:$0xff]  }
 0x6d2   :  { %10359 = vmatpush1.bf16.msra.mxu0 %v14817_v53  ;;  %v14906_v53 = vld [vmem:[#allocation19 + $0x1ec] ss:$16 sps:$4 sm:$0xff]  }
 0x6d3   :  { %10687 = vmatpush1.bf16.msra.mxu1 %v14820_v54  ;;  %10360 = vmatprep.subr.bf16.mxu0 %v14825_v0  ;;  %v14901_v54 = vld [vmem:[#allocation19 + $0x1e0] ss:$16 sps:$4 sm:$0xff]   ;;  %v14904_v0 = vld [vmem:[#allocation19 + $0x1e8] ss:$16 sps:$4 sm:$0xff]  }
 0x6d4   :  { %10688 = vmatprep.subr.bf16.mxu1 %v14828_v55  ;;  %v14909_v55 = vld [vmem:[#allocation19 + $0x204] ss:$16 sps:$4 sm:$0xff]  }
 0x6d6   :  { %10361 = vmatpush1.bf16.msra.mxu0 %v14823_v13  ;;  %v14912_v13 = vld [vmem:[#allocation19 + $0x20c] ss:$16 sps:$4 sm:$0xff]  }
 0x6d7   :  { %10689 = vmatpush1.bf16.msra.mxu1 %v14826_v56  ;;  %10362 = vmatprep.subr.bf16.mxu0 %v14831_v4  ;;  %v6654_v56 = vld [vmem:[#allocation17] sm:$0xff] }
 0x6d8   :  { %10690 = vmatprep.subr.bf16.mxu1 %v14834_v57  ;;  %v6661_v4 = vrot.slane %v6654_v56, %v16538_v24  ;;  %v6669_v57 = vrot.slane %v6654_v56, %v16557_v42 }
 0x6da   :  { %10363 = vmatpush1.bf16.msra.mxu0 %v14829_v59  ;;  %v6665_v59 = vrot.slane %v6654_v56, %v16543_v26 }
 0x6db   :  { %10691 = vmatpush1.bf16.msra.mxu1 %v14832_v25  ;;  %10364 = vmatprep.subr.bf16.mxu0 %v14837_v60  ;;  %v6673_v25 = vrot.slane %v6654_v56, %v16550_v30 }
 0x6dc   :  { %10692 = vmatprep.subr.bf16.mxu1 %v14840_v63 }
 0x6de   :  { %10365 = vmatpush1.bf16.msra.mxu0 %v14835_v18 }
 0x6df   :  { %10693 = vmatpush1.bf16.msra.mxu1 %v14838_v3  ;;  %10366 = vmatprep.subr.bf16.mxu0 %v14843_v1 }
 0x6e0   :  { %10694 = vmatprep.subr.bf16.mxu1 %v14846_v44 }
 0x6e2   :  { %10367 = vmatpush1.bf16.msra.mxu0 %v14841_v5 }
 0x6e3   :  { %10695 = vmatpush1.bf16.msra.mxu1 %v14844_v7  ;;  %10368 = vmatprep.subr.bf16.mxu0 %v14849_v9 }
 0x6e4   :  { %10696 = vmatprep.subr.bf16.mxu1 %v14852_v12 }
 0x6e6   :  { %10369 = vmatpush1.bf16.msra.mxu0 %v14847_v15 }
 0x6e7   :  { %10697 = vmatpush1.bf16.msra.mxu1 %v14850_v16  ;;  %10370 = vmatprep.subr.bf16.mxu0 %v14855_v17 }
 0x6e8   :  { %10698 = vmatprep.subr.bf16.mxu1 %v14858_v23 }
 0x6ea   :  { %10371 = vmatpush1.bf16.msra.mxu0 %v14853_v19 }
 0x6eb   :  { %10699 = vmatpush1.bf16.msra.mxu1 %v14856_v22  ;;  %10372 = vmatprep.subr.bf16.mxu0 %v14861_v27  ;;  %v6677_v22 = vrot.slane %v6654_v56, %v16811_v8 }
 0x6ec   :  { %10700 = vmatprep.subr.bf16.mxu1 %v14864_v28  ;;  %v6685_v28 = vrot.slane %v6654_v56, %v16820_v14 }
 0x6ee   :  { %10373 = vmatpush1.bf16.msra.mxu0 %v14859_v29  ;;  %v14907_v29 = vld [vmem:[#allocation19 + $0x200] ss:$16 sps:$4 sm:$0xff]  }
 0x6ef   :  { %10701 = vmatpush1.bf16.msra.mxu1 %v14862_v31  ;;  %10374 = vmatprep.subr.bf16.mxu0 %v14867_v32  ;;  %v14910_v31 = vld [vmem:[#allocation19 + $0x208] ss:$16 sps:$4 sm:$0xff]   ;;  %v6681_v32 = vrot.slane %v6654_v56, %v16706_v20 }
 0x6f0   :  { %10702 = vmatprep.subr.bf16.mxu1 %v14870_v33 }
 0x6f2   :  { %10375 = vmatpush1.bf16.msra.mxu0 %v14865_v34  ;;  %v6689_v34 = vrot.slane %v6654_v56, %v16709_v21 }
 0x6f3   :  { %10703 = vmatpush1.bf16.msra.mxu1 %v14868_v6  ;;  %10376 = vmatprep.subr.bf16.mxu0 %v14873_v35  ;;  %v14915_v35 = vld [vmem:[#allocation19 + $0x224] ss:$16 sps:$4 sm:$0xff]  }
 0x6f4   :  { %10704 = vmatprep.subr.bf16.mxu1 %v14876_v36  ;;  %v14918_v36 = vld [vmem:[#allocation19 + $0x22c] ss:$16 sps:$4 sm:$0xff]  }
 0x6f6   :  { %10377 = vmatpush1.bf16.msra.mxu0 %v14871_v10 }
 0x6f7   :  { %10705 = vmatpush1.bf16.msra.mxu1 %v14874_v37  ;;  %10378 = vmatprep.subr.bf16.mxu0 %v14879_v38 }
 0x6f8   :  { %10706 = vmatprep.subr.bf16.mxu1 %v14882_v41 }
 0x6fa   :  { %10379 = vmatpush1.bf16.msra.mxu0 %v14877_v39  ;;  %v14913_v39 = vld [vmem:[#allocation19 + $0x220] ss:$16 sps:$4 sm:$0xff]  }
 0x6fb   :  { %10707 = vmatpush1.bf16.msra.mxu1 %v14880_v43  ;;  %10380 = vmatprep.subr.bf16.mxu0 %v14885_v2 }
 0x6fc   :  { %10708 = vmatprep.subr.bf16.mxu1 %v14888_v45 }
 0x6fe   :  { %10381 = vmatpush1.bf16.msra.mxu0 %v14883_v61 }
 0x6ff   :  { %10709 = vmatpush1.bf16.msra.mxu1 %v14886_v46  ;;  %10382 = vmatprep.subr.bf16.mxu0 %v14891_v47  ;;  %v14916_v46 = vld [vmem:[#allocation19 + $0x228] ss:$16 sps:$4 sm:$0xff]  }
 0x700   :  { %10710 = vmatprep.subr.bf16.mxu1 %v14894_v62  ;;  %v17122_v47 = vld [vmem:[#allocation17 + $0x8] sm:$0xff] }
 0x702   :  { %10383 = vmatpush1.bf16.msra.mxu0 %v14889_v48 }
 0x703   :  { %10711 = vmatpush1.bf16.msra.mxu1 %v14892_v50  ;;  %10384 = vmatprep.subr.bf16.mxu0 %v14897_v11  ;;  %v14921_v11 = vld [vmem:[#allocation19 + $0x244] ss:$16 sps:$4 sm:$0xff]  }
 0x704   :  { %10712 = vmatprep.subr.bf16.mxu1 %v14900_v40  ;;  %v14924_v40 = vld [vmem:[#allocation19 + $0x24c] ss:$16 sps:$4 sm:$0xff]  }
 0x706   :  { %10385 = vmatpush1.bf16.msra.mxu0 %v14895_v49 }
 0x707   :  { %10713 = vmatpush1.bf16.msra.mxu1 %v14898_v51  ;;  %10386 = vmatprep.subr.bf16.mxu0 %v14903_v52  ;;  %v6701_v51 = vrot.slane %v17122_v47, %v16557_v42  ;;  %v14919_v52 = vld [vmem:[#allocation19 + $0x240] ss:$16 sps:$4 sm:$0xff]  }
 0x708   :  { %10714 = vmatprep.subr.bf16.mxu1 %v14906_v53  ;;  %v14922_v53 = vld [vmem:[#allocation19 + $0x248] ss:$16 sps:$4 sm:$0xff]  }
 0x70a   :  { %10387 = vmatpush1.bf16.msra.mxu0 %v14901_v54  ;;  %v6705_v54 = vrot.slane %v17122_v47, %v16550_v30 }
 0x70b   :  { %10715 = vmatpush1.bf16.msra.mxu1 %v14904_v0  ;;  %10397 = vmatprep.subr.bf16.mxu0 %v14909_v55  ;;  %v14927_v0 = vld [vmem:[#allocation19 + $0x264] ss:$16 sps:$4 sm:$0xff]   ;;  %v14930_v55 = vld [vmem:[#allocation19 + $0x26c] ss:$16 sps:$4 sm:$0xff]  }
 0x70c   :  { %10725 = vmatprep.subr.bf16.mxu1 %v14912_v13 }
 0x788   :  { %v6936_v60 = vpop.f32.mrb[40].mxu0  ;;  %v6977_v63 = vpop.f32.mrb[40].mxu1 }
 0x789   :  { %v6937_v18 = vadd.f32 %v6936_v60, %v6661_v4  ;;  %v17110_v3 = vadd.f32 %v6977_v63, %v6669_v57  ;;  %v6938_v1 = vpop.f32.mrb[41].mxu0  ;;  %v6979_v44 = vpop.f32.mrb[41].mxu1  ;;  %v14925_v60 = vld [vmem:[#allocation19 + $0x260] ss:$16 sps:$4 sm:$0xff]   ;;  %v14928_v63 = vld [vmem:[#allocation19 + $0x268] ss:$16 sps:$4 sm:$0xff]  }
 0x78a   :  { %v6939_v5 = vadd.f32 %v6938_v1, %v6665_v59  ;;  %v6980_v7 = vadd.f32 %v6979_v44, %v6673_v25  ;;  %v6940_v9 = vpop.f32.mrb[42].mxu0  ;;  %v6981_v12 = vpop.f32.mrb[42].mxu1 }
 0x78b   :  { %v7230_v15 = vmax.f32 %v6937_v18, 0.0  ;;  %v6941_v16 = vpop.f32.mrb[43].mxu0  ;;  %v6982_v17 = vpop.f32.mrb[43].mxu1  ;;  %v6709_v12 = vrot.slane %v17122_v47, %v16811_v8 }
 0x78c   :  { %v7231_v23 = vmax.f32 %v6939_v5, 0.0  ;;  %v7233_v19 = vmax.f32 %v6980_v7, 0.0  ;;  %v14933_v5 = vld [vmem:[#allocation19 + $0x284] ss:$16 sps:$4 sm:$0xff]   ;;  %v14936_v7 = vld [vmem:[#allocation19 + $0x28c] ss:$16 sps:$4 sm:$0xff]  }
 0x78d   :  { %v7246_v33 = vpack.c.bf16 %v7230_v15, %v7230_v15  ;;  %v6717_v15 = vrot.slane %v17122_v47, %v16820_v14  ;;  %v14931_v16 = vld [vmem:[#allocation19 + $0x280] ss:$16 sps:$4 sm:$0xff]   ;;  %v14934_v17 = vld [vmem:[#allocation19 + $0x288] ss:$16 sps:$4 sm:$0xff]  }
 0x78e   :  { %v7247_v27 = vpack.c.bf16 %v7231_v23, %v7231_v23  ;;  %v7249_v10 = vpack.c.bf16 %v7233_v19, %v7233_v19  ;;  %v6713_v23 = vrot.slane %v17122_v47, %v16706_v20  ;;  %v6721_v19 = vrot.slane %v17122_v47, %v16709_v21 }
 0x790   :  { %v7018_v6 = vpop.f32.mrb[44].mxu0  ;;  %10388 = vmatprep.mubr.bf16.mxu0 %v7247_v27  ;;  %10716 = vmatprep.mubr.bf16.mxu1 %v7247_v27  ;;  %v14942_v27 = vld [vmem:[#allocation19 + $0x2ac] ss:$16 sps:$4 sm:$0xff]  }
 0x791   :  { %v17116_v37 = vadd.f32 %v7018_v6, %v6677_v22  ;;  %v7059_v38 = vpop.f32.mrb[44].mxu1  ;;  %v7020_v41 = vpop.f32.mrb[45].mxu0  ;;  %10389 = vmatmul.mubr.bf16.vlgmr.msra.gmra.mrb[56].mxu0 %v7246_v33  ;;  %10717 = vmatmul.mubr.bf16.vlgmr.msra.gmra.mrb[56].mxu1 %v7246_v33  ;;  %v14939_v22 = vld [vmem:[#allocation19 + $0x2a4] ss:$16 sps:$4 sm:$0xff]   ;;  %v14940_v6 = vld [vmem:[#allocation19 + $0x2a8] ss:$16 sps:$4 sm:$0xff]  }
 0x792   :  { %v17118_v43 = vadd.f32 %v7059_v38, %v6685_v28  ;;  %v17120_v2 = vadd.f32 %v7020_v41, %v6681_v32  ;;  %v7061_v45 = vpop.f32.mrb[45].mxu1  ;;  %10398 = vmatpush1.bf16.msra.mxu0 %v14907_v29  ;;  %10726 = vmatpush1.bf16.msra.mxu1 %v14910_v31  ;;  %v7022_v61 = vpop.f32.mrb[46].mxu0  ;;  %v14948_v38 = vld [vmem:[#allocation19 + $0x2cc] ss:$16 sps:$4 sm:$0xff]  }
 0x793   :  { %v17124_v62 = vadd.f32 %v7061_v45, %v6689_v34  ;;  %v7063_v48 = vpop.f32.mrb[46].mxu1  ;;  %10429 = vmatprep.mubr.bf16.mxu0 %v7249_v10  ;;  %10757 = vmatprep.mubr.bf16.mxu1 %v7249_v10  ;;  %v7023_v50 = vpop.f32.mrb[47].mxu0  ;;  %v14937_v34 = vld [vmem:[#allocation19 + $0x2a0] ss:$16 sps:$4 sm:$0xff]   ;;  %v14945_v10 = vld [vmem:[#allocation19 + $0x2c4] ss:$16 sps:$4 sm:$0xff]  }
 0x794   :  { %v7064_v49 = vpop.f32.mrb[47].mxu1  ;;  %10399 = vmatprep.subr.bf16.mxu0 %v14915_v35  ;;  %10727 = vmatprep.subr.bf16.mxu1 %v14918_v36  ;;  %v14946_v45 = vld [vmem:[#allocation19 + $0x2c8] ss:$16 sps:$4 sm:$0xff]   ;;  %v14951_v61 = vld [vmem:[#allocation19 + $0x2e4] ss:$16 sps:$4 sm:$0xff]  }
 0x795   :  { %v14949_v48 = vld [vmem:[#allocation19 + $0x2e0] ss:$16 sps:$4 sm:$0xff]   ;;  %v14952_v50 = vld [vmem:[#allocation19 + $0x2e8] ss:$16 sps:$4 sm:$0xff]  }
 0x796   :  { %10400 = vmatpush1.bf16.msra.mxu0 %v14913_v39  ;;  %10728 = vmatpush1.bf16.msra.mxu1 %v14916_v46  ;;  %v14943_v39 = vld [vmem:[#allocation19 + $0x2c0] ss:$16 sps:$4 sm:$0xff]   ;;  %v14954_v46 = vld [vmem:[#allocation19 + $0x2ec] ss:$16 sps:$4 sm:$0xff]  }
 0x797   :  { %10401 = vmatprep.subr.bf16.mxu0 %v14921_v11  ;;  %10729 = vmatprep.subr.bf16.mxu1 %v14924_v40  ;;  %v14957_v11 = vld [vmem:[#allocation19 + $0x304] ss:$16 sps:$4 sm:$0xff]   ;;  %v14960_v40 = vld [vmem:[#allocation19 + $0x30c] ss:$16 sps:$4 sm:$0xff]   ;;  %v14955_v49 = vld [vmem:[#allocation19 + $0x300] ss:$16 sps:$4 sm:$0xff]  }
 0x798   :  { %v17130_v13 = vpop.f32.mrb[48].mxu0 }
 0x799   :  { %v7141_v56 = vpop.f32.mrb[48].mxu1  ;;  %v17132_v4 = vpop.f32.mrb[49].mxu0 }
 0x79a   :  { %v17134_v57 = vadd.f32 %v7141_v56, %v6701_v51  ;;  %v7143_v59 = vpop.f32.mrb[49].mxu1  ;;  %10402 = vmatpush1.bf16.msra.mxu0 %v14919_v52  ;;  %10730 = vmatpush1.bf16.msra.mxu1 %v14922_v53  ;;  %v7104_v25 = vpop.f32.mrb[50].mxu0  ;;  %v14958_v51 = vld [vmem:[#allocation19 + $0x308] ss:$16 sps:$4 sm:$0xff]   ;;  %v14963_v52 = vld [vmem:[#allocation19 + $0x324] ss:$16 sps:$4 sm:$0xff]  }
 0x79b   :  { %v17136_v18 = vadd.f32 %v7143_v59, %v6705_v54  ;;  %v7145_v1 = vpop.f32.mrb[50].mxu1  ;;  %v7105_v44 = vpop.f32.mrb[51].mxu0  ;;  %10403 = vmatprep.subr.bf16.mxu0 %v14927_v0  ;;  %10731 = vmatprep.subr.bf16.mxu1 %v14930_v55  ;;  %v14966_v53 = vld [vmem:[#allocation19 + $0x32c] ss:$16 sps:$4 sm:$0xff]   ;;  %v14961_v54 = vld [vmem:[#allocation19 + $0x320] ss:$16 sps:$4 sm:$0xff]  }
 0x79c   :  { %v7146_v9 = vpop.f32.mrb[51].mxu1  ;;  %v14964_v0 = vld [vmem:[#allocation19 + $0x328] ss:$16 sps:$4 sm:$0xff]   ;;  %v14969_v55 = vld [vmem:[#allocation19 + $0x344] ss:$16 sps:$4 sm:$0xff]  }
 0x79d   :  { %v14972_v56 = vld [vmem:[#allocation19 + $0x34c] ss:$16 sps:$4 sm:$0xff]   ;;  %v14967_v59 = vld [vmem:[#allocation19 + $0x340] ss:$16 sps:$4 sm:$0xff]   ;;  %v14970_v25 = vld [vmem:[#allocation19 + $0x348] ss:$16 sps:$4 sm:$0xff]  }
 0x79e   :  { %10404 = vmatpush1.bf16.msra.mxu0 %v14925_v60  ;;  %10732 = vmatpush1.bf16.msra.mxu1 %v14928_v63  ;;  %v14975_v60 = vld [vmem:[#allocation19 + $0x364] ss:$16 sps:$4 sm:$0xff]   ;;  %v14978_v63 = vld [vmem:[#allocation19 + $0x36c] ss:$16 sps:$4 sm:$0xff]   ;;  %v14973_v1 = vld [vmem:[#allocation19 + $0x360] ss:$16 sps:$4 sm:$0xff]  }
 0x79f   :  { %10405 = vmatprep.subr.bf16.mxu0 %v14933_v5  ;;  %10733 = vmatprep.subr.bf16.mxu1 %v14936_v7  ;;  %v14976_v44 = vld [vmem:[#allocation19 + $0x368] ss:$16 sps:$4 sm:$0xff]   ;;  %v14981_v5 = vld [vmem:[#allocation19 + $0x384] ss:$16 sps:$4 sm:$0xff]   ;;  %v14984_v7 = vld [vmem:[#allocation19 + $0x38c] ss:$16 sps:$4 sm:$0xff]  }
 0x7a0   :  { %v7182_v28 = vpop.f32.mrb[52].mxu0  ;;  %v14979_v9 = vld [vmem:[#allocation19 + $0x380] ss:$16 sps:$4 sm:$0xff]  }
 0x7a1   :  { %v17146_v29 = vadd.f32 %v7182_v28, %v6709_v12  ;;  %v7223_v8 = vpop.f32.mrb[52].mxu1  ;;  %v7184_v31 = vpop.f32.mrb[53].mxu0  ;;  %v14982_v12 = vld [vmem:[#allocation19 + $0x388] ss:$16 sps:$4 sm:$0xff]  }
 0x7a2   :  { %v17148_v32 = vadd.f32 %v7223_v8, %v6717_v15  ;;  %v17150_v14 = vadd.f32 %v7184_v31, %v6713_v23  ;;  %v7225_v33 = vpop.f32.mrb[53].mxu1  ;;  %10406 = vmatpush1.bf16.msra.mxu0 %v14931_v16  ;;  %10734 = vmatpush1.bf16.msra.mxu1 %v14934_v17  ;;  %v7186_v20 = vpop.f32.mrb[54].mxu0  ;;  %v14987_v15 = vld [vmem:[#allocation19 + $0x3a4] ss:$16 sps:$4 sm:$0xff]   ;;  %v14990_v16 = vld [vmem:[#allocation19 + $0x3ac] ss:$16 sps:$4 sm:$0xff]  }
 0x7a3   :  { %v17152_v35 = vadd.f32 %v7225_v33, %v6721_v19  ;;  %v7227_v21 = vpop.f32.mrb[54].mxu1  ;;  %v7187_v36 = vpop.f32.mrb[55].mxu0  ;;  %10407 = vmatprep.subr.bf16.mxu0 %v14939_v22  ;;  %10735 = vmatprep.subr.bf16.mxu1 %v14942_v27  ;;  %v14985_v17 = vld [vmem:[#allocation19 + $0x3a0] ss:$16 sps:$4 sm:$0xff]   ;;  %v14988_v23 = vld [vmem:[#allocation19 + $0x3a8] ss:$16 sps:$4 sm:$0xff]  }
 0x7a4   :  { %v7228_v41 = vpop.f32.mrb[55].mxu1  ;;  %v14993_v19 = vld [vmem:[#allocation19 + $0x3c4] ss:$16 sps:$4 sm:$0xff]   ;;  %v14996_v22 = vld [vmem:[#allocation19 + $0x3cc] ss:$16 sps:$4 sm:$0xff]   ;;  %v7235_v36 = vmax.f32 %v17120_v2, 0.0 }
 0x7a5   :  { %v14991_v27 = vld [vmem:[#allocation19 + $0x3c0] ss:$16 sps:$4 sm:$0xff]   ;;  %v14994_v28 = vld [vmem:[#allocation19 + $0x3c8] ss:$16 sps:$4 sm:$0xff]   ;;  %v14999_v8 = vld [vmem:[#allocation19 + $0x3e4] ss:$16 sps:$4 sm:$0xff]  }
 0x7a6   :  { %10408 = vmatpush1.bf16.msra.mxu0 %v14937_v34  ;;  %10736 = vmatpush1.bf16.msra.mxu1 %v14940_v6  ;;  %v15002_v31 = vld [vmem:[#allocation19 + $0x3ec] ss:$16 sps:$4 sm:$0xff]   ;;  %v14997_v33 = vld [vmem:[#allocation19 + $0x3e0] ss:$16 sps:$4 sm:$0xff]   ;;  %v15000_v20 = vld [vmem:[#allocation19 + $0x3e8] ss:$16 sps:$4 sm:$0xff]  }
 0x7a7   :  { %10409 = vmatprep.subr.bf16.mxu0 %v14945_v10  ;;  %10737 = vmatprep.subr.bf16.mxu1 %v14948_v38  ;;  %v7232_v34 = vmax.f32 %v17110_v3, 0.0  ;;  %v15005_v6 = vld [vmem:[#allocation19 + $0x404] ss:$16 sps:$4 sm:$0xff]   ;;  %v15008_v21 = vld [vmem:[#allocation19 + $0x40c] ss:$16 sps:$4 sm:$0xff]  }
 0x7a8   :  { %v15003_v10 = vld [vmem:[#allocation19 + $0x400] ss:$16 sps:$4 sm:$0xff]   ;;  %v15006_v41 = vld [vmem:[#allocation19 + $0x408] ss:$16 sps:$4 sm:$0xff]   ;;  %v15020_v2 = vld [vmem:[#allocation19 + $0x44c] ss:$16 sps:$4 sm:$0xff]  }
 0x7a9   :  { %v7248_v38 = vpack.c.bf16 %v7232_v34, %v7232_v34  ;;  %v15009_v3 = vld [vmem:[#allocation19 + $0x420] ss:$16 sps:$4 sm:$0xff]   ;;  %v15066_v34 = vld [vmem:[#allocation19 + $0x548] ss:$16 sps:$4 sm:$0xff]  }
 0x7aa   :  { %10410 = vmatpush1.bf16.msra.mxu0 %v14943_v39  ;;  %10738 = vmatpush1.bf16.msra.mxu1 %v14946_v45  ;;  %v7251_v39 = vpack.c.bf16 %v7235_v36, %v7235_v36  ;;  %v15011_v45 = vld [vmem:[#allocation19 + $0x424] ss:$16 sps:$4 sm:$0xff]   ;;  %v15069_v36 = vld [vmem:[#allocation19 + $0x560] ss:$16 sps:$4 sm:$0xff]  }
 0x7ab   :  { %10411 = vmatprep.subr.bf16.mxu0 %v14951_v61  ;;  %10739 = vmatprep.subr.bf16.mxu1 %v14954_v46  ;;  %v15014_v61 = vld [vmem:[#allocation19 + $0x42c] ss:$16 sps:$4 sm:$0xff]   ;;  %v15012_v46 = vld [vmem:[#allocation19 + $0x428] ss:$16 sps:$4 sm:$0xff]  }
 0x7ae   :  { %10412 = vmatpush1.bf16.msra.mxu0 %v14949_v48  ;;  %10740 = vmatpush1.bf16.msra.mxu1 %v14952_v50  ;;  %v15017_v48 = vld [vmem:[#allocation19 + $0x444] ss:$16 sps:$4 sm:$0xff]   ;;  %v15015_v50 = vld [vmem:[#allocation19 + $0x440] ss:$16 sps:$4 sm:$0xff]  }
 0x7af   :  { %10413 = vmatprep.subr.bf16.mxu0 %v14957_v11  ;;  %10741 = vmatprep.subr.bf16.mxu1 %v14960_v40  ;;  %v15018_v11 = vld [vmem:[#allocation19 + $0x448] ss:$16 sps:$4 sm:$0xff]   ;;  %v15023_v40 = vld [vmem:[#allocation19 + $0x464] ss:$16 sps:$4 sm:$0xff]  }
 0x7b2   :  { %10414 = vmatpush1.bf16.msra.mxu0 %v14955_v49  ;;  %10742 = vmatpush1.bf16.msra.mxu1 %v14958_v51  ;;  %v15026_v49 = vld [vmem:[#allocation19 + $0x46c] ss:$16 sps:$4 sm:$0xff]   ;;  %v15021_v51 = vld [vmem:[#allocation19 + $0x460] ss:$16 sps:$4 sm:$0xff]  }
 0x7b3   :  { %10415 = vmatprep.subr.bf16.mxu0 %v14963_v52  ;;  %10743 = vmatprep.subr.bf16.mxu1 %v14966_v53  ;;  %v15024_v52 = vld [vmem:[#allocation19 + $0x468] ss:$16 sps:$4 sm:$0xff]   ;;  %v15029_v53 = vld [vmem:[#allocation19 + $0x484] ss:$16 sps:$4 sm:$0xff]  }
 0x7b6   :  { %10416 = vmatpush1.bf16.msra.mxu0 %v14961_v54  ;;  %10744 = vmatpush1.bf16.msra.mxu1 %v14964_v0  ;;  %v15032_v54 = vld [vmem:[#allocation19 + $0x48c] ss:$16 sps:$4 sm:$0xff]   ;;  %v15027_v0 = vld [vmem:[#allocation19 + $0x480] ss:$16 sps:$4 sm:$0xff]  }
 0x7b7   :  { %10417 = vmatprep.subr.bf16.mxu0 %v14969_v55  ;;  %10745 = vmatprep.subr.bf16.mxu1 %v14972_v56  ;;  %v15030_v55 = vld [vmem:[#allocation19 + $0x488] ss:$16 sps:$4 sm:$0xff]   ;;  %v15035_v56 = vld [vmem:[#allocation19 + $0x4a4] ss:$16 sps:$4 sm:$0xff]  }
 0x7ba   :  { %10418 = vmatpush1.bf16.msra.mxu0 %v14967_v59  ;;  %10746 = vmatpush1.bf16.msra.mxu1 %v14970_v25  ;;  %v15038_v59 = vld [vmem:[#allocation19 + $0x4ac] ss:$16 sps:$4 sm:$0xff]   ;;  %v15033_v25 = vld [vmem:[#allocation19 + $0x4a0] ss:$16 sps:$4 sm:$0xff]  }
 0x7bb   :  { %10419 = vmatprep.subr.bf16.mxu0 %v14975_v60  ;;  %10747 = vmatprep.subr.bf16.mxu1 %v14978_v63  ;;  %v15036_v60 = vld [vmem:[#allocation19 + $0x4a8] ss:$16 sps:$4 sm:$0xff]   ;;  %v15041_v63 = vld [vmem:[#allocation19 + $0x4c4] ss:$16 sps:$4 sm:$0xff]  }
 0x7be   :  { %10420 = vmatpush1.bf16.msra.mxu0 %v14973_v1  ;;  %10748 = vmatpush1.bf16.msra.mxu1 %v14976_v44  ;;  %v15044_v1 = vld [vmem:[#allocation19 + $0x4cc] ss:$16 sps:$4 sm:$0xff]   ;;  %v15039_v44 = vld [vmem:[#allocation19 + $0x4c0] ss:$16 sps:$4 sm:$0xff]  }
 0x7bf   :  { %10421 = vmatprep.subr.bf16.mxu0 %v14981_v5  ;;  %10749 = vmatprep.subr.bf16.mxu1 %v14984_v7  ;;  %v15042_v5 = vld [vmem:[#allocation19 + $0x4c8] ss:$16 sps:$4 sm:$0xff]   ;;  %v15047_v7 = vld [vmem:[#allocation19 + $0x4e4] ss:$16 sps:$4 sm:$0xff]  }
 0x7c2   :  { %10422 = vmatpush1.bf16.msra.mxu0 %v14979_v9  ;;  %10750 = vmatpush1.bf16.msra.mxu1 %v14982_v12  ;;  %v15050_v9 = vld [vmem:[#allocation19 + $0x4ec] ss:$16 sps:$4 sm:$0xff]   ;;  %v15045_v12 = vld [vmem:[#allocation19 + $0x4e0] ss:$16 sps:$4 sm:$0xff]  }
 0x7c3   :  { %10423 = vmatprep.subr.bf16.mxu0 %v14987_v15  ;;  %10751 = vmatprep.subr.bf16.mxu1 %v14990_v16  ;;  %v15048_v15 = vld [vmem:[#allocation19 + $0x4e8] ss:$16 sps:$4 sm:$0xff]   ;;  %v15053_v16 = vld [vmem:[#allocation19 + $0x504] ss:$16 sps:$4 sm:$0xff]  }
 0x7c6   :  { %10424 = vmatpush1.bf16.msra.mxu0 %v14985_v17  ;;  %10752 = vmatpush1.bf16.msra.mxu1 %v14988_v23  ;;  %v15056_v17 = vld [vmem:[#allocation19 + $0x50c] ss:$16 sps:$4 sm:$0xff]   ;;  %v15051_v23 = vld [vmem:[#allocation19 + $0x500] ss:$16 sps:$4 sm:$0xff]  }
 0x7c7   :  { %10425 = vmatprep.subr.bf16.mxu0 %v14993_v19  ;;  %10753 = vmatprep.subr.bf16.mxu1 %v14996_v22  ;;  %v15054_v19 = vld [vmem:[#allocation19 + $0x508] ss:$16 sps:$4 sm:$0xff]   ;;  %v15059_v22 = vld [vmem:[#allocation19 + $0x524] ss:$16 sps:$4 sm:$0xff]  }
 0x7ca   :  { %10426 = vmatpush1.bf16.msra.mxu0 %v14991_v27  ;;  %10754 = vmatpush1.bf16.msra.mxu1 %v14994_v28  ;;  %v15062_v27 = vld [vmem:[#allocation19 + $0x52c] ss:$16 sps:$4 sm:$0xff]   ;;  %v15057_v28 = vld [vmem:[#allocation19 + $0x520] ss:$16 sps:$4 sm:$0xff]  }
 0x7cb   :  { %10427 = vmatprep.subr.bf16.mxu0 %v14999_v8  ;;  %10755 = vmatprep.subr.bf16.mxu1 %v15002_v31  ;;  %v15060_v8 = vld [vmem:[#allocation19 + $0x528] ss:$16 sps:$4 sm:$0xff]   ;;  %v15065_v31 = vld [vmem:[#allocation19 + $0x544] ss:$16 sps:$4 sm:$0xff]  }
 0x7ce   :  { %10428 = vmatpush1.bf16.msra.mxu0 %v14997_v33  ;;  %10756 = vmatpush1.bf16.msra.mxu1 %v15000_v20  ;;  %v15068_v33 = vld [vmem:[#allocation19 + $0x54c] ss:$16 sps:$4 sm:$0xff]   ;;  %v15063_v20 = vld [vmem:[#allocation19 + $0x540] ss:$16 sps:$4 sm:$0xff]  }
 0x7cf   :  { %10438 = vmatprep.subr.bf16.mxu0 %v15005_v6  ;;  %10766 = vmatprep.subr.bf16.mxu1 %v15008_v21  ;;  %v15071_v6 = vld [vmem:[#allocation19 + $0x564] ss:$16 sps:$4 sm:$0xff]   ;;  %v15074_v21 = vld [vmem:[#allocation19 + $0x56c] ss:$16 sps:$4 sm:$0xff]  }
 0x7d1   :  { %10430 = vmatmul.mubr.bf16.vlgmr.msra.gmra.mrb[56].mxu0 %v7248_v38  ;;  %10758 = vmatmul.mubr.bf16.vlgmr.msra.gmra.mrb[56].mxu1 %v7248_v38  ;;  %v15077_v38 = vld [vmem:[#allocation19 + $0x584] ss:$16 sps:$4 sm:$0xff]  }
 0x7d2   :  { %10439 = vmatpush1.bf16.msra.mxu0 %v15003_v10  ;;  %10470 = vmatprep.mubr.bf16.mxu0 %v7251_v39  ;;  %v15072_v10 = vld [vmem:[#allocation19 + $0x568] ss:$16 sps:$4 sm:$0xff]  }
 0x7d3   :  { %10767 = vmatpush1.bf16.msra.mxu1 %v15006_v41  ;;  %10798 = vmatprep.mubr.bf16.mxu1 %v7251_v39  ;;  %v15080_v41 = vld [vmem:[#allocation19 + $0x58c] ss:$16 sps:$4 sm:$0xff]   ;;  %v15075_v39 = vld [vmem:[#allocation19 + $0x580] ss:$16 sps:$4 sm:$0xff]  }
 0x7d4   :  { %10440 = vmatprep.subr.bf16.mxu0 %v15011_v45  ;;  %10768 = vmatprep.subr.bf16.mxu1 %v15014_v61  ;;  %v15078_v45 = vld [vmem:[#allocation19 + $0x588] ss:$16 sps:$4 sm:$0xff]   ;;  %v15083_v61 = vld [vmem:[#allocation19 + $0x5a4] ss:$16 sps:$4 sm:$0xff]  }
 0x7d6   :  { %10441 = vmatpush1.bf16.msra.mxu0 %v15009_v3  ;;  %v15086_v3 = vld [vmem:[#allocation19 + $0x5ac] ss:$16 sps:$4 sm:$0xff]  }
 0x7d7   :  { %10769 = vmatpush1.bf16.msra.mxu1 %v15012_v46  ;;  %10442 = vmatprep.subr.bf16.mxu0 %v15017_v48  ;;  %v15081_v46 = vld [vmem:[#allocation19 + $0x5a0] ss:$16 sps:$4 sm:$0xff]   ;;  %v15084_v48 = vld [vmem:[#allocation19 + $0x5a8] ss:$16 sps:$4 sm:$0xff]  }
 0x7d8   :  { %10770 = vmatprep.subr.bf16.mxu1 %v15020_v2  ;;  %v15089_v2 = vld [vmem:[#allocation19 + $0x5c4] ss:$16 sps:$4 sm:$0xff]  }
 0x7da   :  { %10443 = vmatpush1.bf16.msra.mxu0 %v15015_v50  ;;  %v15092_v50 = vld [vmem:[#allocation19 + $0x5cc] ss:$16 sps:$4 sm:$0xff]  }
 0x7db   :  { %10771 = vmatpush1.bf16.msra.mxu1 %v15018_v11  ;;  %10444 = vmatprep.subr.bf16.mxu0 %v15023_v40  ;;  %v15087_v11 = vld [vmem:[#allocation19 + $0x5c0] ss:$16 sps:$4 sm:$0xff]   ;;  %v15090_v40 = vld [vmem:[#allocation19 + $0x5c8] ss:$16 sps:$4 sm:$0xff]  }
 0x7dc   :  { %10772 = vmatprep.subr.bf16.mxu1 %v15026_v49  ;;  %v15095_v49 = vld [vmem:[#allocation19 + $0x5e4] ss:$16 sps:$4 sm:$0xff]  }
 0x7de   :  { %10445 = vmatpush1.bf16.msra.mxu0 %v15021_v51  ;;  %v15098_v51 = vld [vmem:[#allocation19 + $0x5ec] ss:$16 sps:$4 sm:$0xff]  }
 0x7df   :  { %10773 = vmatpush1.bf16.msra.mxu1 %v15024_v52  ;;  %10446 = vmatprep.subr.bf16.mxu0 %v15029_v53  ;;  %v15093_v52 = vld [vmem:[#allocation19 + $0x5e0] ss:$16 sps:$4 sm:$0xff]   ;;  %v7234_v53 = vmax.f32 %v17116_v37, 0.0 }
 0x7e0   :  { %10774 = vmatprep.subr.bf16.mxu1 %v15032_v54  ;;  %v15096_v54 = vld [vmem:[#allocation19 + $0x5e8] ss:$16 sps:$4 sm:$0xff]   ;;  %v15105_v37 = vld [vmem:[#allocation19 + $0x620] ss:$16 sps:$4 sm:$0xff]  }
 0x7e2   :  { %10447 = vmatpush1.bf16.msra.mxu0 %v15027_v0  ;;  %v15101_v0 = vld [vmem:[#allocation19 + $0x604] ss:$16 sps:$4 sm:$0xff]  }
 0x7e3   :  { %10775 = vmatpush1.bf16.msra.mxu1 %v15030_v55  ;;  %10448 = vmatprep.subr.bf16.mxu0 %v15035_v56  ;;  %v15104_v55 = vld [vmem:[#allocation19 + $0x60c] ss:$16 sps:$4 sm:$0xff]   ;;  %v7237_v56 = vmax.f32 %v17124_v62, 0.0 }
 0x7e4   :  { %10776 = vmatprep.subr.bf16.mxu1 %v15038_v59  ;;  %v15099_v59 = vld [vmem:[#allocation19 + $0x600] ss:$16 sps:$4 sm:$0xff]   ;;  %v15116_v62 = vld [vmem:[#allocation19 + $0x64c] ss:$16 sps:$4 sm:$0xff]  }
 0x7e6   :  { %10449 = vmatpush1.bf16.msra.mxu0 %v15033_v25  ;;  %v7250_v25 = vpack.c.bf16 %v7234_v53, %v7234_v53  ;;  %v15167_v53 = vld [vmem:[#allocation19 + $0x764] ss:$16 sps:$4 sm:$0xff]  }
 0x7e7   :  { %10777 = vmatpush1.bf16.msra.mxu1 %v15036_v60  ;;  %10450 = vmatprep.subr.bf16.mxu0 %v15041_v63  ;;  %v15102_v60 = vld [vmem:[#allocation19 + $0x608] ss:$16 sps:$4 sm:$0xff]   ;;  %v15107_v63 = vld [vmem:[#allocation19 + $0x624] ss:$16 sps:$4 sm:$0xff]  }
 0x7e8   :  { %10778 = vmatprep.subr.bf16.mxu1 %v15044_v1  ;;  %v7253_v1 = vpack.c.bf16 %v7237_v56, %v7237_v56  ;;  %v15173_v56 = vld [vmem:[#allocation19 + $0x784] ss:$16 sps:$4 sm:$0xff]  }
 0x7ea   :  { %10451 = vmatpush1.bf16.msra.mxu0 %v15039_v44  ;;  %v15110_v44 = vld [vmem:[#allocation19 + $0x62c] ss:$16 sps:$4 sm:$0xff]  }
 0x7eb   :  { %10779 = vmatpush1.bf16.msra.mxu1 %v15042_v5  ;;  %10452 = vmatprep.subr.bf16.mxu0 %v15047_v7  ;;  %v15108_v5 = vld [vmem:[#allocation19 + $0x628] ss:$16 sps:$4 sm:$0xff]   ;;  %v15113_v7 = vld [vmem:[#allocation19 + $0x644] ss:$16 sps:$4 sm:$0xff]  }
 0x7ec   :  { %10780 = vmatprep.subr.bf16.mxu1 %v15050_v9  ;;  %v15111_v9 = vld [vmem:[#allocation19 + $0x640] ss:$16 sps:$4 sm:$0xff]  }
 0x7ee   :  { %10453 = vmatpush1.bf16.msra.mxu0 %v15045_v12  ;;  %v15114_v12 = vld [vmem:[#allocation19 + $0x648] ss:$16 sps:$4 sm:$0xff]  }
 0x7ef   :  { %10781 = vmatpush1.bf16.msra.mxu1 %v15048_v15  ;;  %10454 = vmatprep.subr.bf16.mxu0 %v15053_v16  ;;  %v15119_v15 = vld [vmem:[#allocation19 + $0x664] ss:$16 sps:$4 sm:$0xff]   ;;  %v15122_v16 = vld [vmem:[#allocation19 + $0x66c] ss:$16 sps:$4 sm:$0xff]  }
 0x7f0   :  { %10782 = vmatprep.subr.bf16.mxu1 %v15056_v17  ;;  %v15117_v17 = vld [vmem:[#allocation19 + $0x660] ss:$16 sps:$4 sm:$0xff]  }
 0x7f2   :  { %10455 = vmatpush1.bf16.msra.mxu0 %v15051_v23  ;;  %v15120_v23 = vld [vmem:[#allocation19 + $0x668] ss:$16 sps:$4 sm:$0xff]  }
 0x7f3   :  { %10783 = vmatpush1.bf16.msra.mxu1 %v15054_v19  ;;  %10456 = vmatprep.subr.bf16.mxu0 %v15059_v22  ;;  %v15125_v19 = vld [vmem:[#allocation19 + $0x684] ss:$16 sps:$4 sm:$0xff]   ;;  %v15128_v22 = vld [vmem:[#allocation19 + $0x68c] ss:$16 sps:$4 sm:$0xff]  }
 0x7f4   :  { %10784 = vmatprep.subr.bf16.mxu1 %v15062_v27  ;;  %v15123_v27 = vld [vmem:[#allocation19 + $0x680] ss:$16 sps:$4 sm:$0xff]  }
 0x7f6   :  { %10457 = vmatpush1.bf16.msra.mxu0 %v15057_v28  ;;  %v15126_v28 = vld [vmem:[#allocation19 + $0x688] ss:$16 sps:$4 sm:$0xff]  }
 0x7f7   :  { %10785 = vmatpush1.bf16.msra.mxu1 %v15060_v8  ;;  %10458 = vmatprep.subr.bf16.mxu0 %v15065_v31  ;;  %v15131_v8 = vld [vmem:[#allocation19 + $0x6a4] ss:$16 sps:$4 sm:$0xff]   ;;  %v15134_v31 = vld [vmem:[#allocation19 + $0x6ac] ss:$16 sps:$4 sm:$0xff]  }
 0x7f8   :  { %10786 = vmatprep.subr.bf16.mxu1 %v15068_v33  ;;  %v15129_v33 = vld [vmem:[#allocation19 + $0x6a0] ss:$16 sps:$4 sm:$0xff]  }
 0x7fa   :  { %10459 = vmatpush1.bf16.msra.mxu0 %v15063_v20  ;;  %v15132_v20 = vld [vmem:[#allocation19 + $0x6a8] ss:$16 sps:$4 sm:$0xff]  }
 0x7fb   :  { %10787 = vmatpush1.bf16.msra.mxu1 %v15066_v34  ;;  %10460 = vmatprep.subr.bf16.mxu0 %v15071_v6  ;;  %v15137_v34 = vld [vmem:[#allocation19 + $0x6c4] ss:$16 sps:$4 sm:$0xff]   ;;  %v15140_v6 = vld [vmem:[#allocation19 + $0x6cc] ss:$16 sps:$4 sm:$0xff]  }
 0x7fc   :  { %10788 = vmatprep.subr.bf16.mxu1 %v15074_v21  ;;  %v15135_v21 = vld [vmem:[#allocation19 + $0x6c0] ss:$16 sps:$4 sm:$0xff]  }
 0x7fe   :  { %10461 = vmatpush1.bf16.msra.mxu0 %v15069_v36  ;;  %v15138_v36 = vld [vmem:[#allocation19 + $0x6c8] ss:$16 sps:$4 sm:$0xff]  }
 0x7ff   :  { %10789 = vmatpush1.bf16.msra.mxu1 %v15072_v10  ;;  %10462 = vmatprep.subr.bf16.mxu0 %v15077_v38  ;;  %v15143_v10 = vld [vmem:[#allocation19 + $0x6e4] ss:$16 sps:$4 sm:$0xff]   ;;  %v15146_v38 = vld [vmem:[#allocation19 + $0x6ec] ss:$16 sps:$4 sm:$0xff]  }
 0x800   :  { %10790 = vmatprep.subr.bf16.mxu1 %v15080_v41  ;;  %v15141_v41 = vld [vmem:[#allocation19 + $0x6e0] ss:$16 sps:$4 sm:$0xff]  }
 0x802   :  { %10463 = vmatpush1.bf16.msra.mxu0 %v15075_v39  ;;  %v15144_v39 = vld [vmem:[#allocation19 + $0x6e8] ss:$16 sps:$4 sm:$0xff]  }
 0x803   :  { %10791 = vmatpush1.bf16.msra.mxu1 %v15078_v45  ;;  %10464 = vmatprep.subr.bf16.mxu0 %v15083_v61  ;;  %v15149_v45 = vld [vmem:[#allocation19 + $0x704] ss:$16 sps:$4 sm:$0xff]   ;;  %v15152_v61 = vld [vmem:[#allocation19 + $0x70c] ss:$16 sps:$4 sm:$0xff]  }
 0x804   :  { %10792 = vmatprep.subr.bf16.mxu1 %v15086_v3  ;;  %v15147_v3 = vld [vmem:[#allocation19 + $0x700] ss:$16 sps:$4 sm:$0xff]  }
 0x806   :  { %10465 = vmatpush1.bf16.msra.mxu0 %v15081_v46  ;;  %v15150_v46 = vld [vmem:[#allocation19 + $0x708] ss:$16 sps:$4 sm:$0xff]  }
 0x807   :  { %10793 = vmatpush1.bf16.msra.mxu1 %v15084_v48  ;;  %10466 = vmatprep.subr.bf16.mxu0 %v15089_v2  ;;  %v15155_v48 = vld [vmem:[#allocation19 + $0x724] ss:$16 sps:$4 sm:$0xff]   ;;  %v15158_v2 = vld [vmem:[#allocation19 + $0x72c] ss:$16 sps:$4 sm:$0xff]  }
 0x808   :  { %10794 = vmatprep.subr.bf16.mxu1 %v15092_v50  ;;  %v15153_v50 = vld [vmem:[#allocation19 + $0x720] ss:$16 sps:$4 sm:$0xff]  }
 0x80a   :  { %10467 = vmatpush1.bf16.msra.mxu0 %v15087_v11  ;;  %v15156_v11 = vld [vmem:[#allocation19 + $0x728] ss:$16 sps:$4 sm:$0xff]  }
 0x80b   :  { %10795 = vmatpush1.bf16.msra.mxu1 %v15090_v40  ;;  %10468 = vmatprep.subr.bf16.mxu0 %v15095_v49  ;;  %v15161_v40 = vld [vmem:[#allocation19 + $0x744] ss:$16 sps:$4 sm:$0xff]   ;;  %v15164_v49 = vld [vmem:[#allocation19 + $0x74c] ss:$16 sps:$4 sm:$0xff]  }
 0x80c   :  { %10796 = vmatprep.subr.bf16.mxu1 %v15098_v51  ;;  %v15159_v51 = vld [vmem:[#allocation19 + $0x740] ss:$16 sps:$4 sm:$0xff]  }
 0x80e   :  { %10469 = vmatpush1.bf16.msra.mxu0 %v15093_v52  ;;  %v15162_v52 = vld [vmem:[#allocation19 + $0x748] ss:$16 sps:$4 sm:$0xff]  }
 0x80f   :  { %10797 = vmatpush1.bf16.msra.mxu1 %v15096_v54  ;;  %10479 = vmatprep.subr.bf16.mxu0 %v15101_v0  ;;  %v15170_v54 = vld [vmem:[#allocation19 + $0x76c] ss:$16 sps:$4 sm:$0xff]   ;;  %v15165_v0 = vld [vmem:[#allocation19 + $0x760] ss:$16 sps:$4 sm:$0xff]  }
 0x810   :  { %10807 = vmatprep.subr.bf16.mxu1 %v15104_v55  ;;  %v15168_v55 = vld [vmem:[#allocation19 + $0x768] ss:$16 sps:$4 sm:$0xff]  }
 0x811   :  { %10471 = vmatmul.mubr.bf16.vlgmr.msra.gmra.mrb[56].mxu0 %v7250_v25 }
 0x812   :  { %10799 = vmatmul.mubr.bf16.vlgmr.msra.gmra.mrb[56].mxu1 %v7250_v25  ;;  %10480 = vmatpush1.bf16.msra.mxu0 %v15099_v59  ;;  %v15176_v59 = vld [vmem:[#allocation19 + $0x78c] ss:$16 sps:$4 sm:$0xff]   ;;  %v15171_v25 = vld [vmem:[#allocation19 + $0x780] ss:$16 sps:$4 sm:$0xff]  }
 0x813   :  { %10511 = vmatprep.mubr.bf16.mxu0 %v7253_v1  ;;  %10808 = vmatpush1.bf16.msra.mxu1 %v15102_v60  ;;  %v15174_v60 = vld [vmem:[#allocation19 + $0x788] ss:$16 sps:$4 sm:$0xff]  }
 0x814   :  { %10839 = vmatprep.mubr.bf16.mxu1 %v7253_v1  ;;  %10481 = vmatprep.subr.bf16.mxu0 %v15107_v63  ;;  %v15179_v63 = vld [vmem:[#allocation19 + $0x7a4] ss:$16 sps:$4 sm:$0xff]   ;;  %v15182_v1 = vld [vmem:[#allocation19 + $0x7ac] ss:$16 sps:$4 sm:$0xff]  }
 0x815   :  { %10809 = vmatprep.subr.bf16.mxu1 %v15110_v44  ;;  %v15177_v44 = vld [vmem:[#allocation19 + $0x7a0] ss:$16 sps:$4 sm:$0xff]  }
 0x816   :  { %10482 = vmatpush1.bf16.msra.mxu0 %v15105_v37  ;;  %v15180_v37 = vld [vmem:[#allocation19 + $0x7a8] ss:$16 sps:$4 sm:$0xff]  }
 0x817   :  { %10810 = vmatpush1.bf16.msra.mxu1 %v15108_v5  ;;  %10483 = vmatprep.subr.bf16.mxu0 %v15113_v7  ;;  %v15185_v5 = vld [vmem:[#allocation19 + $0x7c4] ss:$16 sps:$4 sm:$0xff]   ;;  %v15188_v7 = vld [vmem:[#allocation19 + $0x7cc] ss:$16 sps:$4 sm:$0xff]  }
 0x818   :  { %10811 = vmatprep.subr.bf16.mxu1 %v15116_v62  ;;  %v6697_v62 = vrot.slane %v17122_v47, %v16543_v26  ;;  %v15200_v47 = vld [vmem:[#allocation19 + $0x80c] ss:$16 sps:$4 sm:$0xff]  }
 0x81a   :  { %10484 = vmatpush1.bf16.msra.mxu0 %v15111_v9  ;;  %v15183_v9 = vld [vmem:[#allocation19 + $0x7c0] ss:$16 sps:$4 sm:$0xff]  }
 0x81b   :  { %10812 = vmatpush1.bf16.msra.mxu1 %v15114_v12  ;;  %10485 = vmatprep.subr.bf16.mxu0 %v15119_v15  ;;  %v15186_v12 = vld [vmem:[#allocation19 + $0x7c8] ss:$16 sps:$4 sm:$0xff]   ;;  %v15191_v15 = vld [vmem:[#allocation19 + $0x7e4] ss:$16 sps:$4 sm:$0xff]  }
 0x81c   :  { %10813 = vmatprep.subr.bf16.mxu1 %v15122_v16  ;;  %v15194_v16 = vld [vmem:[#allocation19 + $0x7ec] ss:$16 sps:$4 sm:$0xff]  }
 0x81e   :  { %10486 = vmatpush1.bf16.msra.mxu0 %v15117_v17  ;;  %v7103_v17 = vadd.f32 %v17132_v4, %v6697_v62  ;;  %v15257_v62 = vld [vmem:[#allocation19 + $0x944] ss:$16 sps:$4 sm:$0xff]  }
 0x81f   :  { %10814 = vmatpush1.bf16.msra.mxu1 %v15120_v23  ;;  %10487 = vmatprep.subr.bf16.mxu0 %v15125_v19  ;;  %v15189_v23 = vld [vmem:[#allocation19 + $0x7e0] ss:$16 sps:$4 sm:$0xff]   ;;  %v7236_v19 = vmax.f32 %v17118_v43, 0.0 }
 0x820   :  { %10815 = vmatprep.subr.bf16.mxu1 %v15128_v22  ;;  %v15192_v22 = vld [vmem:[#allocation19 + $0x7e8] ss:$16 sps:$4 sm:$0xff]   ;;  %v15201_v43 = vld [vmem:[#allocation19 + $0x820] ss:$16 sps:$4 sm:$0xff]  }
 0x822   :  { %10488 = vmatpush1.bf16.msra.mxu0 %v15123_v27  ;;  %v15197_v27 = vld [vmem:[#allocation19 + $0x804] ss:$16 sps:$4 sm:$0xff]  }
 0x823   :  { %10816 = vmatpush1.bf16.msra.mxu1 %v15126_v28  ;;  %10489 = vmatprep.subr.bf16.mxu0 %v15131_v8  ;;  %v7239_v28 = vmax.f32 %v7103_v17, 0.0  ;;  %v15195_v8 = vld [vmem:[#allocation19 + $0x800] ss:$16 sps:$4 sm:$0xff]   ;;  %v15266_v17 = vld [vmem:[#allocation19 + $0x96c] ss:$16 sps:$4 sm:$0xff]  }
 0x824   :  { %10817 = vmatprep.subr.bf16.mxu1 %v15134_v31  ;;  %v7252_v31 = vpack.c.bf16 %v7236_v19, %v7236_v19  ;;  %v15264_v19 = vld [vmem:[#allocation19 + $0x968] ss:$16 sps:$4 sm:$0xff]  }
 0x825   :  { %v7255_v4 = vpack.c.bf16 %v7239_v28, %v7239_v28  ;;  %v15270_v28 = vld [vmem:[#allocation19 + $0x988] ss:$16 sps:$4 sm:$0xff]  }
 0x826   :  { %10490 = vmatpush1.bf16.msra.mxu0 %v15129_v33  ;;  %v15198_v33 = vld [vmem:[#allocation19 + $0x808] ss:$16 sps:$4 sm:$0xff]  }
 0x827   :  { %10818 = vmatpush1.bf16.msra.mxu1 %v15132_v20  ;;  %10491 = vmatprep.subr.bf16.mxu0 %v15137_v34  ;;  %v15203_v20 = vld [vmem:[#allocation19 + $0x824] ss:$16 sps:$4 sm:$0xff]   ;;  %v15206_v34 = vld [vmem:[#allocation19 + $0x82c] ss:$16 sps:$4 sm:$0xff]  }
 0x828   :  { %10819 = vmatprep.subr.bf16.mxu1 %v15140_v6  ;;  %v15204_v6 = vld [vmem:[#allocation19 + $0x828] ss:$16 sps:$4 sm:$0xff]  }
 0x82a   :  { %10492 = vmatpush1.bf16.msra.mxu0 %v15135_v21  ;;  %v15209_v21 = vld [vmem:[#allocation19 + $0x844] ss:$16 sps:$4 sm:$0xff]  }
 0x82b   :  { %10820 = vmatpush1.bf16.msra.mxu1 %v15138_v36  ;;  %10493 = vmatprep.subr.bf16.mxu0 %v15143_v10  ;;  %v15212_v36 = vld [vmem:[#allocation19 + $0x84c] ss:$16 sps:$4 sm:$0xff]   ;;  %v15207_v10 = vld [vmem:[#allocation19 + $0x840] ss:$16 sps:$4 sm:$0xff]  }
 0x82c   :  { %10821 = vmatprep.subr.bf16.mxu1 %v15146_v38  ;;  %v15210_v38 = vld [vmem:[#allocation19 + $0x848] ss:$16 sps:$4 sm:$0xff]  }
 0x82e   :  { %10494 = vmatpush1.bf16.msra.mxu0 %v15141_v41  ;;  %v15215_v41 = vld [vmem:[#allocation19 + $0x864] ss:$16 sps:$4 sm:$0xff]  }
 0x82f   :  { %10822 = vmatpush1.bf16.msra.mxu1 %v15144_v39  ;;  %10495 = vmatprep.subr.bf16.mxu0 %v15149_v45  ;;  %v15218_v39 = vld [vmem:[#allocation19 + $0x86c] ss:$16 sps:$4 sm:$0xff]   ;;  %v15213_v45 = vld [vmem:[#allocation19 + $0x860] ss:$16 sps:$4 sm:$0xff]  }
 0x830   :  { %10823 = vmatprep.subr.bf16.mxu1 %v15152_v61  ;;  %v15216_v61 = vld [vmem:[#allocation19 + $0x868] ss:$16 sps:$4 sm:$0xff]  }
 0x832   :  { %10496 = vmatpush1.bf16.msra.mxu0 %v15147_v3  ;;  %v15221_v3 = vld [vmem:[#allocation19 + $0x884] ss:$16 sps:$4 sm:$0xff]  }
 0x833   :  { %10824 = vmatpush1.bf16.msra.mxu1 %v15150_v46  ;;  %10497 = vmatprep.subr.bf16.mxu0 %v15155_v48  ;;  %v15224_v46 = vld [vmem:[#allocation19 + $0x88c] ss:$16 sps:$4 sm:$0xff]   ;;  %v15219_v48 = vld [vmem:[#allocation19 + $0x880] ss:$16 sps:$4 sm:$0xff]  }
 0x834   :  { %10825 = vmatprep.subr.bf16.mxu1 %v15158_v2  ;;  %v15222_v2 = vld [vmem:[#allocation19 + $0x888] ss:$16 sps:$4 sm:$0xff]  }
 0x836   :  { %10498 = vmatpush1.bf16.msra.mxu0 %v15153_v50  ;;  %v15227_v50 = vld [vmem:[#allocation19 + $0x8a4] ss:$16 sps:$4 sm:$0xff]  }
 0x837   :  { %10826 = vmatpush1.bf16.msra.mxu1 %v15156_v11  ;;  %10499 = vmatprep.subr.bf16.mxu0 %v15161_v40  ;;  %v15230_v11 = vld [vmem:[#allocation19 + $0x8ac] ss:$16 sps:$4 sm:$0xff]   ;;  %v15225_v40 = vld [vmem:[#allocation19 + $0x8a0] ss:$16 sps:$4 sm:$0xff]  }
 0x838   :  { %10827 = vmatprep.subr.bf16.mxu1 %v15164_v49  ;;  %v15228_v49 = vld [vmem:[#allocation19 + $0x8a8] ss:$16 sps:$4 sm:$0xff]  }
 0x83a   :  { %10500 = vmatpush1.bf16.msra.mxu0 %v15159_v51  ;;  %v15233_v51 = vld [vmem:[#allocation19 + $0x8c4] ss:$16 sps:$4 sm:$0xff]  }
 0x83b   :  { %10828 = vmatpush1.bf16.msra.mxu1 %v15162_v52  ;;  %10501 = vmatprep.subr.bf16.mxu0 %v15167_v53  ;;  %v15236_v52 = vld [vmem:[#allocation19 + $0x8cc] ss:$16 sps:$4 sm:$0xff]   ;;  %v15231_v53 = vld [vmem:[#allocation19 + $0x8c0] ss:$16 sps:$4 sm:$0xff]  }
 0x83c   :  { %10829 = vmatprep.subr.bf16.mxu1 %v15170_v54  ;;  %v15234_v54 = vld [vmem:[#allocation19 + $0x8c8] ss:$16 sps:$4 sm:$0xff]  }
 0x83e   :  { %10502 = vmatpush1.bf16.msra.mxu0 %v15165_v0  ;;  %v15239_v0 = vld [vmem:[#allocation19 + $0x8e4] ss:$16 sps:$4 sm:$0xff]  }
 0x83f   :  { %10830 = vmatpush1.bf16.msra.mxu1 %v15168_v55  ;;  %10503 = vmatprep.subr.bf16.mxu0 %v15173_v56  ;;  %v15242_v55 = vld [vmem:[#allocation19 + $0x8ec] ss:$16 sps:$4 sm:$0xff]   ;;  %v15237_v56 = vld [vmem:[#allocation19 + $0x8e0] ss:$16 sps:$4 sm:$0xff]  }
 0x840   :  { %10831 = vmatprep.subr.bf16.mxu1 %v15176_v59  ;;  %v15240_v59 = vld [vmem:[#allocation19 + $0x8e8] ss:$16 sps:$4 sm:$0xff]  }
 0x842   :  { %10504 = vmatpush1.bf16.msra.mxu0 %v15171_v25  ;;  %v15245_v25 = vld [vmem:[#allocation19 + $0x904] ss:$16 sps:$4 sm:$0xff]  }
 0x843   :  { %10832 = vmatpush1.bf16.msra.mxu1 %v15174_v60  ;;  %10505 = vmatprep.subr.bf16.mxu0 %v15179_v63  ;;  %v15248_v60 = vld [vmem:[#allocation19 + $0x90c] ss:$16 sps:$4 sm:$0xff]   ;;  %v15243_v63 = vld [vmem:[#allocation19 + $0x900] ss:$16 sps:$4 sm:$0xff]  }
 0x844   :  { %10833 = vmatprep.subr.bf16.mxu1 %v15182_v1  ;;  %v15246_v1 = vld [vmem:[#allocation19 + $0x908] ss:$16 sps:$4 sm:$0xff]  }
 0x846   :  { %10506 = vmatpush1.bf16.msra.mxu0 %v15177_v44  ;;  %v15251_v44 = vld [vmem:[#allocation19 + $0x924] ss:$16 sps:$4 sm:$0xff]  }
 0x847   :  { %10834 = vmatpush1.bf16.msra.mxu1 %v15180_v37  ;;  %10507 = vmatprep.subr.bf16.mxu0 %v15185_v5  ;;  %v15254_v37 = vld [vmem:[#allocation19 + $0x92c] ss:$16 sps:$4 sm:$0xff]   ;;  %v15249_v5 = vld [vmem:[#allocation19 + $0x920] ss:$16 sps:$4 sm:$0xff]  }
 0x848   :  { %10835 = vmatprep.subr.bf16.mxu1 %v15188_v7  ;;  %v15252_v7 = vld [vmem:[#allocation19 + $0x928] ss:$16 sps:$4 sm:$0xff]  }
 0x84a   :  { %10508 = vmatpush1.bf16.msra.mxu0 %v15183_v9  ;;  %v15260_v9 = vld [vmem:[#allocation19 + $0x94c] ss:$16 sps:$4 sm:$0xff]  }
 0x84b   :  { %10836 = vmatpush1.bf16.msra.mxu1 %v15186_v12  ;;  %10509 = vmatprep.subr.bf16.mxu0 %v15191_v15  ;;  %v15255_v12 = vld [vmem:[#allocation19 + $0x940] ss:$16 sps:$4 sm:$0xff]   ;;  %v15258_v15 = vld [vmem:[#allocation19 + $0x948] ss:$16 sps:$4 sm:$0xff]  }
 0x84c   :  { %10837 = vmatprep.subr.bf16.mxu1 %v15194_v16  ;;  %v15263_v16 = vld [vmem:[#allocation19 + $0x964] ss:$16 sps:$4 sm:$0xff]  }
 0x84e   :  { %10510 = vmatpush1.bf16.msra.mxu0 %v15189_v23  ;;  %v15261_v23 = vld [vmem:[#allocation19 + $0x960] ss:$16 sps:$4 sm:$0xff]  }
 0x84f   :  { %10838 = vmatpush1.bf16.msra.mxu1 %v15192_v22  ;;  %10520 = vmatprep.subr.bf16.mxu0 %v15197_v27  ;;  %v15269_v22 = vld [vmem:[#allocation19 + $0x984] ss:$16 sps:$4 sm:$0xff]   ;;  %v15272_v27 = vld [vmem:[#allocation19 + $0x98c] ss:$16 sps:$4 sm:$0xff]  }
 0x850   :  { %10848 = vmatprep.subr.bf16.mxu1 %v15200_v47  ;;  %v15267_v47 = vld [vmem:[#allocation19 + $0x980] ss:$16 sps:$4 sm:$0xff]  }
 0x851   :  { %10512 = vmatmul.mubr.bf16.vlgmr.msra.gmra.mrb[56].mxu0 %v7252_v31 }
 0x852   :  { %10840 = vmatmul.mubr.bf16.vlgmr.msra.gmra.mrb[56].mxu1 %v7252_v31  ;;  %10521 = vmatpush1.bf16.msra.mxu0 %v15195_v8  ;;  %v15275_v8 = vld [vmem:[#allocation19 + $0x9a4] ss:$16 sps:$4 sm:$0xff]   ;;  %v15278_v31 = vld [vmem:[#allocation19 + $0x9ac] ss:$16 sps:$4 sm:$0xff]  }
 0x853   :  { %10552 = vmatprep.mubr.bf16.mxu0 %v7255_v4  ;;  %10849 = vmatpush1.bf16.msra.mxu1 %v15198_v33  ;;  %v15273_v33 = vld [vmem:[#allocation19 + $0x9a0] ss:$16 sps:$4 sm:$0xff]  }
 0x854   :  { %10880 = vmatprep.mubr.bf16.mxu1 %v7255_v4  ;;  %10522 = vmatprep.subr.bf16.mxu0 %v15203_v20  ;;  %v15807_v20 = vld [vmem:[#allocation17 + $0x8] sm:$0xff] }
 0x855   :  { %10850 = vmatprep.subr.bf16.mxu1 %v15206_v34  ;;  %v6693_v4 = vrot.slane %v15807_v20, %v16538_v24  ;;  %v15276_v34 = vld [vmem:[#allocation19 + $0x9a8] ss:$16 sps:$4 sm:$0xff]   ;;  %v15345_v20 = vld [vmem:[#allocation19 + $0xb20] ss:$16 sps:$4 sm:$0xff]  }
 0x856   :  { %10523 = vmatpush1.bf16.msra.mxu0 %v15201_v43  ;;  %v15281_v43 = vld [vmem:[#allocation19 + $0x9c4] ss:$16 sps:$4 sm:$0xff]  }
 0x857   :  { %10851 = vmatpush1.bf16.msra.mxu1 %v15204_v6  ;;  %10524 = vmatprep.subr.bf16.mxu0 %v15209_v21  ;;  %v15284_v6 = vld [vmem:[#allocation19 + $0x9cc] ss:$16 sps:$4 sm:$0xff]   ;;  %v15279_v21 = vld [vmem:[#allocation19 + $0x9c0] ss:$16 sps:$4 sm:$0xff]  }
 0x858   :  { %10852 = vmatprep.subr.bf16.mxu1 %v15212_v36  ;;  %v7101_v36 = vadd.f32 %v17130_v13, %v6693_v4  ;;  %v15348_v4 = vld [vmem:[#allocation19 + $0xb28] ss:$16 sps:$4 sm:$0xff]  }
 0x85a   :  { %10525 = vmatpush1.bf16.msra.mxu0 %v15207_v10  ;;  %v15282_v10 = vld [vmem:[#allocation19 + $0x9c8] ss:$16 sps:$4 sm:$0xff]  }
 0x85b   :  { %10853 = vmatpush1.bf16.msra.mxu1 %v15210_v38  ;;  %10526 = vmatprep.subr.bf16.mxu0 %v15215_v41  ;;  %v15287_v38 = vld [vmem:[#allocation19 + $0x9e4] ss:$16 sps:$4 sm:$0xff]   ;;  %v15290_v41 = vld [vmem:[#allocation19 + $0x9ec] ss:$16 sps:$4 sm:$0xff]  }
 0x85c   :  { %10854 = vmatprep.subr.bf16.mxu1 %v15218_v39  ;;  %v15285_v39 = vld [vmem:[#allocation19 + $0x9e0] ss:$16 sps:$4 sm:$0xff]  }
 0x85e   :  { %10527 = vmatpush1.bf16.msra.mxu0 %v15213_v45  ;;  %v7238_v45 = vmax.f32 %v7101_v36, 0.0  ;;  %v15359_v36 = vld [vmem:[#allocation19 + $0xb64] ss:$16 sps:$4 sm:$0xff]  }
 0x85f   :  { %10855 = vmatpush1.bf16.msra.mxu1 %v15216_v61  ;;  %10528 = vmatprep.subr.bf16.mxu0 %v15221_v3  ;;  %v15288_v61 = vld [vmem:[#allocation19 + $0x9e8] ss:$16 sps:$4 sm:$0xff]   ;;  %v15293_v3 = vld [vmem:[#allocation19 + $0xa04] ss:$16 sps:$4 sm:$0xff]  }
 0x860   :  { %10856 = vmatprep.subr.bf16.mxu1 %v15224_v46  ;;  %v15296_v46 = vld [vmem:[#allocation19 + $0xa0c] ss:$16 sps:$4 sm:$0xff]   ;;  %v7254_v13 = vpack.c.bf16 %v7238_v45, %v7238_v45 }
 0x861   :  { %v15368_v45 = vld [vmem:[#allocation19 + $0xb8c] ss:$16 sps:$4 sm:$0xff]  }
 0x862   :  { %10529 = vmatpush1.bf16.msra.mxu0 %v15219_v48  ;;  %v7241_v48 = vmax.f32 %v17136_v18, 0.0  ;;  %v15308_v18 = vld [vmem:[#allocation19 + $0xa4c] ss:$16 sps:$4 sm:$0xff]  }
 0x863   :  { %10857 = vmatpush1.bf16.msra.mxu1 %v15222_v2  ;;  %10530 = vmatprep.subr.bf16.mxu0 %v15227_v50  ;;  %v15291_v2 = vld [vmem:[#allocation19 + $0xa00] ss:$16 sps:$4 sm:$0xff]   ;;  %v15294_v50 = vld [vmem:[#allocation19 + $0xa08] ss:$16 sps:$4 sm:$0xff]  }
 0x864   :  { %10858 = vmatprep.subr.bf16.mxu1 %v15230_v11  ;;  %v15299_v11 = vld [vmem:[#allocation19 + $0xa24] ss:$16 sps:$4 sm:$0xff]  }
 0x866   :  { %10531 = vmatpush1.bf16.msra.mxu0 %v15225_v40  ;;  %v7257_v40 = vpack.c.bf16 %v7241_v48, %v7241_v48  ;;  %v15374_v48 = vld [vmem:[#allocation19 + $0xbac] ss:$16 sps:$4 sm:$0xff]  }
 0x867   :  { %10859 = vmatpush1.bf16.msra.mxu1 %v15228_v49  ;;  %10532 = vmatprep.subr.bf16.mxu0 %v15233_v51  ;;  %v15302_v49 = vld [vmem:[#allocation19 + $0xa2c] ss:$16 sps:$4 sm:$0xff]   ;;  %v15297_v51 = vld [vmem:[#allocation19 + $0xa20] ss:$16 sps:$4 sm:$0xff]  }
 0x868   :  { %10860 = vmatprep.subr.bf16.mxu1 %v15236_v52  ;;  %v15300_v52 = vld [vmem:[#allocation19 + $0xa28] ss:$16 sps:$4 sm:$0xff]  }
 0x86a   :  { %10533 = vmatpush1.bf16.msra.mxu0 %v15231_v53  ;;  %v15305_v53 = vld [vmem:[#allocation19 + $0xa44] ss:$16 sps:$4 sm:$0xff]  }
 0x86b   :  { %10861 = vmatpush1.bf16.msra.mxu1 %v15234_v54  ;;  %10534 = vmatprep.subr.bf16.mxu0 %v15239_v0  ;;  %v15303_v54 = vld [vmem:[#allocation19 + $0xa40] ss:$16 sps:$4 sm:$0xff]   ;;  %v15306_v0 = vld [vmem:[#allocation19 + $0xa48] ss:$16 sps:$4 sm:$0xff]  }
 0x86c   :  { %10862 = vmatprep.subr.bf16.mxu1 %v15242_v55  ;;  %v15311_v55 = vld [vmem:[#allocation19 + $0xa64] ss:$16 sps:$4 sm:$0xff]  }
 0x86e   :  { %10535 = vmatpush1.bf16.msra.mxu0 %v15237_v56  ;;  %v15314_v56 = vld [vmem:[#allocation19 + $0xa6c] ss:$16 sps:$4 sm:$0xff]  }
 0x86f   :  { %10863 = vmatpush1.bf16.msra.mxu1 %v15240_v59  ;;  %10536 = vmatprep.subr.bf16.mxu0 %v15245_v25  ;;  %v15309_v59 = vld [vmem:[#allocation19 + $0xa60] ss:$16 sps:$4 sm:$0xff]   ;;  %v15312_v25 = vld [vmem:[#allocation19 + $0xa68] ss:$16 sps:$4 sm:$0xff]  }
 0x870   :  { %10864 = vmatprep.subr.bf16.mxu1 %v15248_v60  ;;  %v15317_v60 = vld [vmem:[#allocation19 + $0xa84] ss:$16 sps:$4 sm:$0xff]  }
 0x872   :  { %10537 = vmatpush1.bf16.msra.mxu0 %v15243_v63  ;;  %v15320_v63 = vld [vmem:[#allocation19 + $0xa8c] ss:$16 sps:$4 sm:$0xff]  }
 0x873   :  { %10865 = vmatpush1.bf16.msra.mxu1 %v15246_v1  ;;  %10538 = vmatprep.subr.bf16.mxu0 %v15251_v44  ;;  %v15315_v1 = vld [vmem:[#allocation19 + $0xa80] ss:$16 sps:$4 sm:$0xff]   ;;  %v15318_v44 = vld [vmem:[#allocation19 + $0xa88] ss:$16 sps:$4 sm:$0xff]  }
 0x874   :  { %10866 = vmatprep.subr.bf16.mxu1 %v15254_v37  ;;  %v15323_v37 = vld [vmem:[#allocation19 + $0xaa4] ss:$16 sps:$4 sm:$0xff]  }
 0x876   :  { %10539 = vmatpush1.bf16.msra.mxu0 %v15249_v5  ;;  %v15326_v5 = vld [vmem:[#allocation19 + $0xaac] ss:$16 sps:$4 sm:$0xff]  }
 0x877   :  { %10867 = vmatpush1.bf16.msra.mxu1 %v15252_v7  ;;  %10540 = vmatprep.subr.bf16.mxu0 %v15257_v62  ;;  %v15321_v7 = vld [vmem:[#allocation19 + $0xaa0] ss:$16 sps:$4 sm:$0xff]   ;;  %v15324_v62 = vld [vmem:[#allocation19 + $0xaa8] ss:$16 sps:$4 sm:$0xff]  }
 0x878   :  { %10868 = vmatprep.subr.bf16.mxu1 %v15260_v9  ;;  %v15329_v9 = vld [vmem:[#allocation19 + $0xac4] ss:$16 sps:$4 sm:$0xff]  }
 0x87a   :  { %10541 = vmatpush1.bf16.msra.mxu0 %v15255_v12  ;;  %v15332_v12 = vld [vmem:[#allocation19 + $0xacc] ss:$16 sps:$4 sm:$0xff]  }
 0x87b   :  { %10869 = vmatpush1.bf16.msra.mxu1 %v15258_v15  ;;  %10542 = vmatprep.subr.bf16.mxu0 %v15263_v16  ;;  %v15327_v15 = vld [vmem:[#allocation19 + $0xac0] ss:$16 sps:$4 sm:$0xff]   ;;  %v15330_v16 = vld [vmem:[#allocation19 + $0xac8] ss:$16 sps:$4 sm:$0xff]  }
 0x87c   :  { %10870 = vmatprep.subr.bf16.mxu1 %v15266_v17  ;;  %v15335_v17 = vld [vmem:[#allocation19 + $0xae4] ss:$16 sps:$4 sm:$0xff]  }
 0x87e   :  { %10543 = vmatpush1.bf16.msra.mxu0 %v15261_v23  ;;  %v15338_v23 = vld [vmem:[#allocation19 + $0xaec] ss:$16 sps:$4 sm:$0xff]  }
 0x87f   :  { %10871 = vmatpush1.bf16.msra.mxu1 %v15264_v19  ;;  %10544 = vmatprep.subr.bf16.mxu0 %v15269_v22  ;;  %v15333_v19 = vld [vmem:[#allocation19 + $0xae0] ss:$16 sps:$4 sm:$0xff]   ;;  %v15336_v22 = vld [vmem:[#allocation19 + $0xae8] ss:$16 sps:$4 sm:$0xff]  }
 0x880   :  { %10872 = vmatprep.subr.bf16.mxu1 %v15272_v27  ;;  %v15341_v27 = vld [vmem:[#allocation19 + $0xb04] ss:$16 sps:$4 sm:$0xff]  }
 0x882   :  { %10545 = vmatpush1.bf16.msra.mxu0 %v15267_v47  ;;  %v15344_v47 = vld [vmem:[#allocation19 + $0xb0c] ss:$16 sps:$4 sm:$0xff]  }
 0x883   :  { %10873 = vmatpush1.bf16.msra.mxu1 %v15270_v28  ;;  %10546 = vmatprep.subr.bf16.mxu0 %v15275_v8  ;;  %v15339_v28 = vld [vmem:[#allocation19 + $0xb00] ss:$16 sps:$4 sm:$0xff]   ;;  %v15342_v8 = vld [vmem:[#allocation19 + $0xb08] ss:$16 sps:$4 sm:$0xff]  }
 0x884   :  { %10874 = vmatprep.subr.bf16.mxu1 %v15278_v31  ;;  %v15347_v31 = vld [vmem:[#allocation19 + $0xb24] ss:$16 sps:$4 sm:$0xff]  }
 0x886   :  { %10547 = vmatpush1.bf16.msra.mxu0 %v15273_v33  ;;  %v15350_v33 = vld [vmem:[#allocation19 + $0xb2c] ss:$16 sps:$4 sm:$0xff]  }
 0x887   :  { %10875 = vmatpush1.bf16.msra.mxu1 %v15276_v34  ;;  %10548 = vmatprep.subr.bf16.mxu0 %v15281_v43  ;;  %v15353_v34 = vld [vmem:[#allocation19 + $0xb44] ss:$16 sps:$4 sm:$0xff]   ;;  %v15356_v43 = vld [vmem:[#allocation19 + $0xb4c] ss:$16 sps:$4 sm:$0xff]  }
 0x888   :  { %10876 = vmatprep.subr.bf16.mxu1 %v15284_v6  ;;  %v15351_v6 = vld [vmem:[#allocation19 + $0xb40] ss:$16 sps:$4 sm:$0xff]  }
 0x88a   :  { %10549 = vmatpush1.bf16.msra.mxu0 %v15279_v21  ;;  %v15354_v21 = vld [vmem:[#allocation19 + $0xb48] ss:$16 sps:$4 sm:$0xff]  }
 0x88b   :  { %10877 = vmatpush1.bf16.msra.mxu1 %v15282_v10  ;;  %10550 = vmatprep.subr.bf16.mxu0 %v15287_v38  ;;  %v15362_v10 = vld [vmem:[#allocation19 + $0xb6c] ss:$16 sps:$4 sm:$0xff]   ;;  %v15357_v38 = vld [vmem:[#allocation19 + $0xb60] ss:$16 sps:$4 sm:$0xff]  }
 0x88c   :  { %10878 = vmatprep.subr.bf16.mxu1 %v15290_v41  ;;  %v15360_v41 = vld [vmem:[#allocation19 + $0xb68] ss:$16 sps:$4 sm:$0xff]  }
 0x88e   :  { %10551 = vmatpush1.bf16.msra.mxu0 %v15285_v39  ;;  %v15365_v39 = vld [vmem:[#allocation19 + $0xb84] ss:$16 sps:$4 sm:$0xff]  }
 0x88f   :  { %10879 = vmatpush1.bf16.msra.mxu1 %v15288_v61  ;;  %10561 = vmatprep.subr.bf16.mxu0 %v15293_v3  ;;  %v15363_v61 = vld [vmem:[#allocation19 + $0xb80] ss:$16 sps:$4 sm:$0xff]   ;;  %v15366_v3 = vld [vmem:[#allocation19 + $0xb88] ss:$16 sps:$4 sm:$0xff]  }
 0x890   :  { %10889 = vmatprep.subr.bf16.mxu1 %v15296_v46  ;;  %v15371_v46 = vld [vmem:[#allocation19 + $0xba4] ss:$16 sps:$4 sm:$0xff]  }
 0x891   :  { %10553 = vmatmul.mubr.bf16.vlgmr.msra.gmra.mrb[56].mxu0 %v7254_v13 }
 0x892   :  { %10881 = vmatmul.mubr.bf16.vlgmr.msra.gmra.mrb[56].mxu1 %v7254_v13  ;;  %10562 = vmatpush1.bf16.msra.mxu0 %v15291_v2  ;;  %v15369_v2 = vld [vmem:[#allocation19 + $0xba0] ss:$16 sps:$4 sm:$0xff]   ;;  %v15372_v13 = vld [vmem:[#allocation19 + $0xba8] ss:$16 sps:$4 sm:$0xff]  }
 0x893   :  { %10593 = vmatprep.mubr.bf16.mxu0 %v7257_v40  ;;  %10890 = vmatpush1.bf16.msra.mxu1 %v15294_v50  ;;  %v15377_v50 = vld [vmem:[#allocation19 + $0xbc4] ss:$16 sps:$4 sm:$0xff]  }
 0x894   :  { %10921 = vmatprep.mubr.bf16.mxu1 %v7257_v40  ;;  %10563 = vmatprep.subr.bf16.mxu0 %v15299_v11  ;;  %v15380_v11 = vld [vmem:[#allocation19 + $0xbcc] ss:$16 sps:$4 sm:$0xff]   ;;  %v15375_v40 = vld [vmem:[#allocation19 + $0xbc0] ss:$16 sps:$4 sm:$0xff]  }
 0x895   :  { %10891 = vmatprep.subr.bf16.mxu1 %v15302_v49  ;;  %v15378_v49 = vld [vmem:[#allocation19 + $0xbc8] ss:$16 sps:$4 sm:$0xff]  }
 0x896   :  { %10564 = vmatpush1.bf16.msra.mxu0 %v15297_v51  ;;  %v15383_v51 = vld [vmem:[#allocation19 + $0xbe4] ss:$16 sps:$4 sm:$0xff]  }
 0x897   :  { %10892 = vmatpush1.bf16.msra.mxu1 %v15300_v52  ;;  %10565 = vmatprep.subr.bf16.mxu0 %v15305_v53  ;;  %v15386_v52 = vld [vmem:[#allocation19 + $0xbec] ss:$16 sps:$4 sm:$0xff]   ;;  %v15381_v53 = vld [vmem:[#allocation19 + $0xbe0] ss:$16 sps:$4 sm:$0xff]  }
 0x898   :  { %10893 = vmatprep.subr.bf16.mxu1 %v15308_v18  ;;  %v7240_v18 = vmax.f32 %v17134_v57, 0.0  ;;  %v15393_v57 = vld [vmem:[#allocation19 + $0xc20] ss:$16 sps:$4 sm:$0xff]  }
 0x89a   :  { %10566 = vmatpush1.bf16.msra.mxu0 %v15303_v54  ;;  %v15384_v54 = vld [vmem:[#allocation19 + $0xbe8] ss:$16 sps:$4 sm:$0xff]  }
 0x89b   :  { %10894 = vmatpush1.bf16.msra.mxu1 %v15306_v0  ;;  %10567 = vmatprep.subr.bf16.mxu0 %v15311_v55  ;;  %v15389_v0 = vld [vmem:[#allocation19 + $0xc04] ss:$16 sps:$4 sm:$0xff]   ;;  %v15392_v55 = vld [vmem:[#allocation19 + $0xc0c] ss:$16 sps:$4 sm:$0xff]  }
 0x89c   :  { %10895 = vmatprep.subr.bf16.mxu1 %v15314_v56  ;;  %v7243_v56 = vmax.f32 %v17150_v14, 0.0  ;;  %v15404_v14 = vld [vmem:[#allocation19 + $0xc4c] ss:$16 sps:$4 sm:$0xff]  }
 0x89e   :  { %10568 = vmatpush1.bf16.msra.mxu0 %v15309_v59  ;;  %v15387_v59 = vld [vmem:[#allocation19 + $0xc00] ss:$16 sps:$4 sm:$0xff]  }
 0x89f   :  { %10896 = vmatpush1.bf16.msra.mxu1 %v15312_v25  ;;  %10569 = vmatprep.subr.bf16.mxu0 %v15317_v60  ;;  %v7256_v25 = vpack.c.bf16 %v7240_v18, %v7240_v18  ;;  %v15390_v60 = vld [vmem:[#allocation19 + $0xc08] ss:$16 sps:$4 sm:$0xff]  }
 0x8a0   :  { %10897 = vmatprep.subr.bf16.mxu1 %v15320_v63  ;;  %v15395_v63 = vld [vmem:[#allocation19 + $0xc24] ss:$16 sps:$4 sm:$0xff]   ;;  %v15462_v18 = vld [vmem:[#allocation19 + $0xd88] ss:$16 sps:$4 sm:$0xff]  }
 0x8a2   :  { %10570 = vmatpush1.bf16.msra.mxu0 %v15315_v1  ;;  %v7259_v1 = vpack.c.bf16 %v7243_v56, %v7243_v56  ;;  %v15468_v56 = vld [vmem:[#allocation19 + $0xda8] ss:$16 sps:$4 sm:$0xff]  }
 0x8a3   :  { %10898 = vmatpush1.bf16.msra.mxu1 %v15318_v44  ;;  %10571 = vmatprep.subr.bf16.mxu0 %v15323_v37  ;;  %v15398_v44 = vld [vmem:[#allocation19 + $0xc2c] ss:$16 sps:$4 sm:$0xff]   ;;  %v15396_v37 = vld [vmem:[#allocation19 + $0xc28] ss:$16 sps:$4 sm:$0xff]  }
 0x8a4   :  { %10899 = vmatprep.subr.bf16.mxu1 %v15326_v5  ;;  %v15401_v5 = vld [vmem:[#allocation19 + $0xc44] ss:$16 sps:$4 sm:$0xff]  }
 0x8a6   :  { %10572 = vmatpush1.bf16.msra.mxu0 %v15321_v7  ;;  %v15399_v7 = vld [vmem:[#allocation19 + $0xc40] ss:$16 sps:$4 sm:$0xff]  }
 0x8a7   :  { %10900 = vmatpush1.bf16.msra.mxu1 %v15324_v62  ;;  %10573 = vmatprep.subr.bf16.mxu0 %v15329_v9  ;;  %v15402_v62 = vld [vmem:[#allocation19 + $0xc48] ss:$16 sps:$4 sm:$0xff]   ;;  %v15407_v9 = vld [vmem:[#allocation19 + $0xc64] ss:$16 sps:$4 sm:$0xff]  }
 0x8a8   :  { %10901 = vmatprep.subr.bf16.mxu1 %v15332_v12  ;;  %v15410_v12 = vld [vmem:[#allocation19 + $0xc6c] ss:$16 sps:$4 sm:$0xff]  }
 0x8aa   :  { %10574 = vmatpush1.bf16.msra.mxu0 %v15327_v15  ;;  %v15405_v15 = vld [vmem:[#allocation19 + $0xc60] ss:$16 sps:$4 sm:$0xff]  }
 0x8ab   :  { %10902 = vmatpush1.bf16.msra.mxu1 %v15330_v16  ;;  %10575 = vmatprep.subr.bf16.mxu0 %v15335_v17  ;;  %v15408_v16 = vld [vmem:[#allocation19 + $0xc68] ss:$16 sps:$4 sm:$0xff]   ;;  %v15413_v17 = vld [vmem:[#allocation19 + $0xc84] ss:$16 sps:$4 sm:$0xff]  }
 0x8ac   :  { %10903 = vmatprep.subr.bf16.mxu1 %v15338_v23  ;;  %v15416_v23 = vld [vmem:[#allocation19 + $0xc8c] ss:$16 sps:$4 sm:$0xff]  }
 0x8ae   :  { %10576 = vmatpush1.bf16.msra.mxu0 %v15333_v19  ;;  %v15411_v19 = vld [vmem:[#allocation19 + $0xc80] ss:$16 sps:$4 sm:$0xff]  }
 0x8af   :  { %10904 = vmatpush1.bf16.msra.mxu1 %v15336_v22  ;;  %10577 = vmatprep.subr.bf16.mxu0 %v15341_v27  ;;  %v15414_v22 = vld [vmem:[#allocation19 + $0xc88] ss:$16 sps:$4 sm:$0xff]   ;;  %v15419_v27 = vld [vmem:[#allocation19 + $0xca4] ss:$16 sps:$4 sm:$0xff]  }
 0x8b0   :  { %10905 = vmatprep.subr.bf16.mxu1 %v15344_v47  ;;  %v15422_v47 = vld [vmem:[#allocation19 + $0xcac] ss:$16 sps:$4 sm:$0xff]  }
 0x8b2   :  { %10578 = vmatpush1.bf16.msra.mxu0 %v15339_v28  ;;  %v15417_v28 = vld [vmem:[#allocation19 + $0xca0] ss:$16 sps:$4 sm:$0xff]  }
 0x8b3   :  { %10906 = vmatpush1.bf16.msra.mxu1 %v15342_v8  ;;  %10579 = vmatprep.subr.bf16.mxu0 %v15347_v31  ;;  %v15420_v8 = vld [vmem:[#allocation19 + $0xca8] ss:$16 sps:$4 sm:$0xff]   ;;  %v15425_v31 = vld [vmem:[#allocation19 + $0xcc4] ss:$16 sps:$4 sm:$0xff]  }
 0x8b4   :  { %10907 = vmatprep.subr.bf16.mxu1 %v15350_v33  ;;  %v15428_v33 = vld [vmem:[#allocation19 + $0xccc] ss:$16 sps:$4 sm:$0xff]  }
 0x8b6   :  { %10580 = vmatpush1.bf16.msra.mxu0 %v15345_v20  ;;  %v15423_v20 = vld [vmem:[#allocation19 + $0xcc0] ss:$16 sps:$4 sm:$0xff]  }
 0x8b7   :  { %10908 = vmatpush1.bf16.msra.mxu1 %v15348_v4  ;;  %10581 = vmatprep.subr.bf16.mxu0 %v15353_v34  ;;  %v15426_v4 = vld [vmem:[#allocation19 + $0xcc8] ss:$16 sps:$4 sm:$0xff]   ;;  %v15431_v34 = vld [vmem:[#allocation19 + $0xce4] ss:$16 sps:$4 sm:$0xff]  }
 0x8b8   :  { %10909 = vmatprep.subr.bf16.mxu1 %v15356_v43  ;;  %v15434_v43 = vld [vmem:[#allocation19 + $0xcec] ss:$16 sps:$4 sm:$0xff]  }
 0x8ba   :  { %10582 = vmatpush1.bf16.msra.mxu0 %v15351_v6  ;;  %v15429_v6 = vld [vmem:[#allocation19 + $0xce0] ss:$16 sps:$4 sm:$0xff]  }
 0x8bb   :  { %10910 = vmatpush1.bf16.msra.mxu1 %v15354_v21  ;;  %10583 = vmatprep.subr.bf16.mxu0 %v15359_v36  ;;  %v15432_v21 = vld [vmem:[#allocation19 + $0xce8] ss:$16 sps:$4 sm:$0xff]   ;;  %v15437_v36 = vld [vmem:[#allocation19 + $0xd04] ss:$16 sps:$4 sm:$0xff]  }
 0x8bc   :  { %10911 = vmatprep.subr.bf16.mxu1 %v15362_v10  ;;  %v15440_v10 = vld [vmem:[#allocation19 + $0xd0c] ss:$16 sps:$4 sm:$0xff]  }
 0x8be   :  { %10584 = vmatpush1.bf16.msra.mxu0 %v15357_v38  ;;  %v15435_v38 = vld [vmem:[#allocation19 + $0xd00] ss:$16 sps:$4 sm:$0xff]  }
 0x8bf   :  { %10912 = vmatpush1.bf16.msra.mxu1 %v15360_v41  ;;  %10585 = vmatprep.subr.bf16.mxu0 %v15365_v39  ;;  %v15438_v41 = vld [vmem:[#allocation19 + $0xd08] ss:$16 sps:$4 sm:$0xff]   ;;  %v15443_v39 = vld [vmem:[#allocation19 + $0xd24] ss:$16 sps:$4 sm:$0xff]  }
 0x8c0   :  { %10913 = vmatprep.subr.bf16.mxu1 %v15368_v45  ;;  %v15446_v45 = vld [vmem:[#allocation19 + $0xd2c] ss:$16 sps:$4 sm:$0xff]  }
 0x8c2   :  { %10586 = vmatpush1.bf16.msra.mxu0 %v15363_v61  ;;  %v15441_v61 = vld [vmem:[#allocation19 + $0xd20] ss:$16 sps:$4 sm:$0xff]  }
 0x8c3   :  { %10914 = vmatpush1.bf16.msra.mxu1 %v15366_v3  ;;  %10587 = vmatprep.subr.bf16.mxu0 %v15371_v46  ;;  %v15444_v3 = vld [vmem:[#allocation19 + $0xd28] ss:$16 sps:$4 sm:$0xff]   ;;  %v15449_v46 = vld [vmem:[#allocation19 + $0xd44] ss:$16 sps:$4 sm:$0xff]  }
 0x8c4   :  { %10915 = vmatprep.subr.bf16.mxu1 %v15374_v48  ;;  %v15452_v48 = vld [vmem:[#allocation19 + $0xd4c] ss:$16 sps:$4 sm:$0xff]  }
 0x8c6   :  { %10588 = vmatpush1.bf16.msra.mxu0 %v15369_v2  ;;  %v15447_v2 = vld [vmem:[#allocation19 + $0xd40] ss:$16 sps:$4 sm:$0xff]  }
 0x8c7   :  { %10916 = vmatpush1.bf16.msra.mxu1 %v15372_v13  ;;  %10589 = vmatprep.subr.bf16.mxu0 %v15377_v50  ;;  %v15450_v13 = vld [vmem:[#allocation19 + $0xd48] ss:$16 sps:$4 sm:$0xff]   ;;  %v15455_v50 = vld [vmem:[#allocation19 + $0xd64] ss:$16 sps:$4 sm:$0xff]  }
 0x8c8   :  { %10917 = vmatprep.subr.bf16.mxu1 %v15380_v11  ;;  %v15458_v11 = vld [vmem:[#allocation19 + $0xd6c] ss:$16 sps:$4 sm:$0xff]  }
 0x8ca   :  { %10590 = vmatpush1.bf16.msra.mxu0 %v15375_v40  ;;  %v15453_v40 = vld [vmem:[#allocation19 + $0xd60] ss:$16 sps:$4 sm:$0xff]  }
 0x8cb   :  { %10918 = vmatpush1.bf16.msra.mxu1 %v15378_v49  ;;  %10591 = vmatprep.subr.bf16.mxu0 %v15383_v51  ;;  %v15456_v49 = vld [vmem:[#allocation19 + $0xd68] ss:$16 sps:$4 sm:$0xff]   ;;  %v15461_v51 = vld [vmem:[#allocation19 + $0xd84] ss:$16 sps:$4 sm:$0xff]  }
 0x8cc   :  { %10919 = vmatprep.subr.bf16.mxu1 %v15386_v52  ;;  %v15464_v52 = vld [vmem:[#allocation19 + $0xd8c] ss:$16 sps:$4 sm:$0xff]  }
 0x8ce   :  { %10592 = vmatpush1.bf16.msra.mxu0 %v15381_v53  ;;  %v15459_v53 = vld [vmem:[#allocation19 + $0xd80] ss:$16 sps:$4 sm:$0xff]  }
 0x8cf   :  { %10920 = vmatpush1.bf16.msra.mxu1 %v15384_v54  ;;  %10602 = vmatprep.subr.bf16.mxu0 %v15389_v0  ;;  %v15467_v54 = vld [vmem:[#allocation19 + $0xda4] ss:$16 sps:$4 sm:$0xff]   ;;  %v15470_v0 = vld [vmem:[#allocation19 + $0xdac] ss:$16 sps:$4 sm:$0xff]  }
 0x8d0   :  { %10930 = vmatprep.subr.bf16.mxu1 %v15392_v55  ;;  %v15465_v55 = vld [vmem:[#allocation19 + $0xda0] ss:$16 sps:$4 sm:$0xff]  }
 0x8d1   :  { %10594 = vmatmul.mubr.bf16.vlgmr.msra.gmra.mrb[56].mxu0 %v7256_v25 }
 0x8d2   :  { %10922 = vmatmul.mubr.bf16.vlgmr.msra.gmra.mrb[56].mxu1 %v7256_v25  ;;  %10603 = vmatpush1.bf16.msra.mxu0 %v15387_v59  ;;  %v15473_v59 = vld [vmem:[#allocation19 + $0xdc4] ss:$16 sps:$4 sm:$0xff]   ;;  %v15476_v25 = vld [vmem:[#allocation19 + $0xdcc] ss:$16 sps:$4 sm:$0xff]  }
 0x8d3   :  { %10634 = vmatprep.mubr.bf16.mxu0 %v7259_v1  ;;  %10931 = vmatpush1.bf16.msra.mxu1 %v15390_v60  ;;  %v15471_v60 = vld [vmem:[#allocation19 + $0xdc0] ss:$16 sps:$4 sm:$0xff]  }
 0x8d4   :  { %10962 = vmatprep.mubr.bf16.mxu1 %v7259_v1  ;;  %10604 = vmatprep.subr.bf16.mxu0 %v15395_v63  ;;  %v15474_v63 = vld [vmem:[#allocation19 + $0xdc8] ss:$16 sps:$4 sm:$0xff]   ;;  %v15479_v1 = vld [vmem:[#allocation19 + $0xde4] ss:$16 sps:$4 sm:$0xff]  }
 0x8d5   :  { %10932 = vmatprep.subr.bf16.mxu1 %v15398_v44  ;;  %v15482_v44 = vld [vmem:[#allocation19 + $0xdec] ss:$16 sps:$4 sm:$0xff]  }
 0x8d6   :  { %10605 = vmatpush1.bf16.msra.mxu0 %v15393_v57  ;;  %v15477_v57 = vld [vmem:[#allocation19 + $0xde0] ss:$16 sps:$4 sm:$0xff]  }
 0x8d7   :  { %10933 = vmatpush1.bf16.msra.mxu1 %v15396_v37  ;;  %10606 = vmatprep.subr.bf16.mxu0 %v15401_v5  ;;  %v7242_v37 = vmax.f32 %v17146_v29, 0.0  ;;  %v15480_v5 = vld [vmem:[#allocation19 + $0xde8] ss:$16 sps:$4 sm:$0xff]   ;;  %v15489_v29 = vld [vmem:[#allocation19 + $0xe20] ss:$16 sps:$4 sm:$0xff]  }
 0x8d8   :  { %10934 = vmatprep.subr.bf16.mxu1 %v15404_v14  ;;  %v15485_v14 = vld [vmem:[#allocation19 + $0xe04] ss:$16 sps:$4 sm:$0xff]  }
 0x8da   :  { %10607 = vmatpush1.bf16.msra.mxu0 %v15399_v7  ;;  %v15488_v7 = vld [vmem:[#allocation19 + $0xe0c] ss:$16 sps:$4 sm:$0xff]  }
 0x8db   :  { %10935 = vmatpush1.bf16.msra.mxu1 %v15402_v62  ;;  %10608 = vmatprep.subr.bf16.mxu0 %v15407_v9  ;;  %v7245_v62 = vmax.f32 %v17152_v35, 0.0  ;;  %v15483_v9 = vld [vmem:[#allocation19 + $0xe00] ss:$16 sps:$4 sm:$0xff]   ;;  %v15500_v35 = vld [vmem:[#allocation19 + $0xe4c] ss:$16 sps:$4 sm:$0xff]  }
 0x8dc   :  { %10936 = vmatprep.subr.bf16.mxu1 %v15410_v12  ;;  %v7258_v12 = vpack.c.bf16 %v7242_v37, %v7242_v37  ;;  %v15566_v37 = vld [vmem:[#allocation19 + $0xfac] ss:$16 sps:$4 sm:$0xff]  }
 0x8de   :  { %10609 = vmatpush1.bf16.msra.mxu0 %v15405_v15  ;;  %v15486_v15 = vld [vmem:[#allocation19 + $0xe08] ss:$16 sps:$4 sm:$0xff]  }
 0x8df   :  { %10937 = vmatpush1.bf16.msra.mxu1 %v15408_v16  ;;  %10610 = vmatprep.subr.bf16.mxu0 %v15413_v17  ;;  %v15491_v16 = vld [vmem:[#allocation19 + $0xe24] ss:$16 sps:$4 sm:$0xff]   ;;  %v7261_v17 = vpack.c.bf16 %v7245_v62, %v7245_v62  ;;  %v15572_v62 = vld [vmem:[#allocation19 + $0xfcc] ss:$16 sps:$4 sm:$0xff]  }
 0x8e0   :  { %10938 = vmatprep.subr.bf16.mxu1 %v15416_v23  ;;  %v15494_v23 = vld [vmem:[#allocation19 + $0xe2c] ss:$16 sps:$4 sm:$0xff]  }
 0x8e2   :  { %10611 = vmatpush1.bf16.msra.mxu0 %v15411_v19  ;;  %v15492_v19 = vld [vmem:[#allocation19 + $0xe28] ss:$16 sps:$4 sm:$0xff]  }
 0x8e3   :  { %10939 = vmatpush1.bf16.msra.mxu1 %v15414_v22  ;;  %10612 = vmatprep.subr.bf16.mxu0 %v15419_v27  ;;  %v15497_v22 = vld [vmem:[#allocation19 + $0xe44] ss:$16 sps:$4 sm:$0xff]   ;;  %v15495_v27 = vld [vmem:[#allocation19 + $0xe40] ss:$16 sps:$4 sm:$0xff]  }
 0x8e4   :  { %10940 = vmatprep.subr.bf16.mxu1 %v15422_v47  ;;  %v15498_v47 = vld [vmem:[#allocation19 + $0xe48] ss:$16 sps:$4 sm:$0xff]  }
 0x8e6   :  { %10613 = vmatpush1.bf16.msra.mxu0 %v15417_v28  ;;  %v15503_v28 = vld [vmem:[#allocation19 + $0xe64] ss:$16 sps:$4 sm:$0xff]  }
 0x8e7   :  { %10941 = vmatpush1.bf16.msra.mxu1 %v15420_v8  ;;  %10614 = vmatprep.subr.bf16.mxu0 %v15425_v31  ;;  %v15506_v8 = vld [vmem:[#allocation19 + $0xe6c] ss:$16 sps:$4 sm:$0xff]   ;;  %v15501_v31 = vld [vmem:[#allocation19 + $0xe60] ss:$16 sps:$4 sm:$0xff]  }
 0x8e8   :  { %10942 = vmatprep.subr.bf16.mxu1 %v15428_v33  ;;  %v15504_v33 = vld [vmem:[#allocation19 + $0xe68] ss:$16 sps:$4 sm:$0xff]  }
 0x8ea   :  { %10615 = vmatpush1.bf16.msra.mxu0 %v15423_v20  ;;  %v15509_v20 = vld [vmem:[#allocation19 + $0xe84] ss:$16 sps:$4 sm:$0xff]  }
 0x8eb   :  { %10943 = vmatpush1.bf16.msra.mxu1 %v15426_v4  ;;  %10616 = vmatprep.subr.bf16.mxu0 %v15431_v34  ;;  %v15512_v4 = vld [vmem:[#allocation19 + $0xe8c] ss:$16 sps:$4 sm:$0xff]   ;;  %v15507_v34 = vld [vmem:[#allocation19 + $0xe80] ss:$16 sps:$4 sm:$0xff]  }
 0x8ec   :  { %10944 = vmatprep.subr.bf16.mxu1 %v15434_v43  ;;  %v15510_v43 = vld [vmem:[#allocation19 + $0xe88] ss:$16 sps:$4 sm:$0xff]  }
 0x8ee   :  { %10617 = vmatpush1.bf16.msra.mxu0 %v15429_v6  ;;  %v15515_v6 = vld [vmem:[#allocation19 + $0xea4] ss:$16 sps:$4 sm:$0xff]  }
 0x8ef   :  { %10945 = vmatpush1.bf16.msra.mxu1 %v15432_v21  ;;  %10618 = vmatprep.subr.bf16.mxu0 %v15437_v36  ;;  %v15518_v21 = vld [vmem:[#allocation19 + $0xeac] ss:$16 sps:$4 sm:$0xff]   ;;  %v15513_v36 = vld [vmem:[#allocation19 + $0xea0] ss:$16 sps:$4 sm:$0xff]  }
 0x8f0   :  { %10946 = vmatprep.subr.bf16.mxu1 %v15440_v10  ;;  %v15516_v10 = vld [vmem:[#allocation19 + $0xea8] ss:$16 sps:$4 sm:$0xff]  }
 0x8f2   :  { %10619 = vmatpush1.bf16.msra.mxu0 %v15435_v38  ;;  %v15521_v38 = vld [vmem:[#allocation19 + $0xec4] ss:$16 sps:$4 sm:$0xff]  }
 0x8f3   :  { %10947 = vmatpush1.bf16.msra.mxu1 %v15438_v41  ;;  %10620 = vmatprep.subr.bf16.mxu0 %v15443_v39  ;;  %v15524_v41 = vld [vmem:[#allocation19 + $0xecc] ss:$16 sps:$4 sm:$0xff]   ;;  %v15519_v39 = vld [vmem:[#allocation19 + $0xec0] ss:$16 sps:$4 sm:$0xff]  }
 0x8f4   :  { %10948 = vmatprep.subr.bf16.mxu1 %v15446_v45  ;;  %v15522_v45 = vld [vmem:[#allocation19 + $0xec8] ss:$16 sps:$4 sm:$0xff]  }
 0x8f6   :  { %10621 = vmatpush1.bf16.msra.mxu0 %v15441_v61  ;;  %v15527_v61 = vld [vmem:[#allocation19 + $0xee4] ss:$16 sps:$4 sm:$0xff]  }
 0x8f7   :  { %10949 = vmatpush1.bf16.msra.mxu1 %v15444_v3  ;;  %10622 = vmatprep.subr.bf16.mxu0 %v15449_v46  ;;  %v15530_v3 = vld [vmem:[#allocation19 + $0xeec] ss:$16 sps:$4 sm:$0xff]   ;;  %v15525_v46 = vld [vmem:[#allocation19 + $0xee0] ss:$16 sps:$4 sm:$0xff]  }
 0x8f8   :  { %10950 = vmatprep.subr.bf16.mxu1 %v15452_v48  ;;  %v15528_v48 = vld [vmem:[#allocation19 + $0xee8] ss:$16 sps:$4 sm:$0xff]  }
 0x8fa   :  { %10623 = vmatpush1.bf16.msra.mxu0 %v15447_v2  ;;  %v15533_v2 = vld [vmem:[#allocation19 + $0xf04] ss:$16 sps:$4 sm:$0xff]  }
 0x8fb   :  { %10951 = vmatpush1.bf16.msra.mxu1 %v15450_v13  ;;  %10624 = vmatprep.subr.bf16.mxu0 %v15455_v50  ;;  %v15536_v13 = vld [vmem:[#allocation19 + $0xf0c] ss:$16 sps:$4 sm:$0xff]   ;;  %v15531_v50 = vld [vmem:[#allocation19 + $0xf00] ss:$16 sps:$4 sm:$0xff]  }
 0x8fc   :  { %10952 = vmatprep.subr.bf16.mxu1 %v15458_v11  ;;  %v15534_v11 = vld [vmem:[#allocation19 + $0xf08] ss:$16 sps:$4 sm:$0xff]  }
 0x8fe   :  { %10625 = vmatpush1.bf16.msra.mxu0 %v15453_v40  ;;  %v15539_v40 = vld [vmem:[#allocation19 + $0xf24] ss:$16 sps:$4 sm:$0xff]  }
 0x8ff   :  { %10953 = vmatpush1.bf16.msra.mxu1 %v15456_v49  ;;  %10626 = vmatprep.subr.bf16.mxu0 %v15461_v51  ;;  %v15542_v49 = vld [vmem:[#allocation19 + $0xf2c] ss:$16 sps:$4 sm:$0xff]   ;;  %v15537_v51 = vld [vmem:[#allocation19 + $0xf20] ss:$16 sps:$4 sm:$0xff]  }
 0x900   :  { %10954 = vmatprep.subr.bf16.mxu1 %v15464_v52  ;;  %v15540_v52 = vld [vmem:[#allocation19 + $0xf28] ss:$16 sps:$4 sm:$0xff]  }
 0x902   :  { %10627 = vmatpush1.bf16.msra.mxu0 %v15459_v53  ;;  %v15545_v53 = vld [vmem:[#allocation19 + $0xf44] ss:$16 sps:$4 sm:$0xff]  }
 0x903   :  { %10955 = vmatpush1.bf16.msra.mxu1 %v15462_v18  ;;  %10628 = vmatprep.subr.bf16.mxu0 %v15467_v54  ;;  %v15548_v18 = vld [vmem:[#allocation19 + $0xf4c] ss:$16 sps:$4 sm:$0xff]   ;;  %v15543_v54 = vld [vmem:[#allocation19 + $0xf40] ss:$16 sps:$4 sm:$0xff]  }
 0x904   :  { %10956 = vmatprep.subr.bf16.mxu1 %v15470_v0  ;;  %v15546_v0 = vld [vmem:[#allocation19 + $0xf48] ss:$16 sps:$4 sm:$0xff]  }
 0x906   :  { %10629 = vmatpush1.bf16.msra.mxu0 %v15465_v55  ;;  %v15551_v55 = vld [vmem:[#allocation19 + $0xf64] ss:$16 sps:$4 sm:$0xff]  }
 0x907   :  { %10957 = vmatpush1.bf16.msra.mxu1 %v15468_v56  ;;  %10630 = vmatprep.subr.bf16.mxu0 %v15473_v59  ;;  %v15554_v56 = vld [vmem:[#allocation19 + $0xf6c] ss:$16 sps:$4 sm:$0xff]   ;;  %v15549_v59 = vld [vmem:[#allocation19 + $0xf60] ss:$16 sps:$4 sm:$0xff]  }
 0x908   :  { %10958 = vmatprep.subr.bf16.mxu1 %v15476_v25  ;;  %v15552_v25 = vld [vmem:[#allocation19 + $0xf68] ss:$16 sps:$4 sm:$0xff]  }
 0x90a   :  { %10631 = vmatpush1.bf16.msra.mxu0 %v15471_v60  ;;  %v15557_v60 = vld [vmem:[#allocation19 + $0xf84] ss:$16 sps:$4 sm:$0xff]  }
 0x90b   :  { %10959 = vmatpush1.bf16.msra.mxu1 %v15474_v63  ;;  %10632 = vmatprep.subr.bf16.mxu0 %v15479_v1  ;;  %v15560_v63 = vld [vmem:[#allocation19 + $0xf8c] ss:$16 sps:$4 sm:$0xff]   ;;  %v15555_v1 = vld [vmem:[#allocation19 + $0xf80] ss:$16 sps:$4 sm:$0xff]  }
 0x90c   :  { %10960 = vmatprep.subr.bf16.mxu1 %v15482_v44  ;;  %v15558_v44 = vld [vmem:[#allocation19 + $0xf88] ss:$16 sps:$4 sm:$0xff]  }
 0x90e   :  { %10633 = vmatpush1.bf16.msra.mxu0 %v15477_v57  ;;  %v15563_v57 = vld [vmem:[#allocation19 + $0xfa4] ss:$16 sps:$4 sm:$0xff]  }
 0x90f   :  { %10961 = vmatpush1.bf16.msra.mxu1 %v15480_v5  ;;  %10643 = vmatprep.subr.bf16.mxu0 %v15485_v14  ;;  %v15561_v5 = vld [vmem:[#allocation19 + $0xfa0] ss:$16 sps:$4 sm:$0xff]   ;;  %v15564_v14 = vld [vmem:[#allocation19 + $0xfa8] ss:$16 sps:$4 sm:$0xff]  }
 0x910   :  { %10971 = vmatprep.subr.bf16.mxu1 %v15488_v7  ;;  %v15569_v7 = vld [vmem:[#allocation19 + $0xfc4] ss:$16 sps:$4 sm:$0xff]  }
 0x911   :  { %10635 = vmatmul.mubr.bf16.vlgmr.msra.gmra.mrb[56].mxu0 %v7258_v12 }
 0x912   :  { %10963 = vmatmul.mubr.bf16.vlgmr.msra.gmra.mrb[56].mxu1 %v7258_v12  ;;  %10644 = vmatpush1.bf16.msra.mxu0 %v15483_v9  ;;  %v15567_v9 = vld [vmem:[#allocation19 + $0xfc0] ss:$16 sps:$4 sm:$0xff]   ;;  %v15570_v12 = vld [vmem:[#allocation19 + $0xfc8] ss:$16 sps:$4 sm:$0xff]  }
 0x913   :  { %10675 = vmatprep.mubr.bf16.mxu0 %v7261_v17  ;;  %10972 = vmatpush1.bf16.msra.mxu1 %v15486_v15  ;;  %v15575_v15 = vld [vmem:[#allocation19 + $0xfe4] ss:$16 sps:$4 sm:$0xff]  }
 0x914   :  { %11003 = vmatprep.mubr.bf16.mxu1 %v7261_v17  ;;  %10645 = vmatprep.subr.bf16.mxu0 %v15491_v16  ;;  %v15578_v16 = vld [vmem:[#allocation19 + $0xfec] ss:$16 sps:$4 sm:$0xff]   ;;  %v15573_v17 = vld [vmem:[#allocation19 + $0xfe0] ss:$16 sps:$4 sm:$0xff]  }
 0x915   :  { %10973 = vmatprep.subr.bf16.mxu1 %v15494_v23  ;;  %v7244_v23 = vmax.f32 %v17148_v32, 0.0  ;;  %v15588_v32 = vld [vmem:[#allocation22 + $0x28] ss:$16 sps:$4 sm:$0xff]  }
 0x916   :  { %10646 = vmatpush1.bf16.msra.mxu0 %v15489_v29  ;;  %v15576_v29 = vld [vmem:[#allocation19 + $0xfe8] ss:$16 sps:$4 sm:$0xff]  }
 0x917   :  { %10974 = vmatpush1.bf16.msra.mxu1 %v15492_v19  ;;  %10647 = vmatprep.subr.bf16.mxu0 %v15497_v22  ;;  %v15581_v19 = vld [vmem:[#allocation22 + $0x4] ss:$16 sps:$4 sm:$0xff]   ;;  %v15584_v22 = vld [vmem:[#allocation22 + $0xc] ss:$16 sps:$4 sm:$0xff]  }
 0x918   :  { %10975 = vmatprep.subr.bf16.mxu1 %v15500_v35  ;;  %v15579_v35 = vld [vmem:[#allocation22] ss:$16 sps:$4 sm:$0xff]  }
 0x91a   :  { %10648 = vmatpush1.bf16.msra.mxu0 %v15495_v27  ;;  %v7260_v27 = vpack.c.bf16 %v7244_v23, %v7244_v23  ;;  %v15665_v23 = vld [vmem:[#allocation22 + $0x1c4] ss:$16 sps:$4 sm:$0xff]  }
 0x91b   :  { %10976 = vmatpush1.bf16.msra.mxu1 %v15498_v47  ;;  %10649 = vmatprep.subr.bf16.mxu0 %v15503_v28  ;;  %v15582_v47 = vld [vmem:[#allocation22 + $0x8] ss:$16 sps:$4 sm:$0xff]   ;;  %v15587_v28 = vld [vmem:[#allocation22 + $0x24] ss:$16 sps:$4 sm:$0xff]  }
 0x91c   :  { %10977 = vmatprep.subr.bf16.mxu1 %v15506_v8  ;;  %v15590_v8 = vld [vmem:[#allocation22 + $0x2c] ss:$16 sps:$4 sm:$0xff]  }
 0x91e   :  { %10650 = vmatpush1.bf16.msra.mxu0 %v15501_v31  ;;  %v15585_v31 = vld [vmem:[#allocation22 + $0x20] ss:$16 sps:$4 sm:$0xff]  }
 0x91f   :  { %10978 = vmatpush1.bf16.msra.mxu1 %v15504_v33  ;;  %10651 = vmatprep.subr.bf16.mxu0 %v15509_v20  ;;  %v15593_v33 = vld [vmem:[#allocation22 + $0x44] ss:$16 sps:$4 sm:$0xff]   ;;  %v15596_v20 = vld [vmem:[#allocation22 + $0x4c] ss:$16 sps:$4 sm:$0xff]  }
 0x920   :  { %10979 = vmatprep.subr.bf16.mxu1 %v15512_v4  ;;  %v15591_v4 = vld [vmem:[#allocation22 + $0x40] ss:$16 sps:$4 sm:$0xff]  }
 0x922   :  { %10652 = vmatpush1.bf16.msra.mxu0 %v15507_v34  ;;  %v15594_v34 = vld [vmem:[#allocation22 + $0x48] ss:$16 sps:$4 sm:$0xff]  }
 0x923   :  { %10980 = vmatpush1.bf16.msra.mxu1 %v15510_v43  ;;  %10653 = vmatprep.subr.bf16.mxu0 %v15515_v6  ;;  %v15599_v43 = vld [vmem:[#allocation22 + $0x64] ss:$16 sps:$4 sm:$0xff]   ;;  %v15602_v6 = vld [vmem:[#allocation22 + $0x6c] ss:$16 sps:$4 sm:$0xff]  }
 0x924   :  { %10981 = vmatprep.subr.bf16.mxu1 %v15518_v21  ;;  %v15597_v21 = vld [vmem:[#allocation22 + $0x60] ss:$16 sps:$4 sm:$0xff]  }
 0x926   :  { %10654 = vmatpush1.bf16.msra.mxu0 %v15513_v36  ;;  %v15600_v36 = vld [vmem:[#allocation22 + $0x68] ss:$16 sps:$4 sm:$0xff]  }
 0x927   :  { %10982 = vmatpush1.bf16.msra.mxu1 %v15516_v10  ;;  %10655 = vmatprep.subr.bf16.mxu0 %v15521_v38  ;;  %v15605_v10 = vld [vmem:[#allocation22 + $0x84] ss:$16 sps:$4 sm:$0xff]   ;;  %v15608_v38 = vld [vmem:[#allocation22 + $0x8c] ss:$16 sps:$4 sm:$0xff]  }
 0x928   :  { %10983 = vmatprep.subr.bf16.mxu1 %v15524_v41  ;;  %v15603_v41 = vld [vmem:[#allocation22 + $0x80] ss:$16 sps:$4 sm:$0xff]  }
 0x92a   :  { %10656 = vmatpush1.bf16.msra.mxu0 %v15519_v39  ;;  %v15606_v39 = vld [vmem:[#allocation22 + $0x88] ss:$16 sps:$4 sm:$0xff]  }
 0x92b   :  { %10984 = vmatpush1.bf16.msra.mxu1 %v15522_v45  ;;  %10657 = vmatprep.subr.bf16.mxu0 %v15527_v61  ;;  %v15611_v45 = vld [vmem:[#allocation22 + $0xa4] ss:$16 sps:$4 sm:$0xff]   ;;  %v15614_v61 = vld [vmem:[#allocation22 + $0xac] ss:$16 sps:$4 sm:$0xff]  }
 0x92c   :  { %10985 = vmatprep.subr.bf16.mxu1 %v15530_v3  ;;  %v15609_v3 = vld [vmem:[#allocation22 + $0xa0] ss:$16 sps:$4 sm:$0xff]  }
 0x92e   :  { %10658 = vmatpush1.bf16.msra.mxu0 %v15525_v46  ;;  %v15612_v46 = vld [vmem:[#allocation22 + $0xa8] ss:$16 sps:$4 sm:$0xff]  }
 0x92f   :  { %10986 = vmatpush1.bf16.msra.mxu1 %v15528_v48  ;;  %10659 = vmatprep.subr.bf16.mxu0 %v15533_v2  ;;  %v15617_v48 = vld [vmem:[#allocation22 + $0xc4] ss:$16 sps:$4 sm:$0xff]   ;;  %v15620_v2 = vld [vmem:[#allocation22 + $0xcc] ss:$16 sps:$4 sm:$0xff]  }
 0x930   :  { %10987 = vmatprep.subr.bf16.mxu1 %v15536_v13  ;;  %v15615_v13 = vld [vmem:[#allocation22 + $0xc0] ss:$16 sps:$4 sm:$0xff]  }
 0x932   :  { %10660 = vmatpush1.bf16.msra.mxu0 %v15531_v50  ;;  %v15618_v50 = vld [vmem:[#allocation22 + $0xc8] ss:$16 sps:$4 sm:$0xff]  }
 0x933   :  { %10988 = vmatpush1.bf16.msra.mxu1 %v15534_v11  ;;  %10661 = vmatprep.subr.bf16.mxu0 %v15539_v40  ;;  %v15623_v11 = vld [vmem:[#allocation22 + $0xe4] ss:$16 sps:$4 sm:$0xff]   ;;  %v15626_v40 = vld [vmem:[#allocation22 + $0xec] ss:$16 sps:$4 sm:$0xff]  }
 0x934   :  { %10989 = vmatprep.subr.bf16.mxu1 %v15542_v49  ;;  %v15621_v49 = vld [vmem:[#allocation22 + $0xe0] ss:$16 sps:$4 sm:$0xff]  }
 0x936   :  { %10662 = vmatpush1.bf16.msra.mxu0 %v15537_v51  ;;  %v15624_v51 = vld [vmem:[#allocation22 + $0xe8] ss:$16 sps:$4 sm:$0xff]  }
 0x937   :  { %10990 = vmatpush1.bf16.msra.mxu1 %v15540_v52  ;;  %10663 = vmatprep.subr.bf16.mxu0 %v15545_v53  ;;  %v15629_v52 = vld [vmem:[#allocation22 + $0x104] ss:$16 sps:$4 sm:$0xff]   ;;  %v15632_v53 = vld [vmem:[#allocation22 + $0x10c] ss:$16 sps:$4 sm:$0xff]  }
 0x938   :  { %10991 = vmatprep.subr.bf16.mxu1 %v15548_v18  ;;  %v15627_v18 = vld [vmem:[#allocation22 + $0x100] ss:$16 sps:$4 sm:$0xff]  }
 0x93a   :  { %10664 = vmatpush1.bf16.msra.mxu0 %v15543_v54  ;;  %v15630_v54 = vld [vmem:[#allocation22 + $0x108] ss:$16 sps:$4 sm:$0xff]  }
 0x93b   :  { %10992 = vmatpush1.bf16.msra.mxu1 %v15546_v0  ;;  %10665 = vmatprep.subr.bf16.mxu0 %v15551_v55  ;;  %v15635_v0 = vld [vmem:[#allocation22 + $0x124] ss:$16 sps:$4 sm:$0xff]   ;;  %v15638_v55 = vld [vmem:[#allocation22 + $0x12c] ss:$16 sps:$4 sm:$0xff]  }
 0x93c   :  { %10993 = vmatprep.subr.bf16.mxu1 %v15554_v56  ;;  %v15633_v56 = vld [vmem:[#allocation22 + $0x120] ss:$16 sps:$4 sm:$0xff]  }
 0x93e   :  { %10666 = vmatpush1.bf16.msra.mxu0 %v15549_v59  ;;  %v15636_v59 = vld [vmem:[#allocation22 + $0x128] ss:$16 sps:$4 sm:$0xff]  }
 0x93f   :  { %10994 = vmatpush1.bf16.msra.mxu1 %v15552_v25  ;;  %10667 = vmatprep.subr.bf16.mxu0 %v15557_v60  ;;  %v15641_v25 = vld [vmem:[#allocation22 + $0x144] ss:$16 sps:$4 sm:$0xff]   ;;  %v15644_v60 = vld [vmem:[#allocation22 + $0x14c] ss:$16 sps:$4 sm:$0xff]  }
 0x940   :  { %10995 = vmatprep.subr.bf16.mxu1 %v15560_v63  ;;  %v15639_v63 = vld [vmem:[#allocation22 + $0x140] ss:$16 sps:$4 sm:$0xff]  }
 0x942   :  { %10668 = vmatpush1.bf16.msra.mxu0 %v15555_v1  ;;  %v15642_v1 = vld [vmem:[#allocation22 + $0x148] ss:$16 sps:$4 sm:$0xff]  }
 0x943   :  { %10996 = vmatpush1.bf16.msra.mxu1 %v15558_v44  ;;  %10669 = vmatprep.subr.bf16.mxu0 %v15563_v57  ;;  %v15647_v44 = vld [vmem:[#allocation22 + $0x164] ss:$16 sps:$4 sm:$0xff]   ;;  %v15650_v57 = vld [vmem:[#allocation22 + $0x16c] ss:$16 sps:$4 sm:$0xff]  }
 0x944   :  { %10997 = vmatprep.subr.bf16.mxu1 %v15566_v37  ;;  %v15645_v37 = vld [vmem:[#allocation22 + $0x160] ss:$16 sps:$4 sm:$0xff]  }
 0x946   :  { %10670 = vmatpush1.bf16.msra.mxu0 %v15561_v5  ;;  %v15648_v5 = vld [vmem:[#allocation22 + $0x168] ss:$16 sps:$4 sm:$0xff]  }
 0x947   :  { %10998 = vmatpush1.bf16.msra.mxu1 %v15564_v14  ;;  %10671 = vmatprep.subr.bf16.mxu0 %v15569_v7  ;;  %v15653_v14 = vld [vmem:[#allocation22 + $0x184] ss:$16 sps:$4 sm:$0xff]   ;;  %v15656_v7 = vld [vmem:[#allocation22 + $0x18c] ss:$16 sps:$4 sm:$0xff]  }
 0x948   :  { %10999 = vmatprep.subr.bf16.mxu1 %v15572_v62  ;;  %v15651_v62 = vld [vmem:[#allocation22 + $0x180] ss:$16 sps:$4 sm:$0xff]  }
 0x94a   :  { %10672 = vmatpush1.bf16.msra.mxu0 %v15567_v9  ;;  %v15654_v9 = vld [vmem:[#allocation22 + $0x188] ss:$16 sps:$4 sm:$0xff]  }
 0x94b   :  { %11000 = vmatpush1.bf16.msra.mxu1 %v15570_v12  ;;  %10673 = vmatprep.subr.bf16.mxu0 %v15575_v15  ;;  %v15659_v12 = vld [vmem:[#allocation22 + $0x1a4] ss:$16 sps:$4 sm:$0xff]   ;;  %v15662_v15 = vld [vmem:[#allocation22 + $0x1ac] ss:$16 sps:$4 sm:$0xff]  }
 0x94c   :  { %11001 = vmatprep.subr.bf16.mxu1 %v15578_v16  ;;  %v15657_v16 = vld [vmem:[#allocation22 + $0x1a0] ss:$16 sps:$4 sm:$0xff]  }
 0x94e   :  { %10674 = vmatpush1.bf16.msra.mxu0 %v15573_v17  ;;  %v15660_v17 = vld [vmem:[#allocation22 + $0x1a8] ss:$16 sps:$4 sm:$0xff]  }
 0x94f   :  { %11002 = vmatpush1.bf16.msra.mxu1 %v15576_v29  ;;  %11810 = vmatprep.subr.bf16.mxu0 %v15581_v19  ;;  %v15668_v29 = vld [vmem:[#allocation22 + $0x1cc] ss:$16 sps:$4 sm:$0xff]   ;;  %v15663_v19 = vld [vmem:[#allocation22 + $0x1c0] ss:$16 sps:$4 sm:$0xff]  }
 0x950   :  { %11892 = vmatprep.subr.bf16.mxu1 %v15584_v22  ;;  %v15666_v22 = vld [vmem:[#allocation22 + $0x1c8] ss:$16 sps:$4 sm:$0xff]  }
 0x951   :  { %10676 = vmatmul.mubr.bf16.vlgmr.msra.gmra.mrb[56].mxu0 %v7260_v27 }
 0x952   :  { %11004 = vmatmul.mubr.bf16.vlgmr.msra.gmra.mrb[56].mxu1 %v7260_v27  ;;  %11811 = vmatpush1.bf16.msra.mxu0 %v15579_v35  ;;  %v15671_v35 = vld [vmem:[#allocation22 + $0x1e4] ss:$16 sps:$4 sm:$0xff]   ;;  %v15674_v27 = vld [vmem:[#allocation22 + $0x1ec] ss:$16 sps:$4 sm:$0xff]  }
 0x953   :  { %11893 = vmatpush1.bf16.msra.mxu1 %v15582_v47  ;;  %11812 = vmatprep.subr.bf16.mxu0 %v15587_v28  ;;  %v15669_v47 = vld [vmem:[#allocation22 + $0x1e0] ss:$16 sps:$4 sm:$0xff]   ;;  %v15672_v28 = vld [vmem:[#allocation22 + $0x1e8] ss:$16 sps:$4 sm:$0xff]  }
 0x954   :  { %11894 = vmatprep.subr.bf16.mxu1 %v15590_v8  ;;  %v15677_v8 = vld [vmem:[#allocation22 + $0x204] ss:$16 sps:$4 sm:$0xff]  }
 0x956   :  { %11813 = vmatpush1.bf16.msra.mxu0 %v15585_v31  ;;  %v15680_v31 = vld [vmem:[#allocation22 + $0x20c] ss:$16 sps:$4 sm:$0xff]  }
 0x957   :  { %11895 = vmatpush1.bf16.msra.mxu1 %v15588_v32  ;;  %11814 = vmatprep.subr.bf16.mxu0 %v15593_v33  ;;  %v17170_v32 = vld [vmem:[#allocation20] sm:$0xf] }
 0x958   :  { %11896 = vmatprep.subr.bf16.mxu1 %v15596_v20  ;;  %v7779_v33 = vrot.slane %v17170_v32, %v16538_v24  ;;  %v7783_v20 = vrot.slane %v17170_v32, %v16543_v26 }
 0x95a   :  { %11815 = vmatpush1.bf16.msra.mxu0 %v15591_v4  ;;  %v7791_v4 = vrot.slane %v17170_v32, %v16550_v30 }
 0x95b   :  { %11897 = vmatpush1.bf16.msra.mxu1 %v15594_v34  ;;  %11816 = vmatprep.subr.bf16.mxu0 %v15599_v43 }
 0x95c   :  { %11898 = vmatprep.subr.bf16.mxu1 %v15602_v6 }
 0x95e   :  { %11817 = vmatpush1.bf16.msra.mxu0 %v15597_v21 }
 0x95f   :  { %11899 = vmatpush1.bf16.msra.mxu1 %v15600_v36  ;;  %11818 = vmatprep.subr.bf16.mxu0 %v15605_v10 }
 0x960   :  { %11900 = vmatprep.subr.bf16.mxu1 %v15608_v38 }
 0x962   :  { %11819 = vmatpush1.bf16.msra.mxu0 %v15603_v41 }
 0x963   :  { %11901 = vmatpush1.bf16.msra.mxu1 %v15606_v39  ;;  %11820 = vmatprep.subr.bf16.mxu0 %v15611_v45 }
 0x964   :  { %11902 = vmatprep.subr.bf16.mxu1 %v15614_v61 }
 0x966   :  { %11821 = vmatpush1.bf16.msra.mxu0 %v15609_v3 }
 0x967   :  { %11903 = vmatpush1.bf16.msra.mxu1 %v15612_v46  ;;  %11822 = vmatprep.subr.bf16.mxu0 %v15617_v48 }
 0x968   :  { %11904 = vmatprep.subr.bf16.mxu1 %v15620_v2 }
 0x96a   :  { %11823 = vmatpush1.bf16.msra.mxu0 %v15615_v13  ;;  %v15675_v13 = vld [vmem:[#allocation22 + $0x200] ss:$16 sps:$4 sm:$0xff]  }
 0x96b   :  { %11905 = vmatpush1.bf16.msra.mxu1 %v15618_v50  ;;  %11824 = vmatprep.subr.bf16.mxu0 %v15623_v11  ;;  %v15678_v50 = vld [vmem:[#allocation22 + $0x208] ss:$16 sps:$4 sm:$0xff]  }
 0x96c   :  { %11906 = vmatprep.subr.bf16.mxu1 %v15626_v40  ;;  %v15683_v40 = vld [vmem:[#allocation22 + $0x224] ss:$16 sps:$4 sm:$0xff]  }
 0x96e   :  { %11825 = vmatpush1.bf16.msra.mxu0 %v15621_v49  ;;  %v15686_v49 = vld [vmem:[#allocation22 + $0x22c] ss:$16 sps:$4 sm:$0xff]  }
 0x96f   :  { %11907 = vmatpush1.bf16.msra.mxu1 %v15624_v51  ;;  %11826 = vmatprep.subr.bf16.mxu0 %v15629_v52  ;;  %v15681_v52 = vld [vmem:[#allocation22 + $0x220] ss:$16 sps:$4 sm:$0xff]  }
 0x970   :  { %11908 = vmatprep.subr.bf16.mxu1 %v15632_v53  ;;  %v15684_v53 = vld [vmem:[#allocation22 + $0x228] ss:$16 sps:$4 sm:$0xff]  }
 0x972   :  { %11827 = vmatpush1.bf16.msra.mxu0 %v15627_v18  ;;  %v15689_v18 = vld [vmem:[#allocation22 + $0x244] ss:$16 sps:$4 sm:$0xff]  }
 0x973   :  { %11909 = vmatpush1.bf16.msra.mxu1 %v15630_v54  ;;  %11828 = vmatprep.subr.bf16.mxu0 %v15635_v0  ;;  %v15692_v54 = vld [vmem:[#allocation22 + $0x24c] ss:$16 sps:$4 sm:$0xff]   ;;  %v15687_v0 = vld [vmem:[#allocation22 + $0x240] ss:$16 sps:$4 sm:$0xff]  }
 0x974   :  { %11910 = vmatprep.subr.bf16.mxu1 %v15638_v55  ;;  %v15690_v55 = vld [vmem:[#allocation22 + $0x248] ss:$16 sps:$4 sm:$0xff]  }
 0x976   :  { %11829 = vmatpush1.bf16.msra.mxu0 %v15633_v56  ;;  %v15695_v56 = vld [vmem:[#allocation22 + $0x264] ss:$16 sps:$4 sm:$0xff]  }
 0x977   :  { %11911 = vmatpush1.bf16.msra.mxu1 %v15636_v59  ;;  %11830 = vmatprep.subr.bf16.mxu0 %v15641_v25  ;;  %v15698_v59 = vld [vmem:[#allocation22 + $0x26c] ss:$16 sps:$4 sm:$0xff]   ;;  %v15693_v25 = vld [vmem:[#allocation22 + $0x260] ss:$16 sps:$4 sm:$0xff]  }
 0x978   :  { %11912 = vmatprep.subr.bf16.mxu1 %v15644_v60  ;;  %v15696_v60 = vld [vmem:[#allocation22 + $0x268] ss:$16 sps:$4 sm:$0xff]  }
 0x97a   :  { %11831 = vmatpush1.bf16.msra.mxu0 %v15639_v63  ;;  %v15701_v63 = vld [vmem:[#allocation22 + $0x284] ss:$16 sps:$4 sm:$0xff]  }
 0x97b   :  { %11913 = vmatpush1.bf16.msra.mxu1 %v15642_v1  ;;  %11832 = vmatprep.subr.bf16.mxu0 %v15647_v44  ;;  %v15704_v1 = vld [vmem:[#allocation22 + $0x28c] ss:$16 sps:$4 sm:$0xff]   ;;  %v15699_v44 = vld [vmem:[#allocation22 + $0x280] ss:$16 sps:$4 sm:$0xff]  }
 0x97c   :  { %11914 = vmatprep.subr.bf16.mxu1 %v15650_v57  ;;  %v15702_v57 = vld [vmem:[#allocation22 + $0x288] ss:$16 sps:$4 sm:$0xff]  }
 0x97e   :  { %11833 = vmatpush1.bf16.msra.mxu0 %v15645_v37  ;;  %v15707_v37 = vld [vmem:[#allocation22 + $0x2a4] ss:$16 sps:$4 sm:$0xff]  }
 0x97f   :  { %11915 = vmatpush1.bf16.msra.mxu1 %v15648_v5  ;;  %11834 = vmatprep.subr.bf16.mxu0 %v15653_v14  ;;  %v15710_v5 = vld [vmem:[#allocation22 + $0x2ac] ss:$16 sps:$4 sm:$0xff]   ;;  %v15705_v14 = vld [vmem:[#allocation22 + $0x2a0] ss:$16 sps:$4 sm:$0xff]  }
 0x980   :  { %11916 = vmatprep.subr.bf16.mxu1 %v15656_v7  ;;  %v15708_v7 = vld [vmem:[#allocation22 + $0x2a8] ss:$16 sps:$4 sm:$0xff]  }
 0x982   :  { %11835 = vmatpush1.bf16.msra.mxu0 %v15651_v62  ;;  %v15713_v62 = vld [vmem:[#allocation22 + $0x2c4] ss:$16 sps:$4 sm:$0xff]  }
 0x983   :  { %11917 = vmatpush1.bf16.msra.mxu1 %v15654_v9  ;;  %11836 = vmatprep.subr.bf16.mxu0 %v15659_v12  ;;  %v15716_v9 = vld [vmem:[#allocation22 + $0x2cc] ss:$16 sps:$4 sm:$0xff]   ;;  %v15711_v12 = vld [vmem:[#allocation22 + $0x2c0] ss:$16 sps:$4 sm:$0xff]  }
 0x984   :  { %11918 = vmatprep.subr.bf16.mxu1 %v15662_v15  ;;  %v15714_v15 = vld [vmem:[#allocation22 + $0x2c8] ss:$16 sps:$4 sm:$0xff]  }
 0x986   :  { %11837 = vmatpush1.bf16.msra.mxu0 %v15657_v16  ;;  %v15719_v16 = vld [vmem:[#allocation22 + $0x2e4] ss:$16 sps:$4 sm:$0xff]  }
 0x987   :  { %11919 = vmatpush1.bf16.msra.mxu1 %v15660_v17  ;;  %11838 = vmatprep.subr.bf16.mxu0 %v15665_v23  ;;  %v15722_v17 = vld [vmem:[#allocation22 + $0x2ec] ss:$16 sps:$4 sm:$0xff]   ;;  %v15717_v23 = vld [vmem:[#allocation22 + $0x2e0] ss:$16 sps:$4 sm:$0xff]  }
 0x988   :  { %11920 = vmatprep.subr.bf16.mxu1 %v15668_v29  ;;  %v15720_v29 = vld [vmem:[#allocation22 + $0x2e8] ss:$16 sps:$4 sm:$0xff]  }
 0x98a   :  { %11839 = vmatpush1.bf16.msra.mxu0 %v15663_v19  ;;  %v15725_v19 = vld [vmem:[#allocation22 + $0x304] ss:$16 sps:$4 sm:$0xff]  }
 0x98b   :  { %11921 = vmatpush1.bf16.msra.mxu1 %v15666_v22  ;;  %11840 = vmatprep.subr.bf16.mxu0 %v15671_v35  ;;  %v15728_v22 = vld [vmem:[#allocation22 + $0x30c] ss:$16 sps:$4 sm:$0xff]   ;;  %v15723_v35 = vld [vmem:[#allocation22 + $0x300] ss:$16 sps:$4 sm:$0xff]  }
 0x98c   :  { %11922 = vmatprep.subr.bf16.mxu1 %v15674_v27  ;;  %v15726_v27 = vld [vmem:[#allocation22 + $0x308] ss:$16 sps:$4 sm:$0xff]  }
 0x98e   :  { %11841 = vmatpush1.bf16.msra.mxu0 %v15669_v47  ;;  %v15731_v47 = vld [vmem:[#allocation22 + $0x324] ss:$16 sps:$4 sm:$0xff]  }
 0x98f   :  { %11923 = vmatpush1.bf16.msra.mxu1 %v15672_v28  ;;  %11851 = vmatprep.subr.bf16.mxu0 %v15677_v8  ;;  %v15734_v28 = vld [vmem:[#allocation22 + $0x32c] ss:$16 sps:$4 sm:$0xff]   ;;  %v15729_v8 = vld [vmem:[#allocation22 + $0x320] ss:$16 sps:$4 sm:$0xff]  }
 0x990   :  { %11933 = vmatprep.subr.bf16.mxu1 %v15680_v31  ;;  %v15732_v31 = vld [vmem:[#allocation22 + $0x328] ss:$16 sps:$4 sm:$0xff]  }
 0xa24   :  { %v10677_v34 = vpop.f32.mrb[56].mxu0 }
 0xa25   :  { %v14329_v43 = vadd.f32 %v10677_v34, %v7779_v33  ;;  %v17178_v6 = vpop.f32.mrb[56].mxu1  ;;  %v10679_v21 = vpop.f32.mrb[57].mxu0  ;;  %v15737_v33 = vld [vmem:[#allocation22 + $0x344] ss:$16 sps:$4 sm:$0xff]   ;;  %v15738_v34 = vld [vmem:[#allocation22 + $0x348] ss:$16 sps:$4 sm:$0xff]  }
 0xa26   :  { %v14330_v36 = vadd.f32 %v10679_v21, %v7783_v20  ;;  %v11007_v10 = vpop.f32.mrb[57].mxu1  ;;  %v10681_v38 = vpop.f32.mrb[58].mxu0  ;;  %v15740_v20 = vld [vmem:[#allocation22 + $0x34c] ss:$16 sps:$4 sm:$0xff]  }
 0xa27   :  { %v11012_v41 = vmax.f32 %v14329_v43, 0.0  ;;  %v14332_v39 = vadd.f32 %v11007_v10, %v7791_v4  ;;  %v11009_v45 = vpop.f32.mrb[58].mxu1  ;;  %v10682_v61 = vpop.f32.mrb[59].mxu0  ;;  %v15735_v4 = vld [vmem:[#allocation22 + $0x340] ss:$16 sps:$4 sm:$0xff]  }
 0xa28   :  { %v11013_v3 = vmax.f32 %v14330_v36, 0.0  ;;  %v11010_v46 = vpop.f32.mrb[59].mxu1  ;;  %v15743_v43 = vld [vmem:[#allocation22 + $0x364] ss:$16 sps:$4 sm:$0xff]   ;;  %v15746_v21 = vld [vmem:[#allocation22 + $0x36c] ss:$16 sps:$4 sm:$0xff]  }
 0xa29   :  { %v11015_v48 = vmax.f32 %v14332_v39, 0.0  ;;  %v11016_v11 = vpack.c.bf16 %v11012_v41, %v11012_v41  ;;  %v15741_v36 = vld [vmem:[#allocation22 + $0x360] ss:$16 sps:$4 sm:$0xff]   ;;  %v15744_v10 = vld [vmem:[#allocation22 + $0x368] ss:$16 sps:$4 sm:$0xff]  }
 0xa2a   :  { %v11017_v2 = vpack.c.bf16 %v11013_v3, %v11013_v3  ;;  %v15749_v38 = vld [vmem:[#allocation22 + $0x384] ss:$16 sps:$4 sm:$0xff]   ;;  %v15752_v41 = vld [vmem:[#allocation22 + $0x38c] ss:$16 sps:$4 sm:$0xff]   ;;  %v15747_v39 = vld [vmem:[#allocation22 + $0x380] ss:$16 sps:$4 sm:$0xff]  }
 0xa2b   :  { %v11019_v51 = vpack.c.bf16 %v11015_v48, %v11015_v48  ;;  %v15750_v45 = vld [vmem:[#allocation22 + $0x388] ss:$16 sps:$4 sm:$0xff]   ;;  %v15755_v61 = vld [vmem:[#allocation22 + $0x3a4] ss:$16 sps:$4 sm:$0xff]   ;;  %v15758_v3 = vld [vmem:[#allocation22 + $0x3ac] ss:$16 sps:$4 sm:$0xff]  }
 0xa2c   :  { %11842 = vmatprep.mubr.bf16.mxu0 %v11017_v2  ;;  %11924 = vmatprep.mubr.bf16.mxu1 %v11017_v2  ;;  %v15753_v46 = vld [vmem:[#allocation22 + $0x3a0] ss:$16 sps:$4 sm:$0xff]   ;;  %v15756_v48 = vld [vmem:[#allocation22 + $0x3a8] ss:$16 sps:$4 sm:$0xff]   ;;  %v7787_v2 = vrot.slane %v17170_v32, %v16557_v42 }
 0xa2d   :  { %11843 = vmatmul.mubr.bf16.vlgmr.msra.gmra.mrb[60].mxu0 %v11016_v11  ;;  %11925 = vmatmul.mubr.bf16.vlgmr.msra.gmra.mrb[60].mxu1 %v11016_v11  ;;  %v15759_v11 = vld [vmem:[#allocation22 + $0x3c0] ss:$16 sps:$4 sm:$0xff]  }
 0xa2e   :  { %11852 = vmatpush1.bf16.msra.mxu0 %v15675_v13  ;;  %11934 = vmatpush1.bf16.msra.mxu1 %v15678_v50  ;;  %v15761_v13 = vld [vmem:[#allocation22 + $0x3c4] ss:$16 sps:$4 sm:$0xff]   ;;  %v15764_v50 = vld [vmem:[#allocation22 + $0x3cc] ss:$16 sps:$4 sm:$0xff]  }
 0xa2f   :  { %11883 = vmatprep.mubr.bf16.mxu0 %v11019_v51  ;;  %11965 = vmatprep.mubr.bf16.mxu1 %v11019_v51  ;;  %v15767_v51 = vld [vmem:[#allocation22 + $0x3e4] ss:$16 sps:$4 sm:$0xff]   ;;  %v15771_v32 = vld [vmem:[%s17344_s15 + $0x40] sm:$0xff]  }
 0xa30   :  { %11853 = vmatprep.subr.bf16.mxu0 %v15683_v40  ;;  %11935 = vmatprep.subr.bf16.mxu1 %v15686_v49  ;;  %v15762_v40 = vld [vmem:[#allocation22 + $0x3c8] ss:$16 sps:$4 sm:$0xff]   ;;  %v14331_v49 = vadd.f32 %v17178_v6, %v7787_v2 }
 0xa31   :  { %v15772_v6 = vld [vmem:[%s17344_s15] sm:$0xff]  }
 0xa32   :  { %11854 = vmatpush1.bf16.msra.mxu0 %v15681_v52  ;;  %11936 = vmatpush1.bf16.msra.mxu1 %v15684_v53  ;;  %v15770_v52 = vld [vmem:[#allocation22 + $0x3ec] ss:$16 sps:$4 sm:$0xff]   ;;  %v15765_v53 = vld [vmem:[#allocation22 + $0x3e0] ss:$16 sps:$4 sm:$0xff]  }
 0xa33   :  { %11855 = vmatprep.subr.bf16.mxu0 %v15689_v18  ;;  %11937 = vmatprep.subr.bf16.mxu1 %v15692_v54  ;;  %v15768_v18 = vld [vmem:[#allocation22 + $0x3e8] ss:$16 sps:$4 sm:$0xff]   ;;  %v11014_v54 = vmax.f32 %v14331_v49, 0.0 }
 0xa36   :  { %11856 = vmatpush1.bf16.msra.mxu0 %v15687_v0  ;;  %11938 = vmatpush1.bf16.msra.mxu1 %v15690_v55  ;;  %v15773_v0 = vld [vmem:[%s17344_s15 + $0xc0] sm:$0xff]  }
 0xa37   :  { %11857 = vmatprep.subr.bf16.mxu0 %v15695_v56  ;;  %11939 = vmatprep.subr.bf16.mxu1 %v15698_v59  ;;  %v15774_v55 = vld [vmem:[%s17344_s15 + $0x80] sm:$0xff]   ;;  %v11018_v56 = vpack.c.bf16 %v11014_v54, %v11014_v54  ;;  %v15775_v59 = vld [vmem:[%s17344_s15 + $0x48] sm:$0xff]  }
 0xa3a   :  { %11858 = vmatpush1.bf16.msra.mxu0 %v15693_v25  ;;  %11940 = vmatpush1.bf16.msra.mxu1 %v15696_v60  ;;  %v15777_v25 = vld [vmem:[%s17344_s15 + $0xc8] sm:$0xff]  }
 0xa3b   :  { %11859 = vmatprep.subr.bf16.mxu0 %v15701_v63  ;;  %11941 = vmatprep.subr.bf16.mxu1 %v15704_v1  ;;  %v15776_v60 = vld [vmem:[%s17344_s15 + $0x8] sm:$0xff]   ;;  %v15779_v1 = vld [vmem:[%s17344_s15 + $0x50] sm:$0xff]  }
 0xa3c   :  { %v15778_v63 = vld [vmem:[%s17344_s15 + $0x88] sm:$0xff]  }
 0xa3e   :  { %11860 = vmatpush1.bf16.msra.mxu0 %v15699_v44  ;;  %11942 = vmatpush1.bf16.msra.mxu1 %v15702_v57  ;;  %v15781_v44 = vld [vmem:[%s17344_s15 + $0xd0] sm:$0xff]  }
 0xa3f   :  { %11861 = vmatprep.subr.bf16.mxu0 %v15707_v37  ;;  %11943 = vmatprep.subr.bf16.mxu1 %v15710_v5  ;;  %v15780_v57 = vld [vmem:[%s17344_s15 + $0x10] sm:$0xff]   ;;  %v15783_v5 = vld [vmem:[%s17344_s15 + $0x58] sm:$0xff]  }
 0xa40   :  { %v15782_v37 = vld [vmem:[%s17344_s15 + $0x90] sm:$0xff]  }
 0xa42   :  { %11862 = vmatpush1.bf16.msra.mxu0 %v15705_v14  ;;  %11944 = vmatpush1.bf16.msra.mxu1 %v15708_v7  ;;  %v15785_v14 = vld [vmem:[%s17344_s15 + $0xd8] sm:$0xff]  }
 0xa43   :  { %11863 = vmatprep.subr.bf16.mxu0 %v15713_v62  ;;  %11945 = vmatprep.subr.bf16.mxu1 %v15716_v9  ;;  %v15784_v7 = vld [vmem:[%s17344_s15 + $0x18] sm:$0xff]   ;;  %v15787_v9 = vld [vmem:[%s17344_s15 + $0x60] sm:$0xff]  }
 0xa44   :  { %v15786_v62 = vld [vmem:[%s17344_s15 + $0x98] sm:$0xff]  }
 0xa46   :  { %11864 = vmatpush1.bf16.msra.mxu0 %v15711_v12  ;;  %11946 = vmatpush1.bf16.msra.mxu1 %v15714_v15  ;;  %v15789_v12 = vld [vmem:[%s17344_s15 + $0xe0] sm:$0xff]  }
 0xa47   :  { %11865 = vmatprep.subr.bf16.mxu0 %v15719_v16  ;;  %11947 = vmatprep.subr.bf16.mxu1 %v15722_v17  ;;  %v15788_v15 = vld [vmem:[%s17344_s15 + $0x20] sm:$0xff]   ;;  %v15791_v17 = vld [vmem:[%s17344_s15 + $0x68] sm:$0xff]  }
 0xa48   :  { %v15790_v16 = vld [vmem:[%s17344_s15 + $0xa0] sm:$0xff]  }
 0xa4a   :  { %11866 = vmatpush1.bf16.msra.mxu0 %v15717_v23  ;;  %11948 = vmatpush1.bf16.msra.mxu1 %v15720_v29  ;;  %v15793_v23 = vld [vmem:[%s17344_s15 + $0xe8] sm:$0xff]  }
 0xa4b   :  { %11867 = vmatprep.subr.bf16.mxu0 %v15725_v19  ;;  %11949 = vmatprep.subr.bf16.mxu1 %v15728_v22  ;;  %v15792_v29 = vld [vmem:[%s17344_s15 + $0x28] sm:$0xff]   ;;  %v15795_v22 = vld [vmem:[%s17344_s15 + $0x70] sm:$0xff]  }
 0xa4c   :  { %v15794_v19 = vld [vmem:[%s17344_s15 + $0xa8] sm:$0xff]  }
 0xa4e   :  { %11868 = vmatpush1.bf16.msra.mxu0 %v15723_v35  ;;  %11950 = vmatpush1.bf16.msra.mxu1 %v15726_v27  ;;  %v15797_v35 = vld [vmem:[%s17344_s15 + $0xf0] sm:$0xff]  }
 0xa4f   :  { %11869 = vmatprep.subr.bf16.mxu0 %v15731_v47  ;;  %11951 = vmatprep.subr.bf16.mxu1 %v15734_v28  ;;  %v15796_v27 = vld [vmem:[%s17344_s15 + $0x30] sm:$0xff]   ;;  %v15799_v28 = vld [vmem:[%s17344_s15 + $0x78] sm:$0xff]  }
 0xa50   :  { %v15798_v47 = vld [vmem:[%s17344_s15 + $0xb0] sm:$0xff]  }
 0xa52   :  { %11870 = vmatpush1.bf16.msra.mxu0 %v15729_v8  ;;  %11952 = vmatpush1.bf16.msra.mxu1 %v15732_v31  ;;  %v15801_v8 = vld [vmem:[%s17344_s15 + $0xf8] sm:$0xff]  }
 0xa53   :  { %11871 = vmatprep.subr.bf16.mxu0 %v15737_v33  ;;  %11953 = vmatprep.subr.bf16.mxu1 %v15740_v20  ;;  %v15800_v31 = vld [vmem:[%s17344_s15 + $0x38] sm:$0xff]   ;;  %v16222_v20 = vmov 0.0|0.0  }
 0xa54   :  { %v15802_v33 = vld [vmem:[%s17344_s15 + $0xb8] sm:$0xff]  }
 0xa56   :  { %11872 = vmatpush1.bf16.msra.mxu0 %v15735_v4  ;;  %11954 = vmatpush1.bf16.msra.mxu1 %v15738_v34  ;;  %v11148_v4 = vld [vmem:[#allocation23] sm:$0xf] }
 0xa57   :  { %11873 = vmatprep.subr.bf16.mxu0 %v15743_v43  ;;  %11955 = vmatprep.subr.bf16.mxu1 %v15746_v21  ;;  %v11153_v34 = vrot.slane %v11148_v4, %v16538_v24  ;;  %v11161_v43 = vrot.slane %v11148_v4, %v16557_v42  ;;  %v11157_v21 = vrot.slane %v11148_v4, %v16543_v26 }
 0xa5a   :  { %11874 = vmatpush1.bf16.msra.mxu0 %v15741_v36  ;;  %11956 = vmatpush1.bf16.msra.mxu1 %v15744_v10  ;;  %v11165_v36 = vrot.slane %v11148_v4, %v16550_v30  ;;  %v12327_v10 = vld [vmem:[%s17346_s17] sm:$0xff] }
 0xa5b   :  { %11875 = vmatprep.subr.bf16.mxu0 %v15749_v38  ;;  %11957 = vmatprep.subr.bf16.mxu1 %v15752_v41  ;;  %v12328_v38 = vld [vmem:[%s17346_s17 + $0x8] sm:$0xff] }
 0xa5c   :  { %v12409_v42 = vmul.f32 %v12328_v38, %v12328_v38  ;;  %v14298_v54 = vpack.c.bf16 %v12328_v38, %v12327_v10 }
 0xa5e   :  { %11876 = vmatpush1.bf16.msra.mxu0 %v15747_v39  ;;  %11958 = vmatpush1.bf16.msra.mxu1 %v15750_v45 }
 0xa5f   :  { %11877 = vmatprep.subr.bf16.mxu0 %v15755_v61  ;;  %11959 = vmatprep.subr.bf16.mxu1 %v15758_v3 }
 0xa62   :  { %11878 = vmatpush1.bf16.msra.mxu0 %v15753_v46  ;;  %11960 = vmatpush1.bf16.msra.mxu1 %v15756_v48  ;;  %v12408_v48 = vmul.f32 %v12327_v10, %v12327_v10 }
 0xa63   :  { %11879 = vmatprep.subr.bf16.mxu0 %v15761_v13  ;;  %11961 = vmatprep.subr.bf16.mxu1 %v15764_v50 }
 0xa66   :  { %11880 = vmatpush1.bf16.msra.mxu0 %v15759_v11  ;;  %11962 = vmatpush1.bf16.msra.mxu1 %v15762_v40 }
 0xa67   :  { %11881 = vmatprep.subr.bf16.mxu0 %v15767_v51  ;;  %11963 = vmatprep.subr.bf16.mxu1 %v15770_v52  ;;  %v12329_v51 = vld [vmem:[%s17346_s17 + $0x10] sm:$0xff]  ;;  %v12330_v52 = vld [vmem:[%s17346_s17 + $0x18] sm:$0xff]  ;;  %s16226_s17 = smov [#allocation26]  }
 0xa68   :  { %s12509_s24 = sshll.u32 %s16226_s17, 4  ;;  %s12510_s24 = int_to_ptr.vmem [resolvable:$true] %s12509_s24 }
 0xa69   :  { %s16138_s14 = scalar_lea.vmem %s12510_s24, 128  ;;  %p16143_p9 = scmp.lt.s32.totalorder %s12510_s24, %s12510_s24 }
 0xa6a   :  { %11882 = vmatpush1.bf16.msra.mxu0 %v15765_v53  ;;  %11964 = vmatpush1.bf16.msra.mxu1 %v15768_v18  ;;  %p16139_p8 = scmp.ne.s32.totalorder %s12510_s24, %s16138_s14  ;;  %p16144_p10 = scmp.lt.s32.totalorder %s16138_s14, %s16138_s14 }
 0xa6b   :  { %14221 = vmatprep.subr.bf16.mxu0 %v15771_v32  ;;  %14243 = vmatprep.subr.bf16.mxu1 %v15773_v0  ;;  %v14304_v32 = vpack.c.bf16 %v12409_v42, %v12408_v48 }
 0xa6c   :  { %p16145_p11 = por %p16144_p10, %p16143_p9 }
 0xa6d   :  { %11884 = vmatmul.mubr.bf16.vlgmr.msra.gmra.mrb[60].mxu0 %v11018_v56  ;;  %11966 = vmatmul.mubr.bf16.vlgmr.msra.gmra.mrb[60].mxu1 %v11018_v56  ;;  %v12411_v56 = vmul.f32 %v12330_v52, %v12330_v52 }
 0xa6e   :  { %14222 = vmatpush3.bf16.msra.mxu0 %v15772_v6  ;;  %14244 = vmatpush3.bf16.msra.mxu1 %v15774_v55  ;;  %v12410_v55 = vmul.f32 %v12329_v51, %v12329_v51  ;;  %p16146_p12 = pnand %p16145_p11, %p16139_p8 }
 0xa6f   :  { %14223 = vmatprep.subr.bf16.mxu0 %v15775_v59  ;;  %14245 = vmatprep.subr.bf16.mxu1 %v15777_v25 }
 0xa72   :  { %14224 = vmatpush3.bf16.msra.mxu0 %v15776_v60  ;;  %14246 = vmatpush3.bf16.msra.mxu1 %v15778_v63  ;;  %v14301_v60 = vpack.c.bf16 %v12330_v52, %v12329_v51  ;;  %v14307_v63 = vpack.c.bf16 %v12411_v56, %v12410_v55 }
 0xa73   :  { %14225 = vmatprep.subr.bf16.mxu0 %v15779_v1  ;;  %14247 = vmatprep.subr.bf16.mxu1 %v15781_v44  ;;  %v16224_v1 = vmov 0.0   ;;  %v16225_v44 = vmov 1.0  }
 0xa76   :  { %14226 = vmatpush3.bf16.msra.mxu0 %v15780_v57  ;;  %14248 = vmatpush3.bf16.msra.mxu1 %v15782_v37 }
 0xa77   :  { %14227 = vmatprep.subr.bf16.mxu0 %v15783_v5  ;;  %14249 = vmatprep.subr.bf16.mxu1 %v15785_v14  ;;  %v14010_v5 = vld [vmem:[#allocation25] ss:$0 sm:$0xff] }
 0xa7a   :  { %14228 = vmatpush3.bf16.msra.mxu0 %v15784_v7  ;;  %14250 = vmatpush3.bf16.msra.mxu1 %v15786_v62 }
 0xa7b   :  { %14229 = vmatprep.subr.bf16.mxu0 %v15787_v9  ;;  %14251 = vmatprep.subr.bf16.mxu1 %v15789_v12 }
 0xa7e   :  { %14230 = vmatpush3.bf16.msra.mxu0 %v15788_v15  ;;  %14252 = vmatpush3.bf16.msra.mxu1 %v15790_v16 }
 0xa7f   :  { %14231 = vmatprep.subr.bf16.mxu0 %v15791_v17  ;;  %14253 = vmatprep.subr.bf16.mxu1 %v15793_v23 }
 0xa82   :  { %14232 = vmatpush3.bf16.msra.mxu0 %v15792_v29  ;;  %14254 = vmatpush3.bf16.msra.mxu1 %v15794_v19 }
 0xa83   :  { %14233 = vmatprep.subr.bf16.mxu0 %v15795_v22  ;;  %14255 = vmatprep.subr.bf16.mxu1 %v15797_v35 }
 0xa86   :  { %14234 = vmatpush3.bf16.msra.mxu0 %v15796_v27  ;;  %14256 = vmatpush3.bf16.msra.mxu1 %v15798_v47 }
 0xa87   :  { %14235 = vmatprep.subr.bf16.mxu0 %v15799_v28  ;;  %14257 = vmatprep.subr.bf16.mxu1 %v15801_v8  ;;  %v12407_v28 = vpop.xlane.xlu0 %12406 }
 0xa8a   :  { %14236 = vmatpush3.bf16.msra.mxu0 %v15800_v31  ;;  %14258 = vmatpush3.bf16.msra.mxu1 %v15802_v33 }
 0xa8b   :  { %14297 = vmatprep.subr.bf16.mxu0 %v16222_v20  ;;  %14303 = vmatprep.subr.bf16.mxu1 %v16222_v20 }
 0xb40   :  { %v11885_v41 = vpop.f32.mrb[60].mxu0  ;;  %v11967_v39 = vpop.f32.mrb[60].mxu1 }
 0xb41   :  { %v14333_v45 = vadd.f32 %v11885_v41, %v11153_v34  ;;  %v14335_v61 = vadd.f32 %v11967_v39, %v11161_v43  ;;  %v11887_v3 = vpop.f32.mrb[61].mxu0  ;;  %v11969_v46 = vpop.f32.mrb[61].mxu1 }
 0xb42   :  { %v14334_v2 = vadd.f32 %v11887_v3, %v11157_v21  ;;  %v14336_v26 = vadd.f32 %v11969_v46, %v11165_v36  ;;  %v11889_v13 = vpop.f32.mrb[62].mxu0  ;;  %v11971_v30 = vpop.f32.mrb[62].mxu1 }
 0xb43   :  { %v11974_v50 = vmax.f32 %v14333_v45, 0.0  ;;  %v11976_v11 = vmax.f32 %v14335_v61, 0.0  ;;  %v11890_v40 = vpop.f32.mrb[63].mxu0  ;;  %v11972_v49 = vpop.f32.mrb[63].mxu1 }
 0xb44   :  { %v11975_v53 = vmax.f32 %v14334_v2, 0.0  ;;  %v11977_v18 = vmax.f32 %v14336_v26, 0.0 }
 0xb45   :  { %v11978_v59 = vpack.c.bf16 %v11974_v50, %v11974_v50  ;;  %v11980_v25 = vpack.c.bf16 %v11976_v11, %v11976_v11 }
 0xb46   :  { %v11979_v0 = vpack.c.bf16 %v11975_v53, %v11975_v53  ;;  %v11981_v6 = vpack.c.bf16 %v11977_v18, %v11977_v18 }
 0xb48   :  { %12277 = vmatprep.mubr.bf16.mxu0 %v11979_v0  ;;  %12317 = vmatprep.mubr.bf16.mxu1 %v11981_v6 }
 0xb49   :  { %12278 = vmatmul.mubr.bf16.vlgmr.msra.gmra.mrb[64].mxu0 %v11978_v59  ;;  %12318 = vmatmul.mubr.bf16.vlgmr.msra.gmra.mrb[64].mxu1 %v11980_v25 }
 0xb4a   :  { %14299 = vmatpush3.bf16.msra.mxu0 %v14298_v54  ;;  %14305 = vmatpush3.bf16.msra.mxu1 %v14304_v32 }
 0xb4b   :  { %14300 = vmatprep.subr.bf16.mxu0 %v16222_v20  ;;  %14306 = vmatprep.subr.bf16.mxu1 %v16222_v20 }
 0xb4c   :  { %14283 = vmatprep.mubr.msk.f32.mxu0 %vm16223_vm2, %v16224_v1  ;;  %14294 = vmatprep.mubr.msk.f32.mxu1 %vm16223_vm2, %v16224_v1 }
 0xb4e   :  { %14302 = vmatpush3.bf16.msra.mxu0 %v14301_v60  ;;  %14308 = vmatpush3.bf16.msra.mxu1 %v14307_v63 }
 0xb51   :  { %14284 = vmatmul.mubr.msk.f32.vlgmr.msra.gmra.mrb[68].mxu0 %vm6898_vm1, %v17073_v58  ;;  %14295 = vmatmul.mubr.msk.f32.vlgmr.msra.gmra.mrb[68].mxu1 %vm6898_vm1, %v16225_v44 }
 0xc1c   :  { %v14237_v57 = vpop.f32.mrb[64].mxu0  ;;  %v14259_v37 = vpop.f32.mrb[64].mxu1 }
 0xc1d   :  { %v14238_v14 = vpop.f32.mrb[65].mxu0  ;;  %v14260_v7 = vpop.f32.mrb[65].mxu1 }
 0xc1e   :  { %v14239_v62 = vadd.f32 %v14238_v14, %v14237_v57  ;;  %v14261_v9 = vadd.f32 %v14260_v7, %v14259_v37  ;;  %v14240_v12 = vpop.f32.mrb[66].mxu0  ;;  %v14262_v15 = vpop.f32.mrb[66].mxu1 }
 0xc1f   :  { %v14241_v16 = vpop.f32.mrb[67].mxu0  ;;  %v14263_v17 = vpop.f32.mrb[67].mxu1 }
 0xc20   :  { %v12280_v23 = vadd.f32 %v14239_v62, %v14010_v5 }
 0xc22   :  { %v12320_v29 = vadd.f32 %v14261_v9, %v12280_v23 }
 0xc24   :  { %12326 = vst.msk [vmem:[#allocation27] sm:$0xff] %vm370_vm0, %v12320_v29  ;;  %v12400_v19 = vpop.f32.mrb[68].mxu0  ;;  %v12481_v58 = vpop.f32.mrb[68].mxu1 }
 0xc25   :  { %v12485_v22 = vmul.f32 2.0, %v12400_v19  ;;  %v14285_v35 = vpop.f32.mrb[69].mxu0  ;;  %v12490_v27 = vrot.slane %v12481_v58, %v16538_v24  ;;  %v14296_v47 = vpop.f32.mrb[69].mxu1 }
 0xc27   :  { %v12486_v8 = vsub.f32 %v12407_v28, %v12485_v22 }
 0xc29   :  { %v12491_v31 = vadd.f32 %v12490_v27, %v12486_v8 }
 0xc2b   :  { %v12492_v33 = vmax.f32 %v12491_v31, 0.0 }
 0xc2d   :  { %v12493_v20 = vadd.f32 1.0, %v12492_v33 }
 0xc2f   :  { %15803 = vrcp.f32 %v12493_v20 }
 0xc39   :  { %v15804_v4 = vpop.eup %15803 }
 0xc3a   :  { %v12497_v34 = vsel %vm12496_vm3, %v15804_v4, 0.0 }
 0xc3b   :  { %12498 = vadd.xlane.f32.xlu0 %v12497_v34 }
 0xc3c   :  { %16149 = shalt.err (!%p16146_p12)
}
 0xc3d   :  { %s17370_s4 = sld [smem:[#allocation44_spill]] }
 0xc43   :  { %s16150_s22 = scalar_lea.hbm %s17370_s4, 128 }
 0xc44   :  { %p16151_p13 = scmp.ne.s32.totalorder %s17370_s4, %s16150_s22  ;;  %p16154_p0 = scmp.lt.u32.totalorder %s16150_s22, %s17370_s4 }
 0xc46   :  { %p16156_p1 = pnand %p16154_p0, %p16151_p13 }
 0xc48   :  { %16159 = shalt.err (!%p16156_p1)
}
 0xc49   :  { %12512 = dma.vmem_to_hbm [thread:$0]  %s12510_s24, 128, %s17370_s4, [#allocation4]  }
 0xc4a   :  { %s16160_s23 = scalar_lea.vmem %s12520_s26, 128  ;;  %p16165_p3 = scmp.lt.s32.totalorder %s12520_s26, %s12520_s26 }
 0xc4b   :  { %p16161_p2 = scmp.ne.s32.totalorder %s12520_s26, %s16160_s23  ;;  %p16166_p4 = scmp.lt.s32.totalorder %s16160_s23, %s16160_s23 }
 0xc4d   :  { %p16167_p5 = por %p16166_p4, %p16165_p3 }
 0xc4f   :  { %p16168_p6 = pnand %p16167_p5, %p16161_p2 }
 0xc51   :  { %16171 = shalt.err (!%p16168_p6)
}
 0xc52   :  { %s17371_s0 = sld [smem:[#allocation45_spill]] }
 0xc58   :  { %s16172_s21 = scalar_lea.hbm %s17371_s0, 128 }
 0xc59   :  { %p16173_p7 = scmp.ne.s32.totalorder %s17371_s0, %s16172_s21  ;;  %p16176_p8 = scmp.lt.u32.totalorder %s16172_s21, %s17371_s0 }
 0xc5b   :  { %p16178_p9 = pnand %p16176_p8, %p16173_p7 }
 0xc5d   :  { %16181 = shalt.err (!%p16178_p9)
}
 0xc5e   :  { %12522 = dma.vmem_to_hbm [thread:$0]  %s12520_s26, 128, %s17371_s0, [#allocation28]  }
 0xc5f   :  { %s17372_s25 = sld [smem:[#allocation46_spill]] }
 0xcc8   :  { %v12499_v24 = vpop.xlane.xlu0 %12498 }
 0xcc9   :  { %15805 = vrcp.f32 %v12499_v24 }
 0xcd3   :  { %v15806_v43 = vpop.eup %15805 }
 0xcd4   :  { %v12501_v21 = vmul.f32 %v15806_v43, %v15804_v4 }
 0xcd6   :  { %12502 = vst.msk [vmem:[%s17372_s25] sm:$0xff] %vm12496_vm3, %v12501_v21 }
 0xcd7   :  { %16198 = dma.done.wait [#allocation4], 128  }
 0xcd8   :  { %16199 = vsyncadd [#allocation4], 4294967168 }
 0xcd9   :  { %16200 = dma.done.wait [#allocation28], 128  }
 0xcda   :  { %16201 = vsyncadd [#allocation28], 4294967168 }
 0xcdb   :  { %12533 = vsyncpa [#allocation3], 1 }
 0xcdc   :  { %12534 = vsyncpa [#allocation6], 1 }
 0xcdd   :  { %12535 = vsyncpa [#allocation9], 1 }
 0xcde   :  { %12536 = vsyncpa [#allocation12], 1 }
 0xcdf   :  { %12537 = vsyncpa [#allocation15], 1 }
 0xce0   :  { %12538 = vsyncpa [#allocation18], 1 }
 0xce1   :  { %12539 = vsyncpa [#allocation21], 1 }
 0xce2   :  { %12540 = vsyncpa [#allocation24], 1 }
 0xce3   :  { %12541 = vsyncpa [#allocation4], 1 }
 0xce4   :  { %12542 = vsyncpa [#allocation28], 1 }

</bundles_post_ra>
